<compile_context>
chip_gen: v6e
topology: v6e:2x2x1
jax: 0.10.0
libtpu: 0.0.40
codegen_flags: <defaults>
</compile_context>

<pallas_src>
import jax
import jax.numpy as jnp
from jax import lax
from jax.experimental import pallas as pl
from jax.experimental.pallas import tpu as pltpu
import numpy as np


# ----------------------------------------------------------------------------
# Row-tile picker: largest divisor of H whose per-step VMEM footprint fits a
# conservative budget (default scoped VMEM is 32 MiB on v6e/v7x).  TH = H for
# all stock YOLO SPPF placements.
# ----------------------------------------------------------------------------
def _pick_row_tile(H, W, C1, C_, C2, itemsize, budget_bytes=20 * 1024 * 1024):
    Wp = W + 16
    fixed = (H + 12) * Wp * C_ * itemsize            # halo-padded h scratch
    fixed += 2 * H * W * C1 * itemsize               # double-buffered x block
    fixed += H * W * C_ * 4                          # f32 cv1 intermediate
    fixed += 2 * (C1 * C_ + 4 * C_ * C2 + 2 * C_ + 2 * C2) * itemsize  # weights
    for th in range(H, 0, -1):
        if H % th:
            continue
        pools = (2 * (th + 8) + 2 * (th + 4) + th) * Wp * C_ * itemsize
        mm = th * W * (4 * C_ * itemsize + 4 * C_ * 4 + C2 * 4)   # operands + f32 acc
        outb = 2 * th * W * C2 * itemsize                          # double-buffered out
        if fixed + pools + mm + outb <= budget_bytes:
            return th
    # TODO(synk): maps too large for one padded image in VMEM would need a
    # halo-windowed input BlockSpec; fall back to the smallest tile.
    return 1


# ----------------------------------------------------------------------------
# Fused SPPF kernel (per batch / row tile):
#   j == 0 : -inf halo strips + cv1 matmul into the padded scratch interior
#   every j: chained separable 5x5 max pools (y1=pool5, y2=pool9, y3=pool13)
#            + cv2 as a K-split matmul + folded BN + ReLU
# ----------------------------------------------------------------------------
def _sppf_fused_kernel(x_ref, w1_ref, s1_ref, b1_ref, w2_ref, s2_ref, b2_ref,
                       o_ref, hp_ref, vm1_ref, y1x_ref, vm2_ref, y2x_ref, vm3_ref):
    # x_ref    : (1, H, W, C1)   input image for this batch (resident over row tiles)
    # w1/s1/b1 : cv1 weight (C1, C_) + folded-BN scale/bias (1, C_)
    # w2/s2/b2 : cv2 weight (4*C_, C2) + folded-BN scale/bias (1, C2)
    # o_ref    : (1, TH, W, C2)  output row tile
    # hp_ref   : (H+12, W+16, C_)  -inf halo-padded cv1 output, interior at (6, 8)
    # vm*/y*x  : pool intermediates; image column c lives at buffer column 8 + c
    j = pl.program_id(1)
    _, H, W, C1 = x_ref.shape
    C = w1_ref.shape[1]          # C_ = c1 // 2
    C2 = w2_ref.shape[1]
    TH = vm3_ref.shape[0]
    Wp = hp_ref.shape[1]         # W + 16

    # ---- once per batch: halo strips + fused cv1 into the aligned interior --
    @pl.when(j == 0)
    def _():
        hp_ref[pl.ds(0, 6), pl.ds(0, Wp), :] = jnp.full((6, Wp, C), -jnp.inf, hp_ref.dtype)
        hp_ref[pl.ds(6 + H, 6), pl.ds(0, Wp), :] = jnp.full((6, Wp, C), -jnp.inf, hp_ref.dtype)
        hp_ref[pl.ds(6, H), pl.ds(0, 8), :] = jnp.full((H, 8, C), -jnp.inf, hp_ref.dtype)
        hp_ref[pl.ds(6, H), pl.ds(8 + W, 8), :] = jnp.full((H, 8, C), -jnp.inf, hp_ref.dtype)
        # cv1: h = relu((x @ w1) * s1 + b1), f32 accumulation on the MXU
        xv = x_ref[0].reshape(H * W, C1)
        acc1 = jnp.dot(xv, w1_ref[...], preferred_element_type=jnp.float32)
        hv = jnp.maximum(acc1 * s1_ref[...] + b1_ref[...], 0.0)
        hp_ref[pl.ds(6, H), pl.ds(8, W), :] = hv.astype(hp_ref.dtype).reshape(H, W, C)

    r0 = j * TH

    def rmax5(src, row0, nrows, c0, nc):
        # 5-tap max over rows (outer dim); column range [c0, c0+nc).
        acc = src[pl.ds(row0, nrows), pl.ds(c0, nc), :]
        for d in range(1, 5):
            acc = jnp.maximum(acc, src[pl.ds(row0 + d, nrows), pl.ds(c0, nc), :])
        return acc

    def cmax5(src, nrows, c0, nc):
        # 5-tap max over columns (sublane dim).
        acc = src[pl.ds(0, nrows), pl.ds(c0, nc), :]
        for d in range(1, 5):
            acc = jnp.maximum(acc, src[pl.ds(0, nrows), pl.ds(c0 + d, nc), :])
        return acc

    # ---- chained separable pools; image col c <-> buffer col 8 + c ----------
    # vm1 rows cover image rows [r0-4, r0+TH+4); y1 extended cols [-4, W+4)
    vm1_ref[...] = rmax5(hp_ref, r0, TH + 8, 0, Wp)
    y1x_ref[pl.ds(0, TH + 8), pl.ds(4, W + 8), :] = cmax5(vm1_ref, TH + 8, 2, W + 8)
    # y2 = pool5(y1): rows [r0-2, r0+TH+2), cols [-2, W+2)
    vm2_ref[pl.ds(0, TH + 4), pl.ds(4, W + 8), :] = rmax5(y1x_ref, 0, TH + 4, 4, W + 8)
    y2x_ref[pl.ds(0, TH + 4), pl.ds(6, W + 4), :] = cmax5(vm2_ref, TH + 4, 4, W + 4)
    # y3 = pool5(y2): exactly the output tile
    vm3_ref[pl.ds(0, TH), pl.ds(6, W + 4), :] = rmax5(y2x_ref, 0, TH, 6, W + 4)
    y3 = cmax5(vm3_ref, TH, 6, W)

    # ---- cv2: K-split matmul over [h | y1 | y2 | y3]; the 4*C concat never
    # ---- hits HBM; all operand windows are read at 8-aligned column 8. ------
    x0 = hp_ref[pl.ds(6 + r0, TH), pl.ds(8, W), :].reshape(TH * W, C)
    x1 = y1x_ref[pl.ds(4, TH), pl.ds(8, W), :].reshape(TH * W, C)
    x2 = y2x_ref[pl.ds(2, TH), pl.ds(8, W), :].reshape(TH * W, C)
    x3 = y3.reshape(TH * W, C)

    acc = jnp.dot(x0, w2_ref[0 * C:1 * C, :], preferred_element_type=jnp.float32)
    acc = acc + jnp.dot(x1, w2_ref[1 * C:2 * C, :], preferred_element_type=jnp.float32)
    acc = acc + jnp.dot(x2, w2_ref[2 * C:3 * C, :], preferred_element_type=jnp.float32)
    acc = acc + jnp.dot(x3, w2_ref[3 * C:4 * C, :], preferred_element_type=jnp.float32)
    out = jnp.maximum(acc * s2_ref[...] + b2_ref[...], 0.0)
    o_ref[0] = out.astype(o_ref.dtype).reshape(TH, W, C2)


# ----------------------------------------------------------------------------
# SPPF forward (NHWC main path; NCHW wrapper for parity with the PyTorch spec)
# ----------------------------------------------------------------------------
def sppf_forward_nhwc(x_nhwc, p, row_tile=None):
    N, H, W, C1 = x_nhwc.shape
    C_ = p["w1"].shape[1]
    C2 = p["w2"].shape[1]
    dt = x_nhwc.dtype
    itemsize = jnp.dtype(dt).itemsize
    TH = row_tile if row_tile is not None else _pick_row_tile(H, W, C1, C_, C2, itemsize)
    assert H % TH == 0, (H, TH)
    n_rt = H // TH
    Wp = W + 16
    # TODO(synk): for bf16 activations on v5e (no native bf16 VALU) the pool
    # scratch should be f32; v6e/v7x keep the activation dtype end-to-end.

    out = pl.pallas_call(
        _sppf_fused_kernel,
        out_shape=jax.ShapeDtypeStruct((N, H, W, C2), dt),
        grid_spec=pltpu.PrefetchScalarGridSpec(
            num_scalar_prefetch=0,
            grid=(N, n_rt),
            in_specs=[
                pl.BlockSpec((1, H, W, C1), lambda n, j: (n, 0, 0, 0)),
                pl.BlockSpec((C1, C_), lambda n, j: (0, 0)),       # weights resident
                pl.BlockSpec((1, C_), lambda n, j: (0, 0)),
                pl.BlockSpec((1, C_), lambda n, j: (0, 0)),
                pl.BlockSpec((4 * C_, C2), lambda n, j: (0, 0)),
                pl.BlockSpec((1, C2), lambda n, j: (0, 0)),
                pl.BlockSpec((1, C2), lambda n, j: (0, 0)),
            ],
            out_specs=pl.BlockSpec((1, TH, W, C2), lambda n, j: (n, j, 0, 0)),
            scratch_shapes=[
                pltpu.VMEM((H + 12, Wp, C_), dt),   # -inf halo-padded cv1 output
                pltpu.VMEM((TH + 8, Wp, C_), dt),   # vm1: row-max for y1
                pltpu.VMEM((TH + 8, Wp, C_), dt),   # y1 (extended halo)
                pltpu.VMEM((TH + 4, Wp, C_), dt),   # vm2: row-max for y2
                pltpu.VMEM((TH + 4, Wp, C_), dt),   # y2 (extended halo)
                pltpu.VMEM((TH, Wp, C_), dt),       # vm3: row-max for y3
            ],
        ),
        # batch axis -> megacore sharding; the row-tile axis is sequential
        # because the padded cv1 output is computed once per batch at j == 0
        # (with the default TH = H there is only one row tile anyway).
        compiler_params=pltpu.CompilerParams(
            dimension_semantics=("parallel", "arbitrary")),
    )(x_nhwc, p["w1"], p["s1"], p["b1"], p["w2"], p["s2"], p["b2"])
    return out


def sppf_forward_nchw(x_nchw, p):
    # TODO(synk): production callers should feed NHWC directly; the transposes
    # here are only for parity with the PyTorch NCHW interface.
    x_nhwc = jnp.transpose(x_nchw, (0, 2, 3, 1))
    y = sppf_forward_nhwc(x_nhwc, p)
    return jnp.transpose(y, (0, 3, 1, 2))


# ----------------------------------------------------------------------------
# Pure-JAX reference (correctness check)
# ----------------------------------------------------------------------------
def ref_sppf_nhwc(x_nhwc, p):
    def conv(z, w, s, b):
        return jax.nn.relu(jnp.einsum("nhwc,cd->nhwd", z, w) * s + b)

    def pool(z):
        return lax.reduce_window(z, -jnp.inf, lax.max,
                                 (1, 5, 5, 1), (1, 1, 1, 1),
                                 [(0, 0), (2, 2), (2, 2), (0, 0)])

    h = conv(x_nhwc, p["w1"], p["s1"][0], p["b1"][0])
    y1 = pool(h); y2 = pool(y1); y3 = pool(y2)
    cat = jnp.concatenate([h, y1, y2, y3], axis=-1)
    return conv(cat, p["w2"], p["s2"][0], p["b2"][0])


# ----------------------------------------------------------------------------
def make_params(key, c1, c2):
    c_ = c1 // 2
    k1, k2 = jax.random.split(key)
    # PyTorch Conv2d weight shapes: (c_, c1, 1, 1) and (c2, 4*c_, 1, 1)
    w1_oihw = jax.random.normal(k1, (c_, c1, 1, 1), jnp.float32) * 0.1
    w2_oihw = jax.random.normal(k2, (c2, 4 * c_, 1, 1), jnp.float32) * 0.1

    eps = 1e-5
    # BatchNorm2d (eval mode, PyTorch default init) folded to scale/bias.
    def bn_fold(cout):
        gamma = jnp.ones((cout,), jnp.float32)
        beta = jnp.zeros((cout,), jnp.float32)
        mean = jnp.zeros((cout,), jnp.float32)
        var = jnp.ones((cout,), jnp.float32)
        scale = gamma / jnp.sqrt(var + eps)
        bias = beta - mean * scale
        return scale.reshape(1, cout), bias.reshape(1, cout)

    s1, b1 = bn_fold(c_)
    s2, b2 = bn_fold(c2)
    return {
        "w1": jnp.transpose(w1_oihw[:, :, 0, 0]),   # (c1, c_)
        "w2": jnp.transpose(w2_oihw[:, :, 0, 0]),   # (4*c_, c2), [h|y1|y2|y3] order
        "s1": s1, "b1": b1, "s2": s2, "b2": b2,
    }


if __name__ == "__main__":
    key = jax.random.PRNGKey(0)
    N, C1, H, W = 2, 8, 16, 16          # PyTorch NCHW input shape
    C2 = 8

    kx, kp = jax.random.split(key)
    x_nchw = jax.random.normal(kx, (N, C1, H, W), jnp.float32)
    params = make_params(kp, C1, C2)

    out = jax.block_until_ready(sppf_forward_nchw(x_nchw, params))
    assert out.shape == (N, C2, H, W), out.shape

    # correctness check vs pure-JAX reference
    ref = ref_sppf_nhwc(jnp.transpose(x_nchw, (0, 2, 3, 1)), params)
    ref = jnp.transpose(ref, (0, 3, 1, 2))
    np.testing.assert_allclose(np.asarray(out), np.asarray(ref),
                               rtol=1e-4, atol=1e-4)

    print("KERNEL_OK")
</pallas_src>

<mosaic_0001>
module attributes {stable_mosaic.version = 11 : i64} {
  func.func @_sppf_fused_kernel(%arg0: i32, %arg1: i32, %arg2: memref<1x16x16x8xf32, #tpu.memory_space<vmem>>, %arg3: memref<8x4xf32, #tpu.memory_space<vmem>>, %arg4: memref<1x4xf32, #tpu.memory_space<vmem>>, %arg5: memref<1x4xf32, #tpu.memory_space<vmem>>, %arg6: memref<16x8xf32, #tpu.memory_space<vmem>>, %arg7: memref<1x8xf32, #tpu.memory_space<vmem>>, %arg8: memref<1x8xf32, #tpu.memory_space<vmem>>, %arg9: memref<1x16x16x8xf32, #tpu.memory_space<vmem>>, %arg10: memref<28x32x4xf32, #tpu.memory_space<vmem>>, %arg11: memref<24x32x4xf32, #tpu.memory_space<vmem>>, %arg12: memref<24x32x4xf32, #tpu.memory_space<vmem>>, %arg13: memref<20x32x4xf32, #tpu.memory_space<vmem>>, %arg14: memref<20x32x4xf32, #tpu.memory_space<vmem>>, %arg15: memref<16x32x4xf32, #tpu.memory_space<vmem>>) attributes {dimension_semantics = [#tpu.dimension_semantics<parallel>, #tpu.dimension_semantics<arbitrary>], iteration_bounds = array<i64: 2, 1>, scalar_prefetch = 0 : i64, scratch_operands = 6 : i64, tpu.core_type = #tpu.core_type<tc>, window_params = [{transform_indices = @transform_0, window_bounds = array<i64: 1, 16, 16, 8>}, {pipeline_mode = #tpu.pipeline_mode<synchronous>, transform_indices = @transform_1, window_bounds = array<i64: 8, 4>}, {pipeline_mode = #tpu.pipeline_mode<synchronous>, transform_indices = @transform_2, window_bounds = array<i64: 1, 4>}, {pipeline_mode = #tpu.pipeline_mode<synchronous>, transform_indices = @transform_3, window_bounds = array<i64: 1, 4>}, {pipeline_mode = #tpu.pipeline_mode<synchronous>, transform_indices = @transform_4, window_bounds = array<i64: 16, 8>}, {pipeline_mode = #tpu.pipeline_mode<synchronous>, transform_indices = @transform_5, window_bounds = array<i64: 1, 8>}, {pipeline_mode = #tpu.pipeline_mode<synchronous>, transform_indices = @transform_6, window_bounds = array<i64: 1, 8>}, {transform_indices = @transform_7, window_bounds = array<i64: 1, 16, 16, 8>}]} {
    %c0_i32 = arith.constant 0 : i32
    %0 = arith.cmpi eq, %arg1, %c0_i32 : i32
    %1 = arith.extui %0 : i1 to i32
    %c0_i32_0 = arith.constant 0 : i32
    %2 = arith.cmpi ne, %1, %c0_i32_0 : i32
    scf.if %2 {
      %cst_117 = arith.constant 0xFF800000 : f32
      %104 = vector.broadcast %cst_117 : f32 to vector<6x32x4xf32>
      %c0_118 = arith.constant 0 : index
      %c0_119 = arith.constant 0 : index
      %c0_120 = arith.constant 0 : index
      %105 = vector.load %arg10[%c0_118, %c0_119, %c0_120] : memref<28x32x4xf32, #tpu.memory_space<vmem>>, vector<6x32x4xf32>
      tpu.vector_store %arg10[%c0_118, %c0_119, %c0_120], %104 {strides = array<i32>} : memref<28x32x4xf32, #tpu.memory_space<vmem>>, vector<6x32x4xf32>,
      %cst_121 = arith.constant 0xFF800000 : f32
      %106 = vector.broadcast %cst_121 : f32 to vector<6x32x4xf32>
      %c22 = arith.constant 22 : index
      %c0_122 = arith.constant 0 : index
      %c0_123 = arith.constant 0 : index
      %107 = vector.load %arg10[%c22, %c0_122, %c0_123] : memref<28x32x4xf32, #tpu.memory_space<vmem>>, vector<6x32x4xf32>
      tpu.vector_store %arg10[%c22, %c0_122, %c0_123], %106 {strides = array<i32>} : memref<28x32x4xf32, #tpu.memory_space<vmem>>, vector<6x32x4xf32>,
      %cst_124 = arith.constant 0xFF800000 : f32
      %108 = vector.broadcast %cst_124 : f32 to vector<16x8x4xf32>
      %c6_125 = arith.constant 6 : index
      %c0_126 = arith.constant 0 : index
      %c0_127 = arith.constant 0 : index
      %109 = vector.load %arg10[%c6_125, %c0_126, %c0_127] : memref<28x32x4xf32, #tpu.memory_space<vmem>>, vector<16x8x4xf32>
      tpu.vector_store %arg10[%c6_125, %c0_126, %c0_127], %108 {strides = array<i32>} : memref<28x32x4xf32, #tpu.memory_space<vmem>>, vector<16x8x4xf32>,
      %cst_128 = arith.constant 0xFF800000 : f32
      %110 = vector.broadcast %cst_128 : f32 to vector<16x8x4xf32>
      %c6_129 = arith.constant 6 : index
      %c24 = arith.constant 24 : index
      %c0_130 = arith.constant 0 : index
      %111 = vector.load %arg10[%c6_129, %c24, %c0_130] : memref<28x32x4xf32, #tpu.memory_space<vmem>>, vector<16x8x4xf32>
      tpu.vector_store %arg10[%c6_129, %c24, %c0_130], %110 {strides = array<i32>} : memref<28x32x4xf32, #tpu.memory_space<vmem>>, vector<16x8x4xf32>,
      %c0_131 = arith.constant 0 : index
      %c0_132 = arith.constant 0 : index
      %c0_133 = arith.constant 0 : index
      %c0_134 = arith.constant 0 : index
      %112 = vector.load %arg2[%c0_131, %c0_132, %c0_133, %c0_134] : memref<1x16x16x8xf32, #tpu.memory_space<vmem>>, vector<1x16x16x8xf32>
      %113 = vector.shape_cast %112 : vector<1x16x16x8xf32> to vector<16x16x8xf32>
      %114 = vector.shape_cast %113 : vector<16x16x8xf32> to vector<256x8xf32>
      %c0_135 = arith.constant 0 : index
      %c0_136 = arith.constant 0 : index
      %115 = vector.load %arg3[%c0_135, %c0_136] : memref<8x4xf32, #tpu.memory_space<vmem>>, vector<8x4xf32>
      %cst_137 = arith.constant dense<0.000000e+00> : vector<256x4xf32>
      %116 = tpu.matmul %114, %115, %cst_137 {dimension_numbers = #tpu.dot_dimension_numbers<[1], [0], [0], [1], [0, 0, 1, 1], [], []>} : vector<256x8xf32>, vector<8x4xf32>, vector<256x4xf32> -> vector<256x4xf32>
      %c0_138 = arith.constant 0 : index
      %c0_139 = arith.constant 0 : index
      %117 = vector.load %arg4[%c0_138, %c0_139] : memref<1x4xf32, #tpu.memory_space<vmem>>, vector<1x4xf32>
      %118 = vector.broadcast %117 : vector<1x4xf32> to vector<256x4xf32>
      %119 = arith.mulf %116, %118 : vector<256x4xf32>
      %c0_140 = arith.constant 0 : index
      %c0_141 = arith.constant 0 : index
      %120 = vector.load %arg5[%c0_140, %c0_141] : memref<1x4xf32, #tpu.memory_space<vmem>>, vector<1x4xf32>
      %121 = vector.broadcast %120 : vector<1x4xf32> to vector<256x4xf32>
      %122 = arith.addf %119, %121 : vector<256x4xf32>
      %cst_142 = arith.constant 0.000000e+00 : f32
      %123 = vector.broadcast %cst_142 : f32 to vector<256x4xf32>
      %124 = arith.maximumf %122, %123 : vector<256x4xf32>
      %125 = vector.shape_cast %124 : vector<256x4xf32> to vector<16x16x4xf32>
      %c6_143 = arith.constant 6 : index
      %c8_144 = arith.constant 8 : index
      %c0_145 = arith.constant 0 : index
      %126 = vector.load %arg10[%c6_143, %c8_144, %c0_145] : memref<28x32x4xf32, #tpu.memory_space<vmem>>, vector<16x16x4xf32>
      tpu.vector_store %arg10[%c6_143, %c8_144, %c0_145], %125 {strides = array<i32>} : memref<28x32x4xf32, #tpu.memory_space<vmem>>, vector<16x16x4xf32>,
    } else {
    }
    %c16_i32 = arith.constant 16 : i32
    %3 = arith.muli %arg1, %c16_i32 : i32
    %4 = arith.index_cast %3 : i32 to index
    %c0 = arith.constant 0 : index
    %c0_1 = arith.constant 0 : index
    %5 = vector.load %arg10[%4, %c0, %c0_1] : memref<28x32x4xf32, #tpu.memory_space<vmem>>, vector<24x32x4xf32>
    %c1_i32 = arith.constant 1 : i32
    %6 = arith.addi %3, %c1_i32 : i32
    %7 = arith.index_cast %6 : i32 to index
    %c0_2 = arith.constant 0 : index
    %c0_3 = arith.constant 0 : index
    %8 = vector.load %arg10[%7, %c0_2, %c0_3] : memref<28x32x4xf32, #tpu.memory_space<vmem>>, vector<24x32x4xf32>
    %9 = arith.maximumf %5, %8 : vector<24x32x4xf32>
    %c2_i32 = arith.constant 2 : i32
    %10 = arith.addi %3, %c2_i32 : i32
    %11 = arith.index_cast %10 : i32 to index
    %c0_4 = arith.constant 0 : index
    %c0_5 = arith.constant 0 : index
    %12 = vector.load %arg10[%11, %c0_4, %c0_5] : memref<28x32x4xf32, #tpu.memory_space<vmem>>, vector<24x32x4xf32>
    %13 = arith.maximumf %9, %12 : vector<24x32x4xf32>
    %c3_i32 = arith.constant 3 : i32
    %14 = arith.addi %3, %c3_i32 : i32
    %15 = arith.index_cast %14 : i32 to index
    %c0_6 = arith.constant 0 : index
    %c0_7 = arith.constant 0 : index
    %16 = vector.load %arg10[%15, %c0_6, %c0_7] : memref<28x32x4xf32, #tpu.memory_space<vmem>>, vector<24x32x4xf32>
    %17 = arith.maximumf %13, %16 : vector<24x32x4xf32>
    %c4_i32 = arith.constant 4 : i32
    %18 = arith.addi %3, %c4_i32 : i32
    %19 = arith.index_cast %18 : i32 to index
    %c0_8 = arith.constant 0 : index
    %c0_9 = arith.constant 0 : index
    %20 = vector.load %arg10[%19, %c0_8, %c0_9] : memref<28x32x4xf32, #tpu.memory_space<vmem>>, vector<24x32x4xf32>
    %21 = arith.maximumf %17, %20 : vector<24x32x4xf32>
    %c0_10 = arith.constant 0 : index
    %c0_11 = arith.constant 0 : index
    %c0_12 = arith.constant 0 : index
    %22 = vector.load %arg11[%c0_10, %c0_11, %c0_12] : memref<24x32x4xf32, #tpu.memory_space<vmem>>, vector<24x32x4xf32>
    tpu.vector_store %arg11[%c0_10, %c0_11, %c0_12], %21 {strides = array<i32>} : memref<24x32x4xf32, #tpu.memory_space<vmem>>, vector<24x32x4xf32>,
    %c0_13 = arith.constant 0 : index
    %c2 = arith.constant 2 : index
    %c0_14 = arith.constant 0 : index
    %23 = vector.load %arg11[%c0_13, %c2, %c0_14] : memref<24x32x4xf32, #tpu.memory_space<vmem>>, vector<24x24x4xf32>
    %c0_15 = arith.constant 0 : index
    %c3 = arith.constant 3 : index
    %c0_16 = arith.constant 0 : index
    %24 = vector.load %arg11[%c0_15, %c3, %c0_16] : memref<24x32x4xf32, #tpu.memory_space<vmem>>, vector<24x24x4xf32>
    %25 = arith.maximumf %23, %24 : vector<24x24x4xf32>
    %c0_17 = arith.constant 0 : index
    %c4 = arith.constant 4 : index
    %c0_18 = arith.constant 0 : index
    %26 = vector.load %arg11[%c0_17, %c4, %c0_18] : memref<24x32x4xf32, #tpu.memory_space<vmem>>, vector<24x24x4xf32>
    %27 = arith.maximumf %25, %26 : vector<24x24x4xf32>
    %c0_19 = arith.constant 0 : index
    %c5 = arith.constant 5 : index
    %c0_20 = arith.constant 0 : index
    %28 = vector.load %arg11[%c0_19, %c5, %c0_20] : memref<24x32x4xf32, #tpu.memory_space<vmem>>, vector<24x24x4xf32>
    %29 = arith.maximumf %27, %28 : vector<24x24x4xf32>
    %c0_21 = arith.constant 0 : index
    %c6 = arith.constant 6 : index
    %c0_22 = arith.constant 0 : index
    %30 = vector.load %arg11[%c0_21, %c6, %c0_22] : memref<24x32x4xf32, #tpu.memory_space<vmem>>, vector<24x24x4xf32>
    %31 = arith.maximumf %29, %30 : vector<24x24x4xf32>
    %c0_23 = arith.constant 0 : index
    %c4_24 = arith.constant 4 : index
    %c0_25 = arith.constant 0 : index
    %32 = vector.load %arg12[%c0_23, %c4_24, %c0_25] : memref<24x32x4xf32, #tpu.memory_space<vmem>>, vector<24x24x4xf32>
    tpu.vector_store %arg12[%c0_23, %c4_24, %c0_25], %31 {strides = array<i32>} : memref<24x32x4xf32, #tpu.memory_space<vmem>>, vector<24x24x4xf32>,
    %c0_26 = arith.constant 0 : index
    %c4_27 = arith.constant 4 : index
    %c0_28 = arith.constant 0 : index
    %33 = vector.load %arg12[%c0_26, %c4_27, %c0_28] : memref<24x32x4xf32, #tpu.memory_space<vmem>>, vector<20x24x4xf32>
    %c1 = arith.constant 1 : index
    %c4_29 = arith.constant 4 : index
    %c0_30 = arith.constant 0 : index
    %34 = vector.load %arg12[%c1, %c4_29, %c0_30] : memref<24x32x4xf32, #tpu.memory_space<vmem>>, vector<20x24x4xf32>
    %35 = arith.maximumf %33, %34 : vector<20x24x4xf32>
    %c2_31 = arith.constant 2 : index
    %c4_32 = arith.constant 4 : index
    %c0_33 = arith.constant 0 : index
    %36 = vector.load %arg12[%c2_31, %c4_32, %c0_33] : memref<24x32x4xf32, #tpu.memory_space<vmem>>, vector<20x24x4xf32>
    %37 = arith.maximumf %35, %36 : vector<20x24x4xf32>
    %c3_34 = arith.constant 3 : index
    %c4_35 = arith.constant 4 : index
    %c0_36 = arith.constant 0 : index
    %38 = vector.load %arg12[%c3_34, %c4_35, %c0_36] : memref<24x32x4xf32, #tpu.memory_space<vmem>>, vector<20x24x4xf32>
    %39 = arith.maximumf %37, %38 : vector<20x24x4xf32>
    %c4_37 = arith.constant 4 : index
    %c4_38 = arith.constant 4 : index
    %c0_39 = arith.constant 0 : index
    %40 = vector.load %arg12[%c4_37, %c4_38, %c0_39] : memref<24x32x4xf32, #tpu.memory_space<vmem>>, vector<20x24x4xf32>
    %41 = arith.maximumf %39, %40 : vector<20x24x4xf32>
    %c0_40 = arith.constant 0 : index
    %c4_41 = arith.constant 4 : index
    %c0_42 = arith.constant 0 : index
    %42 = vector.load %arg13[%c0_40, %c4_41, %c0_42] : memref<20x32x4xf32, #tpu.memory_space<vmem>>, vector<20x24x4xf32>
    tpu.vector_store %arg13[%c0_40, %c4_41, %c0_42], %41 {strides = array<i32>} : memref<20x32x4xf32, #tpu.memory_space<vmem>>, vector<20x24x4xf32>,
    %c0_43 = arith.constant 0 : index
    %c4_44 = arith.constant 4 : index
    %c0_45 = arith.constant 0 : index
    %43 = vector.load %arg13[%c0_43, %c4_44, %c0_45] : memref<20x32x4xf32, #tpu.memory_space<vmem>>, vector<20x20x4xf32>
    %c0_46 = arith.constant 0 : index
    %c5_47 = arith.constant 5 : index
    %c0_48 = arith.constant 0 : index
    %44 = vector.load %arg13[%c0_46, %c5_47, %c0_48] : memref<20x32x4xf32, #tpu.memory_space<vmem>>, vector<20x20x4xf32>
    %45 = arith.maximumf %43, %44 : vector<20x20x4xf32>
    %c0_49 = arith.constant 0 : index
    %c6_50 = arith.constant 6 : index
    %c0_51 = arith.constant 0 : index
    %46 = vector.load %arg13[%c0_49, %c6_50, %c0_51] : memref<20x32x4xf32, #tpu.memory_space<vmem>>, vector<20x20x4xf32>
    %47 = arith.maximumf %45, %46 : vector<20x20x4xf32>
    %c0_52 = arith.constant 0 : index
    %c7 = arith.constant 7 : index
    %c0_53 = arith.constant 0 : index
    %48 = vector.load %arg13[%c0_52, %c7, %c0_53] : memref<20x32x4xf32, #tpu.memory_space<vmem>>, vector<20x20x4xf32>
    %49 = arith.maximumf %47, %48 : vector<20x20x4xf32>
    %c0_54 = arith.constant 0 : index
    %c8 = arith.constant 8 : index
    %c0_55 = arith.constant 0 : index
    %50 = vector.load %arg13[%c0_54, %c8, %c0_55] : memref<20x32x4xf32, #tpu.memory_space<vmem>>, vector<20x20x4xf32>
    %51 = arith.maximumf %49, %50 : vector<20x20x4xf32>
    %c0_56 = arith.constant 0 : index
    %c6_57 = arith.constant 6 : index
    %c0_58 = arith.constant 0 : index
    %52 = vector.load %arg14[%c0_56, %c6_57, %c0_58] : memref<20x32x4xf32, #tpu.memory_space<vmem>>, vector<20x20x4xf32>
    tpu.vector_store %arg14[%c0_56, %c6_57, %c0_58], %51 {strides = array<i32>} : memref<20x32x4xf32, #tpu.memory_space<vmem>>, vector<20x20x4xf32>,
    %c0_59 = arith.constant 0 : index
    %c6_60 = arith.constant 6 : index
    %c0_61 = arith.constant 0 : index
    %53 = vector.load %arg14[%c0_59, %c6_60, %c0_61] : memref<20x32x4xf32, #tpu.memory_space<vmem>>, vector<16x20x4xf32>
    %c1_62 = arith.constant 1 : index
    %c6_63 = arith.constant 6 : index
    %c0_64 = arith.constant 0 : index
    %54 = vector.load %arg14[%c1_62, %c6_63, %c0_64] : memref<20x32x4xf32, #tpu.memory_space<vmem>>, vector<16x20x4xf32>
    %55 = arith.maximumf %53, %54 : vector<16x20x4xf32>
    %c2_65 = arith.constant 2 : index
    %c6_66 = arith.constant 6 : index
    %c0_67 = arith.constant 0 : index
    %56 = vector.load %arg14[%c2_65, %c6_66, %c0_67] : memref<20x32x4xf32, #tpu.memory_space<vmem>>, vector<16x20x4xf32>
    %57 = arith.maximumf %55, %56 : vector<16x20x4xf32>
    %c3_68 = arith.constant 3 : index
    %c6_69 = arith.constant 6 : index
    %c0_70 = arith.constant 0 : index
    %58 = vector.load %arg14[%c3_68, %c6_69, %c0_70] : memref<20x32x4xf32, #tpu.memory_space<vmem>>, vector<16x20x4xf32>
    %59 = arith.maximumf %57, %58 : vector<16x20x4xf32>
    %c4_71 = arith.constant 4 : index
    %c6_72 = arith.constant 6 : index
    %c0_73 = arith.constant 0 : index
    %60 = vector.load %arg14[%c4_71, %c6_72, %c0_73] : memref<20x32x4xf32, #tpu.memory_space<vmem>>, vector<16x20x4xf32>
    %61 = arith.maximumf %59, %60 : vector<16x20x4xf32>
    %c0_74 = arith.constant 0 : index
    %c6_75 = arith.constant 6 : index
    %c0_76 = arith.constant 0 : index
    %62 = vector.load %arg15[%c0_74, %c6_75, %c0_76] : memref<16x32x4xf32, #tpu.memory_space<vmem>>, vector<16x20x4xf32>
    tpu.vector_store %arg15[%c0_74, %c6_75, %c0_76], %61 {strides = array<i32>} : memref<16x32x4xf32, #tpu.memory_space<vmem>>, vector<16x20x4xf32>,
    %c0_77 = arith.constant 0 : index
    %c6_78 = arith.constant 6 : index
    %c0_79 = arith.constant 0 : index
    %63 = vector.load %arg15[%c0_77, %c6_78, %c0_79] : memref<16x32x4xf32, #tpu.memory_space<vmem>>, vector<16x16x4xf32>
    %c0_80 = arith.constant 0 : index
    %c7_81 = arith.constant 7 : index
    %c0_82 = arith.constant 0 : index
    %64 = vector.load %arg15[%c0_80, %c7_81, %c0_82] : memref<16x32x4xf32, #tpu.memory_space<vmem>>, vector<16x16x4xf32>
    %65 = arith.maximumf %63, %64 : vector<16x16x4xf32>
    %c0_83 = arith.constant 0 : index
    %c8_84 = arith.constant 8 : index
    %c0_85 = arith.constant 0 : index
    %66 = vector.load %arg15[%c0_83, %c8_84, %c0_85] : memref<16x32x4xf32, #tpu.memory_space<vmem>>, vector<16x16x4xf32>
    %67 = arith.maximumf %65, %66 : vector<16x16x4xf32>
    %c0_86 = arith.constant 0 : index
    %c9 = arith.constant 9 : index
    %c0_87 = arith.constant 0 : index
    %68 = vector.load %arg15[%c0_86, %c9, %c0_87] : memref<16x32x4xf32, #tpu.memory_space<vmem>>, vector<16x16x4xf32>
    %69 = arith.maximumf %67, %68 : vector<16x16x4xf32>
    %c0_88 = arith.constant 0 : index
    %c10 = arith.constant 10 : index
    %c0_89 = arith.constant 0 : index
    %70 = vector.load %arg15[%c0_88, %c10, %c0_89] : memref<16x32x4xf32, #tpu.memory_space<vmem>>, vector<16x16x4xf32>
    %71 = arith.maximumf %69, %70 : vector<16x16x4xf32>
    %c6_i32 = arith.constant 6 : i32
    %72 = arith.addi %c6_i32, %3 : i32
    %73 = arith.index_cast %72 : i32 to index
    %c8_90 = arith.constant 8 : index
    %c0_91 = arith.constant 0 : index
    %74 = vector.load %arg10[%73, %c8_90, %c0_91] : memref<28x32x4xf32, #tpu.memory_space<vmem>>, vector<16x16x4xf32>
    %75 = vector.shape_cast %74 : vector<16x16x4xf32> to vector<256x4xf32>
    %c4_92 = arith.constant 4 : index
    %c8_93 = arith.constant 8 : index
    %c0_94 = arith.constant 0 : index
    %76 = vector.load %arg12[%c4_92, %c8_93, %c0_94] : memref<24x32x4xf32, #tpu.memory_space<vmem>>, vector<16x16x4xf32>
    %77 = vector.shape_cast %76 : vector<16x16x4xf32> to vector<256x4xf32>
    %c2_95 = arith.constant 2 : index
    %c8_96 = arith.constant 8 : index
    %c0_97 = arith.constant 0 : index
    %78 = vector.load %arg14[%c2_95, %c8_96, %c0_97] : memref<20x32x4xf32, #tpu.memory_space<vmem>>, vector<16x16x4xf32>
    %79 = vector.shape_cast %78 : vector<16x16x4xf32> to vector<256x4xf32>
    %80 = vector.shape_cast %71 : vector<16x16x4xf32> to vector<256x4xf32>
    %c0_98 = arith.constant 0 : index
    %c0_99 = arith.constant 0 : index
    %81 = vector.load %arg6[%c0_98, %c0_99] : memref<16x8xf32, #tpu.memory_space<vmem>>, vector<4x8xf32>
    %cst = arith.constant dense<0.000000e+00> : vector<256x8xf32>
    %82 = tpu.matmul %75, %81, %cst {dimension_numbers = #tpu.dot_dimension_numbers<[1], [0], [0], [1], [0, 0, 1, 1], [], []>} : vector<256x4xf32>, vector<4x8xf32>, vector<256x8xf32> -> vector<256x8xf32>
    %c4_100 = arith.constant 4 : index
    %c0_101 = arith.constant 0 : index
    %83 = vector.load %arg6[%c4_100, %c0_101] : memref<16x8xf32, #tpu.memory_space<vmem>>, vector<4x8xf32>
    %cst_102 = arith.constant dense<0.000000e+00> : vector<256x8xf32>
    %84 = tpu.matmul %77, %83, %cst_102 {dimension_numbers = #tpu.dot_dimension_numbers<[1], [0], [0], [1], [0, 0, 1, 1], [], []>} : vector<256x4xf32>, vector<4x8xf32>, vector<256x8xf32> -> vector<256x8xf32>
    %85 = arith.addf %82, %84 : vector<256x8xf32>
    %c8_103 = arith.constant 8 : index
    %c0_104 = arith.constant 0 : index
    %86 = vector.load %arg6[%c8_103, %c0_104] : memref<16x8xf32, #tpu.memory_space<vmem>>, vector<4x8xf32>
    %cst_105 = arith.constant dense<0.000000e+00> : vector<256x8xf32>
    %87 = tpu.matmul %79, %86, %cst_105 {dimension_numbers = #tpu.dot_dimension_numbers<[1], [0], [0], [1], [0, 0, 1, 1], [], []>} : vector<256x4xf32>, vector<4x8xf32>, vector<256x8xf32> -> vector<256x8xf32>
    %88 = arith.addf %85, %87 : vector<256x8xf32>
    %c12 = arith.constant 12 : index
    %c0_106 = arith.constant 0 : index
    %89 = vector.load %arg6[%c12, %c0_106] : memref<16x8xf32, #tpu.memory_space<vmem>>, vector<4x8xf32>
    %cst_107 = arith.constant dense<0.000000e+00> : vector<256x8xf32>
    %90 = tpu.matmul %80, %89, %cst_107 {dimension_numbers = #tpu.dot_dimension_numbers<[1], [0], [0], [1], [0, 0, 1, 1], [], []>} : vector<256x4xf32>, vector<4x8xf32>, vector<256x8xf32> -> vector<256x8xf32>
    %91 = arith.addf %88, %90 : vector<256x8xf32>
    %c0_108 = arith.constant 0 : index
    %c0_109 = arith.constant 0 : index
    %92 = vector.load %arg7[%c0_108, %c0_109] : memref<1x8xf32, #tpu.memory_space<vmem>>, vector<1x8xf32>
    %93 = vector.broadcast %92 : vector<1x8xf32> to vector<256x8xf32>
    %94 = arith.mulf %91, %93 : vector<256x8xf32>
    %c0_110 = arith.constant 0 : index
    %c0_111 = arith.constant 0 : index
    %95 = vector.load %arg8[%c0_110, %c0_111] : memref<1x8xf32, #tpu.memory_space<vmem>>, vector<1x8xf32>
    %96 = vector.broadcast %95 : vector<1x8xf32> to vector<256x8xf32>
    %97 = arith.addf %94, %96 : vector<256x8xf32>
    %cst_112 = arith.constant 0.000000e+00 : f32
    %98 = vector.broadcast %cst_112 : f32 to vector<256x8xf32>
    %99 = arith.maximumf %97, %98 : vector<256x8xf32>
    %100 = vector.shape_cast %99 : vector<256x8xf32> to vector<16x16x8xf32>
    %c0_113 = arith.constant 0 : index
    %c0_114 = arith.constant 0 : index
    %c0_115 = arith.constant 0 : index
    %c0_116 = arith.constant 0 : index
    %101 = vector.load %arg9[%c0_113, %c0_114, %c0_115, %c0_116] : memref<1x16x16x8xf32, #tpu.memory_space<vmem>>, vector<1x16x16x8xf32>
    %102 = vector.shape_cast %101 : vector<1x16x16x8xf32> to vector<16x16x8xf32>
    %103 = vector.shape_cast %100 : vector<16x16x8xf32> to vector<1x16x16x8xf32>
    tpu.vector_store %arg9[%c0_113, %c0_114, %c0_115, %c0_116], %103 {strides = array<i32>} : memref<1x16x16x8xf32, #tpu.memory_space<vmem>>, vector<1x16x16x8xf32>,
    return
  }
  func.func @transform_0(%arg0: i32, %arg1: i32) -> (i32, i32, i32, i32) {
    %c0_i32 = arith.constant 0 : i32
    %c0_i32_0 = arith.constant 0 : i32
    %c0_i32_1 = arith.constant 0 : i32
    %c0_i32_2 = arith.constant 0 : i32
    return %arg0, %c0_i32, %c0_i32_0, %c0_i32_1 : i32, i32, i32, i32
  }
  func.func @transform_1(%arg0: i32, %arg1: i32) -> (i32, i32) {
    %c0_i32 = arith.constant 0 : i32
    %c0_i32_0 = arith.constant 0 : i32
    %c0_i32_1 = arith.constant 0 : i32
    return %c0_i32, %c0_i32_0 : i32, i32
  }
  func.func @transform_2(%arg0: i32, %arg1: i32) -> (i32, i32) {
    %c0_i32 = arith.constant 0 : i32
    %c0_i32_0 = arith.constant 0 : i32
    %c0_i32_1 = arith.constant 0 : i32
    return %c0_i32, %c0_i32_0 : i32, i32
  }
  func.func @transform_3(%arg0: i32, %arg1: i32) -> (i32, i32) {
    %c0_i32 = arith.constant 0 : i32
    %c0_i32_0 = arith.constant 0 : i32
    %c0_i32_1 = arith.constant 0 : i32
    return %c0_i32, %c0_i32_0 : i32, i32
  }
  func.func @transform_4(%arg0: i32, %arg1: i32) -> (i32, i32) {
    %c0_i32 = arith.constant 0 : i32
    %c0_i32_0 = arith.constant 0 : i32
    %c0_i32_1 = arith.constant 0 : i32
    return %c0_i32, %c0_i32_0 : i32, i32
  }
  func.func @transform_5(%arg0: i32, %arg1: i32) -> (i32, i32) {
    %c0_i32 = arith.constant 0 : i32
    %c0_i32_0 = arith.constant 0 : i32
    %c0_i32_1 = arith.constant 0 : i32
    return %c0_i32, %c0_i32_0 : i32, i32
  }
  func.func @transform_6(%arg0: i32, %arg1: i32) -> (i32, i32) {
    %c0_i32 = arith.constant 0 : i32
    %c0_i32_0 = arith.constant 0 : i32
    %c0_i32_1 = arith.constant 0 : i32
    return %c0_i32, %c0_i32_0 : i32, i32
  }
  func.func @transform_7(%arg0: i32, %arg1: i32) -> (i32, i32, i32, i32) {
    %c0_i32 = arith.constant 0 : i32
    %c0_i32_0 = arith.constant 0 : i32
    %c0_i32_1 = arith.constant 0 : i32
    return %arg0, %arg1, %c0_i32, %c0_i32_0 : i32, i32, i32, i32
  }
}

</mosaic_0001>

<bundles_post_ra>
// kernel: tpu_custom_call.1
= control target key start
LH: loop header
LB: loop body
LE: loop exit
PB: predicated region body
PF: predicated region fallthrough
CT: control target
= control target key end

     0   :  { %s7398_s24 = smov 0   ;;  %s7400_s25 = smov 0   ;;  %s10281_s0 = inlined_call_operand.vmem [shape: f32[2,16,16,8], index: 0, kind: input, shape index: {}]   ;;  %s10282_s1 = inlined_call_operand.vmem [shape: f32[8,4], index: 1, kind: input, shape index: {}]   ;;  %s10283_s2 = inlined_call_operand.vmem [shape: f32[1,4], index: 2, kind: input, shape index: {}]   ;;  %s10284_s3 = inlined_call_operand.vmem [shape: f32[1,4], index: 3, kind: input, shape index: {}]   ;;  %s10285_s4 = inlined_call_operand.vmem [shape: f32[16,8], index: 4, kind: input, shape index: {}]   ;;  %s10286_s5 = inlined_call_operand.vmem [shape: f32[1,8], index: 5, kind: input, shape index: {}]   ;;  %s10287_s6 = inlined_call_operand.vmem [shape: f32[1,8], index: 6, kind: input, shape index: {}]   ;;  %s10288_s7 = inlined_call_operand.vmem [shape: f32[2,16,16,8], index: 7, kind: output, shape index: {}]  }
   0x1   :  { %s7402_s26 = smov 0  }
   0x2 LB: > { %s29_s27 = sadd.s32 1, %s7351_s25  ;;  %p6281_p0 = scmp.ge.s32.totalorder %s7355_s26, 1  ;;  %s7355_s26 = sphi %s7402_s26, %s17_s26   ;;  %s7351_s25 = sphi %s7400_s25, %s10302_s25   ;;  %s7347_s24 = sphi %s7398_s24, %s10301_s24  }
   0x3   : > { %p31_p1 = scmp.ge.s32.totalorder %s29_s27, 2  ;;  %p251_p2 = scmp.lt.s32.totalorder %s7355_s26, 3 }
   0x5   : > { %s10304_s27 = smov (%p31_p1, %s29_s27), 0  ;;  %p252_p3 = pnand %p6281_p0, %p251_p2 }
   0x7   : > { %255 = sbr.rel (%p252_p3) target bundleno = 963 (0x3c3), region = 48 }
   0xc   : > { %v7421_v0 = vld [vmem:[%s10282_s1] sm:$0xff]  ;;  %p288_p4 = scmp.lt.s32.totalorder %s7347_s24, 1  ;;  %vm308_vm0 = vcmask 31744   ;;  %v7357_v1 = vmov -inf   ;;  %vm424_vm1 = vcmask 64512   ;;  %vm4758_vm2 = vcmask 1043456  }
   0xd   : > { %7039 = vmatprep.subr.mxu0 %v7421_v0  ;;  %7289 = vmatprep.subr.mxu1 %v7421_v0  ;;  %311 = vst.msk [vmem:[#allocation2 + $0x10] sm:$0xff] %vm308_vm0, %v7357_v1  ;;  %315 = vst.msk [vmem:[#allocation2 + $0x30] sm:$0xff] %vm308_vm0, %v7357_v1  ;;  %vm3730_vm3 = vcmask 27648  }
   0xe   : > { %319 = vst.msk [vmem:[#allocation2 + $0x50] sm:$0xff] %vm308_vm0, %v7357_v1  ;;  %320 = vst.msk [vmem:[#allocation2 + $0x58] sm:$0xff] %vm308_vm0, %v7357_v1  ;;  %7040 = vmatpush3.msra.mxu0 %v7421_v0  ;;  %7290 = vmatpush3.msra.mxu1 %v7421_v0  ;;  %s10306_s24 = smov (!%p288_p4, %s7347_s24), 1 }
   0xf   : > { %323 = vst.msk [vmem:[#allocation2 + $0x70] sm:$0xff] %vm308_vm0, %v7357_v1  ;;  %324 = vst.msk [vmem:[#allocation2 + $0x78] sm:$0xff] %vm308_vm0, %v7357_v1  ;;  %s6872_s30 = sshll.u32 %s10306_s24, 8 }
  0x10   : > { %327 = vst.msk [vmem:[#allocation2 + $0x90] sm:$0xff] %vm308_vm0, %v7357_v1  ;;  %328 = vst.msk [vmem:[#allocation2 + $0x98] sm:$0xff] %vm308_vm0, %v7357_v1  ;;  %s7599_s10 = scalar_lea.vmem %s10281_s0, %s6872_s30  ;;  %s10116_s13 = scalar_lea.vmem %s10288_s7, %s6872_s30 }
  0x11   : > { %331 = vst.msk [vmem:[#allocation2 + $0xb0] sm:$0xff] %vm308_vm0, %v7357_v1  ;;  %332 = vst.msk [vmem:[#allocation2 + $0xb8] sm:$0xff] %vm308_vm0, %v7357_v1  ;;  %v391_v2 = vld [vmem:[%s7599_s10] sm:$0xff]  ;;  %v392_v4 = vld [vmem:[%s7599_s10 + $0x8] sm:$0xff] }
  0x12   : > { %375 = vst.msk [vmem:[#allocation2 + $0xd8] sm:$0xff] %vm308_vm0, %v7357_v1  ;;  %309 = vst.msk [vmem:[#allocation2] sm:$0xff] %vm308_vm0, %v7357_v1  ;;  %v407_v3 = vld [vmem:[%s7599_s10 + $0x80] sm:$0xff]  ;;  %7041 = vmatprep.mubr.msk.f32.mxu0 %vm424_vm1, %v391_v2  ;;  %v408_v5 = vld [vmem:[%s7599_s10 + $0x88] sm:$0xff] }
  0x13   : > { %310 = vst.msk [vmem:[#allocation2 + $0x8] sm:$0xff] %vm308_vm0, %v7357_v1  ;;  %312 = vst.msk [vmem:[#allocation2 + $0x18] sm:$0xff] %vm308_vm0, %v7357_v1  ;;  %7065 = vmatprep.mubr.msk.f32.mxu1 %vm424_vm1, %v407_v3  ;;  %v393_v6 = vld [vmem:[%s7599_s10 + $0x10] sm:$0xff]  ;;  %7042 = vmatmul.mubr.msk.f32.vlgmr.msra.gmra.mxu0 %vm424_vm1, %v392_v4  ;;  %v394_v8 = vld [vmem:[%s7599_s10 + $0x18] sm:$0xff] }
  0x14   : > { %313 = vst.msk [vmem:[#allocation2 + $0x20] sm:$0xff] %vm308_vm0, %v7357_v1  ;;  %314 = vst.msk [vmem:[#allocation2 + $0x28] sm:$0xff] %vm308_vm0, %v7357_v1  ;;  %v409_v7 = vld [vmem:[%s7599_s10 + $0x90] sm:$0xff]  ;;  %7066 = vmatmul.mubr.msk.f32.vlgmr.msra.gmra.mxu1 %vm424_vm1, %v408_v5  ;;  %7044 = vmatprep.mubr.msk.f32.mxu0 %vm424_vm1, %v393_v6  ;;  %v410_v9 = vld [vmem:[%s7599_s10 + $0x98] sm:$0xff] }
  0x15   : > { %316 = vst.msk [vmem:[#allocation2 + $0x38] sm:$0xff] %vm308_vm0, %v7357_v1  ;;  %317 = vst.msk [vmem:[#allocation2 + $0x40] sm:$0xff] %vm308_vm0, %v7357_v1  ;;  %7068 = vmatprep.mubr.msk.f32.mxu1 %vm424_vm1, %v409_v7  ;;  %v395_v10 = vld [vmem:[%s7599_s10 + $0x20] sm:$0xff]  ;;  %v396_v12 = vld [vmem:[%s7599_s10 + $0x28] sm:$0xff] }
  0x16   : > { %318 = vst.msk [vmem:[#allocation2 + $0x48] sm:$0xff] %vm308_vm0, %v7357_v1  ;;  %321 = vst.msk [vmem:[#allocation2 + $0x60] sm:$0xff] %vm308_vm0, %v7357_v1  ;;  %v411_v11 = vld [vmem:[%s7599_s10 + $0xa0] sm:$0xff]  ;;  %v412_v13 = vld [vmem:[%s7599_s10 + $0xa8] sm:$0xff] }
  0x17   : > { %322 = vst.msk [vmem:[#allocation2 + $0x68] sm:$0xff] %vm308_vm0, %v7357_v1  ;;  %325 = vst.msk [vmem:[#allocation2 + $0x80] sm:$0xff] %vm308_vm0, %v7357_v1  ;;  %7045 = vmatmul.mubr.msk.f32.gmra.mxu0 %vm424_vm1, %v394_v8  ;;  %v397_v14 = vld [vmem:[%s7599_s10 + $0x30] sm:$0xff]  ;;  %v398_v16 = vld [vmem:[%s7599_s10 + $0x38] sm:$0xff] }
  0x18   : > { %326 = vst.msk [vmem:[#allocation2 + $0x88] sm:$0xff] %vm308_vm0, %v7357_v1  ;;  %329 = vst.msk [vmem:[#allocation2 + $0xa0] sm:$0xff] %vm308_vm0, %v7357_v1  ;;  %7069 = vmatmul.mubr.msk.f32.gmra.mxu1 %vm424_vm1, %v410_v9  ;;  %7047 = vmatprep.mubr.msk.f32.mxu0 %vm424_vm1, %v395_v10  ;;  %v413_v15 = vld [vmem:[%s7599_s10 + $0xb0] sm:$0xff]  ;;  %v414_v17 = vld [vmem:[%s7599_s10 + $0xb8] sm:$0xff] }
  0x19   : > { %330 = vst.msk [vmem:[#allocation2 + $0xa8] sm:$0xff] %vm308_vm0, %v7357_v1  ;;  %334 = vst.msk [vmem:[#allocation2 + $0x2c0] sm:$0xff] %vm308_vm0, %v7357_v1  ;;  %7071 = vmatprep.mubr.msk.f32.mxu1 %vm424_vm1, %v411_v11  ;;  %v399_v18 = vld [vmem:[%s7599_s10 + $0x40] sm:$0xff]  ;;  %v400_v20 = vld [vmem:[%s7599_s10 + $0x48] sm:$0xff] }
  0x1a   : > { %335 = vst.msk [vmem:[#allocation2 + $0x2c8] sm:$0xff] %vm308_vm0, %v7357_v1  ;;  %336 = vst.msk [vmem:[#allocation2 + $0x2d0] sm:$0xff] %vm308_vm0, %v7357_v1  ;;  %v415_v19 = vld [vmem:[%s7599_s10 + $0xc0] sm:$0xff]  ;;  %v416_v21 = vld [vmem:[%s7599_s10 + $0xc8] sm:$0xff] }
  0x1b   : > { %337 = vst.msk [vmem:[#allocation2 + $0x2d8] sm:$0xff] %vm308_vm0, %v7357_v1  ;;  %338 = vst.msk [vmem:[#allocation2 + $0x2e0] sm:$0xff] %vm308_vm0, %v7357_v1  ;;  %7048 = vmatmul.mubr.msk.f32.gmra.mxu0 %vm424_vm1, %v396_v12  ;;  %v401_v22 = vld [vmem:[%s7599_s10 + $0x50] sm:$0xff]  ;;  %v402_v24 = vld [vmem:[%s7599_s10 + $0x58] sm:$0xff] }
  0x1c   : > { %339 = vst.msk [vmem:[#allocation2 + $0x2e8] sm:$0xff] %vm308_vm0, %v7357_v1  ;;  %340 = vst.msk [vmem:[#allocation2 + $0x2f0] sm:$0xff] %vm308_vm0, %v7357_v1  ;;  %7072 = vmatmul.mubr.msk.f32.gmra.mxu1 %vm424_vm1, %v412_v13  ;;  %7050 = vmatprep.mubr.msk.f32.mxu0 %vm424_vm1, %v397_v14  ;;  %v417_v23 = vld [vmem:[%s7599_s10 + $0xd0] sm:$0xff]  ;;  %v418_v25 = vld [vmem:[%s7599_s10 + $0xd8] sm:$0xff] }
  0x1d   : > { %341 = vst.msk [vmem:[#allocation2 + $0x2f8] sm:$0xff] %vm308_vm0, %v7357_v1  ;;  %342 = vst.msk [vmem:[#allocation2 + $0x300] sm:$0xff] %vm308_vm0, %v7357_v1  ;;  %7074 = vmatprep.mubr.msk.f32.mxu1 %vm424_vm1, %v413_v15  ;;  %v403_v26 = vld [vmem:[%s7599_s10 + $0x60] sm:$0xff]  ;;  %v404_v28 = vld [vmem:[%s7599_s10 + $0x68] sm:$0xff] }
  0x1e   : > { %343 = vst.msk [vmem:[#allocation2 + $0x308] sm:$0xff] %vm308_vm0, %v7357_v1  ;;  %344 = vst.msk [vmem:[#allocation2 + $0x310] sm:$0xff] %vm308_vm0, %v7357_v1  ;;  %v419_v27 = vld [vmem:[%s7599_s10 + $0xe0] sm:$0xff]  ;;  %v420_v29 = vld [vmem:[%s7599_s10 + $0xe8] sm:$0xff] }
  0x1f   : > { %345 = vst.msk [vmem:[#allocation2 + $0x318] sm:$0xff] %vm308_vm0, %v7357_v1  ;;  %346 = vst.msk [vmem:[#allocation2 + $0x320] sm:$0xff] %vm308_vm0, %v7357_v1  ;;  %7051 = vmatmul.mubr.msk.f32.gmra.mxu0 %vm424_vm1, %v398_v16  ;;  %v405_v30 = vld [vmem:[%s7599_s10 + $0x70] sm:$0xff]  ;;  %v406_v32 = vld [vmem:[%s7599_s10 + $0x78] sm:$0xff] }
  0x20   : > { %347 = vst.msk [vmem:[#allocation2 + $0x328] sm:$0xff] %vm308_vm0, %v7357_v1  ;;  %348 = vst.msk [vmem:[#allocation2 + $0x330] sm:$0xff] %vm308_vm0, %v7357_v1  ;;  %7075 = vmatmul.mubr.msk.f32.gmra.mxu1 %vm424_vm1, %v414_v17  ;;  %7053 = vmatprep.mubr.msk.f32.mxu0 %vm424_vm1, %v399_v18  ;;  %v421_v31 = vld [vmem:[%s7599_s10 + $0xf0] sm:$0xff]  ;;  %v422_v33 = vld [vmem:[%s7599_s10 + $0xf8] sm:$0xff] }
  0x21   : > { %349 = vst.msk [vmem:[#allocation2 + $0x338] sm:$0xff] %vm308_vm0, %v7357_v1  ;;  %350 = vst.msk [vmem:[#allocation2 + $0x340] sm:$0xff] %vm308_vm0, %v7357_v1  ;;  %7077 = vmatprep.mubr.msk.f32.mxu1 %vm424_vm1, %v415_v19  ;;  %v893_v34 = vld [vmem:[#allocation2 + $0x10] sm:$0xff]  ;;  %v902_v37 = vld [vmem:[#allocation2 + $0x58] sm:$0xff] }
  0x22   : > { %351 = vst.msk [vmem:[#allocation2 + $0x348] sm:$0xff] %vm308_vm0, %v7357_v1  ;;  %352 = vst.msk [vmem:[#allocation2 + $0x350] sm:$0xff] %vm308_vm0, %v7357_v1  ;;  %v897_v35 = vld [vmem:[#allocation2 + $0x30] sm:$0xff]  ;;  %v6331_v42 = vld [vmem:[#allocation2 + $0x78] sm:$0xff] }
  0x23   : > { %353 = vst.msk [vmem:[#allocation2 + $0x358] sm:$0xff] %vm308_vm0, %v7357_v1  ;;  %354 = vst.msk [vmem:[#allocation2 + $0x360] sm:$0xff] %vm308_vm0, %v7357_v1  ;;  %7054 = vmatmul.mubr.msk.f32.gmra.mxu0 %vm424_vm1, %v400_v20  ;;  %v901_v36 = vld [vmem:[#allocation2 + $0x50] sm:$0xff]  ;;  %v1088_v39 = vmax.f32 %v893_v34, %v897_v35  ;;  %v1097_v44 = vmax.f32 %v902_v37, %v6331_v42  ;;  %v892_v47 = vld [vmem:[#allocation2 + $0x8] sm:$0xff] }
  0x24   : > { %355 = vst.msk [vmem:[#allocation2 + $0x368] sm:$0xff] %vm308_vm0, %v7357_v1  ;;  %356 = vst.msk [vmem:[#allocation2 + $0x370] sm:$0xff] %vm308_vm0, %v7357_v1  ;;  %7078 = vmatmul.mubr.msk.f32.gmra.mxu1 %vm424_vm1, %v416_v21  ;;  %7056 = vmatprep.mubr.msk.f32.mxu0 %vm424_vm1, %v401_v22  ;;  %v7665_v38 = vld [vmem:[#allocation2 + $0x70] sm:$0xff]  ;;  %v1092_v40 = vmax.f32 %v897_v35, %v901_v36  ;;  %v896_v48 = vld [vmem:[#allocation2 + $0x28] sm:$0xff] }
  0x25   : > { %357 = vst.msk [vmem:[#allocation2 + $0x378] sm:$0xff] %vm308_vm0, %v7357_v1  ;;  %359 = vst.msk [vmem:[#allocation2 + $0xc0] sm:$0xff] %vm308_vm0, %v7357_v1  ;;  %7080 = vmatprep.mubr.msk.f32.mxu1 %vm424_vm1, %v417_v23  ;;  %v7667_v41 = vld [vmem:[#allocation2 + $0x90] sm:$0xff]  ;;  %v1096_v43 = vmax.f32 %v901_v36, %v7665_v38  ;;  %v1283_v45 = vmax.f32 %v1088_v39, %v901_v36  ;;  %v900_v49 = vld [vmem:[#allocation2 + $0x48] sm:$0xff]  ;;  %v1087_v52 = vmax.f32 %v892_v47, %v896_v48 }
  0x26   : > { %360 = vst.msk [vmem:[#allocation2 + $0xe0] sm:$0xff] %vm308_vm0, %v7357_v1  ;;  %361 = vst.msk [vmem:[#allocation2 + $0x100] sm:$0xff] %vm308_vm0, %v7357_v1  ;;  %v1287_v46 = vmax.f32 %v1092_v40, %v7665_v38  ;;  %v7671_v50 = vld [vmem:[#allocation2 + $0xb0] sm:$0xff]  ;;  %v6427_v51 = vld [vmem:[#allocation2 + $0x98] sm:$0xff]  ;;  %v1091_v53 = vmax.f32 %v896_v48, %v900_v49  ;;  %v1100_v54 = vmax.f32 %v7665_v38, %v7667_v41 }
  0x27   : > { %362 = vst.msk [vmem:[#allocation2 + $0x120] sm:$0xff] %vm308_vm0, %v7357_v1  ;;  %363 = vst.msk [vmem:[#allocation2 + $0x140] sm:$0xff] %vm308_vm0, %v7357_v1  ;;  %7057 = vmatmul.mubr.msk.f32.gmra.mxu0 %vm424_vm1, %v402_v24  ;;  %v7676_v55 = vmax.f32 %v1096_v43, %v7667_v41  ;;  %v1292_v56 = vmax.f32 %v1097_v44, %v6427_v51  ;;  %v1478_v57 = vmax.f32 %v1283_v45, %v7665_v38  ;;  %v899_v58 = vld [vmem:[#allocation2 + $0x40] sm:$0xff]  ;;  %v7679_v59 = vld [vmem:[#allocation2 + $0x68] sm:$0xff] }
  0x28   : > { %364 = vst.msk [vmem:[#allocation2 + $0x160] sm:$0xff] %vm308_vm0, %v7357_v1  ;;  %365 = vst.msk [vmem:[#allocation2 + $0x180] sm:$0xff] %vm308_vm0, %v7357_v1  ;;  %7081 = vmatmul.mubr.msk.f32.gmra.mxu1 %vm424_vm1, %v418_v25  ;;  %7059 = vmatprep.mubr.msk.f32.mxu0 %vm424_vm1, %v403_v26  ;;  %v6328_v60 = vld [vmem:[#allocation2 + $0x60] sm:$0xff]  ;;  %v6523_v61 = vld [vmem:[#allocation2 + $0xb8] sm:$0xff]  ;;  %v1482_v62 = vmax.f32 %v1287_v46, %v7667_v41  ;;  %v1095_v0 = vmax.f32 %v900_v49, %v7679_v59 }
  0x29   : > { %366 = vst.msk [vmem:[#allocation2 + $0x1a0] sm:$0xff] %vm308_vm0, %v7357_v1  ;;  %367 = vst.msk [vmem:[#allocation2 + $0x1c0] sm:$0xff] %vm308_vm0, %v7357_v1  ;;  %7083 = vmatprep.mubr.msk.f32.mxu1 %vm424_vm1, %v419_v27  ;;  %v1094_v63 = vmax.f32 %v899_v58, %v6328_v60  ;;  %v1487_v2 = vmax.f32 %v1292_v56, %v6523_v61  ;;  %v7683_v3 = vld [vmem:[#allocation2 + $0x88] sm:$0xff]  ;;  %v6424_v4 = vld [vmem:[#allocation2 + $0x80] sm:$0xff]  ;;  %v1673_v6 = vmax.f32 %v1478_v57, %v7667_v41 }
  0x2a   : > { %368 = vst.msk [vmem:[#allocation2 + $0x1e0] sm:$0xff] %vm308_vm0, %v7357_v1  ;;  %369 = vst.msk [vmem:[#allocation2 + $0x200] sm:$0xff] %vm308_vm0, %v7357_v1  ;;  %v6619_v5 = vld [vmem:[#allocation2 + $0xd8] sm:$0xff]  ;;  %v1677_v7 = vmax.f32 %v1482_v62, %v7671_v50  ;;  %v1099_v8 = vmax.f32 %v7679_v59, %v7683_v3  ;;  %v1286_v9 = vmax.f32 %v1091_v53, %v7679_v59  ;;  %v7690_v11 = vld [vmem:[#allocation2 + $0xa8] sm:$0xff] }
  0x2b   : > { %370 = vst.msk [vmem:[#allocation2 + $0x220] sm:$0xff] %vm308_vm0, %v7357_v1  ;;  %371 = vst.msk [vmem:[#allocation2 + $0x240] sm:$0xff] %vm308_vm0, %v7357_v1  ;;  %7060 = vmatmul.mubr.msk.f32.gmra.mxu0 %vm424_vm1, %v404_v28  ;;  %v1682_v10 = vmax.f32 %v1487_v2, %v6619_v5  ;;  %v1289_v12 = vmax.f32 %v1094_v63, %v6424_v4  ;;  %v7693_v13 = vmax.f32 %v1095_v0, %v7683_v3  ;;  %v6520_v14 = vld [vmem:[#allocation2 + $0xa0] sm:$0xff]  ;;  %v898_v34 = vld [vmem:[#allocation2 + $0x38] sm:$0xff] }
  0x2c   : > { %372 = vst.msk [vmem:[#allocation2 + $0x260] sm:$0xff] %vm308_vm0, %v7357_v1  ;;  %373 = vst.msk [vmem:[#allocation2 + $0x280] sm:$0xff] %vm308_vm0, %v7357_v1  ;;  %7084 = vmatmul.mubr.msk.f32.gmra.mxu1 %vm424_vm1, %v420_v29  ;;  %7062 = vmatprep.mubr.msk.f32.mxu0 %vm424_vm1, %v405_v30  ;;  %v1481_v16 = vmax.f32 %v1286_v9, %v7683_v3  ;;  %v1101_v17 = vmax.f32 %v6331_v42, %v6427_v51  ;;  %v6616_v19 = vld [vmem:[#allocation2 + $0xc0] sm:$0xff]  ;;  %v6327_v35 = vld [vmem:[#allocation2 + $0x58] sm:$0xff] }
  0x2d   : > { %374 = vst.msk [vmem:[#allocation2 + $0x2a0] sm:$0xff] %vm308_vm0, %v7357_v1  ;;  %376 = vst.msk [vmem:[#allocation2 + $0xf8] sm:$0xff] %vm308_vm0, %v7357_v1  ;;  %7086 = vmatprep.mubr.msk.f32.mxu1 %vm424_vm1, %v421_v31  ;;  %v1484_v18 = vmax.f32 %v1289_v12, %v6520_v14  ;;  %v1098_v23 = vmax.f32 %v6328_v60, %v6424_v4  ;;  %v6620_v30 = vld [vmem:[#allocation2 + $0xe0] sm:$0xff]  ;;  %v1093_v37 = vmax.f32 %v898_v34, %v6327_v35  ;;  %v6423_v45 = vld [vmem:[#allocation2 + $0x78] sm:$0xff] }
  0x2e   : > { %377 = vst.msk [vmem:[#allocation2 + $0x118] sm:$0xff] %vm308_vm0, %v7357_v1  ;;  %378 = vst.msk [vmem:[#allocation2 + $0x138] sm:$0xff] %vm308_vm0, %v7357_v1  ;;  %v1676_v21 = vmax.f32 %v1481_v16, %v7690_v11  ;;  %v1296_v22 = vmax.f32 %v1101_v17, %v6523_v61  ;;  %v891_v39 = vld [vmem:[#allocation2] sm:$0xff]  ;;  %v910_v48 = vld [vmem:[#allocation2 + $0x98] sm:$0xff] }
  0x2f   : > { %379 = vst.msk [vmem:[#allocation2 + $0x158] sm:$0xff] %vm308_vm0, %v7357_v1  ;;  %380 = vst.msk [vmem:[#allocation2 + $0x178] sm:$0xff] %vm308_vm0, %v7357_v1  ;;  %7063 = vmatmul.mubr.msk.f32.gmra.mxu0 %vm424_vm1, %v406_v32  ;;  %v1679_v24 = vmax.f32 %v1484_v18, %v6616_v19  ;;  %v1293_v26 = vmax.f32 %v1098_v23, %v6520_v14  ;;  %v4660_v32 = vld [vmem:[%s10285_s4] sm:$0xf]  ;;  %v7712_v57 = vld [vmem:[#allocation2 + $0xb8] sm:$0xff] }
  0x30   : > { %381 = vst.msk [vmem:[#allocation2 + $0x198] sm:$0xff] %vm308_vm0, %v7357_v1  ;;  %382 = vst.msk [vmem:[#allocation2 + $0x1b8] sm:$0xff] %vm308_vm0, %v7357_v1  ;;  %7087 = vmatmul.mubr.msk.f32.gmra.mxu1 %vm424_vm1, %v422_v33  ;;  %v1491_v25 = vmax.f32 %v1296_v22, %v6619_v5  ;;  %7139 = vmatprep.subr.msk.mxu0 %vm4758_vm2, %v4660_v32  ;;  %v894_v33 = vld [vmem:[#allocation2 + $0x18] sm:$0xff]  ;;  %v895_v40 = vld [vmem:[#allocation2 + $0x20] sm:$0xff]  ;;  %v1105_v5 = vmax.f32 %v910_v48, %v7712_v57 }
  0x31   : > { %383 = vst.msk [vmem:[#allocation2 + $0x1d8] sm:$0xff] %vm308_vm0, %v7357_v1  ;;  %384 = vst.msk [vmem:[#allocation2 + $0x1f8] sm:$0xff] %vm308_vm0, %v7357_v1  ;;  %v1488_v29 = vmax.f32 %v1293_v26, %v6616_v19  ;;  %7140 = vmatpush3.msk.msra.mxu0 %vm4758_vm2, %v4660_v32  ;;  %v1089_v36 = vmax.f32 %v894_v33, %v898_v34  ;;  %v6324_v42 = vld [vmem:[#allocation2 + $0x40] sm:$0xff]  ;;  %v1086_v43 = vmax.f32 %v891_v39, %v895_v40 }
  0x32   : > { %385 = vst.msk [vmem:[#allocation2 + $0x218] sm:$0xff] %vm308_vm0, %v7357_v1  ;;  %386 = vst.msk [vmem:[#allocation2 + $0x238] sm:$0xff] %vm308_vm0, %v7357_v1  ;;  %v1090_v44 = vmax.f32 %v895_v40, %v6324_v42  ;;  %v6420_v47 = vld [vmem:[#allocation2 + $0x60] sm:$0xff] }
  0x33   : > { %387 = vst.msk [vmem:[#allocation2 + $0x258] sm:$0xff] %vm308_vm0, %v7357_v1  ;;  %388 = vst.msk [vmem:[#allocation2 + $0x278] sm:$0xff] %vm308_vm0, %v7357_v1  ;;  %v1683_v31 = vmax.f32 %v1488_v29, %v6620_v30  ;;  %v1284_v46 = vmax.f32 %v1089_v36, %v6327_v35  ;;  %v1281_v51 = vmax.f32 %v1086_v43, %v6324_v42  ;;  %v907_v56 = vld [vmem:[#allocation2 + $0x80] sm:$0xff] }
  0x34   : > { %389 = vst.msk [vmem:[#allocation2 + $0x298] sm:$0xff] %vm308_vm0, %v7357_v1  ;;  %390 = vst.msk [vmem:[#allocation2 + $0x2b8] sm:$0xff] %vm308_vm0, %v7357_v1  ;;  %v1282_v1 = vmax.f32 %v1087_v52, %v900_v49  ;;  %v6623_v27 = vld [vmem:[#allocation2 + $0xf8] sm:$0xff]  ;;  %v1288_v49 = vmax.f32 %v1093_v37, %v6423_v45  ;;  %v1285_v52 = vmax.f32 %v1090_v44, %v6420_v47  ;;  %v7714_v63 = vld [vmem:[#allocation2 + $0xa0] sm:$0xff] }
  0x35   : > { %1770 = vst.msk [vmem:[#allocation3 + $0x10] sm:$0xff] %vm308_vm0, %v1673_v6  ;;  %1774 = vst.msk [vmem:[#allocation3 + $0x30] sm:$0xff] %vm308_vm0, %v1677_v7  ;;  %v1686_v28 = vmax.f32 %v1491_v25, %v6623_v27  ;;  %v1479_v53 = vmax.f32 %v1284_v46, %v6423_v45  ;;  %v1476_v60 = vmax.f32 %v1281_v51, %v6420_v47  ;;  %v7728_v6 = vld [vmem:[#allocation2 + $0xd8] sm:$0xff]  ;;  %v7738_v16 = vld [vmem:[#allocation2 + $0xe0] sm:$0xff] }
  0x36   : > { %v1477_v15 = vmax.f32 %v1282_v1, %v7679_v59  ;;  %1779 = vst.msk [vmem:[#allocation3 + $0x58] sm:$0xff] %vm308_vm0, %v1682_v10  ;;  %1773 = vst.msk [vmem:[#allocation3 + $0x28] sm:$0xff] %vm308_vm0, %v1676_v21  ;;  %v1483_v58 = vmax.f32 %v1288_v49, %v910_v48  ;;  %v1480_v61 = vmax.f32 %v1285_v52, %v907_v56  ;;  %v4661_v1 = vld [vmem:[%s10285_s4 + $0x4] sm:$0xf]  ;;  %v7734_v12 = vld [vmem:[#allocation2 + $0xf8] sm:$0xff] }
  0x37   : > { %1776 = vst.msk [vmem:[#allocation3 + $0x40] sm:$0xff] %vm308_vm0, %v1679_v24  ;;  %1783 = vst.msk [vmem:[#allocation3 + $0x78] sm:$0xff] %vm308_vm0, %v1686_v28  ;;  %v1674_v62 = vmax.f32 %v1479_v53, %v910_v48  ;;  %v1671_v2 = vmax.f32 %v1476_v60, %v907_v56  ;;  %7089 = vmatprep.subr.msk.mxu1 %vm4758_vm2, %v4661_v1  ;;  %v1102_v7 = vmax.f32 %v907_v56, %v7714_v63  ;;  %v7732_v10 = vld [vmem:[#allocation2 + $0xc0] sm:$0xff]  ;;  %v7740_v17 = vld [vmem:[#allocation2 + $0x118] sm:$0xff] }
  0x38   : > { %v1672_v20 = vmax.f32 %v1477_v15, %v7683_v3  ;;  %1780 = vst.msk [vmem:[#allocation3 + $0x60] sm:$0xff] %vm308_vm0, %v1683_v31  ;;  %v1678_v0 = vmax.f32 %v1483_v58, %v7712_v57  ;;  %v1675_v4 = vmax.f32 %v1480_v61, %v7714_v63  ;;  %7090 = vmatpush3.msk.msra.mxu1 %vm4758_vm2, %v4661_v1 }
  0x39   : > { %1771 = vst.msk [vmem:[#allocation3 + $0x18] sm:$0xff] %vm308_vm0, %v1674_v62  ;;  %1768 = vst.msk [vmem:[#allocation3] sm:$0xff] %vm308_vm0, %v1671_v2  ;;  %v1300_v9 = vmax.f32 %v1105_v5, %v7728_v6  ;;  %v1297_v14 = vmax.f32 %v1102_v7, %v7732_v10 }
  0x3a   : > { %1769 = vst.msk [vmem:[#allocation3 + $0x8] sm:$0xff] %vm308_vm0, %v1672_v20  ;;  %1775 = vst.msk [vmem:[#allocation3 + $0x38] sm:$0xff] %vm308_vm0, %v1678_v0  ;;  %v7744_v20 = vld [vmem:[#allocation2 + $0x100] sm:$0xff] }
  0x3b   : > { %1772 = vst.msk [vmem:[#allocation3 + $0x20] sm:$0xff] %vm308_vm0, %v1675_v4  ;;  %v1495_v15 = vmax.f32 %v1300_v9, %v7734_v12  ;;  %v1492_v18 = vmax.f32 %v1297_v14, %v7738_v16  ;;  %v974_v14 = vld [vmem:[#allocation2 + $0x298] sm:$0xff] }
  0x3d   : > { %v1690_v19 = vmax.f32 %v1495_v15, %v7740_v17  ;;  %v1687_v23 = vmax.f32 %v1492_v18, %v7744_v20  ;;  %v1868_v25 = vld [vmem:[#allocation3 + $0x2a] sm:$0xff]  ;;  %v978_v15 = vld [vmem:[#allocation2 + $0x2b8] sm:$0xff] }
  0x3e   : > { %v1940_v29 = vld [vmem:[#allocation3 + $0x2b] sm:$0xff] }
  0x3f   : > { %1787 = vst.msk [vmem:[#allocation3 + $0x98] sm:$0xff] %vm308_vm0, %v1690_v19  ;;  %1784 = vst.msk [vmem:[#allocation3 + $0x80] sm:$0xff] %vm308_vm0, %v1687_v23  ;;  %v2012_v33 = vmax.f32 %v1868_v25, %v1940_v29  ;;  %v2084_v37 = vld [vmem:[#allocation3 + $0x2c] sm:$0xff]  ;;  %v6407_v23 = vld [vmem:[#allocation2 + $0x2d8] sm:$0xff] }
  0x40   : > { %v1866_v43 = vld [vmem:[#allocation3 + $0x12] sm:$0xff]  ;;  %v1173_v25 = vmax.f32 %v978_v15, %v6407_v23 }
  0x41   : > { %v1864_v21 = vld [vmem:[#allocation3 + $0x2] sm:$0xff]  ;;  %v1865_v22 = vld [vmem:[#allocation3 + $0xa] sm:$0xff]  ;;  %v2156_v46 = vmax.f32 %v2012_v33, %v2084_v37  ;;  %v1938_v49 = vld [vmem:[#allocation3 + $0x13] sm:$0xff]  ;;  %v1106_v33 = vmax.f32 %v7714_v63, %v7732_v10 }
  0x42   : > { %v1867_v24 = vld [vmem:[#allocation3 + $0x22] sm:$0xff]  ;;  %v1937_v27 = vld [vmem:[#allocation3 + $0xb] sm:$0xff]  ;;  %v1941_v1 = vld [vmem:[#allocation3 + $0x33] sm:$0xff]  ;;  %v2010_v9 = vmax.f32 %v1866_v43, %v1938_v49 }
  0x43   : > { %v1936_v26 = vld [vmem:[#allocation3 + $0x3] sm:$0xff]  ;;  %v2009_v31 = vmax.f32 %v1865_v22, %v1937_v27  ;;  %v2081_v35 = vld [vmem:[#allocation3 + $0xc] sm:$0xff]  ;;  %v2082_v19 = vld [vmem:[#allocation3 + $0x14] sm:$0xff] }
  0x44   : > { %v1939_v28 = vld [vmem:[#allocation3 + $0x23] sm:$0xff]  ;;  %v2008_v30 = vmax.f32 %v1864_v21, %v1936_v26  ;;  %v2225_v42 = vld [vmem:[#allocation3 + $0xd] sm:$0xff]  ;;  %v1169_v21 = vmax.f32 %v974_v14, %v978_v15  ;;  %v2154_v27 = vmax.f32 %v2010_v9, %v2082_v19  ;;  %v1113_v19 = vmax.f32 %v7728_v6, %v7734_v12 }
  0x45   : > { %v2011_v32 = vmax.f32 %v1867_v24, %v1939_v28  ;;  %v2080_v34 = vld [vmem:[#allocation3 + $0x4] sm:$0xff]  ;;  %v2153_v44 = vmax.f32 %v2009_v31, %v2081_v35  ;;  %v2228_v48 = vld [vmem:[#allocation3 + $0x2d] sm:$0xff]  ;;  %v1109_v24 = vmax.f32 %v7712_v57, %v7728_v6  ;;  %v2226_v28 = vld [vmem:[#allocation3 + $0x15] sm:$0xff]  ;;  %v1301_v57 = vmax.f32 %v1106_v33, %v7738_v16 }
  0x46   : > { %v2083_v36 = vld [vmem:[#allocation3 + $0x24] sm:$0xff]  ;;  %v2152_v39 = vmax.f32 %v2008_v30, %v2080_v34  ;;  %v2369_v53 = vld [vmem:[#allocation3 + $0xe] sm:$0xff]  ;;  %v2300_v61 = vmax.f32 %v2156_v46, %v2228_v48  ;;  %v1364_v26 = vmax.f32 %v1169_v21, %v6407_v23  ;;  %v6503_v31 = vld [vmem:[#allocation2 + $0x2f8] sm:$0xff]  ;;  %v2298_v46 = vmax.f32 %v2154_v27, %v2226_v28 }
  0x47   : > { %v2224_v40 = vld [vmem:[#allocation3 + $0x5] sm:$0xff]  ;;  %v2155_v45 = vmax.f32 %v2011_v32, %v2083_v36  ;;  %v2297_v58 = vmax.f32 %v2153_v44, %v2225_v42  ;;  %v2372_v62 = vld [vmem:[#allocation3 + $0x2e] sm:$0xff]  ;;  %v1368_v35 = vmax.f32 %v1173_v25, %v6503_v31  ;;  %v1304_v37 = vmax.f32 %v1109_v24, %v7734_v12  ;;  %v2373_v23 = vld [vmem:[#allocation3 + $0x36] sm:$0xff] }
  0x48   : > { %v2227_v47 = vld [vmem:[#allocation3 + $0x25] sm:$0xff]  ;;  %v2296_v51 = vmax.f32 %v2152_v39, %v2224_v40  ;;  %v1869_v0 = vld [vmem:[#allocation3 + $0x32] sm:$0xff]  ;;  %v2444_v7 = vmax.f32 %v2300_v61, %v2372_v62  ;;  %v1559_v43 = vmax.f32 %v1364_v26, %v6503_v31  ;;  %v1496_v61 = vmax.f32 %v1301_v57, %v7744_v20 }
  0x49   : > { %v2368_v52 = vld [vmem:[#allocation3 + $0x6] sm:$0xff]  ;;  %v2299_v60 = vmax.f32 %v2155_v45, %v2227_v47  ;;  %v2441_v4 = vmax.f32 %v2297_v58, %v2369_v53  ;;  %v2013_v18 = vmax.f32 %v1869_v0, %v1941_v1  ;;  %v2085_v22 = vld [vmem:[#allocation3 + $0x34] sm:$0xff]  ;;  %v1499_v62 = vmax.f32 %v1304_v37, %v7740_v17 }
  0x4a   : > { %v2371_v56 = vld [vmem:[#allocation3 + $0x26] sm:$0xff]  ;;  %v2440_v2 = vmax.f32 %v2296_v51, %v2368_v52  ;;  %2516 = vst.msk [vmem:[#allocation4 + $0x2c] sm:$0xff] %vm308_vm0, %v2444_v7  ;;  %v981_v29 = vld [vmem:[#allocation2 + $0x2d0] sm:$0xff]  ;;  %v6599_v40 = vld [vmem:[#allocation2 + $0x318] sm:$0xff]  ;;  %v1110_v27 = vmax.f32 %v7732_v10, %v7738_v16  ;;  %v1308_v10 = vmax.f32 %v1113_v19, %v7740_v17 }
  0x4b   : > { %v2443_v5 = vmax.f32 %v2299_v60, %v2371_v56  ;;  %2513 = vst.msk [vmem:[#allocation4 + $0xc] sm:$0xff] %vm308_vm0, %v2441_v4  ;;  %v985_v30 = vld [vmem:[#allocation2 + $0x2f0] sm:$0xff]  ;;  %v2157_v32 = vmax.f32 %v2013_v18, %v2085_v22  ;;  %v971_v44 = vld [vmem:[#allocation2 + $0x280] sm:$0xff]  ;;  %v1563_v51 = vmax.f32 %v1368_v35, %v6599_v40  ;;  %v6695_v52 = vld [vmem:[#allocation2 + $0x338] sm:$0xff]  ;;  %v1754_v58 = vmax.f32 %v1559_v43, %v6599_v40 }
  0x4c   : > { %2512 = vst.msk [vmem:[#allocation4 + $0x4] sm:$0xff] %vm308_vm0, %v2440_v2  ;;  %v1176_v34 = vmax.f32 %v981_v29, %v985_v30  ;;  %v2229_v36 = vld [vmem:[#allocation3 + $0x35] sm:$0xff]  ;;  %v975_v45 = vld [vmem:[#allocation2 + $0x2a0] sm:$0xff]  ;;  %v980_v4 = vld [vmem:[#allocation2 + $0x2c8] sm:$0xff]  ;;  %v1117_v40 = vmax.f32 %v7734_v12, %v7740_v17 }
  0x4d   : > { %2515 = vst.msk [vmem:[#allocation4 + $0x24] sm:$0xff] %vm308_vm0, %v2443_v5  ;;  %v6414_v39 = vld [vmem:[#allocation2 + $0x310] sm:$0xff]  ;;  %v1166_v63 = vmax.f32 %v971_v44, %v975_v45  ;;  %v2301_v53 = vmax.f32 %v2157_v32, %v2229_v36  ;;  %v6404_v60 = vld [vmem:[#allocation2 + $0x2c0] sm:$0xff]  ;;  %v1758_v2 = vmax.f32 %v1563_v51, %v6695_v52  ;;  %1851 = vst.msk [vmem:[#allocation3 + $0x298] sm:$0xff] %vm308_vm0, %v1754_v58 }
  0x4e   : > { %v1371_v42 = vmax.f32 %v1176_v34, %v6414_v39  ;;  %v1180_v47 = vmax.f32 %v985_v30, %v6414_v39  ;;  %v6510_v48 = vld [vmem:[#allocation2 + $0x330] sm:$0xff]  ;;  %v1170_v5 = vmax.f32 %v975_v45, %v6404_v60  ;;  %v984_v9 = vld [vmem:[#allocation2 + $0x2e8] sm:$0xff]  ;;  %v6500_v14 = vld [vmem:[#allocation2 + $0x2e0] sm:$0xff]  ;;  %v1305_v36 = vmax.f32 %v1110_v27, %v7744_v20 }
  0x4f   : > { %v6606_v49 = vld [vmem:[#allocation2 + $0x350] sm:$0xff]  ;;  %v1361_v15 = vmax.f32 %v1166_v63, %v6404_v60  ;;  %1855 = vst.msk [vmem:[#allocation3 + $0x2b8] sm:$0xff] %vm308_vm0, %v1758_v2  ;;  %v1175_v22 = vmax.f32 %v980_v4, %v984_v9  ;;  %v7765_v25 = vld [vmem:[#allocation2 + $0x120] sm:$0xff]  ;;  %v7767_v26 = vld [vmem:[#allocation2 + $0x138] sm:$0xff]  ;;  %v2445_v30 = vmax.f32 %v2301_v53, %v2373_v23  ;;  %v1114_v44 = vmax.f32 %v7738_v16, %v7744_v20 }
  0x50   : > { %v1566_v56 = vmax.f32 %v1371_v42, %v6510_v48  ;;  %v1375_v0 = vmax.f32 %v1180_v47, %v6510_v48  ;;  %v6702_v1 = vld [vmem:[#allocation2 + $0x370] sm:$0xff]  ;;  %v6413_v28 = vld [vmem:[#allocation2 + $0x308] sm:$0xff]  ;;  %v1365_v29 = vmax.f32 %v1170_v5, %v6500_v14  ;;  %v1691_v6 = vmax.f32 %v1496_v61, %v7765_v25  ;;  %v6596_v34 = vld [vmem:[#allocation2 + $0x300] sm:$0xff] }
  0x51   : > { %v2370_v18 = vld [vmem:[#allocation3 + $0x16] sm:$0xff]  ;;  %v1694_v31 = vmax.f32 %v1499_v62, %v7767_v26  ;;  %v1179_v33 = vmax.f32 %v984_v9, %v6413_v28  ;;  %v1556_v35 = vmax.f32 %v1361_v15, %v6500_v14  ;;  %v6509_v37 = vld [vmem:[#allocation2 + $0x328] sm:$0xff]  ;;  %v1370_v39 = vmax.f32 %v1175_v22, %v6413_v28  ;;  %2517 = vst.msk [vmem:[#allocation4 + $0x34] sm:$0xff] %vm308_vm0, %v2445_v30  ;;  %v6632_v48 = vld [vmem:[#allocation2 + $0x140] sm:$0xff] }
  0x52   : > { %v1761_v7 = vmax.f32 %v1566_v56, %v6606_v49  ;;  %v1570_v21 = vmax.f32 %v1375_v0, %v6606_v49  ;;  %v2442_v24 = vmax.f32 %v2298_v46, %v2370_v18  ;;  %1788 = vst.msk [vmem:[#allocation3 + $0xa0] sm:$0xff] %vm308_vm0, %v1691_v6  ;;  %v1560_v57 = vmax.f32 %v1365_v29, %v6596_v34  ;;  %v6635_v43 = vld [vmem:[#allocation2 + $0x158] sm:$0xff]  ;;  %v6692_v46 = vld [vmem:[#allocation2 + $0x320] sm:$0xff]  ;;  %v6605_v52 = vld [vmem:[#allocation2 + $0x348] sm:$0xff] }
  0x53   : > { %1791 = vst.msk [vmem:[#allocation3 + $0xb8] sm:$0xff] %vm308_vm0, %v1694_v31  ;;  %v1500_v42 = vmax.f32 %v1305_v36, %v7765_v25  ;;  %v1374_v45 = vmax.f32 %v1179_v33, %v6509_v37  ;;  %v1751_v47 = vmax.f32 %v1556_v35, %v6596_v34  ;;  %v1503_v49 = vmax.f32 %v1308_v10, %v7767_v26  ;;  %v7790_v61 = vld [vmem:[#allocation2 + $0x178] sm:$0xff]  ;;  %v6701_v0 = vld [vmem:[#allocation2 + $0x368] sm:$0xff]  ;;  %v6636_v2 = vld [vmem:[#allocation2 + $0x160] sm:$0xff] }
  0x54   : > { %1858 = vst.msk [vmem:[#allocation3 + $0x2d0] sm:$0xff] %vm308_vm0, %v1761_v7  ;;  %v1765_v32 = vmax.f32 %v1570_v21, %v6702_v1  ;;  %2514 = vst.msk [vmem:[#allocation4 + $0x14] sm:$0xff] %vm308_vm0, %v2442_v24  ;;  %v1312_v51 = vmax.f32 %v1117_v40, %v7767_v26  ;;  %v1565_v63 = vmax.f32 %v1370_v39, %v6509_v37  ;;  %v6643_v21 = vld [vmem:[#allocation2 + $0x198] sm:$0xff]  ;;  %v6640_v27 = vld [vmem:[#allocation2 + $0x180] sm:$0xff] }
  0x55   : > { %v1695_v12 = vmax.f32 %v1500_v42, %v6632_v48  ;;  %v1309_v53 = vmax.f32 %v1114_v44, %v7765_v25  ;;  %v1755_v56 = vmax.f32 %v1560_v57, %v6692_v46  ;;  %1848 = vst.msk [vmem:[#allocation3 + $0x280] sm:$0xff] %vm308_vm0, %v1751_v47  ;;  %v1698_v58 = vmax.f32 %v1503_v49, %v6635_v43  ;;  %v7816_v33 = vld [vmem:[%s10285_s4 + $0xc] sm:$0xf]  ;;  %v6644_v37 = vld [vmem:[#allocation2 + $0x1a0] sm:$0xff]  ;;  %v6651_v42 = vld [vmem:[#allocation2 + $0x1d8] sm:$0xff] }
  0x56   : > { %1862 = vst.msk [vmem:[#allocation3 + $0x2f0] sm:$0xff] %vm308_vm0, %v1765_v32  ;;  %v1507_v60 = vmax.f32 %v1312_v51, %v6635_v43  ;;  %v1569_v16 = vmax.f32 %v1374_v45, %v6605_v52  ;;  %v1760_v1 = vmax.f32 %v1565_v63, %v6605_v52  ;;  %v1121_v9 = vmax.f32 %v7740_v17, %v7767_v26  ;;  %v6652_v47 = vld [vmem:[#allocation2 + $0x1e0] sm:$0xff] }
  0x57   : > { %1792 = vst.msk [vmem:[#allocation3 + $0xc0] sm:$0xff] %vm308_vm0, %v1695_v12  ;;  %v1504_v62 = vmax.f32 %v1309_v53, %v6632_v48  ;;  %1852 = vst.msk [vmem:[#allocation3 + $0x2a0] sm:$0xff] %vm308_vm0, %v1755_v56  ;;  %v1118_v14 = vmax.f32 %v7744_v20, %v7765_v25  ;;  %v1125_v22 = vmax.f32 %v7767_v26, %v6635_v43  ;;  %v5311_v26 = vld [vmem:[%s10285_s4 + $0x8] sm:$0xf]  ;;  %7239 = vmatprep.subr.msk.mxu0 %vm4758_vm2, %v7816_v33  ;;  %v7827_v12 = vld [vmem:[#allocation2 + $0x200] sm:$0xff] }
  0x58   : > { %1795 = vst.msk [vmem:[#allocation3 + $0xd8] sm:$0xff] %vm308_vm0, %v1698_v58  ;;  %v1702_v4 = vmax.f32 %v1507_v60, %v7790_v61  ;;  %v1764_v7 = vmax.f32 %v1569_v16, %v6701_v0  ;;  %1857 = vst.msk [vmem:[#allocation3 + $0x2c8] sm:$0xff] %vm308_vm0, %v1760_v1  ;;  %v1316_v15 = vmax.f32 %v1121_v9, %v6635_v43  ;;  %7189 = vmatprep.subr.msk.mxu1 %vm4758_vm2, %v5311_v26  ;;  %v7831_v58 = vld [vmem:[#allocation2 + $0x220] sm:$0xff]  ;;  %v6655_v60 = vld [vmem:[#allocation2 + $0x1f8] sm:$0xff] }
  0x59   : > { %v1699_v5 = vmax.f32 %v1504_v62, %v6636_v2  ;;  %v1313_v18 = vmax.f32 %v1118_v14, %v6632_v48  ;;  %v1122_v28 = vmax.f32 %v7765_v25, %v6632_v48  ;;  %v1320_v29 = vmax.f32 %v1125_v22, %v7790_v61  ;;  %v6647_v25 = vld [vmem:[#allocation2 + $0x1b8] sm:$0xff] }
  0x5a   : > { %1799 = vst.msk [vmem:[#allocation3 + $0xf8] sm:$0xff] %vm308_vm0, %v1702_v4  ;;  %1861 = vst.msk [vmem:[#allocation3 + $0x2e8] sm:$0xff] %vm308_vm0, %v1764_v7  ;;  %v1511_v19 = vmax.f32 %v1316_v15, %v7790_v61  ;;  %v1129_v17 = vmax.f32 %v6635_v43, %v7790_v61  ;;  %v1126_v31 = vmax.f32 %v6632_v48, %v6636_v2  ;;  %v6648_v43 = vld [vmem:[#allocation2 + $0x1c0] sm:$0xff] }
  0x5b   : > { %1796 = vst.msk [vmem:[#allocation3 + $0xe0] sm:$0xff] %vm308_vm0, %v1699_v5  ;;  %v1508_v23 = vmax.f32 %v1313_v18, %v6636_v2  ;;  %v1317_v20 = vmax.f32 %v1122_v28, %v6636_v2  ;;  %v1515_v6 = vmax.f32 %v1320_v29, %v6643_v21  ;;  %v1130_v10 = vmax.f32 %v6636_v2, %v6640_v27  ;;  %v7834_v2 = vld [vmem:[#allocation2 + $0x240] sm:$0xff]  ;;  %v7838_v18 = vld [vmem:[#allocation2 + $0x218] sm:$0xff] }
  0x5c   : > { %v1706_v24 = vmax.f32 %v1511_v19, %v6643_v21  ;;  %v1324_v32 = vmax.f32 %v1129_v17, %v6643_v21  ;;  %v1321_v36 = vmax.f32 %v1126_v31, %v6640_v27  ;;  %v1133_v49 = vmax.f32 %v7790_v61, %v6643_v21  ;;  %v7844_v28 = vld [vmem:[#allocation2 + $0x238] sm:$0xff] }
  0x5d   : > { %v1703_v30 = vmax.f32 %v1508_v23, %v6640_v27  ;;  %v1512_v34 = vmax.f32 %v1317_v20, %v6640_v27  ;;  %v1710_v35 = vmax.f32 %v1515_v6, %v6647_v25  ;;  %v1325_v45 = vmax.f32 %v1130_v10, %v6644_v37  ;;  %v7874_v10 = vld [vmem:[%s10284_s3] ss:$0 sm:$0xff] }
  0x5e   : > { %1803 = vst.msk [vmem:[#allocation3 + $0x118] sm:$0xff] %vm308_vm0, %v1706_v24  ;;  %v1519_v39 = vmax.f32 %v1324_v32, %v6647_v25  ;;  %v1516_v57 = vmax.f32 %v1321_v36, %v6644_v37  ;;  %v1142_v52 = vmax.f32 %v6648_v43, %v6652_v47  ;;  %v1328_v63 = vmax.f32 %v1133_v49, %v6647_v25 }
  0x5f   : > { %1800 = vst.msk [vmem:[#allocation3 + $0x100] sm:$0xff] %vm308_vm0, %v1703_v30  ;;  %v1707_v40 = vmax.f32 %v1512_v34, %v6644_v37  ;;  %1807 = vst.msk [vmem:[#allocation3 + $0x138] sm:$0xff] %vm308_vm0, %v1710_v35  ;;  %v1520_v48 = vmax.f32 %v1325_v45, %v6648_v43  ;;  %v1137_v16 = vmax.f32 %v6643_v21, %v6647_v25  ;;  %v7859_v34 = vld [vmem:[#allocation2 + $0x260] sm:$0xff] }
  0x60   : > { %v1714_v44 = vmax.f32 %v1519_v39, %v6651_v42  ;;  %v1711_v46 = vmax.f32 %v1516_v57, %v6648_v43  ;;  %v1337_v53 = vmax.f32 %v1142_v52, %v7827_v12  ;;  %v1523_v56 = vmax.f32 %v1328_v63, %v6651_v42 }
  0x61   : > { %1804 = vst.msk [vmem:[#allocation3 + $0x120] sm:$0xff] %vm308_vm0, %v1707_v40  ;;  %v1715_v51 = vmax.f32 %v1520_v48, %v6652_v47  ;;  %v1141_v1 = vmax.f32 %v6647_v25, %v6651_v42  ;;  %v1134_v61 = vmax.f32 %v6640_v27, %v6644_v37  ;;  %v1332_v4 = vmax.f32 %v1137_v16, %v6651_v42  ;;  %v7857_v25 = vld [vmem:[#allocation2 + $0x258] sm:$0xff] }
  0x62   : > { %1811 = vst.msk [vmem:[#allocation3 + $0x158] sm:$0xff] %vm308_vm0, %v1714_v44  ;;  %1808 = vst.msk [vmem:[#allocation3 + $0x140] sm:$0xff] %vm308_vm0, %v1711_v46  ;;  %v1532_v62 = vmax.f32 %v1337_v53, %v7831_v58  ;;  %v1718_v0 = vmax.f32 %v1523_v56, %v6655_v60  ;;  %v1138_v7 = vmax.f32 %v6644_v37, %v6648_v43  ;;  %v7869_v37 = vld [vmem:[%s10283_s2] ss:$0 sm:$0xff] }
  0x63   : > { %1812 = vst.msk [vmem:[#allocation3 + $0x160] sm:$0xff] %vm308_vm0, %v1715_v51  ;;  %v1336_v9 = vmax.f32 %v1141_v1, %v6655_v60  ;;  %v1329_v14 = vmax.f32 %v1134_v61, %v6648_v43  ;;  %v1527_v15 = vmax.f32 %v1332_v4, %v6655_v60  ;;  %v1145_v22 = vmax.f32 %v6651_v42, %v6655_v60 }
  0x64   : > { %v1727_v5 = vmax.f32 %v1532_v62, %v7834_v2  ;;  %1815 = vst.msk [vmem:[#allocation3 + $0x178] sm:$0xff] %vm308_vm0, %v1718_v0  ;;  %v1333_v19 = vmax.f32 %v1138_v7, %v6652_v47  ;;  %v1146_v23 = vmax.f32 %v6652_v47, %v7827_v12  ;;  %v1149_v43 = vmax.f32 %v6655_v60, %v7838_v18 }
  0x65   : > { %v1531_v21 = vmax.f32 %v1336_v9, %v7838_v18  ;;  %v1524_v24 = vmax.f32 %v1329_v14, %v6652_v47  ;;  %v1722_v27 = vmax.f32 %v1527_v15, %v7838_v18  ;;  %v1340_v30 = vmax.f32 %v1145_v22, %v7838_v18 }
  0x66   : > { %1824 = vst.msk [vmem:[#allocation3 + $0x1c0] sm:$0xff] %vm308_vm0, %v1727_v5  ;;  %v1528_v29 = vmax.f32 %v1333_v19, %v7827_v12  ;;  %v1341_v20 = vmax.f32 %v1146_v23, %v7831_v58  ;;  %v1104_v51 = vmax.f32 %v7667_v41, %v7671_v50  ;;  %v7889_v52 = vmax.f32 %v1100_v54, %v7671_v50 }
  0x67   : > { %v1726_v17 = vmax.f32 %v1531_v21, %v7844_v28  ;;  %v1719_v6 = vmax.f32 %v1524_v24, %v7827_v12  ;;  %1819 = vst.msk [vmem:[#allocation3 + $0x198] sm:$0xff] %vm308_vm0, %v1722_v27  ;;  %v1535_v32 = vmax.f32 %v1340_v30, %v7844_v28  ;;  %v1486_v63 = vmax.f32 %v7676_v55, %v7671_v50  ;;  %v6671_v21 = vld [vmem:[#allocation2 + $0x278] sm:$0xff] }
  0x68   : > { %v1723_v31 = vmax.f32 %v1528_v29, %v7831_v58  ;;  %v1536_v26 = vmax.f32 %v1341_v20, %v7834_v2  ;;  %v1344_v60 = vmax.f32 %v1149_v43, %v7844_v28  ;;  %v1150_v7 = vmax.f32 %v7827_v12, %v7831_v58  ;;  %v7920_v43 = vld [vmem:[#allocation4 + $0x4] sm:$0xff] }
  0x69   : > { %1823 = vst.msk [vmem:[#allocation3 + $0x1b8] sm:$0xff] %vm308_vm0, %v1726_v17  ;;  %1816 = vst.msk [vmem:[#allocation3 + $0x180] sm:$0xff] %vm308_vm0, %v1719_v6  ;;  %v1730_v35 = vmax.f32 %v1535_v32, %v7857_v25  ;;  %v1485_v6 = vmax.f32 %v7693_v13, %v7690_v11  ;;  %v7924_v13 = vld [vmem:[#allocation4 + $0x24] sm:$0xff] }
  0x6a   : > { %1820 = vst.msk [vmem:[#allocation3 + $0x1a0] sm:$0xff] %vm308_vm0, %v1723_v31  ;;  %v1731_v36 = vmax.f32 %v1536_v26, %v7859_v34  ;;  %v1539_v5 = vmax.f32 %v1344_v60, %v7857_v25  ;;  %v1345_v12 = vmax.f32 %v1150_v7, %v7834_v2  ;;  %v1153_v60 = vmax.f32 %v7838_v18, %v7844_v28 }
  0x6b   : > { %1827 = vst.msk [vmem:[#allocation3 + $0x1d8] sm:$0xff] %vm308_vm0, %v1730_v35  ;;  %v1294_v18 = vmax.f32 %v1099_v8, %v7690_v11  ;;  %v2705_v59 = vmax.f32 %v7920_v43, %v7924_v13 }
  0x6c   : > { %1828 = vst.msk [vmem:[#allocation3 + $0x1e0] sm:$0xff] %vm308_vm0, %v1731_v36  ;;  %v1734_v29 = vmax.f32 %v1539_v5, %v6671_v21  ;;  %v1540_v2 = vmax.f32 %v1345_v12, %v7859_v34  ;;  %v6672_v36 = vld [vmem:[#allocation2 + $0x280] sm:$0xff] }
  0x6e   : > { %1831 = vst.msk [vmem:[#allocation3 + $0x1f8] sm:$0xff] %vm308_vm0, %v1734_v29 }
  0xd3   : > { %v7043_v39 = vpop.f32.mrf.mxu0 }
  0xd4   : > { %v7067_v40 = vpop.f32.mrf.mxu1  ;;  %v754_v57 = vmul.f32 %v7043_v39, %v7869_v37 }
  0xd5   : > { %v770_v42 = vmul.f32 %v7067_v40, %v7869_v37  ;;  %v587_v44 = vpop.f32.mrf.mxu0 }
  0xd6   : > { %v667_v45 = vpop.f32.mrf.mxu1  ;;  %v793_v46 = vadd.f32 %v7874_v10, %v754_v57  ;;  %v753_v48 = vmul.f32 %v7869_v37, %v587_v44  ;;  %v7922_v44 = vld [vmem:[#allocation4 + $0xc] sm:$0xff] }
  0xd7   : > { %v809_v47 = vadd.f32 %v7874_v10, %v770_v42  ;;  %v769_v49 = vmul.f32 %v7869_v37, %v667_v45  ;;  %v7046_v53 = vpop.f32.mrf.mxu0 }
  0xd8   : > { %v7070_v56 = vpop.f32.mrf.mxu1  ;;  %v825_v16 = vmax.f32 %v793_v46, 0.0  ;;  %v792_v0 = vadd.f32 %v7874_v10, %v753_v48  ;;  %v756_v61 = vmul.f32 %v7046_v53, %v7869_v37  ;;  %v7930_v48 = vld [vmem:[#allocation4 + $0x2c] sm:$0xff]  ;;  %v7934_v53 = vld [vmem:[#allocation4 + $0x34] sm:$0xff] }
  0xd9   : > { %v841_v62 = vmax.f32 %v809_v47, 0.0  ;;  %v808_v1 = vadd.f32 %v7874_v10, %v769_v49  ;;  %v772_v4 = vmul.f32 %v7070_v56, %v7869_v37  ;;  %v597_v38 = vpop.f32.mrf.mxu0  ;;  %v7932_v49 = vld [vmem:[#allocation4 + $0x14] sm:$0xff]  ;;  %v1735_v56 = vmax.f32 %v1540_v2, %v6672_v36 }
  0xda   : > { %v677_v54 = vpop.f32.mrf.mxu1  ;;  %857 = vst.msk [vmem:[#allocation2 + $0xd0] sm:$0xff] %vm308_vm0, %v825_v16  ;;  %v824_v9 = vmax.f32 %v792_v0, 0.0  ;;  %v755_v15 = vmul.f32 %v7869_v37, %v597_v38  ;;  %v795_v22 = vadd.f32 %v7874_v10, %v756_v61  ;;  %v2707_v8 = vmax.f32 %v7932_v49, %v7934_v53 }
  0xdb   : > { %873 = vst.msk [vmem:[#allocation2 + $0x1d0] sm:$0xff] %vm308_vm0, %v841_v62  ;;  %v840_v14 = vmax.f32 %v808_v1, 0.0  ;;  %v771_v19 = vmul.f32 %v7869_v37, %v677_v54  ;;  %v811_v23 = vadd.f32 %v7874_v10, %v772_v4  ;;  %v7049_v24 = vpop.f32.mrf.mxu0  ;;  %v1103_v4 = vmax.f32 %v7683_v3, %v7690_v11  ;;  %1832 = vst.msk [vmem:[#allocation3 + $0x200] sm:$0xff] %vm308_vm0, %v1735_v56 }
  0xdc   : > { %v7073_v27 = vpop.f32.mrf.mxu1  ;;  %856 = vst.msk [vmem:[#allocation2 + $0xc8] sm:$0xff] %vm308_vm0, %v824_v9  ;;  %v794_v58 = vadd.f32 %v7874_v10, %v755_v15  ;;  %v758_v30 = vmul.f32 %v7049_v24, %v7869_v37  ;;  %v827_v31 = vmax.f32 %v795_v22, 0.0  ;;  %v2706_v3 = vmax.f32 %v7922_v44, %v7930_v48 }
  0xdd   : > { %872 = vst.msk [vmem:[#allocation2 + $0x1c8] sm:$0xff] %vm308_vm0, %v840_v14  ;;  %v810_v17 = vadd.f32 %v7874_v10, %v771_v19  ;;  %v774_v20 = vmul.f32 %v7073_v27, %v7869_v37  ;;  %v843_v32 = vmax.f32 %v811_v23, 0.0  ;;  %v607_v26 = vpop.f32.mrf.mxu0  ;;  %v7978_v27 = vmax.f32 %v1153_v60, %v7857_v25 }
  0xde   : > { %v687_v35 = vpop.f32.mrf.mxu1  ;;  %v826_v39 = vmax.f32 %v794_v58, 0.0  ;;  %v797_v57 = vadd.f32 %v7874_v10, %v758_v30  ;;  %859 = vst.msk [vmem:[#allocation2 + $0xf0] sm:$0xff] %vm308_vm0, %v827_v31  ;;  %v757_v45 = vmul.f32 %v7869_v37, %v607_v26 }
  0xdf   : > { %v842_v40 = vmax.f32 %v810_v17, 0.0  ;;  %v813_v42 = vadd.f32 %v7874_v10, %v774_v20  ;;  %875 = vst.msk [vmem:[#allocation2 + $0x1f0] sm:$0xff] %vm308_vm0, %v843_v32  ;;  %v773_v34 = vmul.f32 %v7869_v37, %v687_v35  ;;  %v7052_v46 = vpop.f32.mrf.mxu0 }
  0xe0   : > { %v7076_v47 = vpop.f32.mrf.mxu1  ;;  %858 = vst.msk [vmem:[#allocation2 + $0xe8] sm:$0xff] %vm308_vm0, %v826_v39  ;;  %v829_v16 = vmax.f32 %v797_v57, 0.0  ;;  %v760_v0 = vmul.f32 %v7052_v46, %v7869_v37  ;;  %v796_v28 = vadd.f32 %v7874_v10, %v757_v45 }
  0xe1   : > { %874 = vst.msk [vmem:[#allocation2 + $0x1e8] sm:$0xff] %vm308_vm0, %v842_v40  ;;  %v845_v62 = vmax.f32 %v813_v42, 0.0  ;;  %v776_v1 = vmul.f32 %v7076_v47, %v7869_v37  ;;  %v7942_v61 = vld [vmem:[#allocation2 + $0xd0] sm:$0xff]  ;;  %v812_v38 = vadd.f32 %v7874_v10, %v773_v34  ;;  %v617_v54 = vpop.f32.mrf.mxu0 }
  0xe2   : > { %v697_v5 = vpop.f32.mrf.mxu1  ;;  %v1681_v7 = vmax.f32 %v1486_v63, %v7942_v61  ;;  %861 = vst.msk [vmem:[#allocation2 + $0x110] sm:$0xff] %vm308_vm0, %v829_v16  ;;  %v828_v14 = vmax.f32 %v796_v28, 0.0  ;;  %v799_v55 = vadd.f32 %v7874_v10, %v760_v0  ;;  %v1108_v22 = vmax.f32 %v7671_v50, %v7942_v61  ;;  %v7990_v30 = vld [vmem:[#allocation2 + $0x1d0] sm:$0xff] }
  0xe3   : > { %877 = vst.msk [vmem:[#allocation2 + $0x210] sm:$0xff] %vm308_vm0, %v845_v62  ;;  %v7965_v9 = vld [vmem:[#allocation2 + $0xc8] sm:$0xff]  ;;  %v844_v15 = vmax.f32 %v812_v38, 0.0  ;;  %v815_v63 = vadd.f32 %v7874_v10, %v776_v1  ;;  %v7055_v19 = vpop.f32.mrf.mxu0  ;;  %v1490_v23 = vmax.f32 %v7889_v52, %v7942_v61  ;;  %v759_v58 = vmul.f32 %v7869_v37, %v617_v54 }
  0xe4   : > { %v7079_v21 = vpop.f32.mrf.mxu1  ;;  %1778 = vst.msk [vmem:[#allocation3 + $0x50] sm:$0xff] %vm308_vm0, %v1681_v7  ;;  %v1680_v24 = vmax.f32 %v1485_v6, %v7965_v9  ;;  %7141 = vmatprep.mubr.msk.f32.mxu0 %vm308_vm0, %v7965_v9  ;;  %860 = vst.msk [vmem:[#allocation2 + $0x108] sm:$0xff] %vm308_vm0, %v828_v14  ;;  %v831_v29 = vmax.f32 %v799_v55, 0.0  ;;  %v775_v52 = vmul.f32 %v7869_v37, %v697_v5  ;;  %v8011_v36 = vld [vmem:[#allocation2 + $0x1c8] sm:$0xff] }
  0xe5   : > { %876 = vst.msk [vmem:[#allocation2 + $0x208] sm:$0xff] %vm308_vm0, %v844_v15  ;;  %v847_v12 = vmax.f32 %v815_v63, 0.0  ;;  %v627_v17 = vpop.f32.mrf.mxu0  ;;  %7142 = vmatmul.mubr.msk.f32.vlgmr.msra.gmra.mxu0 %vm308_vm0, %v7942_v61  ;;  %v1299_v25 = vmax.f32 %v1104_v51, %v7942_v61  ;;  %v1107_v20 = vmax.f32 %v7690_v11, %v7965_v9  ;;  %v1298_v6 = vmax.f32 %v1103_v4, %v7965_v9  ;;  %v7997_v32 = vld [vmem:[#allocation2 + $0xf0] sm:$0xff] }
  0xe6   : > { %v1489_v31 = vmax.f32 %v1294_v18, %v7965_v9  ;;  %1777 = vst.msk [vmem:[#allocation3 + $0x48] sm:$0xff] %vm308_vm0, %v1680_v24  ;;  %v7999_v26 = vld [vmem:[#allocation2 + $0x1f0] sm:$0xff]  ;;  %7240 = vmatpush3.msk.msra.mxu0 %vm4758_vm2, %v7816_v33  ;;  %v1685_v41 = vmax.f32 %v1490_v23, %v7997_v32  ;;  %863 = vst.msk [vmem:[#allocation2 + $0x130] sm:$0xff] %vm308_vm0, %v831_v29  ;;  %v762_v11 = vmul.f32 %v7055_v19, %v7869_v37  ;;  %v707_v2 = vpop.f32.mrf.mxu1 }
  0xe7   : > { %v8004_v50 = vld [vmem:[#allocation2 + $0xe8] sm:$0xff]  ;;  %879 = vst.msk [vmem:[#allocation2 + $0x230] sm:$0xff] %vm308_vm0, %v847_v12  ;;  %v778_v51 = vmul.f32 %v7079_v21, %v7869_v37  ;;  %v761_v35 = vmul.f32 %v7869_v37, %v627_v17  ;;  %v1112_v33 = vmax.f32 %v7942_v61, %v7997_v32  ;;  %v8016_v39 = vmax.f32 %v1108_v22, %v7997_v32  ;;  %v7058_v60 = vpop.f32.mrf.mxu0 }
  0xe8   : > { %v1494_v40 = vmax.f32 %v1299_v25, %v7997_v32  ;;  %v8019_v57 = vld [vmem:[#allocation2 + $0x1e8] sm:$0xff]  ;;  %v777_v42 = vmul.f32 %v7869_v37, %v707_v2  ;;  %7144 = vmatprep.mubr.msk.f32.mxu0 %vm308_vm0, %v8004_v50  ;;  %1782 = vst.msk [vmem:[#allocation3 + $0x70] sm:$0xff] %vm308_vm0, %v1685_v41  ;;  %v1144_v45 = vmax.f32 %v7990_v30, %v7999_v26 }
  0xe9   : > { %v1684_v34 = vmax.f32 %v1489_v31, %v8004_v50  ;;  %v8028_v46 = vld [vmem:[#allocation2 + $0x110] sm:$0xff]  ;;  %v798_v47 = vadd.f32 %v7874_v10, %v759_v58  ;;  %v814_v56 = vadd.f32 %v7874_v10, %v775_v52  ;;  %7145 = vmatmul.mubr.msk.f32.gmra.mxu0 %vm308_vm0, %v7997_v32  ;;  %v1111_v16 = vmax.f32 %v7965_v9, %v8004_v50  ;;  %v637_v52 = vpop.f32.mrf.mxu0 }
  0xea   : > { %v8037_v62 = vmax.f32 %v1107_v20, %v8004_v50  ;;  %v1493_v0 = vmax.f32 %v1298_v6, %v8004_v50  ;;  %v1689_v1 = vmax.f32 %v1494_v40, %v8028_v46  ;;  %v8041_v61 = vld [vmem:[#allocation2 + $0x210] sm:$0xff]  ;;  %v1143_v28 = vmax.f32 %v8011_v36, %v8019_v57 }
  0xeb   : > { %v1872_v4 = vld [vmem:[#allocation3 + $0x52] sm:$0xff]  ;;  %1781 = vst.msk [vmem:[#allocation3 + $0x68] sm:$0xff] %vm308_vm0, %v1684_v34  ;;  %v1116_v38 = vmax.f32 %v7997_v32, %v8028_v46  ;;  %v830_v54 = vmax.f32 %v798_v47, 0.0  ;;  %v846_v5 = vmax.f32 %v814_v56, 0.0  ;;  %v8049_v15 = vld [vmem:[#allocation2 + $0x108] sm:$0xff]  ;;  %v801_v55 = vadd.f32 %v7874_v10, %v762_v11  ;;  %v7082_v34 = vpop.f32.mrf.mxu1 }
  0xec   : > { %v1944_v18 = vld [vmem:[#allocation3 + $0x53] sm:$0xff]  ;;  %1786 = vst.msk [vmem:[#allocation3 + $0x90] sm:$0xff] %vm308_vm0, %v1689_v1  ;;  %v817_v63 = vadd.f32 %v7874_v10, %v778_v51  ;;  %v800_v19 = vadd.f32 %v7874_v10, %v761_v35  ;;  %v8055_v24 = vmax.f32 %v1112_v33, %v8028_v46  ;;  %v1498_v29 = vmax.f32 %v8016_v39, %v8028_v46 }
  0xed   : > { %v2016_v7 = vmax.f32 %v1872_v4, %v1944_v18  ;;  %v2088_v14 = vld [vmem:[#allocation3 + $0x54] sm:$0xff]  ;;  %v1870_v21 = vld [vmem:[#allocation3 + $0x42] sm:$0xff]  ;;  %v1871_v22 = vld [vmem:[#allocation3 + $0x4a] sm:$0xff]  ;;  %v1148_v12 = vmax.f32 %v7999_v26, %v8041_v61  ;;  %v1688_v58 = vmax.f32 %v1493_v0, %v8049_v15  ;;  %862 = vst.msk [vmem:[#allocation2 + $0x128] sm:$0xff] %vm308_vm0, %v830_v54  ;;  %7147 = vmatprep.mubr.msk.f32.mxu0 %vm308_vm0, %v8049_v15  ;;  %v833_v6 = vmax.f32 %v801_v55, 0.0 }
  0xee   : > { %v1942_v23 = vld [vmem:[#allocation3 + $0x43] sm:$0xff]  ;;  %878 = vst.msk [vmem:[#allocation2 + $0x228] sm:$0xff] %vm308_vm0, %v846_v5  ;;  %v1943_v25 = vld [vmem:[#allocation3 + $0x4b] sm:$0xff]  ;;  %v849_v31 = vmax.f32 %v817_v63, 0.0  ;;  %7148 = vmatmul.mubr.msk.f32.gmra.mxu0 %vm308_vm0, %v8028_v46  ;;  %v2232_v41 = vld [vmem:[#allocation3 + $0x55] sm:$0xff]  ;;  %v832_v2 = vmax.f32 %v800_v19, 0.0  ;;  %v816_v33 = vadd.f32 %v7874_v10, %v777_v42  ;;  %v764_v40 = vmul.f32 %v7058_v60, %v7869_v37 }
  0xef   : > { %v2160_v17 = vmax.f32 %v2016_v7, %v2088_v14  ;;  %v2014_v20 = vmax.f32 %v1870_v21, %v1942_v23  ;;  %v2376_v11 = vld [vmem:[#allocation3 + $0x56] sm:$0xff]  ;;  %v2015_v51 = vmax.f32 %v1871_v22, %v1943_v25  ;;  %v2086_v35 = vld [vmem:[#allocation3 + $0x44] sm:$0xff]  ;;  %1785 = vst.msk [vmem:[#allocation3 + $0x88] sm:$0xff] %vm308_vm0, %v1688_v58  ;;  %v2087_v56 = vld [vmem:[#allocation3 + $0x4c] sm:$0xff]  ;;  %v780_v18 = vmul.f32 %v7082_v34, %v7869_v37 }
  0xf0   : > { %v1875_v1 = vld [vmem:[#allocation3 + $0x72] sm:$0xff]  ;;  %865 = vst.msk [vmem:[#allocation2 + $0x150] sm:$0xff] %vm308_vm0, %v833_v6  ;;  %881 = vst.msk [vmem:[#allocation2 + $0x250] sm:$0xff] %vm308_vm0, %v849_v31  ;;  %v763_v54 = vmul.f32 %v7869_v37, %v637_v52  ;;  %v2230_v7 = vld [vmem:[#allocation3 + $0x45] sm:$0xff]  ;;  %v848_v60 = vmax.f32 %v816_v33, 0.0  ;;  %v803_v63 = vadd.f32 %v7874_v10, %v764_v40 }
  0xf1   : > { %v2304_v47 = vmax.f32 %v2160_v17, %v2232_v41  ;;  %v2158_v0 = vmax.f32 %v2014_v20, %v2086_v35  ;;  %v1947_v4 = vld [vmem:[#allocation3 + $0x73] sm:$0xff]  ;;  %v2159_v5 = vmax.f32 %v2015_v51, %v2087_v56  ;;  %864 = vst.msk [vmem:[#allocation2 + $0x148] sm:$0xff] %vm308_vm0, %v832_v2  ;;  %v819_v17 = vadd.f32 %v7874_v10, %v780_v18  ;;  %v2374_v20 = vld [vmem:[#allocation3 + $0x46] sm:$0xff]  ;;  %v717_v35 = vpop.f32.mrf.mxu1 }
  0xf2   : > { %v2231_v14 = vld [vmem:[#allocation3 + $0x4d] sm:$0xff]  ;;  %v2019_v42 = vmax.f32 %v1875_v1, %v1947_v4  ;;  %v1873_v22 = vld [vmem:[#allocation3 + $0x62] sm:$0xff]  ;;  %v802_v25 = vadd.f32 %v7874_v10, %v763_v54  ;;  %880 = vst.msk [vmem:[#allocation2 + $0x248] sm:$0xff] %vm308_vm0, %v848_v60  ;;  %v835_v51 = vmax.f32 %v803_v63, 0.0  ;;  %v2235_v33 = vld [vmem:[#allocation3 + $0x75] sm:$0xff]  ;;  %v8085_v54 = vmax.f32 %v1144_v45, %v8041_v61 }
  0xf3   : > { %v2091_v55 = vld [vmem:[#allocation3 + $0x74] sm:$0xff]  ;;  %v2448_v19 = vmax.f32 %v2304_v47, %v2376_v11  ;;  %v2302_v21 = vmax.f32 %v2158_v0, %v2230_v7  ;;  %v1874_v23 = vld [vmem:[#allocation3 + $0x6a] sm:$0xff]  ;;  %v2303_v52 = vmax.f32 %v2159_v5, %v2231_v14  ;;  %v851_v47 = vmax.f32 %v819_v17, 0.0  ;;  %v8092_v14 = vpop.f32.mrf.mxu0 }
  0xf4   : > { %v1945_v58 = vld [vmem:[#allocation3 + $0x63] sm:$0xff]  ;;  %v2163_v6 = vmax.f32 %v2019_v42, %v2091_v55  ;;  %v1946_v31 = vld [vmem:[#allocation3 + $0x6b] sm:$0xff]  ;;  %v834_v56 = vmax.f32 %v802_v25, 0.0  ;;  %867 = vst.msk [vmem:[#allocation2 + $0x170] sm:$0xff] %vm308_vm0, %v835_v51  ;;  %v2379_v42 = vld [vmem:[#allocation3 + $0x76] sm:$0xff]  ;;  %v1115_v63 = vmax.f32 %v8004_v50, %v8049_v15  ;;  %v8101_v45 = vmax.f32 %v1111_v16, %v8049_v15 }
  0xf5   : > { %v2017_v41 = vmax.f32 %v1873_v22, %v1945_v58  ;;  %2520 = vst.msk [vmem:[#allocation4 + $0x54] sm:$0xff] %vm308_vm0, %v2448_v19  ;;  %v2375_v11 = vld [vmem:[#allocation3 + $0x4e] sm:$0xff]  ;;  %v2446_v2 = vmax.f32 %v2302_v21, %v2374_v20  ;;  %v2018_v40 = vmax.f32 %v1874_v23, %v1946_v31  ;;  %v2089_v34 = vld [vmem:[#allocation3 + $0x64] sm:$0xff]  ;;  %v1497_v19 = vmax.f32 %v8037_v62, %v8049_v15  ;;  %v8119_v62 = vpop.f32.mrf.mxu1 }
  0xf6   : > { %v2447_v0 = vmax.f32 %v2303_v52, %v2375_v11  ;;  %v2307_v1 = vmax.f32 %v2163_v6, %v2235_v33  ;;  %v2090_v4 = vld [vmem:[#allocation3 + $0x6c] sm:$0xff]  ;;  %883 = vst.msk [vmem:[#allocation2 + $0x270] sm:$0xff] %vm308_vm0, %v851_v47  ;;  %866 = vst.msk [vmem:[#allocation2 + $0x168] sm:$0xff] %vm308_vm0, %v834_v56  ;;  %v8117_v16 = vmul.f32 %v7869_v37, %v717_v35  ;;  %v647_v33 = vpop.f32.mrf.mxu0 }
  0xf7   : > { %v2161_v18 = vmax.f32 %v2017_v41, %v2089_v34  ;;  %v8087_v5 = vld [vmem:[#allocation2 + $0x208] sm:$0xff]  ;;  %v8089_v7 = vld [vmem:[#allocation2 + $0x130] sm:$0xff]  ;;  %2518 = vst.msk [vmem:[#allocation4 + $0x44] sm:$0xff] %vm308_vm0, %v2446_v2  ;;  %v2162_v55 = vmax.f32 %v2018_v40, %v2090_v4 }
  0xf8   : > { %v2233_v60 = vld [vmem:[#allocation3 + $0x65] sm:$0xff]  ;;  %2519 = vst.msk [vmem:[#allocation4 + $0x4c] sm:$0xff] %vm308_vm0, %v2447_v0  ;;  %v2451_v22 = vmax.f32 %v2307_v1, %v2379_v42  ;;  %v2234_v23 = vld [vmem:[#allocation3 + $0x6d] sm:$0xff]  ;;  %v1338_v9 = vmax.f32 %v1143_v28, %v8087_v5  ;;  %v1147_v20 = vmax.f32 %v8019_v57, %v8087_v5  ;;  %v1120_v6 = vmax.f32 %v8028_v46, %v8089_v7  ;;  %v727_v0 = vpop.f32.mrf.mxu1 }
  0xf9   : > { %v8105_v21 = vld [vmem:[#allocation2 + $0x128] sm:$0xff]  ;;  %v2305_v58 = vmax.f32 %v2161_v18, %v2233_v60  ;;  %v8114_v50 = vld [vmem:[#allocation2 + $0x230] sm:$0xff]  ;;  %v2306_v25 = vmax.f32 %v2162_v55, %v2234_v23  ;;  %v1693_v28 = vmax.f32 %v1498_v29, %v8089_v7  ;;  %v1311_v35 = vmax.f32 %v1116_v38, %v8089_v7 }
  0xfa   : > { %7150 = vmatprep.mubr.msk.f32.mxu0 %vm308_vm0, %v8105_v21  ;;  %v6711_v17 = vld [vmem:[#allocation2 + $0x130] sm:$0xff]  ;;  %v2377_v52 = vld [vmem:[#allocation3 + $0x66] sm:$0xff]  ;;  %2523 = vst.msk [vmem:[#allocation4 + $0x74] sm:$0xff] %vm308_vm0, %v2451_v22  ;;  %v1343_v11 = vmax.f32 %v1148_v12, %v8114_v50  ;;  %v1534_v39 = vmax.f32 %v8085_v54, %v8114_v50  ;;  %v1502_v32 = vmax.f32 %v8055_v24, %v8089_v7 }
  0xfb   : > { %v8131_v31 = vld [vmem:[#allocation2 + $0x148] sm:$0xff]  ;;  %7151 = vmatmul.mubr.msk.f32.gmra.mxu0 %vm308_vm0, %v6711_v17  ;;  %v2449_v51 = vmax.f32 %v2305_v58, %v2377_v52  ;;  %v8147_v2 = vld [vmem:[#allocation2 + $0x150] sm:$0xff]  ;;  %1790 = vst.msk [vmem:[#allocation3 + $0xb0] sm:$0xff] %vm308_vm0, %v1693_v28  ;;  %v1152_v46 = vmax.f32 %v8041_v61, %v8114_v50  ;;  %v1692_v38 = vmax.f32 %v1497_v19, %v8105_v21  ;;  %v7088_v28 = vpop.f32.mrf.mxu1 }
  0xfc   : > { %v2378_v41 = vld [vmem:[#allocation3 + $0x6e] sm:$0xff]  ;;  %7153 = vmatprep.mubr.msk.f32.mxu0 %vm308_vm0, %v8131_v31  ;;  %v1119_v12 = vmax.f32 %v8049_v15, %v8105_v21  ;;  %v1310_v34 = vmax.f32 %v1115_v63, %v8105_v21  ;;  %v1501_v47 = vmax.f32 %v8101_v45, %v8105_v21  ;;  %v1124_v15 = vmax.f32 %v8089_v7, %v8147_v2  ;;  %v7064_v7 = vpop.f32.mrf.mxu0  ;;  %v2380_v49 = vld [vmem:[#allocation3 + $0x86] sm:$0xff] }
  0xfd   : > { %v8145_v29 = vld [vmem:[#allocation2 + $0x228] sm:$0xff]  ;;  %v2450_v40 = vmax.f32 %v2306_v25, %v2378_v41  ;;  %2521 = vst.msk [vmem:[#allocation4 + $0x64] sm:$0xff] %vm308_vm0, %v2449_v51  ;;  %v8164_v24 = vld [vmem:[#allocation2 + $0x250] sm:$0xff]  ;;  %1789 = vst.msk [vmem:[#allocation3 + $0xa8] sm:$0xff] %vm308_vm0, %v1692_v38  ;;  %v1697_v18 = vmax.f32 %v1502_v32, %v8147_v2  ;;  %v8181_v42 = vmax.f32 %v1120_v6, %v8147_v2 }
  0xfe   : > { %v1533_v56 = vmax.f32 %v1338_v9, %v8145_v29  ;;  %v1151_v1 = vmax.f32 %v8087_v5, %v8145_v29  ;;  %v8171_v4 = vmax.f32 %v1147_v20, %v8145_v29  ;;  %v8176_v54 = vld [vmem:[#allocation2 + $0x248] sm:$0xff]  ;;  %v1506_v55 = vmax.f32 %v1311_v35, %v8147_v2  ;;  %v8186_v45 = vld [vmem:[#allocation2 + $0x170] sm:$0xff]  ;;  %v657_v38 = vpop.f32.mrf.mxu0 }
  0xff   : > { %2522 = vst.msk [vmem:[#allocation4 + $0x6c] sm:$0xff] %vm308_vm0, %v2450_v40  ;;  %7154 = vmatmul.mubr.msk.f32.gmra.mxu0 %vm308_vm0, %v8147_v2  ;;  %v1538_v60 = vmax.f32 %v1343_v11, %v8164_v24  ;;  %v1729_v63 = vmax.f32 %v1534_v39, %v8164_v24  ;;  %v8188_v19 = vld [vmem:[#allocation2 + $0x168] sm:$0xff]  ;;  %1794 = vst.msk [vmem:[#allocation3 + $0xd0] sm:$0xff] %vm308_vm0, %v1697_v18  ;;  %v1156_v22 = vmax.f32 %v8114_v50, %v8164_v24  ;;  %v8199_v17 = vld [vmem:[#allocation2 + $0x270] sm:$0xff] }
 0x100   : > { %v8194_v23 = vmax.f32 %v1152_v46, %v8164_v24  ;;  %v1123_v58 = vmax.f32 %v8105_v21, %v8131_v31  ;;  %v1696_v9 = vmax.f32 %v1501_v47, %v8131_v31  ;;  %7156 = vmatprep.mubr.msk.f32.mxu0 %vm308_vm0, %v8188_v19  ;;  %v8205_v25 = vmax.f32 %v1119_v12, %v8131_v31  ;;  %v8258_v32 = vld [vmem:[#allocation4 + $0x44] sm:$0xff]  ;;  %v8262_v40 = vld [vmem:[#allocation4 + $0x4c] sm:$0xff] }
 0x101   : > { %1826 = vst.msk [vmem:[#allocation3 + $0x1d0] sm:$0xff] %vm308_vm0, %v1729_v63  ;;  %v1505_v52 = vmax.f32 %v1310_v34, %v8131_v31  ;;  %v1155_v20 = vmax.f32 %v8145_v29, %v8176_v54  ;;  %v1728_v6 = vmax.f32 %v1533_v56, %v8176_v54  ;;  %v8213_v41 = vmax.f32 %v1151_v1, %v8176_v54  ;;  %v2381_v53 = vld [vmem:[#allocation3 + $0x8e] sm:$0xff] }
 0x102   : > { %1793 = vst.msk [vmem:[#allocation3 + $0xc8] sm:$0xff] %vm308_vm0, %v1696_v9  ;;  %v1537_v51 = vmax.f32 %v8171_v4, %v8176_v54  ;;  %v1128_v35 = vmax.f32 %v8147_v2, %v8186_v45  ;;  %v1701_v11 = vmax.f32 %v1506_v55, %v8186_v45  ;;  %v8224_v39 = vmax.f32 %v1124_v15, %v8186_v45 }
 0x103   : > { %7157 = vmatmul.mubr.msk.f32.gmra.mxu0 %vm308_vm0, %v8186_v45  ;;  %1825 = vst.msk [vmem:[#allocation3 + $0x1c8] sm:$0xff] %vm308_vm0, %v1728_v6  ;;  %v1733_v46 = vmax.f32 %v1538_v60, %v8199_v17  ;;  %v8233_v12 = vmax.f32 %v1156_v22, %v8199_v17  ;;  %v1700_v34 = vmax.f32 %v1505_v52, %v8188_v19  ;;  %v737_v60 = vpop.f32.mrf.mxu1  ;;  %v1876_v52 = vld [vmem:[#allocation3 + $0x82] sm:$0xff] }
 0x104   : > { %1798 = vst.msk [vmem:[#allocation3 + $0xf0] sm:$0xff] %vm308_vm0, %v1701_v11  ;;  %v818_v47 = vadd.f32 %v7874_v10, %v8117_v16  ;;  %v766_v56 = vmul.f32 %v8092_v14, %v7869_v37  ;;  %v782_v1 = vmul.f32 %v8119_v62, %v7869_v37  ;;  %v765_v15 = vmul.f32 %v7869_v37, %v647_v33 }
 0x105   : > { %1830 = vst.msk [vmem:[#allocation3 + $0x1f0] sm:$0xff] %vm308_vm0, %v1733_v46  ;;  %v781_v18 = vmul.f32 %v7869_v37, %v727_v0  ;;  %v768_v55 = vmul.f32 %v7064_v7, %v7869_v37  ;;  %1797 = vst.msk [vmem:[#allocation3 + $0xe8] sm:$0xff] %vm308_vm0, %v1700_v34  ;;  %v784_v22 = vmul.f32 %v7088_v28, %v7869_v37  ;;  %v1948_v7 = vld [vmem:[#allocation3 + $0x83] sm:$0xff]  ;;  %v1949_v34 = vld [vmem:[#allocation3 + $0x8b] sm:$0xff] }
 0x106   : > { %v850_v63 = vmax.f32 %v818_v47, 0.0  ;;  %v805_v16 = vadd.f32 %v7874_v10, %v766_v56  ;;  %v767_v14 = vmul.f32 %v7869_v37, %v657_v38  ;;  %v821_v9 = vadd.f32 %v7874_v10, %v782_v1  ;;  %v1877_v38 = vld [vmem:[#allocation3 + $0x8a] sm:$0xff] }
 0x107   : > { %v804_v62 = vadd.f32 %v7874_v10, %v765_v15  ;;  %v820_v33 = vadd.f32 %v7874_v10, %v781_v18  ;;  %v807_v0 = vadd.f32 %v7874_v10, %v768_v55  ;;  %v823_v11 = vadd.f32 %v7874_v10, %v784_v22  ;;  %v2092_v18 = vld [vmem:[#allocation3 + $0x84] sm:$0xff] }
 0x108   : > { %882 = vst.msk [vmem:[#allocation2 + $0x268] sm:$0xff] %vm308_vm0, %v850_v63  ;;  %v837_v6 = vmax.f32 %v805_v16, 0.0  ;;  %v806_v46 = vadd.f32 %v7874_v10, %v767_v14  ;;  %v783_v28 = vmul.f32 %v7869_v37, %v737_v60  ;;  %v853_v47 = vmax.f32 %v821_v9, 0.0  ;;  %v8264_v14 = vld [vmem:[#allocation4 + $0x64] sm:$0xff]  ;;  %v8266_v37 = vld [vmem:[#allocation4 + $0x6c] sm:$0xff] }
 0x109   : > { %v836_v56 = vmax.f32 %v804_v62, 0.0  ;;  %v852_v1 = vmax.f32 %v820_v33, 0.0  ;;  %v839_v15 = vmax.f32 %v807_v0, 0.0  ;;  %v855_v55 = vmax.f32 %v823_v11, 0.0  ;;  %v2093_v33 = vld [vmem:[#allocation3 + $0x8c] sm:$0xff]  ;;  %v8290_v11 = vld [vmem:[#allocation3 + $0xa2] sm:$0xff] }
 0x10a   : > { %869 = vst.msk [vmem:[#allocation2 + $0x190] sm:$0xff] %vm308_vm0, %v837_v6  ;;  %v838_v63 = vmax.f32 %v806_v46, 0.0  ;;  %v822_v16 = vadd.f32 %v7874_v10, %v783_v28  ;;  %v2020_v22 = vmax.f32 %v1876_v52, %v1948_v7  ;;  %v1542_v60 = vmax.f32 %v8194_v23, %v8199_v17  ;;  %885 = vst.msk [vmem:[#allocation2 + $0x290] sm:$0xff] %vm308_vm0, %v853_v47  ;;  %v1878_v23 = vld [vmem:[#allocation3 + $0x92] sm:$0xff]  ;;  %v8292_v46 = vld [vmem:[#allocation3 + $0xa3] sm:$0xff] }
 0x10b   : > { %v1127_v9 = vmax.f32 %v8131_v31, %v8188_v19  ;;  %v8276_v62 = vmax.f32 %v1123_v58, %v8188_v19  ;;  %868 = vst.msk [vmem:[#allocation2 + $0x188] sm:$0xff] %vm308_vm0, %v836_v56  ;;  %884 = vst.msk [vmem:[#allocation2 + $0x288] sm:$0xff] %vm308_vm0, %v852_v1  ;;  %v2021_v10 = vmax.f32 %v1877_v38, %v1949_v34  ;;  %v1950_v0 = vld [vmem:[#allocation3 + $0x93] sm:$0xff]  ;;  %v2236_v38 = vld [vmem:[#allocation3 + $0x85] sm:$0xff] }
 0x10c   : > { %871 = vst.msk [vmem:[#allocation2 + $0x1b0] sm:$0xff] %vm308_vm0, %v839_v15  ;;  %v1509_v52 = vmax.f32 %v8205_v25, %v8188_v19  ;;  %887 = vst.msk [vmem:[#allocation2 + $0x2b0] sm:$0xff] %vm308_vm0, %v855_v55  ;;  %v854_v21 = vmax.f32 %v822_v16, 0.0  ;;  %v2164_v58 = vmax.f32 %v2020_v22, %v2092_v18  ;;  %v2708_v7 = vmax.f32 %v7924_v13, %v8258_v32  ;;  %v8288_v6 = vld [vmem:[#allocation4 + $0x54] sm:$0xff]  ;;  %v8300_v56 = vld [vmem:[#allocation3 + $0xaa] sm:$0xff] }
 0x10d   : > { %870 = vst.msk [vmem:[#allocation2 + $0x1a8] sm:$0xff] %vm308_vm0, %v838_v63  ;;  %v2165_v28 = vmax.f32 %v2021_v10, %v2093_v33  ;;  %v2709_v25 = vmax.f32 %v7930_v48, %v8262_v40  ;;  %v8302_v1 = vld [vmem:[#allocation3 + $0xab] sm:$0xff]  ;;  %v8309_v55 = vmax.f32 %v2705_v59, %v8258_v32  ;;  %v8315_v63 = vmax.f32 %v2706_v3, %v8262_v40 }
 0x10e   : > { %886 = vst.msk [vmem:[#allocation2 + $0x2a8] sm:$0xff] %vm308_vm0, %v854_v21  ;;  %v2237_v15 = vld [vmem:[#allocation3 + $0x8d] sm:$0xff]  ;;  %v2308_v18 = vmax.f32 %v2164_v58, %v2236_v38  ;;  %v2022_v16 = vmax.f32 %v1878_v23, %v1950_v0  ;;  %v8320_v33 = vmax.f32 %v2708_v7, %v8264_v14  ;;  %v8326_v43 = vmax.f32 %v2707_v8, %v8288_v6 }
 0x10f   : > { %v8317_v22 = vld [vmem:[#allocation2 + $0x268] sm:$0xff]  ;;  %v2309_v10 = vmax.f32 %v2165_v28, %v2237_v15  ;;  %v2023_v13 = vmax.f32 %v8290_v11, %v8292_v46  ;;  %v2094_v8 = vld [vmem:[#allocation3 + $0x94] sm:$0xff]  ;;  %v10292_v11 = vmax.f32 %v8258_v32, %v8264_v14 }
 0x110   : > { %v1159_v44 = vmax.f32 %v8176_v54, %v8317_v22  ;;  %v8336_v59 = vmax.f32 %v1155_v20, %v8317_v22  ;;  %v1732_v3 = vmax.f32 %v1537_v51, %v8317_v22  ;;  %v1541_v0 = vmax.f32 %v8213_v41, %v8317_v22 }
 0x111   : > { %v941_v21 = vld [vmem:[#allocation2 + $0x190] sm:$0xff]  ;;  %v2452_v58 = vmax.f32 %v2308_v18, %v2380_v49  ;;  %v2453_v7 = vmax.f32 %v2309_v10, %v2381_v53  ;;  %v8346_v28 = vmax.f32 %v2022_v16, %v2094_v8  ;;  %v10289_v51 = vmax.f32 %v8181_v42, %v8186_v45 }
 0x112   : > { %1829 = vst.msk [vmem:[#allocation3 + $0x1e8] sm:$0xff] %vm308_vm0, %v1732_v3  ;;  %v1132_v20 = vmax.f32 %v8186_v45, %v941_v21  ;;  %v1323_v4 = vmax.f32 %v1128_v35, %v941_v21  ;;  %v1514_v54 = vmax.f32 %v8224_v39, %v941_v21  ;;  %v973_v41 = vld [vmem:[#allocation2 + $0x290] sm:$0xff]  ;;  %v8357_v15 = vld [vmem:[#allocation2 + $0x188] sm:$0xff]  ;;  %v10290_v10 = vmax.f32 %v8164_v24, %v8199_v17 }
 0x113   : > { %v1705_v38 = vmax.f32 %v10289_v51, %v941_v21  ;;  %v8359_v18 = vld [vmem:[#allocation2 + $0x288] sm:$0xff]  ;;  %v1164_v16 = vmax.f32 %v8199_v17, %v973_v41  ;;  %v1546_v2 = vmax.f32 %v8233_v12, %v973_v41  ;;  %v1737_v35 = vmax.f32 %v1542_v60, %v973_v41  ;;  %v945_v49 = vld [vmem:[#allocation2 + $0x1b0] sm:$0xff]  ;;  %7159 = vmatprep.mubr.msk.f32.mxu0 %vm308_vm0, %v8357_v15 }
 0x114   : > { %v1355_v3 = vmax.f32 %v10290_v10, %v973_v41  ;;  %v8366_v39 = vld [vmem:[#allocation2 + $0x1a8] sm:$0xff]  ;;  %2524 = vst.msk [vmem:[#allocation4 + $0x84] sm:$0xff] %vm308_vm0, %v2452_v58  ;;  %2525 = vst.msk [vmem:[#allocation4 + $0x8c] sm:$0xff] %vm308_vm0, %v2453_v7  ;;  %v1131_v42 = vmax.f32 %v8188_v19, %v8357_v15  ;;  %v8379_v24 = vmax.f32 %v1127_v9, %v8357_v15  ;;  %v977_v12 = vld [vmem:[#allocation2 + $0x2b0] sm:$0xff]  ;;  %7160 = vmatmul.mubr.msk.f32.gmra.mxu0 %vm308_vm0, %v941_v21 }
 0x115   : > { %1802 = vst.msk [vmem:[#allocation3 + $0x110] sm:$0xff] %vm308_vm0, %v1705_v38  ;;  %v1513_v45 = vmax.f32 %v8276_v62, %v8357_v15  ;;  %v1704_v17 = vmax.f32 %v1509_v52, %v8357_v15  ;;  %1834 = vst.msk [vmem:[#allocation3 + $0x210] sm:$0xff] %vm308_vm0, %v1737_v35  ;;  %v1163_v60 = vmax.f32 %v8317_v22, %v8359_v18  ;;  %7162 = vmatprep.mubr.msk.f32.mxu0 %vm308_vm0, %v8366_v39  ;;  %v6720_v51 = vld [vmem:[#allocation2 + $0x1c8] sm:$0xff]  ;;  %v7316_v10 = vld [vmem:[#allocation2 + $0x2d0] sm:$0xff] }
 0x116   : > { %v8389_v53 = vmax.f32 %v1159_v44, %v8359_v18  ;;  %v1545_v31 = vmax.f32 %v8336_v59, %v8359_v18  ;;  %v1736_v9 = vmax.f32 %v1541_v0, %v8359_v18  ;;  %v1136_v52 = vmax.f32 %v941_v21, %v945_v49  ;;  %v7322_v59 = vld [vmem:[#allocation2 + $0x308] sm:$0xff] }
 0x117   : > { %1801 = vst.msk [vmem:[#allocation3 + $0x108] sm:$0xff] %vm308_vm0, %v1704_v17  ;;  %v1140_v8 = vmax.f32 %v945_v49, %v7990_v30  ;;  %v1327_v58 = vmax.f32 %v1132_v20, %v945_v49  ;;  %v1518_v7 = vmax.f32 %v1323_v4, %v945_v49  ;;  %v1709_v44 = vmax.f32 %v1514_v54, %v945_v49  ;;  %v7317_v4 = vld [vmem:[#allocation2 + $0x2f0] sm:$0xff] }
 0x118   : > { %1833 = vst.msk [vmem:[#allocation3 + $0x208] sm:$0xff] %vm308_vm0, %v1736_v9  ;;  %v1168_v38 = vmax.f32 %v973_v41, %v977_v12  ;;  %v1172_v35 = vmax.f32 %v977_v12, %v7316_v10  ;;  %v1359_v47 = vmax.f32 %v1164_v16, %v977_v12  ;;  %v1331_v0 = vmax.f32 %v1136_v52, %v7990_v30 }
 0x119   : > { %v1335_v34 = vmax.f32 %v1140_v8, %v7999_v26  ;;  %v1522_v23 = vmax.f32 %v1327_v58, %v7990_v30  ;;  %v1713_v21 = vmax.f32 %v1518_v7, %v7990_v30  ;;  %7163 = vmatmul.mubr.msk.f32.gmra.mxu0 %vm308_vm0, %v945_v49  ;;  %1806 = vst.msk [vmem:[#allocation3 + $0x130] sm:$0xff] %vm308_vm0, %v1709_v44  ;;  %v6722_v49 = vld [vmem:[#allocation2 + $0x1e8] sm:$0xff]  ;;  %v7318_v7 = vld [vmem:[#allocation2 + $0x310] sm:$0xff] }
 0x11a   : > { %v1363_v20 = vmax.f32 %v1168_v38, %v7316_v10  ;;  %v1367_v17 = vmax.f32 %v1172_v35, %v7317_v4  ;;  %v1550_v54 = vmax.f32 %v1355_v3, %v977_v12  ;;  %v1554_v41 = vmax.f32 %v1359_v47, %v7316_v10  ;;  %7165 = vmatprep.mubr.msk.f32.mxu0 %vm308_vm0, %v6720_v51  ;;  %v976_v3 = vld [vmem:[#allocation2 + $0x2a8] sm:$0xff]  ;;  %v6721_v47 = vld [vmem:[#allocation2 + $0x1d0] sm:$0xff] }
 0x11b   : > { %v1526_v16 = vmax.f32 %v1331_v0, %v7999_v26  ;;  %v1530_v9 = vmax.f32 %v1335_v34, %v8041_v61  ;;  %v1717_v52 = vmax.f32 %v1522_v23, %v7999_v26  ;;  %1810 = vst.msk [vmem:[#allocation3 + $0x150] sm:$0xff] %vm308_vm0, %v1713_v21  ;;  %v1741_v30 = vmax.f32 %v1546_v2, %v977_v12  ;;  %v4596_v8 = vld [vmem:[#allocation4 + $0x88] sm:$0xff]  ;;  %v7319_v12 = vld [vmem:[#allocation2 + $0x330] sm:$0xff] }
 0x11c   : > { %v1558_v58 = vmax.f32 %v1363_v20, %v7317_v4  ;;  %v1562_v44 = vmax.f32 %v1367_v17, %v7318_v7  ;;  %v1745_v38 = vmax.f32 %v1550_v54, %v7316_v10  ;;  %v1749_v35 = vmax.f32 %v1554_v41, %v7317_v4  ;;  %7091 = vmatprep.mubr.msk.f32.mxu1 %vm308_vm0, %v4596_v8  ;;  %v7320_v17 = vld [vmem:[#allocation2 + $0x2c8] sm:$0xff]  ;;  %v8457_v8 = vld [vmem:[#allocation4 + $0x74] sm:$0xff] }
 0x11d   : > { %v1721_v51 = vmax.f32 %v1526_v16, %v8041_v61  ;;  %v1725_v34 = vmax.f32 %v1530_v9, %v8114_v50  ;;  %1814 = vst.msk [vmem:[#allocation3 + $0x170] sm:$0xff] %vm308_vm0, %v1717_v52  ;;  %1838 = vst.msk [vmem:[#allocation3 + $0x230] sm:$0xff] %vm308_vm0, %v1741_v30  ;;  %v1135_v26 = vmax.f32 %v8357_v15, %v8366_v39  ;;  %7166 = vmatmul.mubr.msk.f32.gmra.mxu0 %vm308_vm0, %v6721_v47  ;;  %v6723_v16 = vld [vmem:[#allocation2 + $0x1f0] sm:$0xff]  ;;  %v7321_v9 = vld [vmem:[#allocation2 + $0x2e8] sm:$0xff] }
 0x11e   : > { %v1139_v23 = vmax.f32 %v8366_v39, %v8011_v36  ;;  %v1753_v2 = vmax.f32 %v1558_v58, %v7318_v7  ;;  %v1757_v10 = vmax.f32 %v1562_v44, %v7319_v12  ;;  %1842 = vst.msk [vmem:[#allocation3 + $0x250] sm:$0xff] %vm308_vm0, %v1745_v38  ;;  %1846 = vst.msk [vmem:[#allocation3 + $0x270] sm:$0xff] %vm308_vm0, %v1749_v35  ;;  %7168 = vmatprep.mubr.msk.f32.mxu0 %vm308_vm0, %v6722_v49  ;;  %v8455_v30 = vld [vmem:[#allocation4 + $0x84] sm:$0xff]  ;;  %v8462_v7 = vld [vmem:[#allocation4 + $0x8c] sm:$0xff] }
 0x11f   : > { %v1326_v61 = vmax.f32 %v1131_v42, %v8366_v39  ;;  %v1517_v50 = vmax.f32 %v8379_v24, %v8366_v39  ;;  %1818 = vst.msk [vmem:[#allocation3 + $0x190] sm:$0xff] %vm308_vm0, %v1721_v51  ;;  %1822 = vst.msk [vmem:[#allocation3 + $0x1b0] sm:$0xff] %vm308_vm0, %v1725_v34  ;;  %v1330_v0 = vmax.f32 %v1135_v26, %v8011_v36  ;;  %v6724_v42 = vld [vmem:[#allocation2 + $0x208] sm:$0xff]  ;;  %v6725_v44 = vld [vmem:[#allocation2 + $0x210] sm:$0xff] }
 0x120   : > { %v1334_v21 = vmax.f32 %v1139_v23, %v8019_v57  ;;  %v1708_v20 = vmax.f32 %v1513_v45, %v8366_v39  ;;  %v1167_v19 = vmax.f32 %v8359_v18, %v976_v3  ;;  %1850 = vst.msk [vmem:[#allocation3 + $0x290] sm:$0xff] %vm308_vm0, %v1753_v2  ;;  %1854 = vst.msk [vmem:[#allocation3 + $0x2b0] sm:$0xff] %vm308_vm0, %v1757_v10  ;;  %v6726_v38 = vld [vmem:[#allocation2 + $0x228] sm:$0xff]  ;;  %v8470_v47 = vld [vmem:[#allocation3 + $0xb2] sm:$0xff] }
 0x121   : > { %v1521_v24 = vmax.f32 %v1326_v61, %v8011_v36  ;;  %v1712_v4 = vmax.f32 %v1517_v50, %v8011_v36  ;;  %v1171_v54 = vmax.f32 %v976_v3, %v7320_v17  ;;  %v1358_v41 = vmax.f32 %v1163_v60, %v976_v3  ;;  %7169 = vmatmul.mubr.msk.f32.gmra.mxu0 %vm308_vm0, %v6723_v16  ;;  %v8472_v51 = vld [vmem:[#allocation3 + $0xb3] sm:$0xff]  ;;  %v8488_v2 = vld [vmem:[#allocation3 + $0xc2] sm:$0xff] }
 0x122   : > { %v1525_v62 = vmax.f32 %v1330_v0, %v8019_v57  ;;  %v1529_v15 = vmax.f32 %v1334_v21, %v8087_v5  ;;  %1805 = vst.msk [vmem:[#allocation3 + $0x128] sm:$0xff] %vm308_vm0, %v1708_v20  ;;  %v1362_v39 = vmax.f32 %v1167_v19, %v7320_v17  ;;  %v1549_v45 = vmax.f32 %v8389_v53, %v976_v3  ;;  %v2096_v23 = vld [vmem:[#allocation3 + $0xac] sm:$0xff]  ;;  %v8490_v12 = vld [vmem:[#allocation3 + $0xc3] sm:$0xff]  ;;  %v2382_v0 = vld [vmem:[#allocation3 + $0x96] sm:$0xff] }
 0x123   : > { %v1716_v36 = vmax.f32 %v1521_v24, %v8019_v57  ;;  %1809 = vst.msk [vmem:[#allocation3 + $0x148] sm:$0xff] %vm308_vm0, %v1712_v4  ;;  %v1366_v52 = vmax.f32 %v1171_v54, %v7321_v9  ;;  %v1553_v22 = vmax.f32 %v1358_v41, %v7320_v17  ;;  %v1740_v60 = vmax.f32 %v1545_v31, %v976_v3  ;;  %v2095_v3 = vld [vmem:[#allocation3 + $0xa4] sm:$0xff]  ;;  %v2240_v20 = vld [vmem:[#allocation3 + $0xad] sm:$0xff] }
 0x124   : > { %7171 = vmatprep.mubr.msk.f32.mxu0 %vm308_vm0, %v6724_v42  ;;  %v1720_v53 = vmax.f32 %v1525_v62, %v8087_v5  ;;  %v1724_v49 = vmax.f32 %v1529_v15, %v8145_v29  ;;  %v1557_v57 = vmax.f32 %v1362_v39, %v7321_v9  ;;  %v1744_v58 = vmax.f32 %v1549_v45, %v7320_v17  ;;  %v2238_v29 = vld [vmem:[#allocation3 + $0x95] sm:$0xff]  ;;  %v7323_v10 = vld [vmem:[#allocation2 + $0x328] sm:$0xff] }
 0x125   : > { %1813 = vst.msk [vmem:[#allocation3 + $0x168] sm:$0xff] %vm308_vm0, %v1716_v36  ;;  %v1561_v18 = vmax.f32 %v1366_v52, %v7322_v59  ;;  %v1748_v31 = vmax.f32 %v1553_v22, %v7321_v9  ;;  %1837 = vst.msk [vmem:[#allocation3 + $0x228] sm:$0xff] %vm308_vm0, %v1740_v60  ;;  %v2947_v35 = vmax.f32 %v8309_v55, %v8264_v14  ;;  %7172 = vmatmul.mubr.msk.f32.gmra.mxu0 %vm308_vm0, %v6725_v44  ;;  %v2239_v21 = vld [vmem:[#allocation3 + $0xa5] sm:$0xff]  ;;  %v6727_v24 = vld [vmem:[#allocation2 + $0x230] sm:$0xff] }
 0x126   : > { %v2948_v5 = vmax.f32 %v8315_v63, %v8266_v37  ;;  %1817 = vst.msk [vmem:[#allocation3 + $0x188] sm:$0xff] %vm308_vm0, %v1720_v53  ;;  %1821 = vst.msk [vmem:[#allocation3 + $0x1a8] sm:$0xff] %vm308_vm0, %v1724_v49  ;;  %v1752_v34 = vmax.f32 %v1557_v57, %v7322_v59  ;;  %v2714_v26 = vmax.f32 %v8264_v14, %v8455_v30  ;;  %v1883_v19 = vld [vmem:[#allocation3 + $0xca] sm:$0xff]  ;;  %7174 = vmatprep.mubr.msk.f32.mxu0 %vm308_vm0, %v6726_v38  ;;  %v2097_v36 = vld [vmem:[#allocation3 + $0xb4] sm:$0xff] }
 0x127   : > { %1841 = vst.msk [vmem:[#allocation3 + $0x248] sm:$0xff] %vm308_vm0, %v1744_v58  ;;  %v8483_v55 = vmax.f32 %v2709_v25, %v8266_v37  ;;  %v2949_v63 = vmax.f32 %v8326_v43, %v8457_v8  ;;  %v1756_v61 = vmax.f32 %v1561_v18, %v7323_v10  ;;  %1845 = vst.msk [vmem:[#allocation3 + $0x268] sm:$0xff] %vm308_vm0, %v1748_v31  ;;  %v1955_v42 = vld [vmem:[#allocation3 + $0xcb] sm:$0xff]  ;;  %v1998_v41 = vld [vmem:[#allocation3 + $0x293] sm:$0xff] }
 0x128   : > { %v2715_v50 = vmax.f32 %v8266_v37, %v8462_v7  ;;  %v3068_v48 = vmax.f32 %v2947_v35, %v8455_v30  ;;  %v3069_v25 = vmax.f32 %v2948_v5, %v8462_v7  ;;  %v6728_v4 = vld [vmem:[#allocation2 + $0x248] sm:$0xff]  ;;  %v1926_v17 = vld [vmem:[#allocation3 + $0x292] sm:$0xff]  ;;  %1849 = vst.msk [vmem:[#allocation3 + $0x288] sm:$0xff] %vm308_vm0, %v1752_v34  ;;  %v2310_v16 = vmax.f32 %v8346_v28, %v2238_v29 }
 0x129   : > { %v1929_v54 = vld [vmem:[#allocation3 + $0x2b2] sm:$0xff]  ;;  %v2167_v62 = vmax.f32 %v2023_v13, %v2095_v3  ;;  %v10291_v15 = vmax.f32 %v8300_v56, %v8302_v1  ;;  %v2025_v45 = vmax.f32 %v8470_v47, %v8472_v51  ;;  %v2070_v60 = vmax.f32 %v1926_v17, %v1998_v41  ;;  %1853 = vst.msk [vmem:[#allocation3 + $0x2a8] sm:$0xff] %vm308_vm0, %v1756_v61  ;;  %v2383_v13 = vld [vmem:[#allocation3 + $0xa6] sm:$0xff] }
 0x12a   : > { %v8508_v9 = vld [vmem:[#allocation3 + $0xd2] sm:$0xff]  ;;  %v8517_v46 = vmax.f32 %v10292_v11, %v8455_v30  ;;  %v10293_v56 = vmax.f32 %v8262_v40, %v8266_v37  ;;  %3128 = vst.msk [vmem:[#allocation5 + $0x4] sm:$0xff] %vm308_vm0, %v3068_v48  ;;  %3129 = vst.msk [vmem:[#allocation5 + $0xc] sm:$0xff] %vm308_vm0, %v3069_v25  ;;  %v2026_v57 = vmax.f32 %v8488_v2, %v8490_v12  ;;  %v2098_v58 = vld [vmem:[#allocation3 + $0xc4] sm:$0xff]  ;;  %7175 = vmatmul.mubr.msk.f32.gmra.mxu0 %vm308_vm0, %v6727_v24 }
 0x12b   : > { %v2168_v39 = vmax.f32 %v10291_v15, %v2096_v23  ;;  %v8510_v52 = vld [vmem:[#allocation3 + $0xd3] sm:$0xff]  ;;  %v2454_v38 = vmax.f32 %v2310_v16, %v2382_v0  ;;  %v2311_v59 = vmax.f32 %v2167_v62, %v2239_v21  ;;  %v1885_v40 = vld [vmem:[#allocation3 + $0xe2] sm:$0xff]  ;;  %v8530_v5 = vld [vmem:[#allocation3 + $0xea] sm:$0xff]  ;;  %v2950_v47 = vmax.f32 %v8320_v33, %v8455_v30  ;;  %7177 = vmatprep.mubr.msk.f32.mxu0 %vm308_vm0, %v6728_v4 }
 0x12c   : > { %v2001_v22 = vld [vmem:[#allocation3 + $0x2b3] sm:$0xff]  ;;  %v8523_v1 = vmax.f32 %v10293_v56, %v8462_v7  ;;  %v2169_v51 = vmax.f32 %v2025_v45, %v2097_v36  ;;  %v2027_v34 = vmax.f32 %v1883_v19, %v1955_v42  ;;  %v2242_v23 = vld [vmem:[#allocation3 + $0xc5] sm:$0xff]  ;;  %v2170_v21 = vmax.f32 %v2026_v57, %v2098_v58 }
 0x12d   : > { %v2142_v53 = vld [vmem:[#allocation3 + $0x294] sm:$0xff]  ;;  %v2073_v44 = vmax.f32 %v1929_v54, %v2001_v22  ;;  %v2312_v18 = vmax.f32 %v2168_v39, %v2240_v20  ;;  %v2099_v35 = vld [vmem:[#allocation3 + $0xcc] sm:$0xff]  ;;  %v1957_v2 = vld [vmem:[#allocation3 + $0xe3] sm:$0xff]  ;;  %2526 = vst.msk [vmem:[#allocation4 + $0x94] sm:$0xff] %vm308_vm0, %v2454_v38  ;;  %v2455_v48 = vmax.f32 %v2311_v59, %v2383_v13  ;;  %v2028_v62 = vmax.f32 %v8508_v9, %v8510_v52 }
 0x12e   : > { %v2145_v28 = vld [vmem:[#allocation3 + $0x2b4] sm:$0xff]  ;;  %v2214_v29 = vmax.f32 %v2070_v60, %v2142_v53  ;;  %v1958_v12 = vld [vmem:[#allocation3 + $0xeb] sm:$0xff]  ;;  %v2171_v19 = vmax.f32 %v2027_v34, %v2099_v35  ;;  %v2314_v45 = vmax.f32 %v2170_v21, %v2242_v23  ;;  %v2029_v60 = vmax.f32 %v1885_v40, %v1957_v2 }
 0x12f   : > { %v2384_v49 = vld [vmem:[#allocation3 + $0xae] sm:$0xff]  ;;  %v2217_v10 = vmax.f32 %v2073_v44, %v2145_v28  ;;  %v2430_v61 = vld [vmem:[#allocation3 + $0x296] sm:$0xff]  ;;  %v2386_v42 = vld [vmem:[#allocation3 + $0xc6] sm:$0xff]  ;;  %2527 = vst.msk [vmem:[#allocation4 + $0xa4] sm:$0xff] %vm308_vm0, %v2455_v48  ;;  %v2030_v53 = vmax.f32 %v8530_v5, %v1958_v12 }
 0x130   : > { %v2286_v32 = vld [vmem:[#allocation3 + $0x295] sm:$0xff]  ;;  %v2456_v25 = vmax.f32 %v2312_v18, %v2384_v49  ;;  %v2243_v20 = vld [vmem:[#allocation3 + $0xcd] sm:$0xff]  ;;  %v2101_v4 = vld [vmem:[#allocation3 + $0xe4] sm:$0xff] }
 0x131   : > { %v2241_v31 = vld [vmem:[#allocation3 + $0xb5] sm:$0xff]  ;;  %v6730_v17 = vld [vmem:[#allocation2 + $0x268] sm:$0xff]  ;;  %v2358_v54 = vmax.f32 %v2214_v29, %v2286_v32  ;;  %v2315_v44 = vmax.f32 %v2171_v19, %v2243_v20  ;;  %v2458_v29 = vmax.f32 %v2314_v45, %v2386_v42 }
 0x132   : > { %v2289_v3 = vld [vmem:[#allocation3 + $0x2b5] sm:$0xff]  ;;  %v2313_v16 = vmax.f32 %v2169_v51, %v2241_v31  ;;  %2528 = vst.msk [vmem:[#allocation4 + $0xac] sm:$0xff] %vm308_vm0, %v2456_v25  ;;  %v2102_v28 = vld [vmem:[#allocation3 + $0xec] sm:$0xff]  ;;  %v1924_v13 = vld [vmem:[#allocation3 + $0x282] sm:$0xff]  ;;  %v2173_v51 = vmax.f32 %v2029_v60, %v2101_v4 }
 0x133   : > { %v2385_v0 = vld [vmem:[#allocation3 + $0xb6] sm:$0xff]  ;;  %v2361_v39 = vmax.f32 %v2217_v10, %v2289_v3  ;;  %v2387_v36 = vld [vmem:[#allocation3 + $0xce] sm:$0xff]  ;;  %v2502_v52 = vmax.f32 %v2358_v54, %v2430_v61  ;;  %v1996_v57 = vld [vmem:[#allocation3 + $0x283] sm:$0xff]  ;;  %v2174_v25 = vmax.f32 %v2030_v53, %v2102_v28  ;;  %2530 = vst.msk [vmem:[#allocation4 + $0xc4] sm:$0xff] %vm308_vm0, %v2458_v29 }
 0x134   : > { %v2100_v24 = vld [vmem:[#allocation3 + $0xd4] sm:$0xff]  ;;  %v6732_v9 = vld [vmem:[#allocation2 + $0x288] sm:$0xff]  ;;  %v2457_v58 = vmax.f32 %v2313_v16, %v2385_v0  ;;  %v2068_v5 = vmax.f32 %v1924_v13, %v1996_v57  ;;  %v2459_v61 = vmax.f32 %v2315_v44, %v2387_v36 }
 0x135   : > { %v2433_v41 = vld [vmem:[#allocation3 + $0x2b6] sm:$0xff]  ;;  %v1925_v49 = vld [vmem:[#allocation3 + $0x28a] sm:$0xff]  ;;  %v2172_v32 = vmax.f32 %v2028_v62, %v2100_v24  ;;  %v1927_v31 = vld [vmem:[#allocation3 + $0x2a2] sm:$0xff]  ;;  %2574 = vst.msk [vmem:[#allocation4 + $0x294] sm:$0xff] %vm308_vm0, %v2502_v52 }
 0x136   : > { %v6729_v15 = vld [vmem:[#allocation2 + $0x250] sm:$0xff]  ;;  %v2245_v38 = vld [vmem:[#allocation3 + $0xe5] sm:$0xff]  ;;  %v2505_v18 = vmax.f32 %v2361_v39, %v2433_v41  ;;  %2529 = vst.msk [vmem:[#allocation4 + $0xb4] sm:$0xff] %vm308_vm0, %v2457_v58  ;;  %2531 = vst.msk [vmem:[#allocation4 + $0xcc] sm:$0xff] %vm308_vm0, %v2459_v61 }
 0x137   : > { %v2244_v22 = vld [vmem:[#allocation3 + $0xd5] sm:$0xff]  ;;  %7178 = vmatmul.mubr.msk.f32.gmra.mxu0 %vm308_vm0, %v6729_v15  ;;  %v1928_v35 = vld [vmem:[#allocation3 + $0x2aa] sm:$0xff]  ;;  %v2317_v16 = vmax.f32 %v2173_v51, %v2245_v38 }
 0x138   : > { %v8541_v11 = vld [vmem:[#allocation3 + $0xf2] sm:$0xff]  ;;  %7180 = vmatprep.mubr.msk.f32.mxu0 %vm308_vm0, %v6730_v17  ;;  %v1999_v23 = vld [vmem:[#allocation3 + $0x2a3] sm:$0xff]  ;;  %v2316_v48 = vmax.f32 %v2172_v32, %v2244_v22  ;;  %2577 = vst.msk [vmem:[#allocation4 + $0x2b4] sm:$0xff] %vm308_vm0, %v2505_v18 }
 0x139   : > { %v8543_v56 = vld [vmem:[#allocation3 + $0xf3] sm:$0xff]  ;;  %v1997_v40 = vld [vmem:[#allocation3 + $0x28b] sm:$0xff]  ;;  %v2071_v21 = vmax.f32 %v1927_v31, %v1999_v23  ;;  %v8555_v22 = vld [vmem:[#allocation3 + $0x102] sm:$0xff] }
 0x13a   : > { %v6731_v59 = vld [vmem:[#allocation2 + $0x270] sm:$0xff]  ;;  %v2069_v12 = vmax.f32 %v1925_v49, %v1997_v40  ;;  %v2140_v10 = vld [vmem:[#allocation3 + $0x284] sm:$0xff]  ;;  %v2031_v36 = vmax.f32 %v8541_v11, %v8543_v56  ;;  %v2951_v11 = vmax.f32 %v8483_v55, %v8462_v7 }
 0x13b   : > { %v2388_v3 = vld [vmem:[#allocation3 + $0xd6] sm:$0xff]  ;;  %v2246_v34 = vld [vmem:[#allocation3 + $0xed] sm:$0xff]  ;;  %v2143_v17 = vld [vmem:[#allocation3 + $0x2a4] sm:$0xff]  ;;  %v2212_v41 = vmax.f32 %v2068_v5, %v2140_v10  ;;  %7181 = vmatmul.mubr.msk.f32.gmra.mxu0 %vm308_vm0, %v6731_v59 }
 0x13c   : > { %v2000_v2 = vld [vmem:[#allocation3 + $0x2ab] sm:$0xff]  ;;  %v2460_v39 = vmax.f32 %v2316_v48, %v2388_v3  ;;  %v2318_v45 = vmax.f32 %v2174_v25, %v2246_v34  ;;  %v8557_v60 = vld [vmem:[#allocation3 + $0x103] sm:$0xff]  ;;  %7183 = vmatprep.mubr.msk.f32.mxu0 %vm308_vm0, %v6732_v9  ;;  %v2215_v28 = vmax.f32 %v2071_v21, %v2143_v17  ;;  %v2103_v32 = vld [vmem:[#allocation3 + $0xf4] sm:$0xff] }
 0x13d   : > { %v2389_v0 = vld [vmem:[#allocation3 + $0xe6] sm:$0xff]  ;;  %v2072_v20 = vmax.f32 %v1928_v35, %v2000_v2  ;;  %v2390_v19 = vld [vmem:[#allocation3 + $0xee] sm:$0xff]  ;;  %v8581_v43 = vmax.f32 %v2031_v36, %v2103_v32 }
 0x13e   : > { %v2141_v24 = vld [vmem:[#allocation3 + $0x28c] sm:$0xff]  ;;  %v2461_v44 = vmax.f32 %v2317_v16, %v2389_v0  ;;  %v8562_v56 = vld [vmem:[#allocation4 + $0x94] sm:$0xff]  ;;  %2532 = vst.msk [vmem:[#allocation4 + $0xd4] sm:$0xff] %vm308_vm0, %v2460_v39  ;;  %v2462_v35 = vmax.f32 %v2318_v45, %v2390_v19  ;;  %v8570_v34 = vld [vmem:[#allocation4 + $0xa4] sm:$0xff] }
 0x13f   : > { %v2144_v54 = vld [vmem:[#allocation3 + $0x2ac] sm:$0xff]  ;;  %v2213_v42 = vmax.f32 %v2069_v12, %v2141_v24  ;;  %v7324_v31 = vld [vmem:[#allocation4 + $0x34] sm:$0xff]  ;;  %v3070_v3 = vmax.f32 %v2949_v63, %v8562_v56  ;;  %v2713_v12 = vmax.f32 %v8288_v6, %v8457_v8  ;;  %v7325_v25 = vld [vmem:[%s10285_s4 + $0x8] sm:$0xf]  ;;  %v8602_v17 = vmax.f32 %v2714_v26, %v8570_v34 }
 0x140   : > { %v2284_v62 = vld [vmem:[#allocation3 + $0x285] sm:$0xff]  ;;  %v2285_v4 = vld [vmem:[#allocation3 + $0x28d] sm:$0xff]  ;;  %v2216_v52 = vmax.f32 %v2072_v20, %v2144_v54  ;;  %v2710_v9 = vmax.f32 %v7324_v31, %v8288_v6  ;;  %2533 = vst.msk [vmem:[#allocation4 + $0xe4] sm:$0xff] %vm308_vm0, %v2461_v44  ;;  %2534 = vst.msk [vmem:[#allocation4 + $0xec] sm:$0xff] %vm308_vm0, %v2462_v35  ;;  %v2717_v6 = vmax.f32 %v8455_v30, %v8570_v34 }
 0x141   : > { %v2287_v15 = vld [vmem:[#allocation3 + $0x2a5] sm:$0xff]  ;;  %v6733_v53 = vld [vmem:[#allocation2 + $0x290] sm:$0xff]  ;;  %v2356_v49 = vmax.f32 %v2212_v41, %v2284_v62  ;;  %v2357_v38 = vmax.f32 %v2213_v42, %v2285_v4  ;;  %3130 = vst.msk [vmem:[#allocation5 + $0x14] sm:$0xff] %vm308_vm0, %v3070_v3  ;;  %v2032_v20 = vmax.f32 %v8555_v22, %v8557_v60  ;;  %v3071_v54 = vmax.f32 %v2950_v47, %v8570_v34 }
 0x142   : > { %v2288_v13 = vld [vmem:[#allocation3 + $0x2ad] sm:$0xff]  ;;  %v2359_v40 = vmax.f32 %v2215_v28, %v2287_v15  ;;  %7184 = vmatmul.mubr.msk.f32.gmra.mxu0 %vm308_vm0, %v6733_v53  ;;  %v2831_v10 = vmax.f32 %v2710_v9, %v8457_v8  ;;  %v8610_v16 = vld [vmem:[#allocation4 + $0xc4] sm:$0xff]  ;;  %v2716_v26 = vmax.f32 %v8457_v8, %v8562_v56  ;;  %v2834_v33 = vmax.f32 %v2713_v12, %v8562_v56  ;;  %v2247_v32 = vld [vmem:[#allocation3 + $0xf5] sm:$0xff] }
 0x143   : > { %v2428_v57 = vld [vmem:[#allocation3 + $0x286] sm:$0xff]  ;;  %v2429_v58 = vld [vmem:[#allocation3 + $0x28e] sm:$0xff]  ;;  %v2360_v5 = vmax.f32 %v2216_v52, %v2288_v13  ;;  %v2953_v42 = vmax.f32 %v8517_v46, %v8570_v34  ;;  %3131 = vst.msk [vmem:[#allocation5 + $0x24] sm:$0xff] %vm308_vm0, %v3071_v54  ;;  %v2720_v8 = vmax.f32 %v8570_v34, %v8610_v16  ;;  %v8657_v13 = vmax.f32 %v2717_v6, %v8610_v16 }
 0x144   : > { %v2431_v59 = vld [vmem:[#allocation3 + $0x2a6] sm:$0xff]  ;;  %v2432_v18 = vld [vmem:[#allocation3 + $0x2ae] sm:$0xff]  ;;  %v2500_v29 = vmax.f32 %v2356_v49, %v2428_v57  ;;  %v2501_v23 = vmax.f32 %v2357_v38, %v2429_v58  ;;  %v2952_v30 = vmax.f32 %v2831_v10, %v8562_v56 }
 0x145   : > { %v4597_v51 = vld [vmem:[#allocation4 + $0x90] sm:$0xff]  ;;  %v4598_v2 = vld [vmem:[#allocation4 + $0xa8] sm:$0xff]  ;;  %v2503_v61 = vmax.f32 %v2359_v40, %v2431_v59  ;;  %v2504_v48 = vmax.f32 %v2360_v5, %v2432_v18  ;;  %v3074_v57 = vmax.f32 %v2953_v42, %v8610_v16 }
 0x146   : > { %v8572_v55 = vld [vmem:[#allocation4 + $0xac] sm:$0xff]  ;;  %7092 = vmatmul.mubr.msk.f32.vlgmr.msra.gmra.mxu1 %vm308_vm0, %v4597_v51  ;;  %2572 = vst.msk [vmem:[#allocation4 + $0x284] sm:$0xff] %vm308_vm0, %v2500_v29  ;;  %v8591_v0 = vld [vmem:[#allocation4 + $0xb4] sm:$0xff]  ;;  %2573 = vst.msk [vmem:[#allocation4 + $0x28c] sm:$0xff] %vm308_vm0, %v2501_v23 }
 0x147   : > { %v6734_v63 = vld [vmem:[#allocation2 + $0x2a8] sm:$0xff]  ;;  %7190 = vmatpush3.msk.msra.mxu1 %vm4758_vm2, %v7325_v25  ;;  %v4599_v21 = vld [vmem:[#allocation4 + $0xb0] sm:$0xff]  ;;  %v2718_v24 = vmax.f32 %v8462_v7, %v8572_v55  ;;  %v3072_v41 = vmax.f32 %v2951_v11, %v8572_v55  ;;  %7094 = vmatprep.mubr.msk.f32.mxu1 %vm308_vm0, %v4598_v2  ;;  %2575 = vst.msk [vmem:[#allocation4 + $0x2a4] sm:$0xff] %vm308_vm0, %v2503_v61  ;;  %2576 = vst.msk [vmem:[#allocation4 + $0x2ac] sm:$0xff] %vm308_vm0, %v2504_v48 }
 0x148   : > { %v2836_v14 = vmax.f32 %v2715_v50, %v8572_v55  ;;  %v8622_v47 = vld [vmem:[#allocation4 + $0xcc] sm:$0xff]  ;;  %7186 = vmatprep.mubr.msk.f32.mxu0 %vm308_vm0, %v6734_v63  ;;  %v2954_v62 = vmax.f32 %v8523_v1, %v8572_v55  ;;  %v2719_v37 = vmax.f32 %v8562_v56, %v8591_v0  ;;  %v8641_v4 = vmax.f32 %v2716_v26, %v8591_v0  ;;  %v8648_v45 = vld [vmem:[#allocation4 + $0xd4] sm:$0xff]  ;;  %v8654_v52 = vld [vmem:[#allocation3 + $0x122] sm:$0xff] }
 0x149   : > { %v4600_v19 = vld [vmem:[#allocation4 + $0xc8] sm:$0xff]  ;;  %3132 = vst.msk [vmem:[#allocation5 + $0x2c] sm:$0xff] %vm308_vm0, %v3072_v41  ;;  %v6735_v46 = vld [vmem:[#allocation2 + $0x2b0] sm:$0xff]  ;;  %v2955_v1 = vmax.f32 %v2834_v33, %v8591_v0  ;;  %v3073_v15 = vmax.f32 %v2952_v30, %v8591_v0  ;;  %v2721_v39 = vmax.f32 %v8572_v55, %v8622_v47  ;;  %v8660_v49 = vmax.f32 %v2718_v24, %v8622_v47 }
 0x14a   : > { %7095 = vmatmul.mubr.msk.f32.gmra.mxu1 %vm308_vm0, %v4599_v21  ;;  %v8636_v7 = vld [vmem:[#allocation3 + $0x10a] sm:$0xff]  ;;  %v8650_v53 = vld [vmem:[#allocation3 + $0x112] sm:$0xff]  ;;  %v3075_v58 = vmax.f32 %v2954_v62, %v8622_v47  ;;  %7187 = vmatmul.mubr.msk.f32.gmra.mxu0 %vm308_vm0, %v6735_v46  ;;  %v2956_v11 = vmax.f32 %v8602_v17, %v8610_v16  ;;  %v2957_v56 = vmax.f32 %v2836_v14, %v8622_v47  ;;  %v1894_v12 = vld [vmem:[#allocation3 + $0x142] sm:$0xff] }
 0x14b   : > { %v8638_v50 = vld [vmem:[#allocation3 + $0x10b] sm:$0xff]  ;;  %7097 = vmatprep.mubr.msk.f32.mxu1 %vm308_vm0, %v4600_v19  ;;  %v8652_v28 = vld [vmem:[#allocation3 + $0x113] sm:$0xff]  ;;  %v1963_v59 = vld [vmem:[#allocation3 + $0x123] sm:$0xff]  ;;  %3133 = vst.msk [vmem:[#allocation5 + $0x34] sm:$0xff] %vm308_vm0, %v3073_v15  ;;  %v2722_v31 = vmax.f32 %v8591_v0, %v8648_v45  ;;  %v3076_v9 = vmax.f32 %v2955_v1, %v8648_v45  ;;  %v8681_v29 = vmax.f32 %v2719_v37, %v8648_v45 }
 0x14c   : > { %v4601_v36 = vld [vmem:[#allocation4 + $0xd0] sm:$0xff]  ;;  %v8664_v44 = vld [vmem:[#allocation4 + $0xe4] sm:$0xff]  ;;  %3134 = vst.msk [vmem:[#allocation5 + $0x44] sm:$0xff] %vm308_vm0, %v3074_v57  ;;  %3135 = vst.msk [vmem:[#allocation5 + $0x4c] sm:$0xff] %vm308_vm0, %v3075_v58  ;;  %v2958_v3 = vmax.f32 %v8641_v4, %v8648_v45  ;;  %v2319_v48 = vmax.f32 %v8581_v43, %v2247_v32  ;;  %v2033_v25 = vmax.f32 %v8636_v7, %v8638_v50 }
 0x14d   : > { %v1892_v38 = vld [vmem:[#allocation3 + $0x12a] sm:$0xff]  ;;  %v8666_v18 = vld [vmem:[#allocation3 + $0x132] sm:$0xff]  ;;  %v2723_v51 = vmax.f32 %v8610_v16, %v8664_v44  ;;  %v8689_v34 = vmax.f32 %v2720_v8, %v8664_v44  ;;  %3136 = vst.msk [vmem:[#allocation5 + $0x54] sm:$0xff] %vm308_vm0, %v3076_v9  ;;  %v3077_v63 = vmax.f32 %v2956_v11, %v8664_v44  ;;  %v2034_v14 = vmax.f32 %v8650_v53, %v8652_v28 }
 0x14e   : > { %v8676_v35 = vld [vmem:[#allocation4 + $0xec] sm:$0xff]  ;;  %7098 = vmatmul.mubr.msk.f32.gmra.mxu1 %vm308_vm0, %v4601_v36  ;;  %v2391_v23 = vld [vmem:[#allocation3 + $0xf6] sm:$0xff]  ;;  %v1966_v10 = vld [vmem:[#allocation3 + $0x143] sm:$0xff]  ;;  %v2035_v26 = vmax.f32 %v8654_v52, %v1963_v59 }
 0x14f   : > { %v4602_v40 = vld [vmem:[#allocation4 + $0xe8] sm:$0xff]  ;;  %v1965_v2 = vld [vmem:[#allocation3 + $0x133] sm:$0xff]  ;;  %v3078_v61 = vmax.f32 %v2957_v56, %v8676_v35  ;;  %3137 = vst.msk [vmem:[#allocation5 + $0x64] sm:$0xff] %vm308_vm0, %v3077_v63  ;;  %v2463_v42 = vmax.f32 %v2319_v48, %v2391_v23  ;;  %v2038_v7 = vmax.f32 %v1894_v12, %v1966_v10 }
 0x150   : > { %v1964_v5 = vld [vmem:[#allocation3 + $0x12b] sm:$0xff]  ;;  %7100 = vmatprep.mubr.msk.f32.mxu1 %vm308_vm0, %v4602_v40  ;;  %v2106_v17 = vld [vmem:[#allocation3 + $0x114] sm:$0xff] }
 0x151   : > { %v2104_v6 = vld [vmem:[#allocation3 + $0x104] sm:$0xff]  ;;  %v2105_v21 = vld [vmem:[#allocation3 + $0x10c] sm:$0xff]  ;;  %v2036_v33 = vmax.f32 %v1892_v38, %v1964_v5  ;;  %v2109_v30 = vld [vmem:[#allocation3 + $0x134] sm:$0xff]  ;;  %3138 = vst.msk [vmem:[#allocation5 + $0x6c] sm:$0xff] %vm308_vm0, %v3078_v61  ;;  %v2178_v36 = vmax.f32 %v2034_v14, %v2106_v17 }
 0x152   : > { %v2248_v24 = vld [vmem:[#allocation3 + $0x105] sm:$0xff]  ;;  %v2176_v54 = vmax.f32 %v2032_v20, %v2104_v6  ;;  %v2249_v41 = vld [vmem:[#allocation3 + $0x10d] sm:$0xff]  ;;  %v2177_v62 = vmax.f32 %v2033_v25, %v2105_v21  ;;  %v2250_v8 = vld [vmem:[#allocation3 + $0x115] sm:$0xff]  ;;  %v2037_v20 = vmax.f32 %v8666_v18, %v1965_v2  ;;  %2535 = vst.msk [vmem:[#allocation4 + $0xf4] sm:$0xff] %vm308_vm0, %v2463_v42 }
 0x153   : > { %v1895_v43 = vld [vmem:[#allocation3 + $0x14a] sm:$0xff]  ;;  %v1896_v50 = vld [vmem:[#allocation3 + $0x152] sm:$0xff]  ;;  %v2322_v63 = vmax.f32 %v2178_v36, %v2250_v8  ;;  %v1897_v6 = vld [vmem:[#allocation3 + $0x162] sm:$0xff] }
 0x154   : > { %v1967_v19 = vld [vmem:[#allocation3 + $0x14b] sm:$0xff]  ;;  %v1968_v46 = vld [vmem:[#allocation3 + $0x153] sm:$0xff]  ;;  %v2320_v1 = vmax.f32 %v2176_v54, %v2248_v24  ;;  %v2321_v38 = vmax.f32 %v2177_v62, %v2249_v41  ;;  %v2181_v9 = vmax.f32 %v2037_v20, %v2109_v30  ;;  %v1969_v24 = vld [vmem:[#allocation3 + $0x163] sm:$0xff] }
 0x155   : > { %v2392_v37 = vld [vmem:[#allocation3 + $0x106] sm:$0xff]  ;;  %v2393_v15 = vld [vmem:[#allocation3 + $0x10e] sm:$0xff]  ;;  %v2394_v59 = vld [vmem:[#allocation3 + $0x116] sm:$0xff]  ;;  %v2039_v18 = vmax.f32 %v1895_v43, %v1967_v19  ;;  %v2040_v8 = vmax.f32 %v1896_v50, %v1968_v46 }
 0x156   : > { %v2107_v22 = vld [vmem:[#allocation3 + $0x124] sm:$0xff]  ;;  %v2108_v60 = vld [vmem:[#allocation3 + $0x12c] sm:$0xff]  ;;  %v2253_v58 = vld [vmem:[#allocation3 + $0x135] sm:$0xff]  ;;  %v2464_v10 = vmax.f32 %v2320_v1, %v2392_v37  ;;  %v2465_v17 = vmax.f32 %v2321_v38, %v2393_v15  ;;  %v2466_v43 = vmax.f32 %v2322_v63, %v2394_v59  ;;  %v2041_v1 = vmax.f32 %v1897_v6, %v1969_v24 }
 0x157   : > { %v2179_v53 = vmax.f32 %v2035_v26, %v2107_v22  ;;  %v2180_v28 = vmax.f32 %v2036_v33, %v2108_v60  ;;  %v2251_v52 = vld [vmem:[#allocation3 + $0x125] sm:$0xff]  ;;  %v2252_v57 = vld [vmem:[#allocation3 + $0x12d] sm:$0xff]  ;;  %v2397_v25 = vld [vmem:[#allocation3 + $0x136] sm:$0xff]  ;;  %v2325_v54 = vmax.f32 %v2181_v9, %v2253_v58  ;;  %v2724_v38 = vmax.f32 %v8622_v47, %v8676_v35 }
 0x158   : > { %v2110_v32 = vld [vmem:[#allocation3 + $0x144] sm:$0xff]  ;;  %v2396_v56 = vld [vmem:[#allocation3 + $0x12e] sm:$0xff]  ;;  %2536 = vst.msk [vmem:[#allocation4 + $0x104] sm:$0xff] %vm308_vm0, %v2464_v10  ;;  %2537 = vst.msk [vmem:[#allocation4 + $0x10c] sm:$0xff] %vm308_vm0, %v2465_v17  ;;  %v8723_v59 = vmax.f32 %v2721_v39, %v8676_v35  ;;  %v2959_v47 = vmax.f32 %v8657_v13, %v8664_v44  ;;  %v2960_v39 = vmax.f32 %v8660_v49, %v8676_v35 }
 0x159   : > { %v2395_v11 = vld [vmem:[#allocation3 + $0x126] sm:$0xff]  ;;  %v2182_v5 = vmax.f32 %v2038_v7, %v2110_v32  ;;  %v1899_v2 = vld [vmem:[#allocation3 + $0x172] sm:$0xff]  ;;  %v2323_v61 = vmax.f32 %v2179_v53, %v2251_v52  ;;  %v2324_v48 = vmax.f32 %v2180_v28, %v2252_v57  ;;  %v2469_v60 = vmax.f32 %v2325_v54, %v2397_v25  ;;  %2538 = vst.msk [vmem:[#allocation4 + $0x114] sm:$0xff] %vm308_vm0, %v2466_v43 }
 0x15a   : > { %v2111_v40 = vld [vmem:[#allocation3 + $0x14c] sm:$0xff]  ;;  %v1900_v33 = vld [vmem:[#allocation3 + $0x182] sm:$0xff]  ;;  %v2112_v22 = vld [vmem:[#allocation3 + $0x154] sm:$0xff] }
 0x15b   : > { %v2254_v23 = vld [vmem:[#allocation3 + $0x145] sm:$0xff]  ;;  %v1971_v12 = vld [vmem:[#allocation3 + $0x173] sm:$0xff]  ;;  %v2183_v41 = vmax.f32 %v2039_v18, %v2111_v40  ;;  %v2467_v19 = vmax.f32 %v2323_v61, %v2395_v11  ;;  %v2468_v42 = vmax.f32 %v2324_v48, %v2396_v56  ;;  %v2184_v52 = vmax.f32 %v2040_v8, %v2112_v22  ;;  %2541 = vst.msk [vmem:[#allocation4 + $0x134] sm:$0xff] %vm308_vm0, %v2469_v60 }
 0x15c   : > { %v1898_v21 = vld [vmem:[#allocation3 + $0x16a] sm:$0xff]  ;;  %v2326_v14 = vmax.f32 %v2182_v5, %v2254_v23  ;;  %v8710_v53 = vld [vmem:[#allocation3 + $0x192] sm:$0xff]  ;;  %v2043_v57 = vmax.f32 %v1899_v2, %v1971_v12 }
 0x15d   : > { %v1970_v26 = vld [vmem:[#allocation3 + $0x16b] sm:$0xff]  ;;  %v1972_v30 = vld [vmem:[#allocation3 + $0x183] sm:$0xff]  ;;  %2539 = vst.msk [vmem:[#allocation4 + $0x124] sm:$0xff] %vm308_vm0, %v2467_v19  ;;  %2540 = vst.msk [vmem:[#allocation4 + $0x12c] sm:$0xff] %vm308_vm0, %v2468_v42 }
 0x15e   : > { %v2255_v62 = vld [vmem:[#allocation3 + $0x14d] sm:$0xff]  ;;  %v2042_v50 = vmax.f32 %v1898_v21, %v1970_v26  ;;  %v2113_v46 = vld [vmem:[#allocation3 + $0x164] sm:$0xff]  ;;  %v2044_v58 = vmax.f32 %v1900_v33, %v1972_v30  ;;  %v2256_v56 = vld [vmem:[#allocation3 + $0x155] sm:$0xff] }
 0x15f   : > { %v2398_v37 = vld [vmem:[#allocation3 + $0x146] sm:$0xff]  ;;  %v2327_v20 = vmax.f32 %v2183_v41, %v2255_v62  ;;  %v2399_v28 = vld [vmem:[#allocation3 + $0x14e] sm:$0xff]  ;;  %v8727_v18 = vmax.f32 %v2041_v1, %v2113_v46  ;;  %v2328_v2 = vmax.f32 %v2184_v52, %v2256_v56  ;;  %v2400_v61 = vld [vmem:[#allocation3 + $0x156] sm:$0xff] }
 0x160   : > { %v2470_v7 = vmax.f32 %v2326_v14, %v2398_v37  ;;  %v1901_v15 = vld [vmem:[#allocation3 + $0x18a] sm:$0xff]  ;;  %v8715_v32 = vld [vmem:[#allocation3 + $0x193] sm:$0xff]  ;;  %v8821_v46 = vld [vmem:[#allocation3 + $0x1a2] sm:$0xff] }
 0x161   : > { %v1973_v36 = vld [vmem:[#allocation3 + $0x18b] sm:$0xff]  ;;  %v2471_v11 = vmax.f32 %v2327_v20, %v2399_v28  ;;  %v2115_v40 = vld [vmem:[#allocation3 + $0x174] sm:$0xff]  ;;  %v2046_v25 = vmax.f32 %v8710_v53, %v8715_v32  ;;  %v2472_v6 = vmax.f32 %v2328_v2, %v2400_v61 }
 0x162   : > { %2542 = vst.msk [vmem:[#allocation4 + $0x144] sm:$0xff] %vm308_vm0, %v2470_v7  ;;  %v2114_v9 = vld [vmem:[#allocation3 + $0x16c] sm:$0xff]  ;;  %v8729_v5 = vld [vmem:[#allocation4 + $0xf4] sm:$0xff]  ;;  %v8733_v10 = vmax.f32 %v2043_v57, %v2115_v40  ;;  %v2045_v55 = vmax.f32 %v1901_v15, %v1973_v36  ;;  %v2116_v48 = vld [vmem:[#allocation3 + $0x184] sm:$0xff] }
 0x163   : > { %v4603_v23 = vld [vmem:[#allocation4 + $0xf0] sm:$0xff]  ;;  %v8731_v12 = vmax.f32 %v2042_v50, %v2114_v9  ;;  %v3079_v63 = vmax.f32 %v2958_v3, %v8729_v5  ;;  %2543 = vst.msk [vmem:[#allocation4 + $0x14c] sm:$0xff] %vm308_vm0, %v2471_v11  ;;  %v2725_v13 = vmax.f32 %v8648_v45, %v8729_v5  ;;  %v2843_v49 = vmax.f32 %v2722_v31, %v8729_v5  ;;  %v8753_v4 = vld [vmem:[#allocation3 + $0x165] sm:$0xff] }
 0x164   : > { %7101 = vmatmul.mubr.msk.f32.gmra.mxu1 %vm308_vm0, %v4603_v23  ;;  %v8755_v3 = vld [vmem:[#allocation3 + $0x16d] sm:$0xff]  ;;  %v8757_v21 = vld [vmem:[#allocation3 + $0x175] sm:$0xff]  ;;  %v8759_v24 = vmax.f32 %v2044_v58, %v2116_v48  ;;  %v2961_v17 = vmax.f32 %v8681_v29, %v8729_v5  ;;  %v8764_v54 = vld [vmem:[#allocation4 + $0x104] sm:$0xff]  ;;  %v2329_v0 = vmax.f32 %v8727_v18, %v8753_v4  ;;  %2544 = vst.msk [vmem:[#allocation4 + $0x154] sm:$0xff] %vm308_vm0, %v2472_v6 }
 0x165   : > { %3139 = vst.msk [vmem:[#allocation5 + $0x74] sm:$0xff] %vm308_vm0, %v3079_v63  ;;  %v2330_v45 = vmax.f32 %v8731_v12, %v8755_v3  ;;  %v2331_v31 = vmax.f32 %v8733_v10, %v8757_v21  ;;  %v2117_v41 = vld [vmem:[#allocation3 + $0x18c] sm:$0xff]  ;;  %v2726_v26 = vmax.f32 %v8664_v44, %v8764_v54  ;;  %v8780_v29 = vmax.f32 %v2723_v51, %v8764_v54  ;;  %v8793_v16 = vld [vmem:[#allocation4 + $0x114] sm:$0xff]  ;;  %v8795_v51 = vld [vmem:[#allocation4 + $0x124] sm:$0xff] }
 0x166   : > { %v8772_v14 = vld [vmem:[#allocation4 + $0x10c] sm:$0xff]  ;;  %v3080_v33 = vmax.f32 %v2959_v47, %v8764_v54  ;;  %v8784_v43 = vmax.f32 %v2045_v55, %v2117_v41  ;;  %v2962_v62 = vmax.f32 %v8689_v34, %v8764_v54  ;;  %v2846_v22 = vmax.f32 %v2725_v13, %v8793_v16  ;;  %v8807_v7 = vld [vmem:[#allocation4 + $0x134] sm:$0xff]  ;;  %v8823_v57 = vld [vmem:[#allocation3 + $0x1a3] sm:$0xff] }
 0x167   : > { %v4604_v30 = vld [vmem:[#allocation4 + $0x108] sm:$0xff]  ;;  %v2727_v19 = vmax.f32 %v8676_v35, %v8772_v14  ;;  %v2845_v42 = vmax.f32 %v2724_v38, %v8772_v14  ;;  %v3081_v37 = vmax.f32 %v2960_v39, %v8772_v14  ;;  %v4605_v44 = vld [vmem:[#allocation4 + $0x110] sm:$0xff]  ;;  %v2963_v8 = vmax.f32 %v8723_v59, %v8772_v14 }
 0x168   : > { %7103 = vmatprep.mubr.msk.f32.mxu1 %vm308_vm0, %v4604_v30  ;;  %3140 = vst.msk [vmem:[#allocation5 + $0x84] sm:$0xff] %vm308_vm0, %v3080_v33  ;;  %v2728_v35 = vmax.f32 %v8729_v5, %v8793_v16  ;;  %v3082_v34 = vmax.f32 %v2961_v17, %v8793_v16  ;;  %v8805_v60 = vld [vmem:[#allocation4 + $0x12c] sm:$0xff]  ;;  %v2118_v15 = vld [vmem:[#allocation3 + $0x194] sm:$0xff]  ;;  %v2964_v36 = vmax.f32 %v2843_v49, %v8793_v16  ;;  %v8854_v49 = vld [vmem:[#allocation3 + $0x1c2] sm:$0xff] }
 0x169   : > { %7104 = vmatmul.mubr.msk.f32.gmra.mxu1 %vm308_vm0, %v4605_v44  ;;  %v4606_v20 = vld [vmem:[#allocation4 + $0x128] sm:$0xff]  ;;  %3141 = vst.msk [vmem:[#allocation5 + $0x8c] sm:$0xff] %vm308_vm0, %v3081_v37  ;;  %v2729_v53 = vmax.f32 %v8764_v54, %v8795_v51  ;;  %v2730_v28 = vmax.f32 %v8772_v14, %v8805_v60  ;;  %v8818_v52 = vmax.f32 %v2726_v26, %v8795_v51  ;;  %v4607_v50 = vld [vmem:[#allocation4 + $0x130] sm:$0xff] }
 0x16a   : > { %v8809_v1 = vld [vmem:[#allocation3 + $0x185] sm:$0xff]  ;;  %7106 = vmatprep.mubr.msk.f32.mxu1 %vm308_vm0, %v4606_v20  ;;  %3142 = vst.msk [vmem:[#allocation5 + $0x94] sm:$0xff] %vm308_vm0, %v3082_v34  ;;  %v2965_v58 = vmax.f32 %v8780_v29, %v8795_v51  ;;  %v2966_v32 = vmax.f32 %v2845_v42, %v8805_v60  ;;  %v3083_v38 = vmax.f32 %v2962_v62, %v8795_v51  ;;  %v2402_v61 = vld [vmem:[#allocation3 + $0x16e] sm:$0xff]  ;;  %v2403_v48 = vld [vmem:[#allocation3 + $0x176] sm:$0xff] }
 0x16b   : > { %v3084_v59 = vmax.f32 %v2963_v8, %v8805_v60  ;;  %v8831_v11 = vld [vmem:[#allocation4 + $0x144] sm:$0xff]  ;;  %v8833_v56 = vld [vmem:[#allocation4 + $0x14c] sm:$0xff]  ;;  %v2967_v40 = vmax.f32 %v2846_v22, %v8807_v7  ;;  %v3085_v5 = vmax.f32 %v2964_v36, %v8807_v7  ;;  %v2332_v23 = vmax.f32 %v8759_v24, %v8809_v1  ;;  %v8870_v29 = vld [vmem:[#allocation4 + $0x154] sm:$0xff] }
 0x16c   : > { %v4608_v9 = vld [vmem:[#allocation4 + $0x148] sm:$0xff]  ;;  %v8839_v2 = vmax.f32 %v2046_v25, %v2118_v15  ;;  %v8842_v55 = vmax.f32 %v2727_v19, %v8805_v60  ;;  %3143 = vst.msk [vmem:[#allocation5 + $0xa4] sm:$0xff] %vm308_vm0, %v3083_v38  ;;  %v2731_v47 = vmax.f32 %v8793_v16, %v8807_v7  ;;  %v8849_v39 = vmax.f32 %v2728_v35, %v8807_v7  ;;  %v2262_v30 = vld [vmem:[#allocation3 + $0x195] sm:$0xff] }
 0x16d   : > { %3144 = vst.msk [vmem:[#allocation5 + $0xac] sm:$0xff] %vm308_vm0, %v3084_v59  ;;  %7107 = vmatmul.mubr.msk.f32.gmra.mxu1 %vm308_vm0, %v4607_v50  ;;  %v2401_v63 = vld [vmem:[#allocation3 + $0x166] sm:$0xff]  ;;  %v2047_v13 = vmax.f32 %v8821_v46, %v8823_v57  ;;  %3145 = vst.msk [vmem:[#allocation5 + $0xb4] sm:$0xff] %vm308_vm0, %v3085_v5  ;;  %v2732_v54 = vmax.f32 %v8795_v51, %v8831_v11  ;;  %v2733_v41 = vmax.f32 %v8805_v60, %v8833_v56  ;;  %v2405_v35 = vld [vmem:[#allocation3 + $0x18e] sm:$0xff] }
 0x16e   : > { %v2261_v25 = vld [vmem:[#allocation3 + $0x18d] sm:$0xff]  ;;  %v8858_v24 = vld [vmem:[#allocation3 + $0x1c3] sm:$0xff]  ;;  %v3086_v14 = vmax.f32 %v2965_v58, %v8831_v11  ;;  %v3087_v26 = vmax.f32 %v2966_v32, %v8833_v56  ;;  %7109 = vmatprep.mubr.msk.f32.mxu1 %vm308_vm0, %v4608_v9  ;;  %v8873_v62 = vmax.f32 %v2729_v53, %v8831_v11  ;;  %v8876_v37 = vmax.f32 %v2730_v28, %v8833_v56  ;;  %v2406_v46 = vld [vmem:[#allocation3 + $0x196] sm:$0xff] }
 0x16f   : > { %v8856_v6 = vld [vmem:[#allocation3 + $0x1ca] sm:$0xff]  ;;  %v2968_v44 = vmax.f32 %v8818_v52, %v8831_v11  ;;  %v3088_v8 = vmax.f32 %v2967_v40, %v8870_v29  ;;  %v1905_v34 = vld [vmem:[#allocation3 + $0x1b2] sm:$0xff]  ;;  %v2473_v36 = vmax.f32 %v2329_v0, %v2401_v63  ;;  %v2474_v53 = vmax.f32 %v2330_v45, %v2402_v61  ;;  %v1909_v45 = vld [vmem:[#allocation3 + $0x1e2] sm:$0xff] }
 0x170   : > { %v8860_v17 = vld [vmem:[#allocation3 + $0x1cb] sm:$0xff]  ;;  %v1977_v20 = vld [vmem:[#allocation3 + $0x1b3] sm:$0xff]  ;;  %3146 = vst.msk [vmem:[#allocation5 + $0xc4] sm:$0xff] %vm308_vm0, %v3086_v14  ;;  %3147 = vst.msk [vmem:[#allocation5 + $0xcc] sm:$0xff] %vm308_vm0, %v3087_v26  ;;  %v2475_v28 = vmax.f32 %v2331_v31, %v2403_v48  ;;  %v2333_v50 = vmax.f32 %v8784_v43, %v2261_v25  ;;  %v2334_v4 = vmax.f32 %v8839_v2, %v2262_v30 }
 0x171   : > { %v2404_v33 = vld [vmem:[#allocation3 + $0x186] sm:$0xff]  ;;  %v4609_v15 = vld [vmem:[#allocation4 + $0x150] sm:$0xff]  ;;  %3148 = vst.msk [vmem:[#allocation5 + $0xd4] sm:$0xff] %vm308_vm0, %v3088_v8  ;;  %2545 = vst.msk [vmem:[#allocation4 + $0x164] sm:$0xff] %vm308_vm0, %v2473_v36  ;;  %v2049_v59 = vmax.f32 %v1905_v34, %v1977_v20  ;;  %v2050_v9 = vmax.f32 %v8854_v49, %v8858_v24  ;;  %v2051_v40 = vmax.f32 %v8856_v6, %v8860_v17 }
 0x172   : > { %v1904_v19 = vld [vmem:[#allocation3 + $0x1aa] sm:$0xff]  ;;  %v1908_v32 = vld [vmem:[#allocation3 + $0x1d2] sm:$0xff]  ;;  %7110 = vmatmul.mubr.msk.f32.gmra.mxu1 %vm308_vm0, %v4609_v15  ;;  %v2476_v18 = vmax.f32 %v2332_v23, %v2404_v33  ;;  %2546 = vst.msk [vmem:[#allocation4 + $0x16c] sm:$0xff] %vm308_vm0, %v2474_v53  ;;  %2547 = vst.msk [vmem:[#allocation4 + $0x174] sm:$0xff] %vm308_vm0, %v2475_v28  ;;  %v2477_v21 = vmax.f32 %v2333_v50, %v2405_v35  ;;  %v2478_v63 = vmax.f32 %v2334_v4, %v2406_v46 }
 0x173   : > { %v1976_v42 = vld [vmem:[#allocation3 + $0x1ab] sm:$0xff]  ;;  %v1980_v38 = vld [vmem:[#allocation3 + $0x1d3] sm:$0xff]  ;;  %v1981_v10 = vld [vmem:[#allocation3 + $0x1e3] sm:$0xff]  ;;  %v2969_v53 = vmax.f32 %v8842_v55, %v8833_v56 }
 0x174   : > { %v2119_v22 = vld [vmem:[#allocation3 + $0x1a4] sm:$0xff]  ;;  %v2120_v57 = vld [vmem:[#allocation3 + $0x1ac] sm:$0xff]  ;;  %v2048_v12 = vmax.f32 %v1904_v19, %v1976_v42  ;;  %v2124_v5 = vld [vmem:[#allocation3 + $0x1d4] sm:$0xff]  ;;  %2548 = vst.msk [vmem:[#allocation4 + $0x184] sm:$0xff] %vm308_vm0, %v2476_v18  ;;  %v2052_v26 = vmax.f32 %v1908_v32, %v1980_v38  ;;  %v2053_v42 = vmax.f32 %v1909_v45, %v1981_v10  ;;  %v2734_v32 = vmax.f32 %v8807_v7, %v8870_v29 }
 0x175   : > { %v2122_v1 = vld [vmem:[#allocation3 + $0x1c4] sm:$0xff]  ;;  %v2191_v3 = vmax.f32 %v2047_v13, %v2119_v22  ;;  %v2123_v0 = vld [vmem:[#allocation3 + $0x1cc] sm:$0xff]  ;;  %v2121_v25 = vld [vmem:[#allocation3 + $0x1b4] sm:$0xff]  ;;  %2549 = vst.msk [vmem:[#allocation4 + $0x18c] sm:$0xff] %vm308_vm0, %v2477_v21  ;;  %v2852_v38 = vmax.f32 %v2731_v47, %v8870_v29 }
 0x176   : > { %v2263_v58 = vld [vmem:[#allocation3 + $0x1a5] sm:$0xff]  ;;  %v2264_v31 = vld [vmem:[#allocation3 + $0x1ad] sm:$0xff]  ;;  %v2192_v61 = vmax.f32 %v2048_v12, %v2120_v57  ;;  %v2193_v30 = vmax.f32 %v2049_v59, %v2121_v25  ;;  %v2265_v49 = vld [vmem:[#allocation3 + $0x1b5] sm:$0xff]  ;;  %v2194_v24 = vmax.f32 %v2050_v9, %v2122_v1  ;;  %v2195_v19 = vmax.f32 %v2051_v40, %v2123_v0  ;;  %2550 = vst.msk [vmem:[#allocation4 + $0x194] sm:$0xff] %vm308_vm0, %v2478_v63 }
 0x177   : > { %v2407_v43 = vld [vmem:[#allocation3 + $0x1a6] sm:$0xff]  ;;  %v2335_v48 = vmax.f32 %v2191_v3, %v2263_v58  ;;  %v2408_v33 = vld [vmem:[#allocation3 + $0x1ae] sm:$0xff]  ;;  %v2196_v34 = vmax.f32 %v2052_v26, %v2124_v5  ;;  %v2412_v20 = vld [vmem:[#allocation3 + $0x1d6] sm:$0xff]  ;;  %v2970_v12 = vmax.f32 %v8849_v39, %v8870_v29 }
 0x178   : > { %v1910_v23 = vld [vmem:[#allocation3 + $0x1ea] sm:$0xff]  ;;  %v2268_v17 = vld [vmem:[#allocation3 + $0x1d5] sm:$0xff]  ;;  %v2336_v8 = vmax.f32 %v2192_v61, %v2264_v31  ;;  %v2337_v28 = vmax.f32 %v2193_v30, %v2265_v49 }
 0x179   : > { %v1982_v2 = vld [vmem:[#allocation3 + $0x1eb] sm:$0xff]  ;;  %v2479_v35 = vmax.f32 %v2335_v48, %v2407_v43  ;;  %v8910_v58 = vld [vmem:[#allocation3 + $0x1f3] sm:$0xff]  ;;  %v2340_v4 = vmax.f32 %v2196_v34, %v2268_v17 }
 0x17a   : > { %v2266_v13 = vld [vmem:[#allocation3 + $0x1c5] sm:$0xff]  ;;  %v2267_v14 = vld [vmem:[#allocation3 + $0x1cd] sm:$0xff]  ;;  %v2054_v15 = vmax.f32 %v1910_v23, %v1982_v2  ;;  %v2480_v18 = vmax.f32 %v2336_v8, %v2408_v33  ;;  %v2409_v55 = vld [vmem:[#allocation3 + $0x1b6] sm:$0xff] }
 0x17b   : > { %v2410_v6 = vld [vmem:[#allocation3 + $0x1c6] sm:$0xff]  ;;  %v2411_v22 = vld [vmem:[#allocation3 + $0x1ce] sm:$0xff]  ;;  %v2338_v50 = vmax.f32 %v2194_v24, %v2266_v13  ;;  %v2339_v46 = vmax.f32 %v2195_v19, %v2267_v14  ;;  %2551 = vst.msk [vmem:[#allocation4 + $0x1a4] sm:$0xff] %vm308_vm0, %v2479_v35  ;;  %v2481_v3 = vmax.f32 %v2337_v28, %v2409_v55  ;;  %v2484_v16 = vmax.f32 %v2340_v4, %v2412_v20 }
 0x17c   : > { %v2125_v36 = vld [vmem:[#allocation3 + $0x1e4] sm:$0xff]  ;;  %v2126_v1 = vld [vmem:[#allocation3 + $0x1ec] sm:$0xff]  ;;  %2552 = vst.msk [vmem:[#allocation4 + $0x1ac] sm:$0xff] %vm308_vm0, %v2480_v18  ;;  %v8945_v5 = vld [vmem:[#allocation4 + $0x174] sm:$0xff] }
 0x17d   : > { %v8908_v57 = vld [vmem:[#allocation3 + $0x1f2] sm:$0xff]  ;;  %v2482_v0 = vmax.f32 %v2338_v50, %v2410_v6  ;;  %v2483_v45 = vmax.f32 %v2339_v46, %v2411_v22  ;;  %v8921_v10 = vld [vmem:[#allocation4 + $0x164] sm:$0xff]  ;;  %v8926_v7 = vmax.f32 %v2053_v42, %v2125_v36  ;;  %v8928_v47 = vmax.f32 %v2054_v15, %v2126_v1  ;;  %2553 = vst.msk [vmem:[#allocation4 + $0x1b4] sm:$0xff] %vm308_vm0, %v2481_v3 }
 0x17e   : > { %v8923_v21 = vld [vmem:[#allocation4 + $0x16c] sm:$0xff]  ;;  %v2055_v43 = vmax.f32 %v8908_v57, %v8910_v58  ;;  %v2735_v39 = vmax.f32 %v8831_v11, %v8921_v10  ;;  %v2853_v9 = vmax.f32 %v2732_v54, %v8921_v10  ;;  %v8947_v2 = vld [vmem:[#allocation4 + $0x184] sm:$0xff]  ;;  %v2971_v51 = vmax.f32 %v8873_v62, %v8921_v10  ;;  %2556 = vst.msk [vmem:[#allocation4 + $0x1d4] sm:$0xff] %vm308_vm0, %v2484_v16  ;;  %v8971_v52 = vld [vmem:[#allocation4 + $0x194] sm:$0xff] }
 0x17f   : > { %v4610_v31 = vld [vmem:[#allocation4 + $0x168] sm:$0xff]  ;;  %v2736_v59 = vmax.f32 %v8833_v56, %v8923_v21  ;;  %v2854_v40 = vmax.f32 %v2733_v41, %v8923_v21  ;;  %v4611_v23 = vld [vmem:[#allocation4 + $0x170] sm:$0xff]  ;;  %2554 = vst.msk [vmem:[#allocation4 + $0x1c4] sm:$0xff] %vm308_vm0, %v2482_v0  ;;  %2555 = vst.msk [vmem:[#allocation4 + $0x1cc] sm:$0xff] %vm308_vm0, %v2483_v45  ;;  %v2972_v60 = vmax.f32 %v8876_v37, %v8923_v21 }
 0x180   : > { %7112 = vmatprep.mubr.msk.f32.mxu1 %vm308_vm0, %v4610_v31  ;;  %v3089_v56 = vmax.f32 %v2968_v44, %v8921_v10  ;;  %v3090_v54 = vmax.f32 %v2969_v53, %v8923_v21  ;;  %v8962_v41 = vld [vmem:[#allocation4 + $0x18c] sm:$0xff]  ;;  %v2737_v62 = vmax.f32 %v8870_v29, %v8945_v5  ;;  %v2855_v61 = vmax.f32 %v2734_v32, %v8945_v5  ;;  %v2127_v35 = vld [vmem:[#allocation3 + $0x1f4] sm:$0xff]  ;;  %v8998_v22 = vld [vmem:[#allocation3 + $0x202] sm:$0xff] }
 0x181   : > { %7113 = vmatmul.mubr.msk.f32.gmra.mxu1 %vm308_vm0, %v4611_v23  ;;  %v4612_v63 = vld [vmem:[#allocation4 + $0x188] sm:$0xff]  ;;  %v2973_v37 = vmax.f32 %v2852_v38, %v8945_v5  ;;  %v3091_v48 = vmax.f32 %v2970_v12, %v8945_v5  ;;  %v2738_v44 = vmax.f32 %v8921_v10, %v8947_v2  ;;  %v2739_v29 = vmax.f32 %v8923_v21, %v8962_v41  ;;  %v4613_v49 = vld [vmem:[#allocation4 + $0x190] sm:$0xff] }
 0x182   : > { %7115 = vmatprep.mubr.msk.f32.mxu1 %vm308_vm0, %v4612_v63  ;;  %v8973_v11 = vld [vmem:[#allocation3 + $0x1e5] sm:$0xff]  ;;  %3149 = vst.msk [vmem:[#allocation5 + $0xe4] sm:$0xff] %vm308_vm0, %v3089_v56  ;;  %3150 = vst.msk [vmem:[#allocation5 + $0xec] sm:$0xff] %vm308_vm0, %v3090_v54  ;;  %v2856_v25 = vmax.f32 %v2735_v39, %v8947_v2  ;;  %v2857_v13 = vmax.f32 %v2736_v59, %v8962_v41  ;;  %v2974_v14 = vmax.f32 %v2853_v9, %v8947_v2  ;;  %v8994_v42 = vld [vmem:[#allocation3 + $0x1ed] sm:$0xff] }
 0x183   : > { %3151 = vst.msk [vmem:[#allocation5 + $0xf4] sm:$0xff] %vm308_vm0, %v3091_v48  ;;  %v2975_v26 = vmax.f32 %v2854_v40, %v8962_v41  ;;  %v3092_v33 = vmax.f32 %v2971_v51, %v8947_v2  ;;  %v3093_v30 = vmax.f32 %v2972_v60, %v8962_v41  ;;  %v8988_v24 = vld [vmem:[#allocation4 + $0x1a4] sm:$0xff]  ;;  %v2858_v19 = vmax.f32 %v2737_v62, %v8971_v52  ;;  %v9004_v20 = vld [vmem:[#allocation4 + $0x1ac] sm:$0xff]  ;;  %v2271_v12 = vld [vmem:[#allocation3 + $0x1f5] sm:$0xff] }
 0x184   : > { %v2976_v6 = vmax.f32 %v2855_v61, %v8971_v52  ;;  %v3094_v17 = vmax.f32 %v2973_v37, %v8971_v52  ;;  %v2341_v8 = vmax.f32 %v8926_v7, %v8973_v11  ;;  %v2740_v34 = vmax.f32 %v8945_v5, %v8971_v52  ;;  %v4614_v28 = vld [vmem:[#allocation4 + $0x1a8] sm:$0xff]  ;;  %v9020_v18 = vld [vmem:[#allocation4 + $0x1b4] sm:$0xff] }
 0x185   : > { %7116 = vmatmul.mubr.msk.f32.gmra.mxu1 %vm308_vm0, %v4613_v49  ;;  %3152 = vst.msk [vmem:[#allocation5 + $0x104] sm:$0xff] %vm308_vm0, %v3092_v33  ;;  %3153 = vst.msk [vmem:[#allocation5 + $0x10c] sm:$0xff] %vm308_vm0, %v3093_v30  ;;  %v2741_v15 = vmax.f32 %v8947_v2, %v8988_v24  ;;  %v2977_v36 = vmax.f32 %v2856_v25, %v8988_v24  ;;  %v3095_v53 = vmax.f32 %v2974_v14, %v8988_v24  ;;  %v1984_v50 = vld [vmem:[#allocation3 + $0x203] sm:$0xff]  ;;  %v2414_v4 = vld [vmem:[#allocation3 + $0x1ee] sm:$0xff] }
 0x186   : > { %3154 = vst.msk [vmem:[#allocation5 + $0x114] sm:$0xff] %vm308_vm0, %v3094_v17  ;;  %v9012_v46 = vmax.f32 %v2738_v44, %v8988_v24  ;;  %v9015_v1 = vmax.f32 %v2739_v29, %v9004_v20  ;;  %v2978_v32 = vmax.f32 %v2857_v13, %v9004_v20  ;;  %v3096_v38 = vmax.f32 %v2975_v26, %v9004_v20  ;;  %v2413_v55 = vld [vmem:[#allocation3 + $0x1e6] sm:$0xff]  ;;  %v4615_v10 = vld [vmem:[#allocation4 + $0x1b0] sm:$0xff]  ;;  %v9030_v39 = vld [vmem:[#allocation2 + $0x298] sm:$0xff] }
 0x187   : > { %7118 = vmatprep.mubr.msk.f32.mxu1 %vm308_vm0, %v4614_v28  ;;  %v1913_v3 = vld [vmem:[#allocation3 + $0x20a] sm:$0xff]  ;;  %3155 = vst.msk [vmem:[#allocation5 + $0x124] sm:$0xff] %vm308_vm0, %v3095_v53  ;;  %v2979_v0 = vmax.f32 %v2858_v19, %v9020_v18  ;;  %v3097_v45 = vmax.f32 %v2976_v6, %v9020_v18  ;;  %v2342_v21 = vmax.f32 %v8928_v47, %v8994_v42  ;;  %v2415_v58 = vld [vmem:[#allocation3 + $0x1f6] sm:$0xff]  ;;  %v7327_v42 = vld [vmem:[#allocation2 + $0x220] sm:$0xff] }
 0x188   : > { %v2199_v31 = vmax.f32 %v2055_v43, %v2127_v35  ;;  %v1985_v16 = vld [vmem:[#allocation3 + $0x20b] sm:$0xff]  ;;  %v2742_v59 = vmax.f32 %v8962_v41, %v9004_v20  ;;  %3156 = vst.msk [vmem:[#allocation5 + $0x12c] sm:$0xff] %vm308_vm0, %v3096_v38  ;;  %v2743_v9 = vmax.f32 %v8971_v52, %v9020_v18  ;;  %v2056_v43 = vmax.f32 %v8998_v22, %v1984_v50  ;;  %v9043_v5 = vld [vmem:[#allocation2 + $0x278] sm:$0xff]  ;;  %v7328_v35 = vld [vmem:[#allocation2 + $0x240] sm:$0xff] }
 0x189   : > { %v2128_v7 = vld [vmem:[#allocation3 + $0x204] sm:$0xff]  ;;  %7119 = vmatmul.mubr.msk.f32.gmra.mxu1 %vm308_vm0, %v4615_v10  ;;  %v9040_v47 = vld [vmem:[#allocation4 + $0x1cc] sm:$0xff]  ;;  %v1543_v23 = vmax.f32 %v7978_v27, %v9043_v5  ;;  %v9048_v2 = vmax.f32 %v2740_v34, %v9020_v18  ;;  %3157 = vst.msk [vmem:[#allocation5 + $0x134] sm:$0xff] %vm308_vm0, %v3097_v45  ;;  %v9056_v54 = vld [vmem:[#allocation4 + $0x1d4] sm:$0xff]  ;;  %v2485_v13 = vmax.f32 %v2341_v8, %v2413_v55 }
 0x18a   : > { %v9038_v40 = vld [vmem:[#allocation4 + $0x1c4] sm:$0xff]  ;;  %v2745_v51 = vmax.f32 %v9004_v20, %v9040_v47  ;;  %v3099_v56 = vmax.f32 %v2978_v32, %v9040_v47  ;;  %v2981_v37 = vmax.f32 %v9015_v1, %v9040_v47  ;;  %v3100_v48 = vmax.f32 %v2979_v0, %v9056_v54  ;;  %v2129_v11 = vld [vmem:[#allocation3 + $0x20c] sm:$0xff]  ;;  %v7329_v28 = vld [vmem:[#allocation2 + $0x238] sm:$0xff] }
 0x18b   : > { %v4616_v57 = vld [vmem:[#allocation4 + $0x1c8] sm:$0xff]  ;;  %v3098_v60 = vmax.f32 %v2977_v36, %v9038_v40  ;;  %v9059_v27 = vmax.f32 %v2741_v15, %v9038_v40  ;;  %v2980_v61 = vmax.f32 %v9012_v46, %v9038_v40  ;;  %v4617_v25 = vld [vmem:[#allocation4 + $0x1d0] sm:$0xff]  ;;  %v2486_v14 = vmax.f32 %v2342_v21, %v2414_v4  ;;  %2557 = vst.msk [vmem:[#allocation4 + $0x1e4] sm:$0xff] %vm308_vm0, %v2485_v13  ;;  %v7330_v50 = vld [vmem:[#allocation2 + $0x258] sm:$0xff] }
 0x18c   : > { %7121 = vmatprep.mubr.msk.f32.mxu1 %vm308_vm0, %v4616_v57  ;;  %v1916_v63 = vld [vmem:[#allocation3 + $0x22a] sm:$0xff]  ;;  %3159 = vst.msk [vmem:[#allocation5 + $0x14c] sm:$0xff] %vm308_vm0, %v3099_v56  ;;  %v2343_v26 = vmax.f32 %v2199_v31, %v2271_v12  ;;  %v2057_v33 = vmax.f32 %v1913_v3, %v1985_v16  ;;  %3160 = vst.msk [vmem:[#allocation5 + $0x154] sm:$0xff] %vm308_vm0, %v3100_v48  ;;  %v2200_v19 = vmax.f32 %v2056_v43, %v2128_v7  ;;  %v9073_v38 = vld [vmem:[#allocation2 + $0x260] sm:$0xff] }
 0x18d   : > { %v1988_v62 = vld [vmem:[#allocation3 + $0x22b] sm:$0xff]  ;;  %3158 = vst.msk [vmem:[#allocation5 + $0x144] sm:$0xff] %vm308_vm0, %v3098_v60  ;;  %7122 = vmatmul.mubr.msk.f32.gmra.mxu1 %vm308_vm0, %v4617_v25  ;;  %v1738_v17 = vmax.f32 %v1543_v23, %v9030_v39  ;;  %v1154_v22 = vmax.f32 %v7327_v42, %v7328_v35  ;;  %2558 = vst.msk [vmem:[#allocation4 + $0x1ec] sm:$0xff] %vm308_vm0, %v2486_v14  ;;  %v1157_v32 = vmax.f32 %v7329_v28, %v7330_v50  ;;  %v6676_v45 = vld [vmem:[#allocation2 + $0x2a0] sm:$0xff] }
 0x18e   : > { %v2272_v44 = vld [vmem:[#allocation3 + $0x205] sm:$0xff]  ;;  %v2273_v6 = vld [vmem:[#allocation3 + $0x20d] sm:$0xff]  ;;  %v2060_v34 = vmax.f32 %v1916_v63, %v1988_v62  ;;  %v2487_v8 = vmax.f32 %v2343_v26, %v2415_v58  ;;  %v2201_v15 = vmax.f32 %v2057_v33, %v2129_v11  ;;  %v1158_v55 = vmax.f32 %v7328_v35, %v9073_v38  ;;  %v9081_v62 = vld [vmem:[#allocation2 + $0x2b8] sm:$0xff] }
 0x18f   : > { %v2132_v29 = vld [vmem:[#allocation3 + $0x22c] sm:$0xff]  ;;  %v2344_v12 = vmax.f32 %v2200_v19, %v2272_v44  ;;  %1835 = vst.msk [vmem:[#allocation3 + $0x218] sm:$0xff] %vm308_vm0, %v1738_v17  ;;  %v1349_v0 = vmax.f32 %v1154_v22, %v9073_v38  ;;  %v1352_v7 = vmax.f32 %v1157_v32, %v9043_v5  ;;  %v7332_v57 = vld [vmem:[#allocation2 + $0x280] sm:$0xff]  ;;  %v1161_v23 = vmax.f32 %v7330_v50, %v9043_v5  ;;  %v9102_v22 = vld [vmem:[#allocation2 + $0x2d8] sm:$0xff] }
 0x190   : > { %v1919_v30 = vld [vmem:[#allocation3 + $0x24a] sm:$0xff]  ;;  %v2204_v10 = vmax.f32 %v2060_v34, %v2132_v29  ;;  %2559 = vst.msk [vmem:[#allocation4 + $0x1f4] sm:$0xff] %vm308_vm0, %v2487_v8  ;;  %v2345_v31 = vmax.f32 %v2201_v15, %v2273_v6  ;;  %v1353_v58 = vmax.f32 %v1158_v55, %v7332_v57  ;;  %v9083_v48 = vld [vmem:[#allocation2 + $0x2c0] sm:$0xff]  ;;  %v1162_v19 = vmax.f32 %v9073_v38, %v7332_v57 }
 0x191   : > { %v1991_v49 = vld [vmem:[#allocation3 + $0x24b] sm:$0xff]  ;;  %v1544_v56 = vmax.f32 %v1349_v0, %v7332_v57  ;;  %v1547_v29 = vmax.f32 %v1352_v7, %v9030_v39  ;;  %v1356_v14 = vmax.f32 %v1161_v23, %v9030_v39  ;;  %v9087_v26 = vld [vmem:[#allocation2 + $0x2e0] sm:$0xff]  ;;  %v9095_v6 = vmax.f32 %v2742_v59, %v9040_v47 }
 0x192   : > { %v2416_v36 = vld [vmem:[#allocation3 + $0x206] sm:$0xff]  ;;  %v2417_v3 = vld [vmem:[#allocation3 + $0x20e] sm:$0xff]  ;;  %v2063_v21 = vmax.f32 %v1919_v30, %v1991_v49  ;;  %v1548_v25 = vmax.f32 %v1353_v58, %v6676_v45  ;;  %v2982_v17 = vmax.f32 %v9048_v2, %v9056_v54  ;;  %v1174_v2 = vmax.f32 %v9083_v48, %v9087_v26 }
 0x193   : > { %v2276_v53 = vld [vmem:[#allocation3 + $0x22d] sm:$0xff]  ;;  %v2488_v60 = vmax.f32 %v2344_v12, %v2416_v36  ;;  %v2489_v44 = vmax.f32 %v2345_v31, %v2417_v3  ;;  %v6412_v33 = vld [vmem:[#allocation2 + $0x300] sm:$0xff]  ;;  %v1739_v5 = vmax.f32 %v1544_v56, %v6676_v45  ;;  %v1742_v42 = vmax.f32 %v1547_v29, %v9081_v62 }
 0x194   : > { %v2135_v4 = vld [vmem:[#allocation3 + $0x24c] sm:$0xff]  ;;  %v2348_v63 = vmax.f32 %v2204_v10, %v2276_v53  ;;  %v1743_v35 = vmax.f32 %v1548_v25, %v9083_v48  ;;  %v9104_v34 = vld [vmem:[#allocation2 + $0x320] sm:$0xff]  ;;  %v1551_v59 = vmax.f32 %v1356_v14, %v9081_v62  ;;  %v1178_v36 = vmax.f32 %v9087_v26, %v6412_v33 }
 0x195   : > { %v2420_v16 = vld [vmem:[#allocation3 + $0x22e] sm:$0xff]  ;;  %v2207_v11 = vmax.f32 %v2063_v21, %v2135_v4  ;;  %2560 = vst.msk [vmem:[#allocation4 + $0x204] sm:$0xff] %vm308_vm0, %v2488_v60  ;;  %2561 = vst.msk [vmem:[#allocation4 + $0x20c] sm:$0xff] %vm308_vm0, %v2489_v44  ;;  %v2744_v28 = vmax.f32 %v8988_v24, %v9038_v40  ;;  %v2746_v50 = vmax.f32 %v9020_v18, %v9056_v54  ;;  %v9126_v38 = vld [vmem:[#allocation4 + $0x1e4] sm:$0xff] }
 0x196   : > { %v2279_v43 = vld [vmem:[#allocation3 + $0x24d] sm:$0xff]  ;;  %v2492_v30 = vmax.f32 %v2348_v63, %v2420_v16  ;;  %1836 = vst.msk [vmem:[#allocation3 + $0x220] sm:$0xff] %vm308_vm0, %v1739_v5  ;;  %v9124_v32 = vmax.f32 %v2743_v9, %v9056_v54  ;;  %1839 = vst.msk [vmem:[#allocation3 + $0x238] sm:$0xff] %vm308_vm0, %v1742_v42  ;;  %v2983_v24 = vmax.f32 %v9059_v27, %v9126_v38  ;;  %v2274_v25 = vld [vmem:[#allocation3 + $0x215] sm:$0xff] }
 0x197   : > { %v2423_v13 = vld [vmem:[#allocation3 + $0x24e] sm:$0xff]  ;;  %v2351_v49 = vmax.f32 %v2207_v11, %v2279_v43  ;;  %1840 = vst.msk [vmem:[#allocation3 + $0x240] sm:$0xff] %vm308_vm0, %v1743_v35  ;;  %v3101_v52 = vmax.f32 %v2980_v61, %v9126_v38  ;;  %v9144_v3 = vmax.f32 %v1162_v19, %v6676_v45  ;;  %v1746_v21 = vmax.f32 %v1551_v59, %v9102_v22  ;;  %v6700_v14 = vld [vmem:[#allocation2 + $0x360] sm:$0xff] }
 0x198   : > { %v9106_v8 = vld [vmem:[#allocation4 + $0x1ec] sm:$0xff]  ;;  %2564 = vst.msk [vmem:[#allocation4 + $0x22c] sm:$0xff] %vm308_vm0, %v2492_v30  ;;  %v9141_v9 = vld [vmem:[#allocation4 + $0x1f4] sm:$0xff]  ;;  %v1369_v20 = vmax.f32 %v1174_v2, %v6412_v33  ;;  %v2747_v7 = vmax.f32 %v9038_v40, %v9126_v38  ;;  %v9167_v57 = vmax.f32 %v2744_v28, %v9126_v38 }
 0x199   : > { %v4618_v15 = vld [vmem:[#allocation4 + $0x1e8] sm:$0xff]  ;;  %v2495_v41 = vmax.f32 %v2351_v49, %v2423_v13  ;;  %v1914_v55 = vld [vmem:[#allocation3 + $0x212] sm:$0xff]  ;;  %v3102_v18 = vmax.f32 %v2981_v37, %v9106_v8  ;;  %v2748_v27 = vmax.f32 %v9040_v47, %v9106_v8  ;;  %v2866_v46 = vmax.f32 %v2745_v51, %v9106_v8  ;;  %3161 = vst.msk [vmem:[#allocation5 + $0x164] sm:$0xff] %vm308_vm0, %v3101_v52  ;;  %v6604_v51 = vld [vmem:[#allocation2 + $0x340] sm:$0xff] }
 0x19a   : > { %v9114_v53 = vld [vmem:[#allocation3 + $0x26a] sm:$0xff]  ;;  %7124 = vmatprep.mubr.msk.f32.mxu1 %vm308_vm0, %v4618_v15  ;;  %v1986_v4 = vld [vmem:[#allocation3 + $0x213] sm:$0xff]  ;;  %v2984_v1 = vmax.f32 %v9095_v6, %v9106_v8  ;;  %v3103_v61 = vmax.f32 %v2982_v17, %v9141_v9  ;;  %v1373_v47 = vmax.f32 %v1178_v36, %v9104_v34  ;;  %v2749_v58 = vmax.f32 %v9056_v54, %v9141_v9 }
 0x19b   : > { %v4619_v12 = vld [vmem:[#allocation4 + $0x1f0] sm:$0xff]  ;;  %2567 = vst.msk [vmem:[#allocation4 + $0x24c] sm:$0xff] %vm308_vm0, %v2495_v41  ;;  %3162 = vst.msk [vmem:[#allocation5 + $0x16c] sm:$0xff] %vm308_vm0, %v3102_v18  ;;  %v2058_v10 = vmax.f32 %v1914_v55, %v1986_v4  ;;  %v9176_v63 = vmax.f32 %v2746_v50, %v9141_v9  ;;  %v1552_v13 = vmax.f32 %v9144_v3, %v9083_v48 }
 0x19c   : > { %v1994_v0 = vld [vmem:[#allocation3 + $0x26b] sm:$0xff]  ;;  %7125 = vmatmul.mubr.msk.f32.gmra.mxu1 %vm308_vm0, %v4619_v12  ;;  %3163 = vst.msk [vmem:[#allocation5 + $0x174] sm:$0xff] %vm308_vm0, %v3103_v61  ;;  %v2130_v23 = vld [vmem:[#allocation3 + $0x214] sm:$0xff]  ;;  %1843 = vst.msk [vmem:[#allocation3 + $0x258] sm:$0xff] %vm308_vm0, %v1746_v21  ;;  %v1568_v28 = vmax.f32 %v1373_v47, %v6604_v51 }
 0x19d   : > { %v9156_v37 = vld [vmem:[#allocation3 + $0x2ca] sm:$0xff]  ;;  %v2066_v60 = vmax.f32 %v9114_v53, %v1994_v0  ;;  %v1915_v17 = vld [vmem:[#allocation3 + $0x222] sm:$0xff]  ;;  %v2202_v48 = vmax.f32 %v2058_v10, %v2130_v23  ;;  %v2418_v41 = vld [vmem:[#allocation3 + $0x216] sm:$0xff]  ;;  %v1564_v53 = vmax.f32 %v1369_v20, %v9104_v34 }
 0x19e   : > { %v9158_v45 = vld [vmem:[#allocation3 + $0x2cb] sm:$0xff]  ;;  %v1987_v42 = vld [vmem:[#allocation3 + $0x223] sm:$0xff]  ;;  %v1989_v52 = vld [vmem:[#allocation3 + $0x233] sm:$0xff]  ;;  %v1763_v47 = vmax.f32 %v1568_v28, %v6700_v14 }
 0x19f   : > { %v1934_v31 = vld [vmem:[#allocation3 + $0x2ea] sm:$0xff]  ;;  %v2075_v33 = vmax.f32 %v9156_v37, %v9158_v45  ;;  %v2059_v59 = vmax.f32 %v1915_v17, %v1987_v42  ;;  %v2133_v18 = vld [vmem:[#allocation3 + $0x234] sm:$0xff]  ;;  %v2346_v3 = vmax.f32 %v2202_v48, %v2274_v25  ;;  %v1918_v34 = vld [vmem:[#allocation3 + $0x242] sm:$0xff]  ;;  %v1759_v20 = vmax.f32 %v1564_v53, %v6604_v51 }
 0x1a0   : > { %v2006_v16 = vld [vmem:[#allocation3 + $0x2eb] sm:$0xff]  ;;  %v2277_v45 = vld [vmem:[#allocation3 + $0x235] sm:$0xff]  ;;  %v1990_v10 = vld [vmem:[#allocation3 + $0x243] sm:$0xff]  ;;  %1860 = vst.msk [vmem:[#allocation3 + $0x2e0] sm:$0xff] %vm308_vm0, %v1763_v47 }
 0x1a1   : > { %v9172_v43 = vld [vmem:[#allocation4 + $0x204] sm:$0xff]  ;;  %v2138_v56 = vld [vmem:[#allocation3 + $0x26c] sm:$0xff]  ;;  %v2078_v15 = vmax.f32 %v1934_v31, %v2006_v16  ;;  %v2490_v23 = vmax.f32 %v2346_v3, %v2418_v41  ;;  %1856 = vst.msk [vmem:[#allocation3 + $0x2c0] sm:$0xff] %vm308_vm0, %v1759_v20 }
 0x1a2   : > { %v9178_v11 = vld [vmem:[#allocation4 + $0x20c] sm:$0xff]  ;;  %v3104_v44 = vmax.f32 %v2983_v24, %v9172_v43  ;;  %v2131_v35 = vld [vmem:[#allocation3 + $0x224] sm:$0xff]  ;;  %v9199_v12 = vmax.f32 %v2066_v60, %v2138_v56  ;;  %v2750_v51 = vmax.f32 %v9126_v38, %v9172_v43  ;;  %v2986_v40 = vmax.f32 %v9167_v57, %v9172_v43 }
 0x1a3   : > { %v4620_v29 = vld [vmem:[#allocation4 + $0x208] sm:$0xff]  ;;  %v2869_v49 = vmax.f32 %v2748_v27, %v9178_v11  ;;  %v2987_v19 = vmax.f32 %v2866_v46, %v9178_v11  ;;  %v3105_v6 = vmax.f32 %v2984_v1, %v9178_v11  ;;  %v2751_v50 = vmax.f32 %v9106_v8, %v9178_v11  ;;  %v1917_v24 = vld [vmem:[#allocation3 + $0x232] sm:$0xff]  ;;  %2562 = vst.msk [vmem:[#allocation4 + $0x214] sm:$0xff] %vm308_vm0, %v2490_v23 }
 0x1a4   : > { %v2147_v5 = vld [vmem:[#allocation3 + $0x2cc] sm:$0xff]  ;;  %7127 = vmatprep.mubr.msk.f32.mxu1 %vm308_vm0, %v4620_v29  ;;  %3164 = vst.msk [vmem:[#allocation5 + $0x184] sm:$0xff] %vm308_vm0, %v3104_v44  ;;  %v2203_v0 = vmax.f32 %v2059_v59, %v2131_v35  ;;  %v2061_v46 = vmax.f32 %v1917_v24, %v1989_v52  ;;  %v1747_v1 = vmax.f32 %v1552_v13, %v9087_v26  ;;  %v2134_v21 = vld [vmem:[#allocation3 + $0x244] sm:$0xff]  ;;  %v2421_v44 = vld [vmem:[#allocation3 + $0x236] sm:$0xff] }
 0x1a5   : > { %v2150_v30 = vld [vmem:[#allocation3 + $0x2ec] sm:$0xff]  ;;  %3165 = vst.msk [vmem:[#allocation5 + $0x18c] sm:$0xff] %vm308_vm0, %v3105_v6  ;;  %v2219_v31 = vmax.f32 %v2075_v33, %v2147_v5  ;;  %v2062_v26 = vmax.f32 %v1918_v34, %v1990_v10  ;;  %v2985_v6 = vmax.f32 %v9124_v32, %v9141_v9  ;;  %v2136_v17 = vld [vmem:[#allocation3 + $0x254] sm:$0xff]  ;;  %v9222_v41 = vld [vmem:[#allocation5 + $0x4] sm:$0xff] }
 0x1a6   : > { %v2275_v2 = vld [vmem:[#allocation3 + $0x225] sm:$0xff]  ;;  %v9202_v61 = vld [vmem:[#allocation3 + $0x26d] sm:$0xff]  ;;  %v2222_v16 = vmax.f32 %v2078_v15, %v2150_v30  ;;  %v2205_v56 = vmax.f32 %v2061_v46, %v2133_v18  ;;  %1844 = vst.msk [vmem:[#allocation3 + $0x260] sm:$0xff] %vm308_vm0, %v1747_v1 }
 0x1a7   : > { %v9191_v36 = vld [vmem:[#allocation4 + $0x22c] sm:$0xff]  ;;  %v2347_v60 = vmax.f32 %v2203_v0, %v2275_v2  ;;  %v2206_v15 = vmax.f32 %v2062_v26, %v2134_v21  ;;  %v9240_v3 = vld [vmem:[#allocation5 + $0x44] sm:$0xff] }
 0x1a8   : > { %v2990_v55 = vmax.f32 %v2869_v49, %v9191_v36  ;;  %v3108_v4 = vmax.f32 %v2987_v19, %v9191_v36  ;;  %v2419_v27 = vld [vmem:[#allocation3 + $0x226] sm:$0xff]  ;;  %v2426_v13 = vld [vmem:[#allocation3 + $0x26e] sm:$0xff]  ;;  %v2754_v14 = vmax.f32 %v9178_v11, %v9191_v36  ;;  %v2349_v35 = vmax.f32 %v2205_v56, %v2277_v45 }
 0x1a9   : > { %v9204_v8 = vld [vmem:[#allocation3 + $0x2cd] sm:$0xff]  ;;  %v2278_v29 = vld [vmem:[#allocation3 + $0x245] sm:$0xff]  ;;  %v2491_v42 = vmax.f32 %v2347_v60, %v2419_v27  ;;  %v9231_v53 = vmax.f32 %v2751_v50, %v9191_v36  ;;  %v9248_v50 = vmax.f32 %v2747_v7, %v9172_v43  ;;  %v2424_v7 = vld [vmem:[#allocation3 + $0x256] sm:$0xff] }
 0x1aa   : > { %v9206_v37 = vld [vmem:[#allocation3 + $0x2ed] sm:$0xff]  ;;  %3168 = vst.msk [vmem:[#allocation5 + $0x1ac] sm:$0xff] %vm308_vm0, %v3108_v4  ;;  %v9226_v11 = vld [vmem:[#allocation5 + $0x24] sm:$0xff]  ;;  %v2354_v4 = vmax.f32 %v9199_v12, %v9202_v61  ;;  %v2363_v24 = vmax.f32 %v2219_v31, %v9204_v8  ;;  %v2493_v27 = vmax.f32 %v2349_v35, %v2421_v44  ;;  %v2350_v12 = vmax.f32 %v2206_v15, %v2278_v29 }
 0x1ab   : > { %v9209_v25 = vld [vmem:[#allocation4 + $0x24c] sm:$0xff]  ;;  %v2366_v52 = vmax.f32 %v2222_v16, %v9206_v37  ;;  %2563 = vst.msk [vmem:[#allocation4 + $0x224] sm:$0xff] %vm308_vm0, %v2491_v42  ;;  %v9253_v1 = vld [vmem:[#allocation5 + $0x64] sm:$0xff] }
 0x1ac   : > { %v2435_v49 = vld [vmem:[#allocation3 + $0x2ce] sm:$0xff]  ;;  %v3111_v33 = vmax.f32 %v2990_v55, %v9209_v25  ;;  %v9228_v2 = vld [vmem:[#allocation5 + $0x5] sm:$0xff]  ;;  %v2498_v10 = vmax.f32 %v2354_v4, %v2426_v13  ;;  %2565 = vst.msk [vmem:[#allocation4 + $0x234] sm:$0xff] %vm308_vm0, %v2493_v27  ;;  %v2757_v60 = vmax.f32 %v9191_v36, %v9209_v25  ;;  %v9275_v56 = vmax.f32 %v2754_v14, %v9209_v25 }
 0x1ad   : > { %v2438_v19 = vld [vmem:[#allocation3 + $0x2ee] sm:$0xff]  ;;  %v2422_v28 = vld [vmem:[#allocation3 + $0x246] sm:$0xff]  ;;  %v2507_v21 = vmax.f32 %v2363_v24, %v2435_v49  ;;  %v3308_v14 = vmax.f32 %v9222_v41, %v9228_v2 }
 0x1ae   : > { %v1920_v5 = vld [vmem:[#allocation3 + $0x252] sm:$0xff]  ;;  %3171 = vst.msk [vmem:[#allocation5 + $0x1cc] sm:$0xff] %vm308_vm0, %v3111_v33  ;;  %v9257_v8 = vld [vmem:[#allocation5 + $0x25] sm:$0xff]  ;;  %v2510_v20 = vmax.f32 %v2366_v52, %v2438_v19  ;;  %v2494_v23 = vmax.f32 %v2350_v12, %v2422_v28  ;;  %v2993_v19 = vmax.f32 %v9231_v53, %v9209_v25  ;;  %2570 = vst.msk [vmem:[#allocation4 + $0x26c] sm:$0xff] %vm308_vm0, %v2498_v10 }
 0x1af   : > { %v1992_v30 = vld [vmem:[#allocation3 + $0x253] sm:$0xff]  ;;  %v9261_v45 = vld [vmem:[#allocation5 + $0x45] sm:$0xff]  ;;  %2579 = vst.msk [vmem:[#allocation4 + $0x2cc] sm:$0xff] %vm308_vm0, %v2507_v21  ;;  %v3311_v42 = vmax.f32 %v9226_v11, %v9257_v8 }
 0x1b0   : > { %v2064_v48 = vmax.f32 %v1920_v5, %v1992_v30  ;;  %v9224_v59 = vld [vmem:[#allocation5 + $0xc] sm:$0xff]  ;;  %v2280_v55 = vld [vmem:[#allocation3 + $0x255] sm:$0xff]  ;;  %v9265_v47 = vld [vmem:[#allocation5 + $0x84] sm:$0xff]  ;;  %2582 = vst.msk [vmem:[#allocation4 + $0x2ec] sm:$0xff] %vm308_vm0, %v2510_v20  ;;  %v3314_v24 = vmax.f32 %v9240_v3, %v9261_v45 }
 0x1b1   : > { %v9238_v18 = vld [vmem:[#allocation5 + $0x2c] sm:$0xff]  ;;  %v1921_v33 = vld [vmem:[#allocation3 + $0x262] sm:$0xff]  ;;  %2566 = vst.msk [vmem:[#allocation4 + $0x244] sm:$0xff] %vm308_vm0, %v2494_v23  ;;  %v9301_v41 = vld [vmem:[#allocation4 + $0x214] sm:$0xff] }
 0x1b2   : > { %v9242_v0 = vld [vmem:[#allocation5 + $0xd] sm:$0xff]  ;;  %v2208_v46 = vmax.f32 %v2064_v48, %v2136_v17  ;;  %v9269_v16 = vld [vmem:[#allocation5 + $0x65] sm:$0xff]  ;;  %v9313_v8 = vmax.f32 %v2749_v58, %v9301_v41 }
 0x1b3   : > { %v9251_v34 = vld [vmem:[#allocation5 + $0x4c] sm:$0xff]  ;;  %v1993_v5 = vld [vmem:[#allocation3 + $0x263] sm:$0xff]  ;;  %v3309_v17 = vmax.f32 %v9224_v59, %v9242_v0  ;;  %v3317_v0 = vmax.f32 %v9253_v1, %v9269_v16 }
 0x1b4   : > { %v9255_v61 = vld [vmem:[#allocation5 + $0x6c] sm:$0xff]  ;;  %v2352_v44 = vmax.f32 %v2208_v46, %v2280_v55  ;;  %v2137_v30 = vld [vmem:[#allocation3 + $0x264] sm:$0xff]  ;;  %v2065_v55 = vmax.f32 %v1921_v33, %v1993_v5 }
 0x1b5   : > { %v9259_v37 = vld [vmem:[#allocation5 + $0x2d] sm:$0xff]  ;;  %v9281_v13 = vld [vmem:[#allocation5 + $0x85] sm:$0xff] }
 0x1b6   : > { %v9267_v31 = vld [vmem:[#allocation5 + $0x4d] sm:$0xff]  ;;  %v2496_v35 = vmax.f32 %v2352_v44, %v2424_v7  ;;  %v1930_v15 = vld [vmem:[#allocation3 + $0x2c2] sm:$0xff]  ;;  %v3312_v4 = vmax.f32 %v9238_v18, %v9259_v37  ;;  %v2988_v7 = vmax.f32 %v9176_v63, %v9301_v41  ;;  %v3320_v54 = vmax.f32 %v9265_v47, %v9281_v13 }
 0x1b7   : > { %v9277_v26 = vld [vmem:[#allocation5 + $0x8c] sm:$0xff]  ;;  %v1933_v48 = vld [vmem:[#allocation3 + $0x2e2] sm:$0xff]  ;;  %v3315_v11 = vmax.f32 %v9251_v34, %v9267_v31  ;;  %v3106_v34 = vmax.f32 %v2985_v6, %v9301_v41  ;;  %v2209_v44 = vmax.f32 %v2065_v55, %v2137_v30 }
 0x1b8   : > { %v9279_v29 = vld [vmem:[#allocation5 + $0x6d] sm:$0xff]  ;;  %v2002_v28 = vld [vmem:[#allocation3 + $0x2c3] sm:$0xff]  ;;  %2568 = vst.msk [vmem:[#allocation4 + $0x254] sm:$0xff] %vm308_vm0, %v2496_v35 }
 0x1b9   : > { %v9283_v49 = vld [vmem:[#allocation5 + $0x8d] sm:$0xff]  ;;  %v2005_v59 = vld [vmem:[#allocation3 + $0x2e3] sm:$0xff]  ;;  %v2074_v52 = vmax.f32 %v1930_v15, %v2002_v28  ;;  %v3318_v27 = vmax.f32 %v9255_v61, %v9279_v29  ;;  %3166 = vst.msk [vmem:[#allocation5 + $0x194] sm:$0xff] %vm308_vm0, %v3106_v34 }
 0x1ba   : > { %v4621_v2 = vld [vmem:[#allocation4 + $0x210] sm:$0xff]  ;;  %v3368_v12 = vld [vmem:[#allocation5 + $0x6] sm:$0xff]  ;;  %v2077_v63 = vmax.f32 %v1933_v48, %v2005_v59  ;;  %v10294_v61 = vmax.f32 %v9277_v26, %v9283_v49 }
 0x1bb   : > { %v3369_v46 = vld [vmem:[#allocation5 + $0xe] sm:$0xff]  ;;  %7128 = vmatmul.mubr.msk.f32.gmra.mxu1 %vm308_vm0, %v4621_v2  ;;  %v2146_v10 = vld [vmem:[#allocation3 + $0x2c4] sm:$0xff]  ;;  %v9339_v55 = vmax.f32 %v3308_v14, %v3368_v12 }
 0x1bc   : > { %v2149_v21 = vld [vmem:[#allocation3 + $0x2e4] sm:$0xff]  ;;  %v2218_v33 = vmax.f32 %v2074_v52, %v2146_v10  ;;  %v9337_v28 = vld [vmem:[#allocation4 + $0x28c] sm:$0xff]  ;;  %v9341_v2 = vmax.f32 %v3309_v17, %v3369_v46  ;;  %v9343_v59 = vld [vmem:[#allocation4 + $0x234] sm:$0xff] }
 0x1bd   : > { %v2281_v20 = vld [vmem:[#allocation3 + $0x265] sm:$0xff]  ;;  %v4623_v52 = vld [vmem:[#allocation4 + $0x230] sm:$0xff]  ;;  %v2991_v17 = vmax.f32 %v9313_v8, %v9343_v59  ;;  %v3109_v12 = vmax.f32 %v2988_v7, %v9343_v59 }
 0x1be   : > { %v3371_v58 = vld [vmem:[#allocation5 + $0x26] sm:$0xff]  ;;  %v2353_v34 = vmax.f32 %v2209_v44, %v2281_v20  ;;  %v3372_v32 = vld [vmem:[#allocation5 + $0x2e] sm:$0xff] }
 0x1bf   : > { %v9325_v31 = vld [vmem:[#allocation4 + $0x224] sm:$0xff]  ;;  %v9345_v57 = vmax.f32 %v3311_v42, %v3371_v58  ;;  %v2642_v46 = vld [vmem:[#allocation4 + $0x26c] sm:$0xff]  ;;  %3169 = vst.msk [vmem:[#allocation5 + $0x1b4] sm:$0xff] %vm308_vm0, %v3109_v12  ;;  %v9369_v44 = vmax.f32 %v3312_v4, %v3372_v32 }
 0x1c0   : > { %v4622_v23 = vld [vmem:[#allocation4 + $0x228] sm:$0xff]  ;;  %v2989_v6 = vmax.f32 %v9248_v50, %v9325_v31  ;;  %v3107_v35 = vmax.f32 %v2986_v40, %v9325_v31  ;;  %v2221_v50 = vmax.f32 %v2077_v63, %v2149_v21  ;;  %v2753_v40 = vmax.f32 %v9172_v43, %v9325_v31 }
 0x1c1   : > { %v2290_v5 = vld [vmem:[#allocation3 + $0x2c5] sm:$0xff]  ;;  %7130 = vmatprep.mubr.msk.f32.mxu1 %vm308_vm0, %v4622_v23  ;;  %v9353_v14 = vmax.f32 %v2750_v51, %v9325_v31  ;;  %v2760_v43 = vmax.f32 %v9209_v25, %v2642_v46  ;;  %v3375_v51 = vld [vmem:[#allocation5 + $0x4e] sm:$0xff]  ;;  %v2878_v18 = vmax.f32 %v2757_v60, %v2642_v46  ;;  %v3114_v12 = vmax.f32 %v2993_v19, %v2642_v46 }
 0x1c2   : > { %v2293_v15 = vld [vmem:[#allocation3 + $0x2e5] sm:$0xff]  ;;  %v2362_v10 = vmax.f32 %v2218_v33, %v2290_v5  ;;  %3167 = vst.msk [vmem:[#allocation5 + $0x1a4] sm:$0xff] %vm308_vm0, %v3107_v35  ;;  %7131 = vmatmul.mubr.msk.f32.gmra.mxu1 %vm308_vm0, %v4623_v52  ;;  %v9376_v5 = vmax.f32 %v3315_v11, %v3375_v51  ;;  %v9378_v35 = vld [vmem:[#allocation4 + $0x254] sm:$0xff] }
 0x1c3   : > { %v2425_v48 = vld [vmem:[#allocation3 + $0x266] sm:$0xff]  ;;  %v2365_v23 = vmax.f32 %v2221_v50, %v2293_v15  ;;  %v4625_v15 = vld [vmem:[#allocation4 + $0x250] sm:$0xff]  ;;  %v2881_v3 = vmax.f32 %v2760_v43, %v9337_v28  ;;  %3174 = vst.msk [vmem:[#allocation5 + $0x1ec] sm:$0xff] %vm308_vm0, %v3114_v12 }
 0x1c4   : > { %v2434_v30 = vld [vmem:[#allocation3 + $0x2c6] sm:$0xff]  ;;  %v2497_v63 = vmax.f32 %v2353_v34, %v2425_v48  ;;  %v3378_v60 = vld [vmem:[#allocation5 + $0x6e] sm:$0xff] }
 0x1c5   : > { %v2437_v42 = vld [vmem:[#allocation3 + $0x2e6] sm:$0xff]  ;;  %v2506_v38 = vmax.f32 %v2362_v10, %v2434_v30  ;;  %v2999_v30 = vmax.f32 %v2878_v18, %v9337_v28  ;;  %v3381_v34 = vld [vmem:[#allocation5 + $0x8e] sm:$0xff] }
 0x1c6   : > { %v3374_v21 = vld [vmem:[#allocation5 + $0x46] sm:$0xff]  ;;  %v2509_v48 = vmax.f32 %v2365_v23, %v2437_v42  ;;  %2569 = vst.msk [vmem:[#allocation4 + $0x264] sm:$0xff] %vm308_vm0, %v2497_v63  ;;  %v3492_v1 = vld [vmem:[#allocation5 + $0x2f] sm:$0xff]  ;;  %v9428_v47 = vmax.f32 %v10294_v61, %v3381_v34 }
 0x1c7   : > { %v9360_v20 = vld [vmem:[#allocation4 + $0x244] sm:$0xff]  ;;  %v2824_v7 = vld [vmem:[#allocation4 + $0x2ac] sm:$0xff]  ;;  %v9374_v33 = vmax.f32 %v3314_v24, %v3374_v21  ;;  %2578 = vst.msk [vmem:[#allocation4 + $0x2c4] sm:$0xff] %vm308_vm0, %v2506_v38  ;;  %v3112_v24 = vmax.f32 %v2991_v17, %v9378_v35  ;;  %v3552_v49 = vmax.f32 %v9369_v44, %v3492_v1  ;;  %v3196_v1 = vld [vmem:[#allocation5 + $0x54] sm:$0xf] }
 0x1c8   : > { %v4624_v58 = vld [vmem:[#allocation4 + $0x248] sm:$0xff]  ;;  %v3110_v8 = vmax.f32 %v2989_v6, %v9360_v20  ;;  %v2763_v6 = vmax.f32 %v2642_v46, %v9337_v28  ;;  %v2756_v37 = vmax.f32 %v9325_v31, %v9360_v20  ;;  %v9390_v45 = vmax.f32 %v2753_v40, %v9360_v20  ;;  %2581 = vst.msk [vmem:[#allocation4 + $0x2e4] sm:$0xff] %vm308_vm0, %v2509_v48 }
 0x1c9   : > { %7133 = vmatprep.mubr.msk.f32.mxu1 %vm308_vm0, %v4624_v58  ;;  %v2992_v4 = vmax.f32 %v9353_v14, %v9360_v20  ;;  %v2945_v11 = vld [vmem:[#allocation4 + $0x2cc] sm:$0xff]  ;;  %v2996_v31 = vmax.f32 %v9275_v56, %v2642_v46  ;;  %v3002_v52 = vmax.f32 %v2881_v3, %v2824_v7  ;;  %3172 = vst.msk [vmem:[#allocation5 + $0x1d4] sm:$0xff] %vm308_vm0, %v3112_v24  ;;  %v9401_v40 = vld [vmem:[#allocation4 + $0x284] sm:$0xff]  ;;  %v3190_v14 = vld [vmem:[#allocation5 + $0x14] sm:$0xf] }
 0x1ca   : > { %3170 = vst.msk [vmem:[#allocation5 + $0x1c4] sm:$0xff] %vm308_vm0, %v3110_v8  ;;  %7134 = vmatmul.mubr.msk.f32.gmra.mxu1 %vm308_vm0, %v4625_v15  ;;  %v3377_v36 = vld [vmem:[#allocation5 + $0x66] sm:$0xff]  ;;  %v2884_v32 = vmax.f32 %v2763_v6, %v2824_v7  ;;  %v9414_v56 = vmax.f32 %v3318_v27, %v3378_v60  ;;  %v3489_v58 = vld [vmem:[#allocation5 + $0xf] sm:$0xff]  ;;  %v3120_v53 = vmax.f32 %v2999_v30, %v2824_v7 }
 0x1cb   : > { %v3380_v50 = vld [vmem:[#allocation5 + $0x86] sm:$0xff]  ;;  %v9409_v42 = vmax.f32 %v3317_v0, %v3377_v36  ;;  %v3117_v25 = vmax.f32 %v2996_v31, %v9337_v28  ;;  %v3123_v19 = vmax.f32 %v3002_v52, %v2945_v11  ;;  %v3495_v0 = vld [vmem:[#allocation5 + $0x4f] sm:$0xff]  ;;  %v3549_v28 = vmax.f32 %v9341_v2, %v3489_v58 }
 0x1cc   : > { %v3488_v10 = vld [vmem:[#allocation5 + $0x7] sm:$0xff]  ;;  %v9419_v21 = vmax.f32 %v3320_v54, %v3380_v50  ;;  %v3005_v63 = vmax.f32 %v2884_v32, %v2945_v11  ;;  %v9430_v13 = vld [vmem:[#allocation5 + $0x6f] sm:$0xff]  ;;  %3180 = vst.msk [vmem:[#allocation5 + $0x22c] sm:$0xff] %vm308_vm0, %v3120_v53  ;;  %v3555_v8 = vmax.f32 %v9376_v5, %v3495_v0 }
 0x1cd   : > { %v3066_v17 = vld [vmem:[#allocation4 + $0x2ec] sm:$0xff]  ;;  %v9422_v46 = vld [vmem:[#allocation4 + $0x2a4] sm:$0xff]  ;;  %v3548_v54 = vmax.f32 %v9339_v55, %v3488_v10  ;;  %3177 = vst.msk [vmem:[#allocation5 + $0x20c] sm:$0xff] %vm308_vm0, %v3117_v25  ;;  %3183 = vst.msk [vmem:[#allocation5 + $0x24c] sm:$0xff] %vm308_vm0, %v3123_v19  ;;  %v3558_v48 = vmax.f32 %v9414_v56, %v9430_v13 }
 0x1ce   : > { %v3491_v23 = vld [vmem:[#allocation5 + $0x27] sm:$0xff]  ;;  %v3126_v43 = vmax.f32 %v3005_v63, %v3066_v17  ;;  %v3501_v26 = vld [vmem:[#allocation5 + $0x8f] sm:$0xff]  ;;  %v9457_v17 = vld [vmem:[#allocation2 + $0x2f8] sm:$0xff] }
 0x1cf   : > { %v3494_v16 = vld [vmem:[#allocation5 + $0x47] sm:$0xff]  ;;  %v3551_v38 = vmax.f32 %v9345_v57, %v3491_v23  ;;  %v3609_v55 = vld [vmem:[#allocation5 + $0x10] sm:$0xff]  ;;  %v3561_v18 = vmax.f32 %v9428_v47, %v3501_v26  ;;  %v6415_v23 = vld [vmem:[#allocation2 + $0x318] sm:$0xff] }
 0x1d0   : > { %v3497_v29 = vld [vmem:[#allocation5 + $0x67] sm:$0xff]  ;;  %v3554_v51 = vmax.f32 %v9374_v33, %v3494_v16  ;;  %3186 = vst.msk [vmem:[#allocation5 + $0x26c] sm:$0xff] %vm308_vm0, %v3126_v43  ;;  %v3612_v11 = vld [vmem:[#allocation5 + $0x30] sm:$0xff]  ;;  %v3669_v34 = vmax.f32 %v3549_v28, %v3609_v55  ;;  %v6511_v55 = vld [vmem:[#allocation2 + $0x338] sm:$0xff] }
 0x1d1   : > { %v9432_v27 = vld [vmem:[#allocation5 + $0x87] sm:$0xff]  ;;  %v3557_v57 = vmax.f32 %v9409_v42, %v3497_v29  ;;  %v3615_v60 = vld [vmem:[#allocation5 + $0x50] sm:$0xff]  ;;  %v3672_v63 = vmax.f32 %v3552_v49, %v3612_v11 }
 0x1d2   : > { %v3608_v7 = vld [vmem:[#allocation5 + $0x8] sm:$0xff]  ;;  %v3560_v6 = vmax.f32 %v9419_v21, %v9432_v27  ;;  %v3618_v52 = vld [vmem:[#allocation5 + $0x70] sm:$0xff]  ;;  %v3675_v53 = vmax.f32 %v3555_v8, %v3615_v60  ;;  %3729 = vst.msk [vmem:[#allocation6 + $0xe] sm:$0xff] %vm308_vm0, %v3669_v34 }
 0x1d3   : > { %v2641_v15 = vld [vmem:[#allocation4 + $0x264] sm:$0xff]  ;;  %v3668_v50 = vmax.f32 %v3548_v54, %v3608_v7  ;;  %v3621_v58 = vld [vmem:[#allocation5 + $0x90] sm:$0xff]  ;;  %v3678_v47 = vmax.f32 %v3558_v48, %v3618_v52  ;;  %3733 = vst.msk [vmem:[#allocation6 + $0x2e] sm:$0xff] %vm308_vm0, %v3672_v63  ;;  %v1181_v7 = vmax.f32 %v9457_v17, %v6415_v23 }
 0x1d4   : > { %v4626_v2 = vld [vmem:[#allocation4 + $0x268] sm:$0xff]  ;;  %v2759_v44 = vmax.f32 %v9360_v20, %v2641_v15  ;;  %v2762_v33 = vmax.f32 %v2641_v15, %v9401_v40  ;;  %v2877_v5 = vmax.f32 %v2756_v37, %v2641_v15  ;;  %v2995_v24 = vmax.f32 %v9390_v45, %v2641_v15  ;;  %v970_v37 = vld [vmem:[#allocation2 + $0x278] sm:$0xff]  ;;  %v3193_v20 = vld [vmem:[#allocation5 + $0x34] sm:$0xf]  ;;  %3736 = vst.msk [vmem:[#allocation6 + $0x4e] sm:$0xff] %vm308_vm0, %v3675_v53 }
 0x1d5   : > { %v3611_v3 = vld [vmem:[#allocation5 + $0x28] sm:$0xff]  ;;  %7136 = vmatprep.mubr.msk.f32.mxu1 %vm308_vm0, %v4626_v2  ;;  %v3113_v30 = vmax.f32 %v2992_v4, %v2641_v15  ;;  %3728 = vst.msk [vmem:[#allocation6 + $0x6] sm:$0xff] %vm308_vm0, %v3668_v50  ;;  %v3199_v29 = vld [vmem:[#allocation5 + $0x74] sm:$0xf]  ;;  %v3681_v28 = vmax.f32 %v3561_v18, %v3621_v58  ;;  %3739 = vst.msk [vmem:[#allocation6 + $0x6e] sm:$0xff] %vm308_vm0, %v3678_v47 }
 0x1d6   : > { %v3614_v36 = vld [vmem:[#allocation5 + $0x48] sm:$0xff]  ;;  %v3671_v10 = vmax.f32 %v3551_v38, %v3611_v3  ;;  %v2880_v45 = vmax.f32 %v2759_v44, %v9401_v40  ;;  %v2883_v12 = vmax.f32 %v2762_v33, %v9422_v46  ;;  %v2998_v42 = vmax.f32 %v2877_v5, %v9401_v40  ;;  %v3253_v13 = vld [vmem:[#allocation5 + $0x35] sm:$0xf] }
 0x1d7   : > { %v3617_v32 = vld [vmem:[#allocation5 + $0x68] sm:$0xff]  ;;  %v3116_v56 = vmax.f32 %v2995_v24, %v9401_v40  ;;  %3173 = vst.msk [vmem:[#allocation5 + $0x1e4] sm:$0xff] %vm308_vm0, %v3113_v30  ;;  %v3674_v25 = vmax.f32 %v3554_v51, %v3614_v36  ;;  %v3250_v40 = vld [vmem:[#allocation5 + $0x15] sm:$0xf]  ;;  %v1165_v38 = vmax.f32 %v970_v37, %v9030_v39  ;;  %3742 = vst.msk [vmem:[#allocation6 + $0x8e] sm:$0xff] %vm308_vm0, %v3681_v28 }
 0x1d8   : > { %v2944_v31 = vld [vmem:[#allocation4 + $0x2c4] sm:$0xff]  ;;  %v3677_v19 = vmax.f32 %v3557_v57, %v3617_v32  ;;  %3732 = vst.msk [vmem:[#allocation6 + $0x26] sm:$0xff] %vm308_vm0, %v3671_v10  ;;  %v3001_v16 = vmax.f32 %v2880_v45, %v9422_v46  ;;  %v3119_v61 = vmax.f32 %v2998_v42, %v9422_v46  ;;  %v3256_v27 = vld [vmem:[#allocation5 + $0x55] sm:$0xf]  ;;  %v1177_v46 = vmax.f32 %v9102_v22, %v9457_v17  ;;  %v3204_v63 = vld [vmem:[#allocation5 + $0xac] sm:$0xff] }
 0x1d9   : > { %v3620_v21 = vld [vmem:[#allocation5 + $0x88] sm:$0xff]  ;;  %v3004_v0 = vmax.f32 %v2883_v12, %v2944_v31  ;;  %3176 = vst.msk [vmem:[#allocation5 + $0x204] sm:$0xff] %vm308_vm0, %v3116_v56  ;;  %3735 = vst.msk [vmem:[#allocation6 + $0x46] sm:$0xff] %vm308_vm0, %v3674_v25  ;;  %v3202_v43 = vld [vmem:[#allocation5 + $0x94] sm:$0xf]  ;;  %v3310_v2 = vmax.f32 %v3190_v14, %v3250_v40  ;;  %v1360_v39 = vmax.f32 %v1165_v38, %v9081_v62 }
 0x1da   : > { %v3065_v4 = vld [vmem:[#allocation4 + $0x2e4] sm:$0xff]  ;;  %v3680_v54 = vmax.f32 %v3560_v6, %v3620_v21  ;;  %3738 = vst.msk [vmem:[#allocation6 + $0x66] sm:$0xff] %vm308_vm0, %v3677_v19  ;;  %v3259_v26 = vld [vmem:[#allocation5 + $0x75] sm:$0xf]  ;;  %v3122_v51 = vmax.f32 %v3001_v16, %v2944_v31  ;;  %3179 = vst.msk [vmem:[#allocation5 + $0x224] sm:$0xff] %vm308_vm0, %v3119_v61  ;;  %v1372_v48 = vmax.f32 %v1177_v46, %v6415_v23 }
 0x1db   : > { %v3262_v49 = vld [vmem:[#allocation5 + $0x95] sm:$0xf]  ;;  %v3125_v8 = vmax.f32 %v3004_v0, %v3065_v4  ;;  %v3313_v18 = vmax.f32 %v3193_v20, %v3253_v13  ;;  %v3316_v3 = vmax.f32 %v3196_v1, %v3256_v27  ;;  %v1376_v24 = vmax.f32 %v1181_v7, %v6511_v55  ;;  %v3203_v4 = vld [vmem:[#allocation5 + $0xa4] sm:$0xff]  ;;  %v3264_v53 = vld [vmem:[#allocation5 + $0xad] sm:$0xff] }
 0x1dc   : > { %v6607_v15 = vld [vmem:[#allocation2 + $0x358] sm:$0xff]  ;;  %3741 = vst.msk [vmem:[#allocation6 + $0x86] sm:$0xff] %vm308_vm0, %v3680_v54  ;;  %3182 = vst.msk [vmem:[#allocation5 + $0x244] sm:$0xff] %vm308_vm0, %v3122_v51  ;;  %v3319_v11 = vmax.f32 %v3199_v29, %v3259_v26  ;;  %v3322_v36 = vmax.f32 %v3202_v43, %v3262_v49  ;;  %v1555_v62 = vmax.f32 %v1360_v39, %v9102_v22  ;;  %v3789_v12 = vld [vmem:[#allocation6 + $0x6] sm:$0xff] }
 0x1dd   : > { %v3370_v57 = vld [vmem:[#allocation5 + $0x16] sm:$0xf]  ;;  %3185 = vst.msk [vmem:[#allocation5 + $0x264] sm:$0xff] %vm308_vm0, %v3125_v8  ;;  %v1567_v52 = vmax.f32 %v1372_v48, %v6511_v55  ;;  %v1571_v56 = vmax.f32 %v1376_v24, %v6607_v15  ;;  %v3263_v25 = vld [vmem:[#allocation5 + $0xa5] sm:$0xff]  ;;  %v3790_v22 = vld [vmem:[#allocation6 + $0xe] sm:$0xff] }
 0x1de   : > { %v6703_v6 = vld [vmem:[#allocation2 + $0x378] sm:$0xff]  ;;  %v3430_v32 = vmax.f32 %v3310_v2, %v3370_v57  ;;  %v1750_v1 = vmax.f32 %v1555_v62, %v9457_v17  ;;  %v3205_v29 = vld [vmem:[#allocation5 + $0xb4] sm:$0xf]  ;;  %v3206_v55 = vld [vmem:[#allocation5 + $0xc4] sm:$0xff] }
 0x1df   : > { %v3373_v44 = vld [vmem:[#allocation5 + $0x36] sm:$0xf]  ;;  %v9486_v42 = vld [vmem:[#allocation6 + $0x26] sm:$0xff]  ;;  %v1762_v40 = vmax.f32 %v1567_v52, %v6607_v15  ;;  %v9490_v27 = vld [vmem:[#allocation6 + $0x2e] sm:$0xff]  ;;  %v1766_v38 = vmax.f32 %v1571_v56, %v6703_v6 }
 0x1e0   : > { %v3376_v33 = vld [vmem:[#allocation5 + $0x56] sm:$0xf]  ;;  %v3433_v50 = vmax.f32 %v3313_v18, %v3373_v44  ;;  %v3886_v19 = vmax.f32 %v3789_v12, %v9486_v42  ;;  %v9492_v54 = vld [vmem:[#allocation6 + $0x46] sm:$0xff]  ;;  %v9494_v28 = vld [vmem:[#allocation6 + $0x4e] sm:$0xff]  ;;  %v3887_v49 = vmax.f32 %v3790_v22, %v9490_v27  ;;  %1847 = vst.msk [vmem:[#allocation3 + $0x278] sm:$0xff] %vm308_vm0, %v1750_v1  ;;  %v3323_v44 = vmax.f32 %v3203_v4, %v3263_v25 }
 0x1e1   : > { %v3379_v5 = vld [vmem:[#allocation5 + $0x76] sm:$0xf]  ;;  %v3436_v34 = vmax.f32 %v3316_v3, %v3376_v33  ;;  %v9498_v51 = vld [vmem:[#allocation6 + $0x66] sm:$0xff]  ;;  %1859 = vst.msk [vmem:[#allocation3 + $0x2d8] sm:$0xff] %vm308_vm0, %v1762_v40  ;;  %v9502_v2 = vld [vmem:[#allocation6 + $0x6e] sm:$0xff]  ;;  %v3324_v33 = vmax.f32 %v3204_v63, %v3264_v53 }
 0x1e2   : > { %v3382_v60 = vld [vmem:[#allocation5 + $0x96] sm:$0xf]  ;;  %v3439_v21 = vmax.f32 %v3319_v11, %v3379_v5  ;;  %v3983_v17 = vmax.f32 %v3886_v19, %v9492_v54  ;;  %v3266_v15 = vld [vmem:[#allocation5 + $0xc5] sm:$0xff]  ;;  %1863 = vst.msk [vmem:[#allocation3 + $0x2f8] sm:$0xff] %vm308_vm0, %v1766_v38  ;;  %v3984_v18 = vmax.f32 %v3887_v49, %v9494_v28  ;;  %v3267_v11 = vld [vmem:[#allocation5 + $0xcd] sm:$0xff] }
 0x1e3   : > { %v3490_v31 = vld [vmem:[#allocation5 + $0x17] sm:$0xf]  ;;  %v3442_v58 = vmax.f32 %v3322_v36, %v3382_v60  ;;  %v9504_v57 = vld [vmem:[#allocation6 + $0x86] sm:$0xff]  ;;  %v9511_v36 = vld [vmem:[#allocation6 + $0x8e] sm:$0xff] }
 0x1e4   : > { %v3493_v30 = vld [vmem:[#allocation5 + $0x37] sm:$0xf]  ;;  %v3550_v23 = vmax.f32 %v3430_v32, %v3490_v31  ;;  %v4080_v3 = vmax.f32 %v3983_v17, %v9498_v51  ;;  %v3383_v5 = vld [vmem:[#allocation5 + $0xa6] sm:$0xff]  ;;  %v3384_v60 = vld [vmem:[#allocation5 + $0xae] sm:$0xff]  ;;  %v4081_v62 = vmax.f32 %v3984_v18, %v9502_v2 }
 0x1e5   : > { %v3496_v10 = vld [vmem:[#allocation5 + $0x57] sm:$0xf]  ;;  %v3553_v16 = vmax.f32 %v3433_v50, %v3493_v30  ;;  %v3207_v24 = vld [vmem:[#allocation5 + $0xcc] sm:$0xff]  ;;  %v3326_v30 = vmax.f32 %v3206_v55, %v3266_v15  ;;  %v3443_v50 = vmax.f32 %v3323_v44, %v3383_v5 }
 0x1e6   : > { %v3499_v37 = vld [vmem:[#allocation5 + $0x77] sm:$0xf]  ;;  %v3556_v46 = vmax.f32 %v3436_v34, %v3496_v10  ;;  %v3503_v32 = vld [vmem:[#allocation5 + $0xa7] sm:$0xff]  ;;  %v4177_v52 = vmax.f32 %v4080_v3, %v9504_v57  ;;  %v3444_v34 = vmax.f32 %v3324_v33, %v3384_v60  ;;  %v3504_v10 = vld [vmem:[#allocation5 + $0xaf] sm:$0xff]  ;;  %v4178_v4 = vmax.f32 %v4081_v62, %v9511_v36 }
 0x1e7   : > { %v3502_v45 = vld [vmem:[#allocation5 + $0x97] sm:$0xf]  ;;  %v3559_v43 = vmax.f32 %v3439_v21, %v3499_v37  ;;  %v3623_v12 = vld [vmem:[#allocation5 + $0xa8] sm:$0xff]  ;;  %v3563_v63 = vmax.f32 %v3443_v50, %v3503_v32  ;;  %v3889_v60 = vmax.f32 %v9486_v42, %v9492_v54  ;;  %v3890_v32 = vmax.f32 %v9490_v27, %v9494_v28 }
 0x1e8   : > { %v3610_v14 = vld [vmem:[#allocation5 + $0x18] sm:$0xf]  ;;  %v3562_v26 = vmax.f32 %v3442_v58, %v3502_v45  ;;  %v3624_v56 = vld [vmem:[#allocation5 + $0xb0] sm:$0xff]  ;;  %v3327_v58 = vmax.f32 %v3207_v24, %v3267_v11  ;;  %4225 = vst.msk [vmem:[#allocation7 + $0x6] sm:$0xff] %vm308_vm0, %v4177_v52  ;;  %v3564_v25 = vmax.f32 %v3444_v34, %v3504_v10  ;;  %v3626_v38 = vld [vmem:[#allocation5 + $0xc8] sm:$0xff] }
 0x1e9   : > { %v3613_v20 = vld [vmem:[#allocation5 + $0x38] sm:$0xf]  ;;  %v3670_v8 = vmax.f32 %v3550_v23, %v3610_v14  ;;  %v3386_v23 = vld [vmem:[#allocation5 + $0xc6] sm:$0xff]  ;;  %v3387_v14 = vld [vmem:[#allocation5 + $0xce] sm:$0xff]  ;;  %4226 = vst.msk [vmem:[#allocation7 + $0xe] sm:$0xff] %vm308_vm0, %v4178_v4  ;;  %v3683_v17 = vmax.f32 %v3563_v63, %v3623_v12  ;;  %v2755_v12 = vmax.f32 %v9301_v41, %v9343_v59  ;;  %v3986_v27 = vmax.f32 %v3889_v60, %v9498_v51 }
 0x1ea   : > { %v3616_v0 = vld [vmem:[#allocation5 + $0x58] sm:$0xf]  ;;  %v3673_v7 = vmax.f32 %v3553_v16, %v3613_v20  ;;  %v3506_v20 = vld [vmem:[#allocation5 + $0xc7] sm:$0xff]  ;;  %v3446_v22 = vmax.f32 %v3326_v30, %v3386_v23  ;;  %v3507_v19 = vld [vmem:[#allocation5 + $0xcf] sm:$0xff]  ;;  %v2752_v16 = vmax.f32 %v9141_v9, %v9301_v41  ;;  %v3987_v23 = vmax.f32 %v3890_v32, %v9502_v2 }
 0x1eb   : > { %v3619_v61 = vld [vmem:[#allocation5 + $0x78] sm:$0xf]  ;;  %v3676_v39 = vmax.f32 %v3556_v46, %v3616_v0  ;;  %3731 = vst.msk [vmem:[#allocation6 + $0x16] sm:$0xf] %vm3730_vm3, %v3670_v8  ;;  %v3208_v1 = vld [vmem:[#allocation5 + $0xd4] sm:$0xf]  ;;  %v3684_v8 = vmax.f32 %v3564_v25, %v3624_v56 }
 0x1ec   : > { %v3622_v47 = vld [vmem:[#allocation5 + $0x98] sm:$0xf]  ;;  %v3679_v48 = vmax.f32 %v3559_v43, %v3619_v61  ;;  %3734 = vst.msk [vmem:[#allocation6 + $0x36] sm:$0xf] %vm3730_vm3, %v3673_v7  ;;  %v3566_v7 = vmax.f32 %v3446_v22, %v3506_v20  ;;  %v3627_v55 = vld [vmem:[#allocation5 + $0xd0] sm:$0xff] }
 0x1ed   : > { %v3265_v13 = vld [vmem:[#allocation5 + $0xb5] sm:$0xf]  ;;  %v3682_v6 = vmax.f32 %v3562_v26, %v3622_v47  ;;  %3737 = vst.msk [vmem:[#allocation6 + $0x56] sm:$0xf] %vm3730_vm3, %v3676_v39 }
 0x1ee   : > { %3740 = vst.msk [vmem:[#allocation6 + $0x76] sm:$0xf] %vm3730_vm3, %v3679_v48  ;;  %v3325_v31 = vmax.f32 %v3205_v29, %v3265_v13  ;;  %v3385_v37 = vld [vmem:[#allocation5 + $0xb6] sm:$0xf]  ;;  %v3447_v13 = vmax.f32 %v3327_v58, %v3387_v14 }
 0x1ef   : > { %3743 = vst.msk [vmem:[#allocation6 + $0x96] sm:$0xf] %vm3730_vm3, %v3682_v6  ;;  %v3505_v45 = vld [vmem:[#allocation5 + $0xb7] sm:$0xf]  ;;  %v4273_v14 = vld [vmem:[#allocation7 + $0x6] sm:$0xff] }
 0x1f0   : > { %v3445_v21 = vmax.f32 %v3325_v31, %v3385_v37  ;;  %v3625_v53 = vld [vmem:[#allocation5 + $0xb8] sm:$0xf]  ;;  %v3567_v44 = vmax.f32 %v3447_v13, %v3507_v19  ;;  %3744 = vst.msk [vmem:[#allocation6 + $0xa6] sm:$0xff] %vm308_vm0, %v3683_v17  ;;  %3745 = vst.msk [vmem:[#allocation6 + $0xae] sm:$0xff] %vm308_vm0, %v3684_v8  ;;  %v3686_v31 = vmax.f32 %v3566_v7, %v3626_v38 }
 0x1f1   : > { %v3268_v40 = vld [vmem:[#allocation5 + $0xd5] sm:$0xf]  ;;  %v4083_v19 = vmax.f32 %v3986_v27, %v9504_v57  ;;  %v4084_v8 = vmax.f32 %v3987_v23, %v9511_v36  ;;  %v3270_v27 = vld [vmem:[#allocation5 + $0xed] sm:$0xff] }
 0x1f2   : > { %v1923_v0 = vld [vmem:[#allocation3 + $0x272] sm:$0xff]  ;;  %v3565_v29 = vmax.f32 %v3445_v21, %v3505_v45  ;;  %v3687_v37 = vmax.f32 %v3567_v44, %v3627_v55  ;;  %v3328_v45 = vmax.f32 %v3208_v1, %v3268_v40  ;;  %3747 = vst.msk [vmem:[#allocation6 + $0xc6] sm:$0xff] %vm308_vm0, %v3686_v31 }
 0x1f3   : > { %v1932_v61 = vld [vmem:[#allocation3 + $0x2d2] sm:$0xff] }
 0x1f4   : > { %v1995_v47 = vld [vmem:[#allocation3 + $0x273] sm:$0xff]  ;;  %v3685_v3 = vmax.f32 %v3565_v29, %v3625_v53  ;;  %3748 = vst.msk [vmem:[#allocation6 + $0xce] sm:$0xff] %vm308_vm0, %v3687_v37 }
 0x1f5   : > { %v1935_v46 = vld [vmem:[#allocation3 + $0x2f2] sm:$0xff]  ;;  %v2067_v49 = vmax.f32 %v1923_v0, %v1995_v47  ;;  %v3892_v0 = vmax.f32 %v9492_v54, %v9498_v51  ;;  %v4305_v47 = vld [vmem:[#allocation7 + $0x7] sm:$0xff] }
 0x1f6   : > { %v2004_v43 = vld [vmem:[#allocation3 + $0x2d3] sm:$0xff]  ;;  %3746 = vst.msk [vmem:[#allocation6 + $0xb6] sm:$0xf] %vm3730_vm3, %v3685_v3 }
 0x1f7   : > { %v2007_v26 = vld [vmem:[#allocation3 + $0x2f3] sm:$0xff]  ;;  %v2076_v15 = vmax.f32 %v1932_v61, %v2004_v43  ;;  %v3893_v61 = vmax.f32 %v9494_v28, %v9502_v2  ;;  %v3989_v55 = vmax.f32 %v3892_v0, %v9504_v57  ;;  %v9548_v28 = vmax.f32 %v2752_v16, %v9343_v59 }
 0x1f8   : > { %v2079_v39 = vmax.f32 %v1935_v46, %v2007_v26  ;;  %v2139_v48 = vld [vmem:[#allocation3 + $0x274] sm:$0xff]  ;;  %v4337_v26 = vmax.f32 %v4273_v14, %v4305_v47 }
 0x1f9   : > { %v2148_v6 = vld [vmem:[#allocation3 + $0x2d4] sm:$0xff]  ;;  %v2211_v33 = vmax.f32 %v2067_v49, %v2139_v48  ;;  %v4369_v49 = vld [vmem:[#allocation7 + $0x8] sm:$0xff]  ;;  %v3990_v3 = vmax.f32 %v3893_v61, %v9511_v36  ;;  %v3895_v61 = vmax.f32 %v9498_v51, %v9504_v57 }
 0x1fa   : > { %v2151_v18 = vld [vmem:[#allocation3 + $0x2f4] sm:$0xff]  ;;  %v2220_v62 = vmax.f32 %v2076_v15, %v2148_v6  ;;  %v4401_v44 = vmax.f32 %v4337_v26, %v4369_v49  ;;  %v3509_v49 = vld [vmem:[#allocation5 + $0xe7] sm:$0xff] }
 0x1fb   : > { %v2283_v5 = vld [vmem:[#allocation3 + $0x275] sm:$0xff]  ;;  %v2223_v52 = vmax.f32 %v2079_v39, %v2151_v18  ;;  %v9552_v39 = vld [vmem:[#allocation6 + $0xa6] sm:$0xff] }
 0x1fc   : > { %v2292_v24 = vld [vmem:[#allocation3 + $0x2d5] sm:$0xff]  ;;  %v2355_v56 = vmax.f32 %v2211_v33, %v2283_v5  ;;  %v4180_v33 = vmax.f32 %v4083_v19, %v9552_v39  ;;  %v4086_v16 = vmax.f32 %v3989_v55, %v9552_v39  ;;  %v4628_v19 = vld [vmem:[#allocation6 + $0x48] sm:$0xff]  ;;  %v9587_v51 = vmax.f32 %v3895_v61, %v9552_v39 }
 0x1fd   : > { %v2295_v11 = vld [vmem:[#allocation3 + $0x2f5] sm:$0xff]  ;;  %v2364_v20 = vmax.f32 %v2220_v62, %v2292_v24  ;;  %v3209_v24 = vld [vmem:[#allocation5 + $0xe4] sm:$0xff] }
 0x1fe   : > { %v3388_v30 = vld [vmem:[#allocation5 + $0xd6] sm:$0xf]  ;;  %v2367_v4 = vmax.f32 %v2223_v52, %v2295_v11  ;;  %v9554_v48 = vld [vmem:[#allocation6 + $0xae] sm:$0xff]  ;;  %4228 = vst.msk [vmem:[#allocation7 + $0x26] sm:$0xff] %vm308_vm0, %v4180_v33 }
 0x1ff   : > { %v2427_v50 = vld [vmem:[#allocation3 + $0x276] sm:$0xff]  ;;  %v3448_v25 = vmax.f32 %v3328_v45, %v3388_v30  ;;  %v4181_v9 = vmax.f32 %v4084_v8, %v9554_v48  ;;  %v4433_v11 = vld [vmem:[#allocation7 + $0x9] sm:$0xff]  ;;  %v4087_v31 = vmax.f32 %v3990_v3, %v9554_v48 }
 0x200   : > { %v2436_v34 = vld [vmem:[#allocation3 + $0x2d6] sm:$0xff]  ;;  %v2499_v53 = vmax.f32 %v2355_v56, %v2427_v50  ;;  %v9561_v30 = vld [vmem:[#allocation6 + $0xc6] sm:$0xff]  ;;  %v2758_v50 = vmax.f32 %v9343_v59, %v9378_v35  ;;  %v9568_v37 = vld [vmem:[#allocation6 + $0xce] sm:$0xff] }
 0x201   : > { %v2439_v10 = vld [vmem:[#allocation3 + $0x2f6] sm:$0xff]  ;;  %v2508_v29 = vmax.f32 %v2364_v20, %v2436_v34  ;;  %v3210_v52 = vld [vmem:[#allocation5 + $0xec] sm:$0xff]  ;;  %v2876_v34 = vmax.f32 %v2755_v12, %v9378_v35  ;;  %4229 = vst.msk [vmem:[#allocation7 + $0x2e] sm:$0xff] %vm308_vm0, %v4181_v9  ;;  %v4183_v45 = vmax.f32 %v4086_v16, %v9561_v30  ;;  %v4184_v12 = vmax.f32 %v4087_v31, %v9568_v37 }
 0x202   : > { %v3791_v21 = vld [vmem:[#allocation6 + $0x16] sm:$0xf]  ;;  %v2511_v13 = vmax.f32 %v2367_v4, %v2439_v10  ;;  %2571 = vst.msk [vmem:[#allocation4 + $0x274] sm:$0xff] %vm308_vm0, %v2499_v53  ;;  %v4465_v10 = vmax.f32 %v4401_v44, %v4433_v11  ;;  %v3390_v26 = vld [vmem:[#allocation5 + $0xee] sm:$0xff] }
 0x203   : > { %v3840_v42 = vld [vmem:[#allocation6 + $0x36] sm:$0xf]  ;;  %2580 = vst.msk [vmem:[#allocation4 + $0x2d4] sm:$0xff] %vm308_vm0, %v2508_v29  ;;  %4231 = vst.msk [vmem:[#allocation7 + $0x46] sm:$0xff] %vm308_vm0, %v4183_v45  ;;  %v3629_v9 = vld [vmem:[#allocation5 + $0xe8] sm:$0xff] }
 0x204   : > { %v3937_v58 = vld [vmem:[#allocation6 + $0x56] sm:$0xf]  ;;  %v3888_v63 = vmax.f32 %v3791_v21, %v3840_v42  ;;  %2583 = vst.msk [vmem:[#allocation4 + $0x2f4] sm:$0xff] %vm308_vm0, %v2511_v13  ;;  %v3269_v21 = vld [vmem:[#allocation5 + $0xe5] sm:$0xff]  ;;  %v2994_v42 = vmax.f32 %v9548_v28, %v9378_v35  ;;  %4232 = vst.msk [vmem:[#allocation7 + $0x4e] sm:$0xff] %vm308_vm0, %v4184_v12 }
 0x205   : > { %v4034_v22 = vld [vmem:[#allocation6 + $0x76] sm:$0xf]  ;;  %v3329_v23 = vmax.f32 %v3209_v24, %v3269_v21  ;;  %v4275_v16 = vld [vmem:[#allocation7 + $0x26] sm:$0xff] }
 0x206   : > { %v3794_v1 = vld [vmem:[#allocation6 + $0x36] sm:$0xf]  ;;  %v3985_v38 = vmax.f32 %v3888_v63, %v3937_v58  ;;  %v4497_v58 = vld [vmem:[#allocation7 + $0xa] sm:$0xff]  ;;  %v3330_v63 = vmax.f32 %v3210_v52, %v3270_v27 }
 0x207   : > { %v3843_v40 = vld [vmem:[#allocation6 + $0x56] sm:$0xf]  ;;  %v4529_v14 = vmax.f32 %v4465_v10, %v4497_v58 }
 0x208   : > { %v3891_v46 = vmax.f32 %v3794_v1, %v3843_v40  ;;  %v3508_v43 = vld [vmem:[#allocation5 + $0xd7] sm:$0xf]  ;;  %v4082_v15 = vmax.f32 %v3985_v38, %v4034_v22  ;;  %v3510_v33 = vld [vmem:[#allocation5 + $0xef] sm:$0xff] }
 0x209   : > { %v4131_v17 = vld [vmem:[#allocation6 + $0x96] sm:$0xf]  ;;  %v3568_v54 = vmax.f32 %v3448_v25, %v3508_v43  ;;  %v3389_v25 = vld [vmem:[#allocation5 + $0xe6] sm:$0xff]  ;;  %7241 = vmatprep.mubr.msk.f32.mxu0 %vm308_vm0, %v4529_v14  ;;  %v4274_v43 = vld [vmem:[#allocation7 + $0xe] sm:$0xff] }
 0x20a   : > { %v3940_v7 = vld [vmem:[#allocation6 + $0x76] sm:$0xf]  ;;  %v4179_v60 = vmax.f32 %v4082_v15, %v4131_v17  ;;  %v3449_v0 = vmax.f32 %v3329_v23, %v3389_v25  ;;  %v4371_v21 = vld [vmem:[#allocation7 + $0x28] sm:$0xff] }
 0x20b   : > { %v3988_v6 = vmax.f32 %v3891_v46, %v3940_v7  ;;  %v4037_v18 = vld [vmem:[#allocation6 + $0x96] sm:$0xf]  ;;  %v3450_v7 = vmax.f32 %v3330_v63, %v3390_v26  ;;  %v4276_v63 = vld [vmem:[#allocation7 + $0x2e] sm:$0xff]  ;;  %v4277_v61 = vld [vmem:[#allocation7 + $0x46] sm:$0xff] }
 0x20c   : > { %v4134_v41 = vld [vmem:[#allocation6 + $0xb6] sm:$0xf]  ;;  %4227 = vst.msk [vmem:[#allocation7 + $0x16] sm:$0xf] %vm3730_vm3, %v4179_v60  ;;  %v3569_v55 = vmax.f32 %v3449_v0, %v3509_v49  ;;  %v4435_v0 = vld [vmem:[#allocation7 + $0x29] sm:$0xff]  ;;  %v4089_v49 = vmax.f32 %v9587_v51, %v9561_v30 }
 0x20d   : > { %v3628_v5 = vld [vmem:[#allocation5 + $0xd8] sm:$0xf]  ;;  %v4085_v32 = vmax.f32 %v3988_v6, %v4037_v18  ;;  %v4627_v46 = vld [vmem:[#allocation4 + $0x270] sm:$0xff]  ;;  %v3570_v11 = vmax.f32 %v3450_v7, %v3510_v33  ;;  %v4309_v26 = vld [vmem:[#allocation7 + $0x47] sm:$0xff] }
 0x20e   : > { %v3688_v62 = vmax.f32 %v3568_v54, %v3628_v5  ;;  %v3846_v56 = vld [vmem:[#allocation6 + $0x76] sm:$0xf]  ;;  %7137 = vmatmul.mubr.msk.f32.gmra.mxu1 %vm308_vm0, %v4627_v46  ;;  %v4307_v5 = vld [vmem:[#allocation7 + $0x27] sm:$0xff]  ;;  %v3689_v60 = vmax.f32 %v3569_v55, %v3629_v9 }
 0x20f   : > { %v4182_v59 = vmax.f32 %v4085_v32, %v4134_v41  ;;  %v2704_v20 = vld [vmem:[#allocation4 + $0x294] sm:$0xff]  ;;  %7191 = vmatprep.mubr.msk.f32.mxu1 %vm308_vm0, %v4628_v19 }
 0x210   : > { %3749 = vst.msk [vmem:[#allocation6 + $0xd6] sm:$0xf] %vm3730_vm3, %v3688_v62  ;;  %v3797_v4 = vld [vmem:[#allocation6 + $0x56] sm:$0xf] }
 0x211   : > { %v2643_v53 = vld [vmem:[#allocation4 + $0x274] sm:$0xff]  ;;  %4230 = vst.msk [vmem:[#allocation7 + $0x36] sm:$0xf] %vm3730_vm3, %v4182_v59  ;;  %v3894_v1 = vmax.f32 %v3797_v4, %v3846_v56  ;;  %v3896_v59 = vmax.f32 %v9502_v2, %v9511_v36 }
 0x212   : > { %v2825_v22 = vld [vmem:[#allocation4 + $0x2b4] sm:$0xff]  ;;  %v2761_v47 = vmax.f32 %v9378_v35, %v2643_v53  ;;  %v2764_v29 = vmax.f32 %v2643_v53, %v2704_v20  ;;  %v2879_v13 = vmax.f32 %v2758_v50, %v2643_v53  ;;  %v2997_v38 = vmax.f32 %v2876_v34, %v2643_v53  ;;  %3750 = vst.msk [vmem:[#allocation6 + $0xe6] sm:$0xff] %vm308_vm0, %v3689_v60  ;;  %v3212_v60 = vld [vmem:[#allocation5 + $0x104] sm:$0xff] }
 0x213   : > { %v3943_v40 = vld [vmem:[#allocation6 + $0x96] sm:$0xf]  ;;  %v3115_v17 = vmax.f32 %v2994_v42, %v2643_v53  ;;  %v4339_v34 = vmax.f32 %v4275_v16, %v4307_v5  ;;  %v4630_v42 = vld [vmem:[#allocation6 + $0x68] sm:$0xff] }
 0x214   : > { %v9584_v8 = vld [vmem:[#allocation6 + $0xb6] sm:$0xf]  ;;  %v2882_v35 = vmax.f32 %v2761_v47, %v2704_v20  ;;  %v2885_v15 = vmax.f32 %v2764_v29, %v2825_v22  ;;  %v3000_v18 = vmax.f32 %v2879_v13, %v2704_v20  ;;  %v3118_v3 = vmax.f32 %v2997_v38, %v2704_v20  ;;  %v4632_v47 = vld [vmem:[#allocation6 + $0x88] sm:$0xff] }
 0x215   : > { %v3211_v54 = vld [vmem:[#allocation5 + $0xf4] sm:$0xf]  ;;  %3175 = vst.msk [vmem:[#allocation5 + $0x1f4] sm:$0xff] %vm308_vm0, %v3115_v17  ;;  %v3991_v24 = vmax.f32 %v3894_v1, %v3943_v40  ;;  %v4403_v4 = vmax.f32 %v4339_v34, %v4371_v21  ;;  %v3631_v19 = vld [vmem:[#allocation5 + $0xf8] sm:$0xf]  ;;  %v3993_v29 = vmax.f32 %v3896_v59, %v9554_v48  ;;  %v4634_v21 = vld [vmem:[#allocation6 + $0xa8] sm:$0xff] }
 0x216   : > { %v3271_v28 = vld [vmem:[#allocation5 + $0xf5] sm:$0xf]  ;;  %v3003_v31 = vmax.f32 %v2882_v35, %v2825_v22  ;;  %v3121_v52 = vmax.f32 %v3000_v18, %v2825_v22  ;;  %3178 = vst.msk [vmem:[#allocation5 + $0x214] sm:$0xff] %vm308_vm0, %v3118_v3  ;;  %v4373_v3 = vld [vmem:[#allocation7 + $0x48] sm:$0xff] }
 0x217   : > { %v2946_v6 = vld [vmem:[#allocation4 + $0x2d4] sm:$0xff]  ;;  %v3331_v32 = vmax.f32 %v3211_v54, %v3271_v28  ;;  %v4088_v22 = vmax.f32 %v3991_v24, %v9584_v8  ;;  %v4467_v46 = vmax.f32 %v4403_v4, %v4435_v0  ;;  %v4499_v8 = vld [vmem:[#allocation7 + $0x2a] sm:$0xff]  ;;  %v4341_v54 = vmax.f32 %v4277_v61, %v4309_v26 }
 0x218   : > { %v4629_v44 = vld [vmem:[#allocation6 + $0x50] sm:$0xff]  ;;  %v3006_v62 = vmax.f32 %v2885_v15, %v2946_v6  ;;  %v3124_v23 = vmax.f32 %v3003_v31, %v2946_v6  ;;  %3181 = vst.msk [vmem:[#allocation5 + $0x234] sm:$0xff] %vm308_vm0, %v3121_v52  ;;  %v4090_v24 = vmax.f32 %v3993_v29, %v9568_v37  ;;  %v3272_v52 = vld [vmem:[#allocation5 + $0x105] sm:$0xff]  ;;  %v3898_v29 = vmax.f32 %v9504_v57, %v9552_v39 }
 0x219   : > { %v3067_v41 = vld [vmem:[#allocation4 + $0x2f4] sm:$0xff]  ;;  %7192 = vmatmul.mubr.msk.f32.vlgmr.msra.gmra.mxu1 %vm308_vm0, %v4629_v44  ;;  %v4531_v6 = vmax.f32 %v4467_v46, %v4499_v8  ;;  %v4437_v44 = vld [vmem:[#allocation7 + $0x49] sm:$0xff]  ;;  %v4405_v5 = vmax.f32 %v4341_v54, %v4373_v3  ;;  %v3899_v26 = vmax.f32 %v9511_v36, %v9554_v48 }
 0x21a   : > { %v4306_v50 = vld [vmem:[#allocation7 + $0xf] sm:$0xff]  ;;  %v3511_v27 = vld [vmem:[#allocation5 + $0xf7] sm:$0xf]  ;;  %v3127_v14 = vmax.f32 %v3006_v62, %v3067_v41  ;;  %7194 = vmatprep.mubr.msk.f32.mxu1 %vm308_vm0, %v4630_v42  ;;  %3184 = vst.msk [vmem:[#allocation5 + $0x254] sm:$0xff] %vm308_vm0, %v3124_v23  ;;  %v9610_v31 = vld [vmem:[#allocation6 + $0xe6] sm:$0xff] }
 0x21b   : > { %v3630_v10 = vld [vmem:[#allocation5 + $0xf0] sm:$0xff]  ;;  %v4338_v56 = vmax.f32 %v4274_v43, %v4306_v50  ;;  %v3392_v4 = vld [vmem:[#allocation5 + $0x106] sm:$0xff] }
 0x21c   : > { %v3391_v45 = vld [vmem:[#allocation5 + $0xf6] sm:$0xf]  ;;  %v3690_v58 = vmax.f32 %v3570_v11, %v3630_v10  ;;  %3187 = vst.msk [vmem:[#allocation5 + $0x274] sm:$0xff] %vm308_vm0, %v3127_v14  ;;  %v3273_v50 = vld [vmem:[#allocation5 + $0x10d] sm:$0xff]  ;;  %v4469_v10 = vmax.f32 %v4405_v5, %v4437_v44  ;;  %v3215_v3 = vld [vmem:[#allocation5 + $0x124] sm:$0xff]  ;;  %v9631_v44 = vmax.f32 %v3898_v29, %v9561_v30 }
 0x21d   : > { %v3451_v12 = vmax.f32 %v3331_v32, %v3391_v45  ;;  %v4370_v20 = vld [vmem:[#allocation7 + $0x10] sm:$0xff]  ;;  %v4186_v45 = vmax.f32 %v4089_v49, %v9610_v31  ;;  %v3632_v61 = vld [vmem:[#allocation5 + $0x108] sm:$0xff] }
 0x21e   : > { %v4308_v25 = vld [vmem:[#allocation7 + $0x2f] sm:$0xff]  ;;  %v4402_v1 = vmax.f32 %v4338_v56, %v4370_v20  ;;  %3751 = vst.msk [vmem:[#allocation6 + $0xee] sm:$0xff] %vm308_vm0, %v3690_v58  ;;  %v3514_v54 = vld [vmem:[#allocation5 + $0x117] sm:$0xf] }
 0x21f   : > { %v4631_v53 = vld [vmem:[#allocation6 + $0x70] sm:$0xff]  ;;  %v4340_v2 = vmax.f32 %v4276_v63, %v4308_v25  ;;  %v3571_v13 = vmax.f32 %v3451_v12, %v3511_v27  ;;  %v3332_v12 = vmax.f32 %v3212_v60, %v3272_v52  ;;  %4234 = vst.msk [vmem:[#allocation7 + $0x66] sm:$0xff] %vm308_vm0, %v4186_v45 }
 0x220   : > { %v4434_v40 = vld [vmem:[#allocation7 + $0x11] sm:$0xff]  ;;  %7195 = vmatmul.mubr.msk.f32.gmra.mxu1 %vm308_vm0, %v4631_v53 }
 0x221   : > { %v4498_v38 = vld [vmem:[#allocation7 + $0x12] sm:$0xff]  ;;  %v4466_v17 = vmax.f32 %v4402_v1, %v4434_v40  ;;  %v3691_v35 = vmax.f32 %v3571_v13, %v3631_v19  ;;  %7197 = vmatprep.mubr.msk.f32.mxu1 %vm308_vm0, %v4632_v47  ;;  %v4501_v42 = vld [vmem:[#allocation7 + $0x4a] sm:$0xff] }
 0x222   : > { %v4372_v43 = vld [vmem:[#allocation7 + $0x30] sm:$0xff]  ;;  %v4533_v23 = vmax.f32 %v4469_v10, %v4501_v42  ;;  %v3512_v1 = vld [vmem:[#allocation5 + $0x107] sm:$0xff] }
 0x223   : > { %v4404_v7 = vmax.f32 %v4340_v2, %v4372_v43  ;;  %v4436_v55 = vld [vmem:[#allocation7 + $0x31] sm:$0xff]  ;;  %v4530_v51 = vmax.f32 %v4466_v17, %v4498_v38  ;;  %3752 = vst.msk [vmem:[#allocation6 + $0xf6] sm:$0xf] %vm3730_vm3, %v3691_v35 }
 0x224   : > { %v4137_v28 = vld [vmem:[#allocation6 + $0xd6] sm:$0xf]  ;;  %v3213_v32 = vld [vmem:[#allocation5 + $0x10c] sm:$0xff] }
 0x225   : > { %v3800_v15 = vld [vmem:[#allocation6 + $0x76] sm:$0xf]  ;;  %v4185_v33 = vmax.f32 %v4088_v22, %v4137_v28  ;;  %v4468_v16 = vmax.f32 %v4404_v7, %v4436_v55  ;;  %7242 = vmatmul.mubr.msk.f32.vlgmr.msra.gmra.mxu0 %vm308_vm0, %v4530_v51  ;;  %v9616_v58 = vld [vmem:[#allocation6 + $0xee] sm:$0xff]  ;;  %v3333_v27 = vmax.f32 %v3213_v32, %v3273_v50  ;;  %v3452_v22 = vmax.f32 %v3332_v12, %v3392_v4 }
 0x226   : > { %v4500_v18 = vld [vmem:[#allocation7 + $0x32] sm:$0xff]  ;;  %7244 = vmatprep.mubr.msk.f32.mxu0 %vm308_vm0, %v4531_v6  ;;  %v4187_v20 = vmax.f32 %v4090_v24, %v9616_v58  ;;  %v4279_v5 = vld [vmem:[#allocation7 + $0x66] sm:$0xff]  ;;  %v3996_v24 = vmax.f32 %v3899_v26, %v9568_v37 }
 0x227   : > { %v4633_v9 = vld [vmem:[#allocation6 + $0x90] sm:$0xff]  ;;  %4233 = vst.msk [vmem:[#allocation7 + $0x56] sm:$0xf] %vm3730_vm3, %v4185_v33  ;;  %v4532_v34 = vmax.f32 %v4468_v16, %v4500_v18  ;;  %v3572_v46 = vmax.f32 %v3452_v22, %v3512_v1  ;;  %v4636_v18 = vld [vmem:[#allocation6 + $0xc8] sm:$0xff]  ;;  %v3902_v22 = vmax.f32 %v9554_v48, %v9568_v37 }
 0x228   : > { %v3849_v41 = vld [vmem:[#allocation6 + $0x96] sm:$0xf]  ;;  %7198 = vmatmul.mubr.msk.f32.gmra.mxu1 %vm308_vm0, %v4633_v9  ;;  %v4278_v14 = vld [vmem:[#allocation7 + $0x4e] sm:$0xff]  ;;  %4235 = vst.msk [vmem:[#allocation7 + $0x6e] sm:$0xff] %vm308_vm0, %v4187_v20  ;;  %v4093_v1 = vmax.f32 %v3996_v24, %v9616_v58  ;;  %v3218_v24 = vld [vmem:[#allocation5 + $0x144] sm:$0xff] }
 0x229   : > { %v3946_v11 = vld [vmem:[#allocation6 + $0xb6] sm:$0xf]  ;;  %v3897_v62 = vmax.f32 %v3800_v15, %v3849_v41  ;;  %7200 = vmatprep.mubr.msk.f32.mxu1 %vm308_vm0, %v4634_v21  ;;  %v3393_v63 = vld [vmem:[#allocation5 + $0x10e] sm:$0xff]  ;;  %7245 = vmatmul.mubr.msk.f32.gmra.mxu0 %vm308_vm0, %v4532_v34  ;;  %v3692_v15 = vmax.f32 %v3572_v46, %v3632_v61  ;;  %v3275_v41 = vld [vmem:[#allocation5 + $0x125] sm:$0xff] }
 0x22a   : > { %v4043_v56 = vld [vmem:[#allocation6 + $0xd6] sm:$0xf]  ;;  %v3453_v19 = vmax.f32 %v3333_v27, %v3393_v63  ;;  %7247 = vmatprep.mubr.msk.f32.mxu0 %vm308_vm0, %v4533_v23  ;;  %v3216_v9 = vld [vmem:[#allocation5 + $0x12c] sm:$0xff]  ;;  %v3335_v32 = vmax.f32 %v3215_v3, %v3275_v41  ;;  %v3901_v23 = vmax.f32 %v9552_v39, %v9561_v30  ;;  %v4092_v63 = vmax.f32 %v9631_v44, %v9610_v31 }
 0x22b   : > { %v3994_v59 = vmax.f32 %v3897_v62, %v3946_v11  ;;  %v3214_v25 = vld [vmem:[#allocation5 + $0x114] sm:$0xf]  ;;  %3753 = vst.msk [vmem:[#allocation6 + $0x106] sm:$0xff] %vm308_vm0, %v3692_v15  ;;  %v3634_v11 = vld [vmem:[#allocation5 + $0x118] sm:$0xf]  ;;  %v3395_v34 = vld [vmem:[#allocation5 + $0x126] sm:$0xff]  ;;  %v3999_v44 = vmax.f32 %v3902_v22, %v9616_v58 }
 0x22c   : > { %v4635_v40 = vld [vmem:[#allocation6 + $0xb0] sm:$0xff]  ;;  %v3515_v27 = vld [vmem:[#allocation5 + $0x127] sm:$0xff]  ;;  %v3998_v3 = vmax.f32 %v3901_v23, %v9610_v31 }
 0x22d   : > { %v4091_v53 = vmax.f32 %v3994_v59, %v4043_v56  ;;  %v3274_v0 = vld [vmem:[#allocation5 + $0x115] sm:$0xf]  ;;  %7201 = vmatmul.mubr.msk.f32.gmra.mxu1 %vm308_vm0, %v4635_v40  ;;  %v3276_v51 = vld [vmem:[#allocation5 + $0x12d] sm:$0xff]  ;;  %v3455_v59 = vmax.f32 %v3335_v32, %v3395_v34 }
 0x22e   : > { %v3513_v2 = vld [vmem:[#allocation5 + $0x10f] sm:$0xff]  ;;  %v3334_v13 = vmax.f32 %v3214_v25, %v3274_v0  ;;  %7203 = vmatprep.mubr.msk.f32.mxu1 %vm308_vm0, %v4636_v18  ;;  %v3336_v62 = vmax.f32 %v3216_v9, %v3276_v51  ;;  %v3398_v23 = vld [vmem:[#allocation5 + $0x146] sm:$0xff] }
 0x22f   : > { %v3633_v47 = vld [vmem:[#allocation5 + $0x110] sm:$0xff]  ;;  %v3573_v43 = vmax.f32 %v3453_v19, %v3513_v2  ;;  %v4311_v21 = vld [vmem:[#allocation7 + $0x67] sm:$0xff]  ;;  %v3575_v40 = vmax.f32 %v3455_v59, %v3515_v27 }
 0x230   : > { %v4140_v38 = vld [vmem:[#allocation6 + $0xf6] sm:$0xf]  ;;  %v3396_v10 = vld [vmem:[#allocation5 + $0x12e] sm:$0xff] }
 0x231   : > { %v3394_v49 = vld [vmem:[#allocation5 + $0x116] sm:$0xf]  ;;  %v4188_v7 = vmax.f32 %v4091_v53, %v4140_v38  ;;  %v3693_v6 = vmax.f32 %v3573_v43, %v3633_v47  ;;  %v3456_v12 = vmax.f32 %v3336_v62, %v3396_v10  ;;  %v4375_v20 = vld [vmem:[#allocation7 + $0x68] sm:$0xff] }
 0x232   : > { %v3852_v17 = vld [vmem:[#allocation6 + $0xb6] sm:$0xf]  ;;  %v3454_v55 = vmax.f32 %v3334_v13, %v3394_v49  ;;  %v4280_v4 = vld [vmem:[#allocation7 + $0x6e] sm:$0xff] }
 0x233   : > { %v4310_v8 = vld [vmem:[#allocation7 + $0x4f] sm:$0xff]  ;;  %4236 = vst.msk [vmem:[#allocation7 + $0x76] sm:$0xf] %vm3730_vm3, %v4188_v7 }
 0x234   : > { %v3803_v28 = vld [vmem:[#allocation6 + $0x96] sm:$0xf]  ;;  %v4342_v35 = vmax.f32 %v4278_v14, %v4310_v8  ;;  %v3574_v33 = vmax.f32 %v3454_v55, %v3514_v54  ;;  %3754 = vst.msk [vmem:[#allocation6 + $0x10e] sm:$0xff] %vm308_vm0, %v3693_v6  ;;  %v4343_v14 = vmax.f32 %v4279_v5, %v4311_v21  ;;  %v4439_v29 = vld [vmem:[#allocation7 + $0x69] sm:$0xff] }
 0x235   : > { %v4374_v57 = vld [vmem:[#allocation7 + $0x50] sm:$0xff]  ;;  %v3900_v36 = vmax.f32 %v3803_v28, %v3852_v17  ;;  %v3635_v13 = vld [vmem:[#allocation5 + $0x128] sm:$0xff] }
 0x236   : > { %v4406_v16 = vmax.f32 %v4342_v35, %v4374_v57  ;;  %v3949_v60 = vld [vmem:[#allocation6 + $0xd6] sm:$0xf]  ;;  %v3694_v50 = vmax.f32 %v3574_v33, %v3634_v11  ;;  %v4407_v47 = vmax.f32 %v4343_v14, %v4375_v20  ;;  %v4503_v43 = vld [vmem:[#allocation7 + $0x6a] sm:$0xff]  ;;  %v3695_v48 = vmax.f32 %v3575_v40, %v3635_v13 }
 0x237   : > { %v4438_v52 = vld [vmem:[#allocation7 + $0x51] sm:$0xff]  ;;  %v3997_v25 = vmax.f32 %v3900_v36, %v3949_v60  ;;  %v9649_v55 = vld [vmem:[#allocation6 + $0x106] sm:$0xff] }
 0x238   : > { %v4470_v45 = vmax.f32 %v4406_v16, %v4438_v52  ;;  %v4502_v56 = vld [vmem:[#allocation7 + $0x52] sm:$0xff]  ;;  %3755 = vst.msk [vmem:[#allocation6 + $0x116] sm:$0xf] %vm3730_vm3, %v3694_v50  ;;  %v4471_v8 = vmax.f32 %v4407_v47, %v4439_v29  ;;  %v4189_v6 = vmax.f32 %v4092_v63, %v9649_v55  ;;  %v4638_v5 = vld [vmem:[#allocation6 + $0xe8] sm:$0xff]  ;;  %v3904_v47 = vmax.f32 %v9561_v30, %v9610_v31 }
 0x239   : > { %v9637_v42 = vld [vmem:[#allocation6 + $0xf6] sm:$0xf]  ;;  %3756 = vst.msk [vmem:[#allocation6 + $0x126] sm:$0xff] %vm308_vm0, %v3695_v48  ;;  %v3219_v11 = vld [vmem:[#allocation5 + $0x14c] sm:$0xff]  ;;  %v3905_v29 = vmax.f32 %v9568_v37, %v9616_v58 }
 0x23a   : > { %v3516_v53 = vld [vmem:[#allocation5 + $0x12f] sm:$0xff]  ;;  %v4534_v19 = vmax.f32 %v4470_v45, %v4502_v56  ;;  %v4094_v28 = vmax.f32 %v3997_v25, %v9637_v42  ;;  %v3517_v57 = vld [vmem:[#allocation5 + $0x137] sm:$0xf]  ;;  %v4535_v41 = vmax.f32 %v4471_v8, %v4503_v43  ;;  %4237 = vst.msk [vmem:[#allocation7 + $0x86] sm:$0xff] %vm308_vm0, %v4189_v6  ;;  %v3278_v52 = vld [vmem:[#allocation5 + $0x145] sm:$0xff]  ;;  %v4095_v42 = vmax.f32 %v3998_v3, %v9649_v55 }
 0x23b   : > { %v3576_v0 = vmax.f32 %v3456_v12, %v3516_v53  ;;  %v4637_v2 = vld [vmem:[#allocation6 + $0xd0] sm:$0xff]  ;;  %v3637_v33 = vld [vmem:[#allocation5 + $0x138] sm:$0xf]  ;;  %v3338_v12 = vmax.f32 %v3218_v24, %v3278_v52 }
 0x23c   : > { %v3217_v39 = vld [vmem:[#allocation5 + $0x134] sm:$0xf]  ;;  %7204 = vmatmul.mubr.msk.f32.gmra.mxu1 %vm308_vm0, %v4637_v2  ;;  %7248 = vmatmul.mubr.msk.f32.gmra.mxu0 %vm308_vm0, %v4534_v19 }
 0x23d   : > { %v3277_v61 = vld [vmem:[#allocation5 + $0x135] sm:$0xf]  ;;  %7206 = vmatprep.mubr.msk.f32.mxu1 %vm308_vm0, %v4638_v5  ;;  %7250 = vmatprep.mubr.msk.f32.mxu0 %vm308_vm0, %v4535_v41  ;;  %v3279_v56 = vld [vmem:[#allocation5 + $0x14d] sm:$0xff]  ;;  %v3458_v22 = vmax.f32 %v3338_v12, %v3398_v23  ;;  %v4001_v5 = vmax.f32 %v3904_v47, %v9649_v55 }
 0x23e   : > { %v3636_v38 = vld [vmem:[#allocation5 + $0x130] sm:$0xff]  ;;  %v3337_v46 = vmax.f32 %v3217_v39, %v3277_v61  ;;  %v3339_v27 = vmax.f32 %v3219_v11, %v3279_v56  ;;  %v3638_v61 = vld [vmem:[#allocation5 + $0x148] sm:$0xff] }
 0x23f   : > { %v4312_v26 = vld [vmem:[#allocation7 + $0x6f] sm:$0xff]  ;;  %v3696_v49 = vmax.f32 %v3576_v0, %v3636_v38  ;;  %v3221_v11 = vld [vmem:[#allocation5 + $0x164] sm:$0xff] }
 0x240   : > { %v3397_v17 = vld [vmem:[#allocation5 + $0x136] sm:$0xf]  ;;  %v4344_v7 = vmax.f32 %v4280_v4, %v4312_v26  ;;  %v9651_v54 = vld [vmem:[#allocation6 + $0x10e] sm:$0xff]  ;;  %v9670_v2 = vld [vmem:[#allocation6 + $0x126] sm:$0xff] }
 0x241   : > { %v3457_v35 = vmax.f32 %v3337_v46, %v3397_v17  ;;  %v4376_v15 = vld [vmem:[#allocation7 + $0x70] sm:$0xff]  ;;  %v4190_v18 = vmax.f32 %v4093_v1, %v9651_v54  ;;  %3757 = vst.msk [vmem:[#allocation6 + $0x12e] sm:$0xff] %vm308_vm0, %v3696_v49  ;;  %v4096_v59 = vmax.f32 %v3999_v44, %v9651_v54  ;;  %v3518_v1 = vld [vmem:[#allocation5 + $0x147] sm:$0xff]  ;;  %v4192_v38 = vmax.f32 %v4095_v42, %v9670_v2 }
 0x242   : > { %v3806_v36 = vld [vmem:[#allocation6 + $0xb6] sm:$0xf]  ;;  %v4408_v51 = vmax.f32 %v4344_v7, %v4376_v15  ;;  %v3399_v4 = vld [vmem:[#allocation5 + $0x14e] sm:$0xff]  ;;  %v3578_v43 = vmax.f32 %v3458_v22, %v3518_v1  ;;  %v4281_v8 = vld [vmem:[#allocation7 + $0x86] sm:$0xff]  ;;  %v4002_v24 = vmax.f32 %v3905_v29, %v9651_v54 }
 0x243   : > { %v3855_v9 = vld [vmem:[#allocation6 + $0xd6] sm:$0xf]  ;;  %v3577_v16 = vmax.f32 %v3457_v35, %v3517_v57  ;;  %4238 = vst.msk [vmem:[#allocation7 + $0x8e] sm:$0xff] %vm308_vm0, %v4190_v18  ;;  %v3459_v19 = vmax.f32 %v3339_v27, %v3399_v4  ;;  %4240 = vst.msk [vmem:[#allocation7 + $0xa6] sm:$0xff] %vm308_vm0, %v4192_v38  ;;  %v4640_v41 = vld [vmem:[#allocation6 + $0x108] sm:$0xff]  ;;  %v9688_v4 = vpop.f32.mrf.mxu0 }
 0x244   : > { %v4440_v60 = vld [vmem:[#allocation7 + $0x71] sm:$0xff]  ;;  %v3903_v62 = vmax.f32 %v3806_v36, %v3855_v9  ;;  %v3698_v37 = vmax.f32 %v3578_v43, %v3638_v61  ;;  %v3281_v56 = vld [vmem:[#allocation5 + $0x165] sm:$0xff] }
 0x245   : > { %v4143_v32 = vld [vmem:[#allocation6 + $0x116] sm:$0xf]  ;;  %v4472_v50 = vmax.f32 %v4408_v51, %v4440_v60  ;;  %v3697_v10 = vmax.f32 %v3577_v16, %v3637_v33  ;;  %v3222_v60 = vld [vmem:[#allocation5 + $0x16c] sm:$0xff]  ;;  %v9694_v38 = vpop.f32.mrf.mxu0 }
 0x246   : > { %v4191_v34 = vmax.f32 %v4094_v28, %v4143_v32  ;;  %v3952_v45 = vld [vmem:[#allocation6 + $0xf6] sm:$0xf]  ;;  %3759 = vst.msk [vmem:[#allocation6 + $0x146] sm:$0xff] %vm308_vm0, %v3698_v37  ;;  %v3401_v22 = vld [vmem:[#allocation5 + $0x166] sm:$0xff] }
 0x247   : > { %v4504_v21 = vld [vmem:[#allocation7 + $0x72] sm:$0xff]  ;;  %3758 = vst.msk [vmem:[#allocation6 + $0x136] sm:$0xf] %vm3730_vm3, %v3697_v10  ;;  %v4000_v53 = vmax.f32 %v3903_v62, %v3952_v45 }
 0x248   : > { %v4536_v14 = vmax.f32 %v4472_v50, %v4504_v21  ;;  %4239 = vst.msk [vmem:[#allocation7 + $0x96] sm:$0xf] %vm3730_vm3, %v4191_v34  ;;  %v4049_v20 = vld [vmem:[#allocation6 + $0x116] sm:$0xf]  ;;  %v9672_v39 = vld [vmem:[#allocation6 + $0x12e] sm:$0xff] }
 0x249   : > { %v4639_v63 = vld [vmem:[#allocation6 + $0xf0] sm:$0xff]  ;;  %v4193_v46 = vmax.f32 %v4096_v59, %v9672_v39  ;;  %v4097_v30 = vmax.f32 %v4000_v53, %v4049_v20  ;;  %v3640_v18 = vld [vmem:[#allocation5 + $0x158] sm:$0xf]  ;;  %v4099_v53 = vmax.f32 %v4002_v24, %v9672_v39 }
 0x24a   : > { %v3220_v25 = vld [vmem:[#allocation5 + $0x154] sm:$0xf]  ;;  %7207 = vmatmul.mubr.msk.f32.gmra.mxu1 %vm308_vm0, %v4639_v63  ;;  %7251 = vmatmul.mubr.msk.f32.gmra.mxu0 %vm308_vm0, %v4536_v14  ;;  %v4313_v7 = vld [vmem:[#allocation7 + $0x87] sm:$0xff]  ;;  %v3341_v14 = vmax.f32 %v3221_v11, %v3281_v56 }
 0x24b   : > { %v3519_v40 = vld [vmem:[#allocation5 + $0x14f] sm:$0xff]  ;;  %v3520_v35 = vld [vmem:[#allocation5 + $0x157] sm:$0xf]  ;;  %v4345_v57 = vmax.f32 %v4281_v8, %v4313_v7  ;;  %4241 = vst.msk [vmem:[#allocation7 + $0xae] sm:$0xff] %vm308_vm0, %v4193_v46  ;;  %7209 = vmatprep.mubr.msk.f32.mxu1 %vm308_vm0, %v4640_v41  ;;  %v4283_v61 = vld [vmem:[#allocation7 + $0xa6] sm:$0xff] }
 0x24c   : > { %v3280_v0 = vld [vmem:[#allocation5 + $0x155] sm:$0xf]  ;;  %v3579_v26 = vmax.f32 %v3459_v19, %v3519_v40  ;;  %v4377_v44 = vld [vmem:[#allocation7 + $0x88] sm:$0xff]  ;;  %v3461_v29 = vmax.f32 %v3341_v14, %v3401_v22  ;;  %v9724_v14 = vpop.f32.mrf.mxu1 }
 0x24d   : > { %v3340_v13 = vmax.f32 %v3220_v25, %v3280_v0  ;;  %v3639_v48 = vld [vmem:[#allocation5 + $0x150] sm:$0xff]  ;;  %v4409_v51 = vmax.f32 %v4345_v57, %v4377_v44  ;;  %v4098_v25 = vmax.f32 %v4001_v5, %v9670_v2  ;;  %v9699_v8 = vld [vmem:[#allocation6 + $0x146] sm:$0xff] }
 0x24e   : > { %v3400_v49 = vld [vmem:[#allocation5 + $0x156] sm:$0xf]  ;;  %v4282_v15 = vld [vmem:[#allocation7 + $0x8e] sm:$0xff]  ;;  %v3699_v6 = vmax.f32 %v3579_v26, %v3639_v48 }
 0x24f   : > { %v3858_v17 = vld [vmem:[#allocation6 + $0xf6] sm:$0xf]  ;;  %v3460_v28 = vmax.f32 %v3340_v13, %v3400_v49  ;;  %v4441_v32 = vld [vmem:[#allocation7 + $0x89] sm:$0xff]  ;;  %v3907_v49 = vmax.f32 %v9610_v31, %v9649_v55  ;;  %v3908_v31 = vmax.f32 %v9616_v58, %v9651_v54 }
 0x250   : > { %v3809_v3 = vld [vmem:[#allocation6 + $0xd6] sm:$0xf]  ;;  %3760 = vst.msk [vmem:[#allocation6 + $0x14e] sm:$0xff] %vm308_vm0, %v3699_v6  ;;  %v4473_v34 = vmax.f32 %v4409_v51, %v4441_v32  ;;  %v3282_v21 = vld [vmem:[#allocation5 + $0x16d] sm:$0xff]  ;;  %v4195_v6 = vmax.f32 %v4098_v25, %v9699_v8 }
 0x251   : > { %v3580_v33 = vmax.f32 %v3460_v28, %v3520_v35  ;;  %v3906_v36 = vmax.f32 %v3809_v3, %v3858_v17  ;;  %v3955_v9 = vld [vmem:[#allocation6 + $0x116] sm:$0xf]  ;;  %v4505_v42 = vld [vmem:[#allocation7 + $0x8a] sm:$0xff]  ;;  %v3342_v20 = vmax.f32 %v3222_v60, %v3282_v21 }
 0x252   : > { %v4314_v16 = vld [vmem:[#allocation7 + $0x8f] sm:$0xff]  ;;  %v4537_v63 = vmax.f32 %v4473_v34, %v4505_v42  ;;  %v4315_v47 = vld [vmem:[#allocation7 + $0xa7] sm:$0xff]  ;;  %4243 = vst.msk [vmem:[#allocation7 + $0xc6] sm:$0xff] %vm308_vm0, %v4195_v6 }
 0x253   : > { %v4346_v62 = vmax.f32 %v4282_v15, %v4314_v16  ;;  %v4146_v52 = vld [vmem:[#allocation6 + $0x136] sm:$0xf]  ;;  %v3700_v50 = vmax.f32 %v3580_v33, %v3640_v18  ;;  %v4003_v27 = vmax.f32 %v3906_v36, %v3955_v9  ;;  %v3402_v19 = vld [vmem:[#allocation5 + $0x16e] sm:$0xff]  ;;  %v4347_v46 = vmax.f32 %v4283_v61, %v4315_v47 }
 0x254   : > { %v4378_v10 = vld [vmem:[#allocation7 + $0x90] sm:$0xff]  ;;  %v4194_v45 = vmax.f32 %v4097_v30, %v4146_v52  ;;  %v3462_v13 = vmax.f32 %v3342_v20, %v3402_v19  ;;  %7253 = vmatprep.mubr.msk.f32.mxu0 %vm308_vm0, %v4537_v63  ;;  %v4379_v43 = vld [vmem:[#allocation7 + $0xa8] sm:$0xff]  ;;  %v9703_v30 = vpop.f32.mrf.mxu0 }
 0x255   : > { %v4410_v59 = vmax.f32 %v4346_v62, %v4378_v10  ;;  %v4442_v12 = vld [vmem:[#allocation7 + $0x91] sm:$0xff]  ;;  %3761 = vst.msk [vmem:[#allocation6 + $0x156] sm:$0xf] %vm3730_vm3, %v3700_v50  ;;  %v3521_v26 = vld [vmem:[#allocation5 + $0x167] sm:$0xff]  ;;  %v4411_v37 = vmax.f32 %v4347_v46, %v4379_v43  ;;  %v9717_v50 = vmax.f32 %v3907_v49, %v9670_v2 }
 0x256   : > { %v4052_v23 = vld [vmem:[#allocation6 + $0x136] sm:$0xf]  ;;  %4242 = vst.msk [vmem:[#allocation7 + $0xb6] sm:$0xf] %vm3730_vm3, %v4194_v45  ;;  %v3581_v35 = vmax.f32 %v3461_v29, %v3521_v26  ;;  %v3641_v3 = vld [vmem:[#allocation5 + $0x168] sm:$0xff]  ;;  %v9710_v24 = vpop.f32.mrf.mxu0 }
 0x257   : > { %v4641_v1 = vld [vmem:[#allocation6 + $0x110] sm:$0xff]  ;;  %v4474_v40 = vmax.f32 %v4410_v59, %v4442_v12  ;;  %v4100_v28 = vmax.f32 %v4003_v27, %v4052_v23  ;;  %v9722_v12 = vmax.f32 %v3908_v31, %v9672_v39  ;;  %v4642_v27 = vld [vmem:[#allocation6 + $0x128] sm:$0xff]  ;;  %v4101_v43 = vmax.f32 %v9717_v50, %v9699_v8 }
 0x258   : > { %v4506_v0 = vld [vmem:[#allocation7 + $0x92] sm:$0xff]  ;;  %7210 = vmatmul.mubr.msk.f32.gmra.mxu1 %vm308_vm0, %v4641_v1  ;;  %v4443_v36 = vld [vmem:[#allocation7 + $0xa9] sm:$0xff]  ;;  %v3701_v51 = vmax.f32 %v3581_v35, %v3641_v3  ;;  %v9719_v56 = vpop.f32.mrf.mxu0 }
 0x259   : > { %v3522_v48 = vld [vmem:[#allocation5 + $0x16f] sm:$0xff]  ;;  %v4538_v17 = vmax.f32 %v4474_v40, %v4506_v0  ;;  %v4475_v11 = vmax.f32 %v4411_v37, %v4443_v36  ;;  %v3523_v10 = vld [vmem:[#allocation5 + $0x177] sm:$0xf]  ;;  %v3224_v23 = vld [vmem:[#allocation5 + $0x184] sm:$0xff]  ;;  %7212 = vmatprep.mubr.msk.f32.mxu1 %vm308_vm0, %v4642_v27 }
 0x25a   : > { %v9701_v7 = vld [vmem:[#allocation6 + $0x14e] sm:$0xff]  ;;  %v3582_v57 = vmax.f32 %v3462_v13, %v3522_v48  ;;  %v3403_v32 = vld [vmem:[#allocation5 + $0x176] sm:$0xf]  ;;  %3762 = vst.msk [vmem:[#allocation6 + $0x166] sm:$0xff] %vm308_vm0, %v3701_v51  ;;  %v9728_v19 = vpop.f32.mrf.mxu0  ;;  %v9731_v13 = vpop.f32.mrf.mxu1  ;;  %v3404_v48 = vld [vmem:[#allocation5 + $0x186] sm:$0xff] }
 0x25b   : > { %v3223_v15 = vld [vmem:[#allocation5 + $0x174] sm:$0xf]  ;;  %v4196_v18 = vmax.f32 %v4099_v53, %v9701_v7  ;;  %7254 = vmatmul.mubr.msk.f32.gmra.mxu0 %vm308_vm0, %v4538_v17  ;;  %v4507_v9 = vld [vmem:[#allocation7 + $0xaa] sm:$0xff]  ;;  %v3643_v0 = vld [vmem:[#allocation5 + $0x178] sm:$0xf] }
 0x25c   : > { %v3642_v44 = vld [vmem:[#allocation5 + $0x170] sm:$0xff]  ;;  %v4539_v21 = vmax.f32 %v4475_v11, %v4507_v9  ;;  %v3284_v53 = vld [vmem:[#allocation5 + $0x185] sm:$0xff] }
 0x25d   : > { %v3283_v33 = vld [vmem:[#allocation5 + $0x175] sm:$0xf]  ;;  %v3702_v16 = vmax.f32 %v3582_v57, %v3642_v44  ;;  %4244 = vst.msk [vmem:[#allocation7 + $0xce] sm:$0xff] %vm308_vm0, %v4196_v18  ;;  %v3225_v25 = vld [vmem:[#allocation5 + $0x18c] sm:$0xff]  ;;  %v3344_v47 = vmax.f32 %v3224_v23, %v3284_v53  ;;  %v4102_v57 = vmax.f32 %v9722_v12, %v9701_v7  ;;  %v9739_v44 = vpop.f32.mrf.mxu1 }
 0x25e   : > { %v4284_v41 = vld [vmem:[#allocation7 + $0xae] sm:$0xff]  ;;  %v3343_v5 = vmax.f32 %v3223_v15, %v3283_v33  ;;  %v4149_v60 = vld [vmem:[#allocation6 + $0x156] sm:$0xf]  ;;  %7256 = vmatprep.mubr.msk.f32.mxu0 %vm308_vm0, %v4539_v21  ;;  %v4285_v31 = vld [vmem:[#allocation7 + $0xc6] sm:$0xff]  ;;  %v3911_v21 = vmax.f32 %v9651_v54, %v9672_v39 }
 0x25f   : > { %v3861_v62 = vld [vmem:[#allocation6 + $0x116] sm:$0xf]  ;;  %v4197_v52 = vmax.f32 %v4100_v28, %v4149_v60  ;;  %3763 = vst.msk [vmem:[#allocation6 + $0x16e] sm:$0xff] %vm308_vm0, %v3702_v16  ;;  %v3285_v22 = vld [vmem:[#allocation5 + $0x18d] sm:$0xff]  ;;  %v9735_v28 = vpop.f32.mrf.mxu0  ;;  %v3464_v15 = vmax.f32 %v3344_v47, %v3404_v48 }
 0x260   : > { %v4316_v58 = vld [vmem:[#allocation7 + $0xaf] sm:$0xff]  ;;  %v3463_v34 = vmax.f32 %v3343_v5, %v3403_v32  ;;  %v3345_v29 = vmax.f32 %v3225_v25, %v3285_v22  ;;  %v3524_v17 = vld [vmem:[#allocation5 + $0x187] sm:$0xff] }
 0x261   : > { %v3812_v45 = vld [vmem:[#allocation6 + $0xf6] sm:$0xf]  ;;  %v4348_v42 = vmax.f32 %v4284_v41, %v4316_v58  ;;  %4245 = vst.msk [vmem:[#allocation7 + $0xd6] sm:$0xf] %vm3730_vm3, %v4197_v52  ;;  %v3405_v49 = vld [vmem:[#allocation5 + $0x18e] sm:$0xff]  ;;  %v9745_v51 = vpop.f32.mrf.mxu0  ;;  %v3584_v32 = vmax.f32 %v3464_v15, %v3524_v17  ;;  %v9747_v52 = vpop.f32.mrf.mxu1 }
 0x262   : > { %v4380_v59 = vld [vmem:[#allocation7 + $0xb0] sm:$0xff]  ;;  %v3583_v20 = vmax.f32 %v3463_v34, %v3523_v10  ;;  %v3909_v63 = vmax.f32 %v3812_v45, %v3861_v62  ;;  %v3465_v37 = vmax.f32 %v3345_v29, %v3405_v49  ;;  %v3644_v58 = vld [vmem:[#allocation5 + $0x188] sm:$0xff]  ;;  %v3910_v45 = vmax.f32 %v9649_v55, %v9670_v2 }
 0x263   : > { %v4412_v1 = vmax.f32 %v4348_v42, %v4380_v59  ;;  %v4444_v40 = vld [vmem:[#allocation7 + $0xb1] sm:$0xff]  ;;  %v9749_v34 = vld [vmem:[#allocation6 + $0x166] sm:$0xff]  ;;  %v9757_v42 = vpop.f32.mrf.mxu0  ;;  %v3704_v25 = vmax.f32 %v3584_v32, %v3644_v58  ;;  %v7099_v53 = vpop.f32.mrf.mxu1 }
 0x264   : > { %v3958_v61 = vld [vmem:[#allocation6 + $0x136] sm:$0xf]  ;;  %v3703_v26 = vmax.f32 %v3583_v20, %v3643_v0  ;;  %v4317_v33 = vld [vmem:[#allocation7 + $0xc7] sm:$0xff]  ;;  %v4198_v23 = vmax.f32 %v4101_v43, %v9749_v34  ;;  %v9768_v17 = vmax.f32 %v3910_v45, %v9699_v8 }
 0x265   : > { %v4508_v46 = vld [vmem:[#allocation7 + $0xb2] sm:$0xff]  ;;  %v4476_v35 = vmax.f32 %v4412_v1, %v4444_v40  ;;  %v9742_v36 = vmax.f32 %v3909_v63, %v3958_v61  ;;  %v4349_v5 = vmax.f32 %v4285_v31, %v4317_v33  ;;  %v4381_v50 = vld [vmem:[#allocation7 + $0xc8] sm:$0xff]  ;;  %3765 = vst.msk [vmem:[#allocation6 + $0x186] sm:$0xff] %vm308_vm0, %v3704_v25  ;;  %v4848_v48 = vpop.f32.mrf.mxu1 }
 0x266   : > { %v4643_v6 = vld [vmem:[#allocation6 + $0x130] sm:$0xff]  ;;  %3764 = vst.msk [vmem:[#allocation6 + $0x176] sm:$0xf] %vm3730_vm3, %v3703_v26  ;;  %v4644_v15 = vld [vmem:[#allocation6 + $0x148] sm:$0xff]  ;;  %v3646_v32 = vld [vmem:[#allocation5 + $0x198] sm:$0xf] }
 0x267   : > { %v3226_v18 = vld [vmem:[#allocation5 + $0x194] sm:$0xf]  ;;  %7213 = vmatmul.mubr.msk.f32.gmra.mxu1 %vm308_vm0, %v4643_v6  ;;  %v4540_v16 = vmax.f32 %v4476_v35, %v4508_v46  ;;  %v4413_v59 = vmax.f32 %v4349_v5, %v4381_v50  ;;  %v4445_v12 = vld [vmem:[#allocation7 + $0xc9] sm:$0xff]  ;;  %4246 = vst.msk [vmem:[#allocation7 + $0xe6] sm:$0xff] %vm308_vm0, %v4198_v23  ;;  %v9771_v35 = vmax.f32 %v3911_v21, %v9701_v7 }
 0x268   : > { %v3286_v3 = vld [vmem:[#allocation5 + $0x195] sm:$0xf]  ;;  %v4509_v22 = vld [vmem:[#allocation7 + $0xca] sm:$0xff]  ;;  %7215 = vmatprep.mubr.msk.f32.mxu1 %vm308_vm0, %v4644_v15 }
 0x269   : > { %v3525_v9 = vld [vmem:[#allocation5 + $0x18f] sm:$0xff]  ;;  %v3346_v41 = vmax.f32 %v3226_v18, %v3286_v3  ;;  %7257 = vmatmul.mubr.msk.f32.gmra.mxu0 %vm308_vm0, %v4540_v16  ;;  %v4477_v61 = vmax.f32 %v4413_v59, %v4445_v12  ;;  %v3526_v46 = vld [vmem:[#allocation5 + $0x197] sm:$0xf]  ;;  %v9773_v18 = vpop.f32.mrf.mxu0  ;;  %v9780_v16 = vadd.f32 %v9728_v19, %v4848_v48  ;;  %v3407_v59 = vld [vmem:[#allocation5 + $0x1a6] sm:$0xff] }
 0x26a   : > { %v4286_v11 = vld [vmem:[#allocation7 + $0xce] sm:$0xff]  ;;  %v4055_v60 = vld [vmem:[#allocation6 + $0x156] sm:$0xf]  ;;  %v3585_v62 = vmax.f32 %v3465_v37, %v3525_v9  ;;  %v3227_v37 = vld [vmem:[#allocation5 + $0x1a4] sm:$0xff] }
 0x26b   : > { %v9751_v10 = vld [vmem:[#allocation6 + $0x16e] sm:$0xff]  ;;  %v4103_v40 = vmax.f32 %v9742_v36, %v4055_v60  ;;  %v3406_v0 = vld [vmem:[#allocation5 + $0x196] sm:$0xf]  ;;  %v4541_v3 = vmax.f32 %v4477_v61, %v4509_v22  ;;  %v3287_v9 = vld [vmem:[#allocation5 + $0x1a5] sm:$0xff]  ;;  %v9788_v25 = vpop.f32.mrf.mxu0 }
 0x26c   : > { %v4318_v27 = vld [vmem:[#allocation7 + $0xcf] sm:$0xff]  ;;  %v4199_v20 = vmax.f32 %v4102_v57, %v9751_v10  ;;  %v3466_v29 = vmax.f32 %v3346_v41, %v3406_v0  ;;  %v9777_v41 = vadd.f32 %v9719_v56, %v7099_v53  ;;  %v3347_v58 = vmax.f32 %v3227_v37, %v3287_v9  ;;  %v3527_v23 = vld [vmem:[#allocation5 + $0x1a7] sm:$0xff] }
 0x26d   : > { %v3645_v63 = vld [vmem:[#allocation5 + $0x190] sm:$0xff]  ;;  %v4350_v1 = vmax.f32 %v4286_v11, %v4318_v27  ;;  %7259 = vmatprep.mubr.msk.f32.mxu0 %vm308_vm0, %v4541_v3  ;;  %v4104_v53 = vmax.f32 %v9768_v17, %v9749_v34  ;;  %v4105_v22 = vmax.f32 %v9771_v35, %v9751_v10  ;;  %v9799_v15 = vld [vmem:[#allocation6 + $0x186] sm:$0xff] }
 0x26e   : > { %v4382_v55 = vld [vmem:[#allocation7 + $0xd0] sm:$0xff]  ;;  %v3705_v54 = vmax.f32 %v3585_v62, %v3645_v63  ;;  %4247 = vst.msk [vmem:[#allocation7 + $0xee] sm:$0xff] %vm308_vm0, %v4199_v20  ;;  %v3586_v33 = vmax.f32 %v3466_v29, %v3526_v46  ;;  %v3467_v19 = vmax.f32 %v3347_v58, %v3407_v59  ;;  %v4287_v0 = vld [vmem:[#allocation7 + $0xe6] sm:$0xff]  ;;  %v3913_v46 = vmax.f32 %v9670_v2, %v9699_v8  ;;  %v9807_v2 = vpop.f32.mrf.mxu0 }
 0x26f   : > { %v4446_v47 = vld [vmem:[#allocation7 + $0xd1] sm:$0xff]  ;;  %v4414_v49 = vmax.f32 %v4350_v1, %v4382_v55  ;;  %v4201_v9 = vmax.f32 %v4104_v53, %v9799_v15  ;;  %v4646_v59 = vld [vmem:[#allocation6 + $0x168] sm:$0xff] }
 0x270   : > { %v3815_v43 = vld [vmem:[#allocation6 + $0x116] sm:$0xf]  ;;  %3766 = vst.msk [vmem:[#allocation6 + $0x18e] sm:$0xff] %vm308_vm0, %v3705_v54  ;;  %v3228_v6 = vld [vmem:[#allocation5 + $0x1ac] sm:$0xff]  ;;  %v3706_v50 = vmax.f32 %v3586_v33, %v3646_v32 }
 0x271   : > { %v3864_v26 = vld [vmem:[#allocation6 + $0x136] sm:$0xf]  ;;  %v4478_v5 = vmax.f32 %v4414_v49, %v4446_v47  ;;  %v3288_v62 = vld [vmem:[#allocation5 + $0x1ad] sm:$0xff]  ;;  %v3587_v47 = vmax.f32 %v3467_v19, %v3527_v23  ;;  %4249 = vst.msk [vmem:[#allocation7 + $0x106] sm:$0xff] %vm308_vm0, %v4201_v9  ;;  %v3230_v19 = vld [vmem:[#allocation5 + $0x1c4] sm:$0xff] }
 0x272   : > { %v3912_v57 = vmax.f32 %v3815_v43, %v3864_v26  ;;  %v4152_v31 = vld [vmem:[#allocation6 + $0x176] sm:$0xf]  ;;  %v3348_v21 = vmax.f32 %v3228_v6, %v3288_v62  ;;  %v3408_v12 = vld [vmem:[#allocation5 + $0x1ae] sm:$0xff]  ;;  %3767 = vst.msk [vmem:[#allocation6 + $0x196] sm:$0xf] %vm3730_vm3, %v3706_v50  ;;  %v9813_v50 = vmax.f32 %v3913_v46, %v9749_v34 }
 0x273   : > { %v3961_v36 = vld [vmem:[#allocation6 + $0x156] sm:$0xf]  ;;  %v4200_v60 = vmax.f32 %v4103_v40, %v4152_v31  ;;  %v3647_v40 = vld [vmem:[#allocation5 + $0x1a8] sm:$0xff]  ;;  %v3914_v31 = vmax.f32 %v9672_v39, %v9701_v7 }
 0x274   : > { %v4510_v11 = vld [vmem:[#allocation7 + $0xd2] sm:$0xff]  ;;  %v9786_v56 = vmax.f32 %v3912_v57, %v3961_v36  ;;  %v3468_v1 = vmax.f32 %v3348_v21, %v3408_v12  ;;  %v3707_v3 = vmax.f32 %v3587_v47, %v3647_v40  ;;  %v7102_v12 = vpop.f32.mrf.mxu1 }
 0x275   : > { %v9783_v45 = vld [vmem:[#allocation6 + $0x176] sm:$0xf]  ;;  %v4542_v27 = vmax.f32 %v4478_v5, %v4510_v11  ;;  %4248 = vst.msk [vmem:[#allocation7 + $0xf6] sm:$0xf] %vm3730_vm3, %v4200_v60  ;;  %v4319_v61 = vld [vmem:[#allocation7 + $0xe7] sm:$0xff] }
 0x276   : > { %v4645_v20 = vld [vmem:[#allocation6 + $0x150] sm:$0xff]  ;;  %v4351_v26 = vmax.f32 %v4287_v0, %v4319_v61  ;;  %v4383_v48 = vld [vmem:[#allocation7 + $0xe8] sm:$0xff]  ;;  %v4106_v6 = vmax.f32 %v9786_v56, %v9783_v45  ;;  %3768 = vst.msk [vmem:[#allocation6 + $0x1a6] sm:$0xff] %vm308_vm0, %v3707_v3  ;;  %v3649_v39 = vld [vmem:[#allocation5 + $0x1b8] sm:$0xf]  ;;  %v4858_v0 = vpop.f32.mrf.mxu1 }
 0x277   : > { %v3229_v63 = vld [vmem:[#allocation5 + $0x1b4] sm:$0xf]  ;;  %7216 = vmatmul.mubr.msk.f32.gmra.mxu1 %vm308_vm0, %v4645_v20  ;;  %7260 = vmatmul.mubr.msk.f32.gmra.mxu0 %vm308_vm0, %v4542_v27  ;;  %v4447_v58 = vld [vmem:[#allocation7 + $0xe9] sm:$0xff] }
 0x278   : > { %v3528_v55 = vld [vmem:[#allocation5 + $0x1af] sm:$0xff]  ;;  %v3529_v35 = vld [vmem:[#allocation5 + $0x1b7] sm:$0xf]  ;;  %v4415_v36 = vmax.f32 %v4351_v26, %v4383_v48  ;;  %7218 = vmatprep.mubr.msk.f32.mxu1 %vm308_vm0, %v4646_v59  ;;  %v9827_v26 = vadd.f32 %v9735_v28, %v7102_v12  ;;  %v9830_v48 = vadd.f32 %v9745_v51, %v4858_v0  ;;  %v3530_v28 = vld [vmem:[#allocation5 + $0x1c7] sm:$0xff]  ;;  %v3916_v51 = vmax.f32 %v9699_v8, %v9749_v34 }
 0x279   : > { %v3289_v54 = vld [vmem:[#allocation5 + $0x1b5] sm:$0xf]  ;;  %v3588_v49 = vmax.f32 %v3468_v1, %v3528_v55  ;;  %v3231_v23 = vld [vmem:[#allocation5 + $0x1cc] sm:$0xff]  ;;  %v9820_v1 = vmax.f32 %v3914_v31, %v9751_v10 }
 0x27a   : > { %v3648_v29 = vld [vmem:[#allocation5 + $0x1b0] sm:$0xff]  ;;  %v3349_v43 = vmax.f32 %v3229_v63, %v3289_v54  ;;  %v4479_v27 = vmax.f32 %v4415_v36, %v4447_v58  ;;  %v9824_v54 = vpop.f32.mrf.mxu0  ;;  %v3650_v12 = vld [vmem:[#allocation5 + $0x1c8] sm:$0xff] }
 0x27b   : > { %v3409_v17 = vld [vmem:[#allocation5 + $0x1b6] sm:$0xf]  ;;  %v4288_v57 = vld [vmem:[#allocation7 + $0xee] sm:$0xff]  ;;  %v3708_v11 = vmax.f32 %v3588_v49, %v3648_v29  ;;  %v3290_v29 = vld [vmem:[#allocation5 + $0x1c5] sm:$0xff] }
 0x27c   : > { %v9801_v37 = vld [vmem:[#allocation6 + $0x18e] sm:$0xff]  ;;  %v3469_v33 = vmax.f32 %v3349_v43, %v3409_v17  ;;  %v3818_v60 = vld [vmem:[#allocation6 + $0x136] sm:$0xf]  ;;  %v3410_v43 = vld [vmem:[#allocation5 + $0x1c6] sm:$0xff]  ;;  %v3350_v3 = vmax.f32 %v3230_v19, %v3290_v29 }
 0x27d   : > { %v4202_v5 = vmax.f32 %v4105_v22, %v9801_v37  ;;  %v3867_v32 = vld [vmem:[#allocation6 + $0x156] sm:$0xf]  ;;  %3769 = vst.msk [vmem:[#allocation6 + $0x1ae] sm:$0xff] %vm308_vm0, %v3708_v11  ;;  %v4511_v20 = vld [vmem:[#allocation7 + $0xea] sm:$0xff] }
 0x27e   : > { %v3964_v62 = vld [vmem:[#allocation6 + $0x176] sm:$0xf]  ;;  %v3589_v45 = vmax.f32 %v3469_v33, %v3529_v35  ;;  %v3915_v21 = vmax.f32 %v3818_v60, %v3867_v32  ;;  %v4543_v61 = vmax.f32 %v4479_v27, %v4511_v20  ;;  %v3291_v46 = vld [vmem:[#allocation5 + $0x1cd] sm:$0xff]  ;;  %v4107_v35 = vmax.f32 %v9813_v50, %v9799_v15 }
 0x27f   : > { %v4320_v56 = vld [vmem:[#allocation7 + $0xef] sm:$0xff]  ;;  %4250 = vst.msk [vmem:[#allocation7 + $0x10e] sm:$0xff] %vm308_vm0, %v4202_v5  ;;  %v3351_v31 = vmax.f32 %v3231_v23, %v3291_v46  ;;  %v7105_v5 = vpop.f32.mrf.mxu1  ;;  %v3470_v60 = vmax.f32 %v3350_v3, %v3410_v43  ;;  %v9847_v59 = vld [vmem:[#allocation6 + $0x1a6] sm:$0xff]  ;;  %v3532_v0 = vld [vmem:[#allocation5 + $0x1d7] sm:$0xf] }
 0x280   : > { %v4352_v63 = vmax.f32 %v4288_v57, %v4320_v56  ;;  %v4384_v53 = vld [vmem:[#allocation7 + $0xf0] sm:$0xff]  ;;  %v3709_v55 = vmax.f32 %v3589_v45, %v3649_v39  ;;  %v9822_v40 = vmax.f32 %v3915_v21, %v3964_v62  ;;  %7262 = vmatprep.mubr.msk.f32.mxu0 %vm308_vm0, %v4543_v61  ;;  %v9840_v45 = vpop.f32.mrf.mxu0  ;;  %v9843_v39 = vadd.f32 %v9757_v42, %v7105_v5  ;;  %v3652_v29 = vld [vmem:[#allocation5 + $0x1d8] sm:$0xf] }
 0x281   : > { %v4155_v22 = vld [vmem:[#allocation6 + $0x196] sm:$0xf]  ;;  %v4108_v21 = vmax.f32 %v9820_v1, %v9801_v37  ;;  %v3917_v56 = vmax.f32 %v9701_v7, %v9751_v10  ;;  %v4868_v23 = vpop.f32.mrf.mxu1  ;;  %v4204_v42 = vmax.f32 %v4107_v35, %v9847_v59 }
 0x282   : > { %v4203_v47 = vmax.f32 %v4106_v6, %v4155_v22  ;;  %v4416_v49 = vmax.f32 %v4352_v63, %v4384_v53  ;;  %v4448_v17 = vld [vmem:[#allocation7 + $0xf1] sm:$0xff]  ;;  %3770 = vst.msk [vmem:[#allocation6 + $0x1b6] sm:$0xf] %vm3730_vm3, %v3709_v55  ;;  %v4289_v63 = vld [vmem:[#allocation7 + $0x106] sm:$0xff]  ;;  %v3590_v22 = vmax.f32 %v3470_v60, %v3530_v28  ;;  %v9860_v35 = vadd.f32 %v9773_v18, %v4868_v23 }
 0x283   : > { %v4061_v57 = vld [vmem:[#allocation6 + $0x196] sm:$0xf]  ;;  %v3411_v6 = vld [vmem:[#allocation5 + $0x1ce] sm:$0xff]  ;;  %4252 = vst.msk [vmem:[#allocation7 + $0x126] sm:$0xff] %vm308_vm0, %v4204_v42  ;;  %v4014_v18 = vmax.f32 %v3917_v56, %v9801_v37  ;;  %v3233_v23 = vld [vmem:[#allocation5 + $0x1e4] sm:$0xff] }
 0x284   : > { %v4512_v33 = vld [vmem:[#allocation7 + $0xf2] sm:$0xff]  ;;  %4251 = vst.msk [vmem:[#allocation7 + $0x116] sm:$0xf] %vm3730_vm3, %v4203_v47  ;;  %v4480_v11 = vmax.f32 %v4416_v49, %v4448_v17  ;;  %v3471_v32 = vmax.f32 %v3351_v31, %v3411_v6  ;;  %v4109_v8 = vmax.f32 %v9822_v40, %v4061_v57  ;;  %v7108_v40 = vpop.f32.mrf.mxu1  ;;  %v3710_v7 = vmax.f32 %v3590_v22, %v3650_v12  ;;  %v9857_v57 = vpop.f32.mrf.mxu0  ;;  %v3293_v56 = vld [vmem:[#allocation5 + $0x1e5] sm:$0xff] }
 0x285   : > { %v3531_v36 = vld [vmem:[#allocation5 + $0x1cf] sm:$0xff] }
 0x286   : > { %v4647_v9 = vld [vmem:[#allocation6 + $0x170] sm:$0xff]  ;;  %v4544_v20 = vmax.f32 %v4480_v11, %v4512_v33  ;;  %v4321_v53 = vld [vmem:[#allocation7 + $0x107] sm:$0xff]  ;;  %v3591_v55 = vmax.f32 %v3471_v32, %v3531_v36  ;;  %v4878_v36 = vpop.f32.mrf.mxu1  ;;  %3771 = vst.msk [vmem:[#allocation6 + $0x1c6] sm:$0xff] %vm308_vm0, %v3710_v7  ;;  %v4013_v32 = vmax.f32 %v3916_v51, %v9799_v15 }
 0x287   : > { %7219 = vmatmul.mubr.msk.f32.gmra.mxu1 %vm308_vm0, %v4647_v9  ;;  %v3232_v62 = vld [vmem:[#allocation5 + $0x1d4] sm:$0xf]  ;;  %v4353_v1 = vmax.f32 %v4289_v63, %v4321_v53  ;;  %v4385_v61 = vld [vmem:[#allocation7 + $0x108] sm:$0xff]  ;;  %v9873_v53 = vpop.f32.mrf.mxu0  ;;  %v9876_v42 = vadd.f32 %v9807_v2, %v4878_v36 }
 0x288   : > { %v3292_v58 = vld [vmem:[#allocation5 + $0x1d5] sm:$0xf]  ;;  %7263 = vmatmul.mubr.msk.f32.gmra.mxu0 %vm308_vm0, %v4544_v20  ;;  %v4449_v9 = vld [vmem:[#allocation7 + $0x109] sm:$0xff]  ;;  %v7111_v20 = vpop.f32.mrf.mxu1  ;;  %v4110_v7 = vmax.f32 %v4013_v32, %v9847_v59  ;;  %v3920_v32 = vmax.f32 %v9751_v10, %v9801_v37 }
 0x289   : > { %v3412_v50 = vld [vmem:[#allocation5 + $0x1d6] sm:$0xf]  ;;  %v3352_v19 = vmax.f32 %v3232_v62, %v3292_v58  ;;  %v4290_v46 = vld [vmem:[#allocation7 + $0x10e] sm:$0xff]  ;;  %v4417_v3 = vmax.f32 %v4353_v1, %v4385_v61  ;;  %v9879_v22 = vadd.f32 %v9824_v54, %v7111_v20  ;;  %v3353_v1 = vmax.f32 %v3233_v23, %v3293_v56 }
 0x28a   : > { %v3651_v27 = vld [vmem:[#allocation5 + $0x1d0] sm:$0xff]  ;;  %v3653_v54 = vld [vmem:[#allocation5 + $0x1e8] sm:$0xff] }
 0x28b   : > { %v3472_v47 = vmax.f32 %v3352_v19, %v3412_v50  ;;  %v9854_v43 = vld [vmem:[#allocation6 + $0x1ae] sm:$0xff]  ;;  %v3711_v49 = vmax.f32 %v3591_v55, %v3651_v27  ;;  %v3870_v17 = vld [vmem:[#allocation6 + $0x176] sm:$0xf]  ;;  %v4481_v58 = vmax.f32 %v4417_v3, %v4449_v9 }
 0x28c   : > { %v4205_v31 = vmax.f32 %v4108_v21, %v9854_v43  ;;  %v4158_v6 = vld [vmem:[#allocation6 + $0x1b6] sm:$0xf]  ;;  %v4513_v5 = vld [vmem:[#allocation7 + $0x10a] sm:$0xff] }
 0x28d   : > { %v3592_v33 = vmax.f32 %v3472_v47, %v3532_v0  ;;  %v3821_v28 = vld [vmem:[#allocation6 + $0x156] sm:$0xf]  ;;  %v4206_v60 = vmax.f32 %v4109_v8, %v4158_v6  ;;  %3772 = vst.msk [vmem:[#allocation6 + $0x1ce] sm:$0xff] %vm308_vm0, %v3711_v49  ;;  %v4648_v19 = vld [vmem:[#allocation6 + $0x188] sm:$0xff]  ;;  %v9869_v8 = vadd.f32 %v9788_v25, %v7108_v40  ;;  %v4545_v55 = vmax.f32 %v4481_v58, %v4513_v5  ;;  %v4888_v40 = vpop.f32.mrf.mxu1 }
 0x28e   : > { %v4322_v11 = vld [vmem:[#allocation7 + $0x10f] sm:$0xff]  ;;  %v3918_v62 = vmax.f32 %v3821_v28, %v3870_v17  ;;  %4253 = vst.msk [vmem:[#allocation7 + $0x12e] sm:$0xff] %vm308_vm0, %v4205_v31  ;;  %7221 = vmatprep.mubr.msk.f32.mxu1 %vm308_vm0, %v4648_v19  ;;  %v3413_v47 = vld [vmem:[#allocation5 + $0x1e6] sm:$0xff]  ;;  %v4111_v49 = vmax.f32 %v4014_v18, %v9854_v43  ;;  %v9885_v31 = vadd.f32 %v9840_v45, %v4888_v40  ;;  %v3535_v56 = vld [vmem:[#allocation5 + $0x1f7] sm:$0xf] }
 0x28f   : > { %v4354_v50 = vmax.f32 %v4290_v46, %v4322_v11  ;;  %v4386_v21 = vld [vmem:[#allocation7 + $0x110] sm:$0xff]  ;;  %v3712_v12 = vmax.f32 %v3592_v33, %v3652_v29  ;;  %4254 = vst.msk [vmem:[#allocation7 + $0x136] sm:$0xf] %vm3730_vm3, %v4206_v60  ;;  %v3533_v17 = vld [vmem:[#allocation5 + $0x1e7] sm:$0xff]  ;;  %7265 = vmatprep.mubr.msk.f32.mxu0 %vm308_vm0, %v4545_v55  ;;  %v3473_v33 = vmax.f32 %v3353_v1, %v3413_v47  ;;  %v3655_v47 = vld [vmem:[#allocation5 + $0x1f8] sm:$0xf] }
 0x290   : > { %v3967_v27 = vld [vmem:[#allocation6 + $0x196] sm:$0xf]  ;;  %v3234_v51 = vld [vmem:[#allocation5 + $0x1ec] sm:$0xff]  ;;  %v3919_v60 = vmax.f32 %v9749_v34, %v9799_v15 }
 0x291   : > { %v3294_v63 = vld [vmem:[#allocation5 + $0x1ed] sm:$0xff]  ;;  %v4418_v0 = vmax.f32 %v4354_v50, %v4386_v21  ;;  %3773 = vst.msk [vmem:[#allocation6 + $0x1d6] sm:$0xf] %vm3730_vm3, %v3712_v12  ;;  %v4015_v2 = vmax.f32 %v3918_v62, %v3967_v27  ;;  %v3295_v18 = vld [vmem:[#allocation5 + $0x1f5] sm:$0xf]  ;;  %v9893_v62 = vpop.f32.mrf.mxu0  ;;  %v3593_v27 = vmax.f32 %v3473_v33, %v3533_v17 }
 0x292   : > { %v4450_v25 = vld [vmem:[#allocation7 + $0x111] sm:$0xff]  ;;  %v3354_v61 = vmax.f32 %v3234_v51, %v3294_v63  ;;  %v4291_v11 = vld [vmem:[#allocation7 + $0x126] sm:$0xff] }
 0x293   : > { %v3414_v29 = vld [vmem:[#allocation5 + $0x1ee] sm:$0xff]  ;;  %v4482_v6 = vmax.f32 %v4418_v0, %v4450_v25  ;;  %v3415_v45 = vld [vmem:[#allocation5 + $0x1f6] sm:$0xf]  ;;  %v9895_v50 = vld [vmem:[#allocation6 + $0x1c6] sm:$0xff]  ;;  %v3713_v25 = vmax.f32 %v3593_v27, %v3653_v54  ;;  %v9912_v54 = vmax.f32 %v3920_v32, %v9854_v43 }
 0x294   : > { %v4514_v46 = vld [vmem:[#allocation7 + $0x112] sm:$0xff]  ;;  %v3474_v28 = vmax.f32 %v3354_v61, %v3414_v29  ;;  %v4207_v34 = vmax.f32 %v4110_v7, %v9895_v50  ;;  %v9904_v7 = vpop.f32.mrf.mxu0  ;;  %v3236_v32 = vld [vmem:[#allocation5 + $0x204] sm:$0xff] }
 0x295   : > { %v3534_v3 = vld [vmem:[#allocation5 + $0x1ef] sm:$0xff]  ;;  %v4546_v58 = vmax.f32 %v4482_v6, %v4514_v46  ;;  %v4323_v20 = vld [vmem:[#allocation7 + $0x127] sm:$0xff]  ;;  %3774 = vst.msk [vmem:[#allocation6 + $0x1e6] sm:$0xff] %vm308_vm0, %v3713_v25 }
 0x296   : > { %v3654_v36 = vld [vmem:[#allocation5 + $0x1f0] sm:$0xff]  ;;  %v3594_v19 = vmax.f32 %v3474_v28, %v3534_v3  ;;  %v4355_v63 = vmax.f32 %v4291_v11, %v4323_v20  ;;  %v4387_v29 = vld [vmem:[#allocation7 + $0x128] sm:$0xff]  ;;  %4255 = vst.msk [vmem:[#allocation7 + $0x146] sm:$0xff] %vm308_vm0, %v4207_v34  ;;  %v9909_v3 = vmax.f32 %v3919_v60, %v9847_v59 }
 0x297   : > { %v4649_v9 = vld [vmem:[#allocation6 + $0x190] sm:$0xff]  ;;  %7266 = vmatmul.mubr.msk.f32.gmra.mxu0 %vm308_vm0, %v4546_v58  ;;  %v3296_v20 = vld [vmem:[#allocation5 + $0x205] sm:$0xff] }
 0x298   : > { %v3235_v5 = vld [vmem:[#allocation5 + $0x1f4] sm:$0xf]  ;;  %7222 = vmatmul.mubr.msk.f32.gmra.mxu1 %vm308_vm0, %v4649_v9  ;;  %v3714_v1 = vmax.f32 %v3594_v19, %v3654_v36  ;;  %v4451_v40 = vld [vmem:[#allocation7 + $0x129] sm:$0xff]  ;;  %v7114_v36 = vpop.f32.mrf.mxu1 }
 0x299   : > { %v9897_v21 = vld [vmem:[#allocation6 + $0x1ce] sm:$0xff]  ;;  %v4064_v12 = vld [vmem:[#allocation6 + $0x1b6] sm:$0xf]  ;;  %v3355_v23 = vmax.f32 %v3235_v5, %v3295_v18  ;;  %v9915_v27 = vadd.f32 %v9857_v57, %v7114_v36 }
 0x29a   : > { %v4208_v10 = vmax.f32 %v4111_v49, %v9897_v21  ;;  %v4112_v51 = vmax.f32 %v4015_v2, %v4064_v12  ;;  %v4292_v55 = vld [vmem:[#allocation7 + $0x12e] sm:$0xff]  ;;  %v4419_v49 = vmax.f32 %v4355_v63, %v4387_v29  ;;  %v4161_v2 = vld [vmem:[#allocation6 + $0x1d6] sm:$0xf]  ;;  %3775 = vst.msk [vmem:[#allocation6 + $0x1ee] sm:$0xff] %vm308_vm0, %v3714_v1  ;;  %v4898_v34 = vpop.f32.mrf.mxu1  ;;  %v3356_v63 = vmax.f32 %v3236_v32, %v3296_v20 }
 0x29b   : > { %v4324_v0 = vld [vmem:[#allocation7 + $0x12f] sm:$0xff]  ;;  %v3475_v61 = vmax.f32 %v3355_v23, %v3415_v45  ;;  %v9922_v57 = vadd.f32 %v9873_v53, %v4898_v34 }
 0x29c   : > { %v4356_v46 = vmax.f32 %v4292_v55, %v4324_v0  ;;  %v4388_v17 = vld [vmem:[#allocation7 + $0x130] sm:$0xff]  ;;  %4256 = vst.msk [vmem:[#allocation7 + $0x14e] sm:$0xff] %vm308_vm0, %v4208_v10  ;;  %v4209_v18 = vmax.f32 %v4112_v51, %v4161_v2  ;;  %v4650_v12 = vld [vmem:[#allocation6 + $0x1a8] sm:$0xff]  ;;  %v4483_v19 = vmax.f32 %v4419_v49, %v4451_v40  ;;  %v9919_v0 = vpop.f32.mrf.mxu0  ;;  %v4114_v49 = vmax.f32 %v9912_v54, %v9897_v21 }
 0x29d   : > { %v3595_v6 = vmax.f32 %v3475_v61, %v3535_v56  ;;  %v3824_v33 = vld [vmem:[#allocation6 + $0x176] sm:$0xf]  ;;  %v4515_v9 = vld [vmem:[#allocation7 + $0x12a] sm:$0xff]  ;;  %7224 = vmatprep.mubr.msk.f32.mxu1 %vm308_vm0, %v4650_v12  ;;  %v4113_v61 = vmax.f32 %v9909_v3, %v9895_v50 }
 0x29e   : > { %v3873_v28 = vld [vmem:[#allocation6 + $0x196] sm:$0xf]  ;;  %v4420_v5 = vmax.f32 %v4356_v46, %v4388_v17  ;;  %v3237_v23 = vld [vmem:[#allocation5 + $0x20c] sm:$0xff]  ;;  %4257 = vst.msk [vmem:[#allocation7 + $0x156] sm:$0xf] %vm3730_vm3, %v4209_v18  ;;  %v4547_v25 = vmax.f32 %v4483_v19, %v4515_v9  ;;  %v7117_v46 = vpop.f32.mrf.mxu1 }
 0x29f   : > { %v4452_v11 = vld [vmem:[#allocation7 + $0x131] sm:$0xff]  ;;  %v3921_v45 = vmax.f32 %v3824_v33, %v3873_v28  ;;  %v3715_v60 = vmax.f32 %v3595_v6, %v3655_v47  ;;  %v3416_v51 = vld [vmem:[#allocation5 + $0x206] sm:$0xff]  ;;  %v9930_v36 = vadd.f32 %v9893_v62, %v7117_v46 }
 0x2a0   : > { %v3970_v58 = vld [vmem:[#allocation6 + $0x1b6] sm:$0xf]  ;;  %v4484_v10 = vmax.f32 %v4420_v5, %v4452_v11  ;;  %v3297_v56 = vld [vmem:[#allocation5 + $0x20d] sm:$0xff]  ;;  %v3476_v6 = vmax.f32 %v3356_v63, %v3416_v51  ;;  %7268 = vmatprep.mubr.msk.f32.mxu0 %vm308_vm0, %v4547_v25  ;;  %v4908_v18 = vpop.f32.mrf.mxu1 }
 0x2a1   : > { %v3417_v55 = vld [vmem:[#allocation5 + $0x20e] sm:$0xff]  ;;  %3776 = vst.msk [vmem:[#allocation6 + $0x1f6] sm:$0xf] %vm3730_vm3, %v3715_v60  ;;  %v4018_v47 = vmax.f32 %v3921_v45, %v3970_v58  ;;  %v3357_v29 = vmax.f32 %v3237_v23, %v3297_v56  ;;  %v4067_v2 = vld [vmem:[#allocation6 + $0x1d6] sm:$0xf]  ;;  %v4293_v3 = vld [vmem:[#allocation7 + $0x146] sm:$0xff]  ;;  %v5242_v60 = vpop.f32.mrf.mxu0  ;;  %v9936_v62 = vadd.f32 %v9904_v7, %v4908_v18  ;;  %v3923_v56 = vmax.f32 %v9801_v37, %v9854_v43 }
 0x2a2   : > { %v4516_v1 = vld [vmem:[#allocation7 + $0x132] sm:$0xff]  ;;  %v3536_v40 = vld [vmem:[#allocation5 + $0x207] sm:$0xff]  ;;  %v7120_v51 = vpop.f32.mrf.mxu1 }
 0x2a3   : > { %v4548_v17 = vmax.f32 %v4484_v10, %v4516_v1  ;;  %v3537_v33 = vld [vmem:[#allocation5 + $0x20f] sm:$0xff]  ;;  %v4325_v9 = vld [vmem:[#allocation7 + $0x147] sm:$0xff]  ;;  %v3477_v5 = vmax.f32 %v3357_v29, %v3417_v55  ;;  %v3596_v12 = vmax.f32 %v3476_v6, %v3536_v40  ;;  %v4115_v20 = vmax.f32 %v4018_v47, %v4067_v2  ;;  %v3538_v6 = vld [vmem:[#allocation5 + $0x217] sm:$0xf] }
 0x2a4   : > { %v3656_v53 = vld [vmem:[#allocation5 + $0x208] sm:$0xff]  ;;  %v4651_v28 = vld [vmem:[#allocation6 + $0x1b0] sm:$0xff]  ;;  %v4357_v54 = vmax.f32 %v4293_v3, %v4325_v9  ;;  %v3922_v10 = vmax.f32 %v9799_v15, %v9847_v59 }
 0x2a5   : > { %v3657_v11 = vld [vmem:[#allocation5 + $0x210] sm:$0xff]  ;;  %7225 = vmatmul.mubr.msk.f32.gmra.mxu1 %vm308_vm0, %v4651_v28  ;;  %7269 = vmatmul.mubr.msk.f32.gmra.mxu0 %vm308_vm0, %v4548_v17  ;;  %v4389_v45 = vld [vmem:[#allocation7 + $0x148] sm:$0xff]  ;;  %v3597_v34 = vmax.f32 %v3477_v5, %v3537_v33  ;;  %v3716_v29 = vmax.f32 %v3596_v12, %v3656_v53  ;;  %v4918_v33 = vpop.f32.mrf.mxu1 }
 0x2a6   : > { %v4294_v58 = vld [vmem:[#allocation7 + $0x14e] sm:$0xff]  ;;  %v9938_v32 = vld [vmem:[#allocation6 + $0x1e6] sm:$0xff]  ;;  %v4421_v55 = vmax.f32 %v4357_v54, %v4389_v45  ;;  %v3418_v40 = vld [vmem:[#allocation5 + $0x216] sm:$0xf] }
 0x2a7   : > { %v3238_v19 = vld [vmem:[#allocation5 + $0x214] sm:$0xf]  ;;  %v4453_v25 = vld [vmem:[#allocation7 + $0x149] sm:$0xff]  ;;  %v4210_v1 = vmax.f32 %v4113_v61, %v9938_v32  ;;  %v3717_v47 = vmax.f32 %v3597_v34, %v3657_v11  ;;  %3777 = vst.msk [vmem:[#allocation6 + $0x206] sm:$0xff] %vm308_vm0, %v3716_v29  ;;  %v3658_v61 = vld [vmem:[#allocation5 + $0x218] sm:$0xf]  ;;  %v9953_v11 = vmax.f32 %v3922_v10, %v9895_v50  ;;  %v7123_v45 = vpop.f32.mrf.mxu1 }
 0x2a8   : > { %v9940_v23 = vld [vmem:[#allocation6 + $0x1ee] sm:$0xff]  ;;  %v4485_v15 = vmax.f32 %v4421_v55, %v4453_v25  ;;  %v4164_v37 = vld [vmem:[#allocation6 + $0x1f6] sm:$0xf]  ;;  %v9957_v25 = vadd.f32 %v9919_v0, %v7120_v51  ;;  %v3299_v10 = vld [vmem:[#allocation5 + $0x225] sm:$0xff] }
 0x2a9   : > { %v3298_v63 = vld [vmem:[#allocation5 + $0x215] sm:$0xf]  ;;  %v4211_v7 = vmax.f32 %v4114_v49, %v9940_v23  ;;  %v4517_v46 = vld [vmem:[#allocation7 + $0x14a] sm:$0xff]  ;;  %4258 = vst.msk [vmem:[#allocation7 + $0x166] sm:$0xff] %vm308_vm0, %v4210_v1  ;;  %v7173_v49 = vpop.f32.mrf.mxu0  ;;  %v4212_v5 = vmax.f32 %v4115_v20, %v4164_v37  ;;  %3778 = vst.msk [vmem:[#allocation6 + $0x20e] sm:$0xff] %vm308_vm0, %v3717_v47 }
 0x2aa   : > { %v4326_v17 = vld [vmem:[#allocation7 + $0x14f] sm:$0xff]  ;;  %v3358_v2 = vmax.f32 %v3238_v19, %v3298_v63  ;;  %v4020_v19 = vmax.f32 %v3923_v56, %v9897_v21  ;;  %v3239_v63 = vld [vmem:[#allocation5 + $0x224] sm:$0xff]  ;;  %v4928_v56 = vpop.f32.mrf.mxu1 }
 0x2ab   : > { %v4358_v28 = vmax.f32 %v4294_v58, %v4326_v17  ;;  %4259 = vst.msk [vmem:[#allocation7 + $0x16e] sm:$0xff] %vm308_vm0, %v4211_v7  ;;  %v3827_v3 = vld [vmem:[#allocation6 + $0x196] sm:$0xf]  ;;  %v4549_v58 = vmax.f32 %v4485_v15, %v4517_v46  ;;  %v4652_v34 = vld [vmem:[#allocation6 + $0x1c8] sm:$0xff]  ;;  %v9963_v46 = vadd.f32 %v7173_v49, %v7123_v45  ;;  %v3359_v51 = vmax.f32 %v3239_v63, %v3299_v10 }
 0x2ac   : > { %v4390_v53 = vld [vmem:[#allocation7 + $0x150] sm:$0xff]  ;;  %v3478_v18 = vmax.f32 %v3358_v2, %v3418_v40  ;;  %4260 = vst.msk [vmem:[#allocation7 + $0x176] sm:$0xf] %vm3730_vm3, %v4212_v5  ;;  %7227 = vmatprep.mubr.msk.f32.mxu1 %vm308_vm0, %v4652_v34  ;;  %v3419_v29 = vld [vmem:[#allocation5 + $0x226] sm:$0xff]  ;;  %v9961_v40 = vadd.f32 %v5242_v60, %v4918_v33  ;;  %v4117_v5 = vmax.f32 %v4020_v19, %v9940_v23 }
 0x2ad   : > { %v4454_v9 = vld [vmem:[#allocation7 + $0x151] sm:$0xff]  ;;  %v4422_v12 = vmax.f32 %v4358_v28, %v4390_v53  ;;  %7271 = vmatprep.mubr.msk.f32.mxu0 %vm308_vm0, %v4549_v58  ;;  %v4116_v28 = vmax.f32 %v9953_v11, %v9938_v32  ;;  %v3659_v11 = vld [vmem:[#allocation5 + $0x228] sm:$0xff] }
 0x2ae   : > { %v3876_v54 = vld [vmem:[#allocation6 + $0x1b6] sm:$0xf]  ;;  %v3240_v55 = vld [vmem:[#allocation5 + $0x22c] sm:$0xff]  ;;  %v3598_v20 = vmax.f32 %v3478_v18, %v3538_v6  ;;  %v5252_v6 = vpop.f32.mrf.mxu0  ;;  %v3479_v18 = vmax.f32 %v3359_v51, %v3419_v29 }
 0x2af   : > { %v3924_v1 = vmax.f32 %v3827_v3, %v3876_v54  ;;  %v3300_v7 = vld [vmem:[#allocation5 + $0x22d] sm:$0xff]  ;;  %v4486_v17 = vmax.f32 %v4422_v12, %v4454_v9  ;;  %v3973_v0 = vld [vmem:[#allocation6 + $0x1d6] sm:$0xf]  ;;  %v9968_v33 = vadd.f32 %v5252_v6, %v4928_v56 }
 0x2b0   : > { %v4518_v47 = vld [vmem:[#allocation7 + $0x152] sm:$0xff]  ;;  %v3360_v2 = vmax.f32 %v3240_v55, %v3300_v7  ;;  %v3718_v37 = vmax.f32 %v3598_v20, %v3658_v61  ;;  %v3539_v3 = vld [vmem:[#allocation5 + $0x227] sm:$0xff] }
 0x2b1   : > { %v3420_v15 = vld [vmem:[#allocation5 + $0x22e] sm:$0xff]  ;;  %10295 = vst [vmem:[#allocation8_spill] sm:$0xff] %v9968_v33  ;;  %v4550_v49 = vmax.f32 %v4486_v17, %v4518_v47  ;;  %v3421_v58 = vld [vmem:[#allocation5 + $0x236] sm:$0xf]  ;;  %v4295_v12 = vld [vmem:[#allocation7 + $0x166] sm:$0xff]  ;;  %v4021_v61 = vmax.f32 %v3924_v1, %v3973_v0  ;;  %v3599_v19 = vmax.f32 %v3479_v18, %v3539_v3  ;;  %v3925_v47 = vmax.f32 %v9847_v59, %v9895_v50 }
 0x2b2   : > { %v3540_v53 = vld [vmem:[#allocation5 + $0x22f] sm:$0xff]  ;;  %v3480_v9 = vmax.f32 %v3360_v2, %v3420_v15  ;;  %v4327_v34 = vld [vmem:[#allocation7 + $0x167] sm:$0xff]  ;;  %3779 = vst.msk [vmem:[#allocation6 + $0x216] sm:$0xf] %vm3730_vm3, %v3718_v37  ;;  %v3926_v1 = vmax.f32 %v9854_v43, %v9897_v21  ;;  %v3541_v51 = vld [vmem:[#allocation5 + $0x237] sm:$0xf] }
 0x2b3   : > { %v4653_v60 = vld [vmem:[#allocation6 + $0x1d0] sm:$0xff]  ;;  %7272 = vmatmul.mubr.msk.f32.gmra.mxu0 %vm308_vm0, %v4550_v49  ;;  %v4359_v55 = vmax.f32 %v4295_v12, %v4327_v34  ;;  %v4391_v20 = vld [vmem:[#allocation7 + $0x168] sm:$0xff]  ;;  %v3661_v59 = vld [vmem:[#allocation5 + $0x238] sm:$0xf]  ;;  %v7176_v34 = vpop.f32.mrf.mxu0 }
 0x2b4   : > { %7228 = vmatmul.mubr.msk.f32.gmra.mxu1 %vm308_vm0, %v4653_v60  ;;  %v3241_v54 = vld [vmem:[#allocation5 + $0x234] sm:$0xf]  ;;  %v3600_v7 = vmax.f32 %v3480_v9, %v3540_v53  ;;  %v9974_v56 = vld [vmem:[#allocation6 + $0x206] sm:$0xff]  ;;  %v3719_v60 = vmax.f32 %v3599_v19, %v3659_v11  ;;  %v7126_v11 = vpop.f32.mrf.mxu1 }
 0x2b5   : > { %v3301_v45 = vld [vmem:[#allocation5 + $0x235] sm:$0xf]  ;;  %v4423_v2 = vmax.f32 %v4359_v55, %v4391_v20  ;;  %v4455_v15 = vld [vmem:[#allocation7 + $0x169] sm:$0xff]  ;;  %v4213_v37 = vmax.f32 %v4116_v28, %v9974_v56  ;;  %v9992_v20 = vmax.f32 %v3926_v1, %v9940_v23 }
 0x2b6   : > { %v3361_v63 = vmax.f32 %v3241_v54, %v3301_v45  ;;  %v4296_v10 = vld [vmem:[#allocation7 + $0x16e] sm:$0xff]  ;;  %v4070_v53 = vld [vmem:[#allocation6 + $0x1f6] sm:$0xf]  ;;  %3780 = vst.msk [vmem:[#allocation6 + $0x226] sm:$0xff] %vm308_vm0, %v3719_v60  ;;  %v3242_v19 = vld [vmem:[#allocation5 + $0x244] sm:$0xff] }
 0x2b7   : > { %v3660_v29 = vld [vmem:[#allocation5 + $0x230] sm:$0xff]  ;;  %v4118_v54 = vmax.f32 %v4021_v61, %v4070_v53  ;;  %v4487_v43 = vmax.f32 %v4423_v2, %v4455_v15  ;;  %4261 = vst.msk [vmem:[#allocation7 + $0x186] sm:$0xff] %vm308_vm0, %v4213_v37  ;;  %v9989_v61 = vmax.f32 %v3925_v47, %v9938_v32  ;;  %v4938_v53 = vpop.f32.mrf.mxu1  ;;  %v3422_v1 = vld [vmem:[#allocation5 + $0x246] sm:$0xff] }
 0x2b8   : > { %v9976_v17 = vld [vmem:[#allocation6 + $0x20e] sm:$0xff]  ;;  %v3481_v0 = vmax.f32 %v3361_v63, %v3421_v58  ;;  %v3720_v45 = vmax.f32 %v3600_v7, %v3660_v29  ;;  %v3830_v12 = vld [vmem:[#allocation6 + $0x1b6] sm:$0xf]  ;;  %v3302_v29 = vld [vmem:[#allocation5 + $0x245] sm:$0xff] }
 0x2b9   : > { %v4328_v6 = vld [vmem:[#allocation7 + $0x16f] sm:$0xff]  ;;  %v4214_v3 = vmax.f32 %v4117_v5, %v9976_v17  ;;  %v3362_v37 = vmax.f32 %v3242_v19, %v3302_v29 }
 0x2ba   : > { %v4519_v49 = vld [vmem:[#allocation7 + $0x16a] sm:$0xff]  ;;  %v4360_v18 = vmax.f32 %v4296_v10, %v4328_v6  ;;  %v3601_v28 = vmax.f32 %v3481_v0, %v3541_v51  ;;  %v3879_v5 = vld [vmem:[#allocation6 + $0x1d6] sm:$0xf]  ;;  %3781 = vst.msk [vmem:[#allocation6 + $0x22e] sm:$0xff] %vm308_vm0, %v3720_v45 }
 0x2bb   : > { %v4392_v9 = vld [vmem:[#allocation7 + $0x170] sm:$0xff]  ;;  %4262 = vst.msk [vmem:[#allocation7 + $0x18e] sm:$0xff] %vm308_vm0, %v4214_v3  ;;  %v4654_v63 = vld [vmem:[#allocation6 + $0x1e8] sm:$0xff]  ;;  %v3927_v10 = vmax.f32 %v3830_v12, %v3879_v5  ;;  %v4551_v2 = vmax.f32 %v4487_v43, %v4519_v49  ;;  %v9995_v3 = vadd.f32 %v7176_v34, %v7126_v11  ;;  %v5262_v12 = vpop.f32.mrf.mxu0 }
 0x2bc   : > { %v4456_v58 = vld [vmem:[#allocation7 + $0x171] sm:$0xff]  ;;  %v4424_v55 = vmax.f32 %v4360_v18, %v4392_v9  ;;  %7230 = vmatprep.mubr.msk.f32.mxu1 %vm308_vm0, %v4654_v63  ;;  %v3721_v51 = vmax.f32 %v3601_v28, %v3661_v59  ;;  %v3542_v45 = vld [vmem:[#allocation5 + $0x247] sm:$0xff]  ;;  %v3482_v59 = vmax.f32 %v3362_v37, %v3422_v1  ;;  %v9999_v63 = vadd.f32 %v5262_v12, %v4938_v53 }
 0x2bd   : > { %v3243_v7 = vld [vmem:[#allocation5 + $0x24c] sm:$0xff]  ;;  %v4167_v0 = vld [vmem:[#allocation6 + $0x216] sm:$0xf]  ;;  %10296 = vst [vmem:[#allocation9_spill] sm:$0xff] %v9995_v3  ;;  %7274 = vmatprep.mubr.msk.f32.mxu0 %vm308_vm0, %v4551_v2  ;;  %v3929_v53 = vmax.f32 %v9897_v21, %v9940_v23 }
 0x2be   : > { %v3976_v15 = vld [vmem:[#allocation6 + $0x1f6] sm:$0xf]  ;;  %v3303_v6 = vld [vmem:[#allocation5 + $0x24d] sm:$0xff]  ;;  %v4488_v47 = vmax.f32 %v4424_v55, %v4456_v58  ;;  %v4215_v60 = vmax.f32 %v4118_v54, %v4167_v0  ;;  %3782 = vst.msk [vmem:[#allocation6 + $0x236] sm:$0xf] %vm3730_vm3, %v3721_v51  ;;  %10297 = vst [vmem:[#allocation10_spill] sm:$0xff] %v9999_v63  ;;  %v3928_v58 = vmax.f32 %v9895_v50, %v9938_v32  ;;  %v7129_v63 = vpop.f32.mrf.mxu1 }
 0x2bf   : > { %v3363_v18 = vmax.f32 %v3243_v7, %v3303_v6  ;;  %v3423_v9 = vld [vmem:[#allocation5 + $0x24e] sm:$0xff]  ;;  %v4024_v49 = vmax.f32 %v3927_v10, %v3976_v15  ;;  %v4119_v7 = vmax.f32 %v9989_v61, %v9974_v56  ;;  %v4120_v10 = vmax.f32 %v9992_v20, %v9976_v17  ;;  %v3424_v51 = vld [vmem:[#allocation5 + $0x256] sm:$0xf]  ;;  %v4297_v15 = vld [vmem:[#allocation7 + $0x186] sm:$0xff] }
 0x2c0   : > { %v4520_v5 = vld [vmem:[#allocation7 + $0x172] sm:$0xff]  ;;  %v3662_v28 = vld [vmem:[#allocation5 + $0x248] sm:$0xff]  ;;  %4263 = vst.msk [vmem:[#allocation7 + $0x196] sm:$0xf] %vm3730_vm3, %v4215_v60  ;;  %v3602_v29 = vmax.f32 %v3482_v59, %v3542_v45 }
 0x2c1   : > { %v3543_v43 = vld [vmem:[#allocation5 + $0x24f] sm:$0xff]  ;;  %v4552_v34 = vmax.f32 %v4488_v47, %v4520_v5  ;;  %v3483_v54 = vmax.f32 %v3363_v18, %v3423_v9  ;;  %v3544_v1 = vld [vmem:[#allocation5 + $0x257] sm:$0xf]  ;;  %v10012_v45 = vld [vmem:[#allocation6 + $0x226] sm:$0xff] }
 0x2c2   : > { %v4655_v11 = vld [vmem:[#allocation6 + $0x1f0] sm:$0xff]  ;;  %v4329_v6 = vld [vmem:[#allocation7 + $0x187] sm:$0xff]  ;;  %v3722_v18 = vmax.f32 %v3602_v29, %v3662_v28  ;;  %v3664_v9 = vld [vmem:[#allocation5 + $0x258] sm:$0xf] }
 0x2c3   : > { %v3244_v55 = vld [vmem:[#allocation5 + $0x254] sm:$0xf]  ;;  %7231 = vmatmul.mubr.msk.f32.gmra.mxu1 %vm308_vm0, %v4655_v11  ;;  %7275 = vmatmul.mubr.msk.f32.gmra.mxu0 %vm308_vm0, %v4552_v34  ;;  %v3603_v37 = vmax.f32 %v3483_v54, %v3543_v43  ;;  %v4361_v47 = vmax.f32 %v4297_v15, %v4329_v6  ;;  %v4393_v61 = vld [vmem:[#allocation7 + $0x188] sm:$0xff]  ;;  %v10016_v34 = vpop.f32.mrf.mxu0  ;;  %v4216_v54 = vmax.f32 %v4119_v7, %v10012_v45 }
 0x2c4   : > { %v3304_v19 = vld [vmem:[#allocation5 + $0x255] sm:$0xf]  ;;  %3783 = vst.msk [vmem:[#allocation6 + $0x246] sm:$0xff] %vm308_vm0, %v3722_v18  ;;  %v3245_v15 = vld [vmem:[#allocation5 + $0x264] sm:$0xff]  ;;  %v3246_v18 = vld [vmem:[#allocation5 + $0x26c] sm:$0xff] }
 0x2c5   : > { %v3663_v2 = vld [vmem:[#allocation5 + $0x250] sm:$0xff]  ;;  %v3364_v0 = vmax.f32 %v3244_v55, %v3304_v19  ;;  %v4425_v11 = vmax.f32 %v4361_v47, %v4393_v61  ;;  %v4656_v55 = vld [vmem:[#allocation6 + $0x208] sm:$0xff]  ;;  %4264 = vst.msk [vmem:[#allocation7 + $0x1a6] sm:$0xff] %vm308_vm0, %v4216_v54 }
 0x2c6   : > { %v4073_v50 = vld [vmem:[#allocation6 + $0x216] sm:$0xf]  ;;  %v10014_v12 = vld [vmem:[#allocation6 + $0x22e] sm:$0xff]  ;;  %v3723_v5 = vmax.f32 %v3603_v37, %v3663_v2  ;;  %v4026_v2 = vmax.f32 %v3929_v53, %v9976_v17  ;;  %7233 = vmatprep.mubr.msk.f32.mxu1 %vm308_vm0, %v4656_v55  ;;  %v10027_v53 = vpop.f32.mrf.mxu0 }
 0x2c7   : > { %v4121_v60 = vmax.f32 %v4024_v49, %v4073_v50  ;;  %v3484_v20 = vmax.f32 %v3364_v0, %v3424_v51  ;;  %v3833_v59 = vld [vmem:[#allocation6 + $0x1d6] sm:$0xf]  ;;  %v4298_v43 = vld [vmem:[#allocation7 + $0x18e] sm:$0xff]  ;;  %v4217_v21 = vmax.f32 %v4120_v10, %v10014_v12  ;;  %v4025_v49 = vmax.f32 %v3928_v58, %v9974_v56 }
 0x2c8   : > { %v3882_v28 = vld [vmem:[#allocation6 + $0x1f6] sm:$0xf]  ;;  %v4457_v19 = vld [vmem:[#allocation7 + $0x189] sm:$0xff]  ;;  %3784 = vst.msk [vmem:[#allocation6 + $0x24e] sm:$0xff] %vm308_vm0, %v3723_v5 }
 0x2c9   : > { %v4170_v29 = vld [vmem:[#allocation6 + $0x236] sm:$0xf]  ;;  %v3604_v0 = vmax.f32 %v3484_v20, %v3544_v1  ;;  %v3930_v51 = vmax.f32 %v3833_v59, %v3882_v28  ;;  %v4489_v7 = vmax.f32 %v4425_v11, %v4457_v19  ;;  %v4521_v6 = vld [vmem:[#allocation7 + $0x18a] sm:$0xff]  ;;  %4265 = vst.msk [vmem:[#allocation7 + $0x1ae] sm:$0xff] %vm308_vm0, %v4217_v21  ;;  %v4122_v1 = vmax.f32 %v4025_v49, %v10012_v45 }
 0x2ca   : > { %v4330_v10 = vld [vmem:[#allocation7 + $0x18f] sm:$0xff]  ;;  %v4218_v58 = vmax.f32 %v4121_v60, %v4170_v29  ;;  %v3305_v5 = vld [vmem:[#allocation5 + $0x265] sm:$0xff] }
 0x2cb   : > { %v3979_v50 = vld [vmem:[#allocation6 + $0x216] sm:$0xf]  ;;  %v4362_v37 = vmax.f32 %v4298_v43, %v4330_v10  ;;  %v3724_v61 = vmax.f32 %v3604_v0, %v3664_v9  ;;  %v4553_v20 = vmax.f32 %v4489_v7, %v4521_v6  ;;  %v3306_v11 = vld [vmem:[#allocation5 + $0x26d] sm:$0xff]  ;;  %v3365_v54 = vmax.f32 %v3245_v15, %v3305_v5 }
 0x2cc   : > { %v4394_v47 = vld [vmem:[#allocation7 + $0x190] sm:$0xff]  ;;  %4266 = vst.msk [vmem:[#allocation7 + $0x1b6] sm:$0xf] %vm3730_vm3, %v4218_v58  ;;  %v3425_v28 = vld [vmem:[#allocation5 + $0x266] sm:$0xff]  ;;  %v4123_v43 = vmax.f32 %v4026_v2, %v10014_v12  ;;  %v4027_v9 = vmax.f32 %v3930_v51, %v3979_v50  ;;  %v3366_v19 = vmax.f32 %v3246_v18, %v3306_v11  ;;  %v7182_v50 = vpop.f32.mrf.mxu0 }
 0x2cd   : > { %v10031_v59 = vld [vmem:[#allocation6 + $0x236] sm:$0xf]  ;;  %v3426_v21 = vld [vmem:[#allocation5 + $0x26e] sm:$0xff]  ;;  %v4426_v60 = vmax.f32 %v4362_v37, %v4394_v47  ;;  %3785 = vst.msk [vmem:[#allocation6 + $0x256] sm:$0xf] %vm3730_vm3, %v3724_v61  ;;  %7277 = vmatprep.mubr.msk.f32.mxu0 %vm308_vm0, %v4553_v20  ;;  %v3485_v7 = vmax.f32 %v3365_v54, %v3425_v28  ;;  %v10036_v15 = vld [vmem:[#allocation6 + $0x246] sm:$0xff]  ;;  %v3931_v37 = vmax.f32 %v9938_v32, %v9974_v56 }
 0x2ce   : > { %v4458_v55 = vld [vmem:[#allocation7 + $0x191] sm:$0xff]  ;;  %v3545_v29 = vld [vmem:[#allocation5 + $0x267] sm:$0xff]  ;;  %v3486_v5 = vmax.f32 %v3366_v19, %v3426_v21  ;;  %v4219_v18 = vmax.f32 %v4122_v1, %v10036_v15  ;;  %v3932_v54 = vmax.f32 %v9940_v23, %v9976_v17  ;;  %v4124_v56 = vmax.f32 %v4027_v9, %v10031_v59 }
 0x2cf   : > { %v3546_v0 = vld [vmem:[#allocation5 + $0x26f] sm:$0xff]  ;;  %v4490_v58 = vmax.f32 %v4426_v60, %v4458_v55  ;;  %v3605_v20 = vmax.f32 %v3485_v7, %v3545_v29  ;;  %v4299_v60 = vld [vmem:[#allocation7 + $0x1a6] sm:$0xff]  ;;  %v10050_v7 = vadd.f32 %v10016_v34, %v7129_v63  ;;  %v4028_v59 = vmax.f32 %v3931_v37, %v10012_v45  ;;  %v3667_v9 = vld [vmem:[#allocation5 + $0x278] sm:$0xf] }
 0x2d0   : > { %v3665_v49 = vld [vmem:[#allocation5 + $0x268] sm:$0xff]  ;;  %v4657_v6 = vld [vmem:[#allocation6 + $0x210] sm:$0xff]  ;;  %v3606_v19 = vmax.f32 %v3486_v5, %v3546_v0  ;;  %4267 = vst.msk [vmem:[#allocation7 + $0x1c6] sm:$0xff] %vm308_vm0, %v4219_v18  ;;  %v5282_v0 = vpop.f32.mrf.mxu0  ;;  %v4029_v45 = vmax.f32 %v3932_v54, %v10014_v12 }
 0x2d1   : > { %v3247_v10 = vld [vmem:[#allocation5 + $0x274] sm:$0xf]  ;;  %7234 = vmatmul.mubr.msk.f32.gmra.mxu1 %vm308_vm0, %v4657_v6  ;;  %v4331_v55 = vld [vmem:[#allocation7 + $0x1a7] sm:$0xff]  ;;  %v3725_v1 = vmax.f32 %v3605_v20, %v3665_v49 }
 0x2d2   : > { %v3307_v2 = vld [vmem:[#allocation5 + $0x275] sm:$0xf]  ;;  %v4363_v3 = vmax.f32 %v4299_v60, %v4331_v55  ;;  %v4395_v23 = vld [vmem:[#allocation7 + $0x1a8] sm:$0xff] }
 0x2d3   : > { %v3427_v51 = vld [vmem:[#allocation5 + $0x276] sm:$0xf]  ;;  %v10041_v61 = vld [vmem:[#allocation6 + $0x24e] sm:$0xff]  ;;  %v3367_v28 = vmax.f32 %v3247_v10, %v3307_v2  ;;  %v4948_v10 = vpop.f32.mrf.mxu1  ;;  %3786 = vst.msk [vmem:[#allocation6 + $0x266] sm:$0xff] %vm308_vm0, %v3725_v1 }
 0x2d4   : > { %v4522_v47 = vld [vmem:[#allocation7 + $0x192] sm:$0xff]  ;;  %v4220_v32 = vmax.f32 %v4123_v43, %v10041_v61  ;;  %v4459_v5 = vld [vmem:[#allocation7 + $0x1a9] sm:$0xff] }
 0x2d5   : > { %v3666_v11 = vld [vmem:[#allocation5 + $0x270] sm:$0xff]  ;;  %v4554_v21 = vmax.f32 %v4490_v58, %v4522_v47  ;;  %v3487_v29 = vmax.f32 %v3367_v28, %v3427_v51  ;;  %v4427_v58 = vmax.f32 %v4363_v3, %v4395_v23  ;;  %v10057_v51 = vadd.f32 %v10027_v53, %v4948_v10  ;;  %v4658_v60 = vld [vmem:[#allocation6 + $0x228] sm:$0xff] }
 0x2d6   : > { %v3547_v6 = vld [vmem:[#allocation5 + $0x277] sm:$0xf]  ;;  %v4300_v33 = vld [vmem:[#allocation7 + $0x1ae] sm:$0xff]  ;;  %4268 = vst.msk [vmem:[#allocation7 + $0x1ce] sm:$0xff] %vm308_vm0, %v4220_v32  ;;  %v3726_v43 = vmax.f32 %v3606_v19, %v3666_v11  ;;  %v7132_v11 = vpop.f32.mrf.mxu1  ;;  %v4125_v53 = vmax.f32 %v4028_v59, %v10036_v15  ;;  %7236 = vmatprep.mubr.msk.f32.mxu1 %vm308_vm0, %v4658_v60  ;;  %v7185_v19 = vpop.f32.mrf.mxu0  ;;  %v4126_v15 = vmax.f32 %v4029_v45, %v10041_v61 }
 0x2d7   : > { %7278 = vmatmul.mubr.msk.f32.gmra.mxu0 %vm308_vm0, %v4554_v21  ;;  %v4332_v17 = vld [vmem:[#allocation7 + $0x1af] sm:$0xff]  ;;  %v3607_v63 = vmax.f32 %v3487_v29, %v3547_v6  ;;  %v4491_v3 = vmax.f32 %v4427_v58, %v4459_v5  ;;  %v10064_v6 = vadd.f32 %v7182_v50, %v7132_v11 }
 0x2d8   : > { %v4364_v2 = vmax.f32 %v4300_v33, %v4332_v17  ;;  %v4173_v49 = vld [vmem:[#allocation6 + $0x256] sm:$0xf]  ;;  %3787 = vst.msk [vmem:[#allocation6 + $0x26e] sm:$0xff] %vm308_vm0, %v3726_v43  ;;  %v4523_v55 = vld [vmem:[#allocation7 + $0x1aa] sm:$0xff]  ;;  %v4958_v12 = vpop.f32.mrf.mxu1 }
 0x2d9   : > { %v3836_v34 = vld [vmem:[#allocation6 + $0x1f6] sm:$0xf]  ;;  %v4221_v18 = vmax.f32 %v4124_v56, %v4173_v49  ;;  %v3727_v33 = vmax.f32 %v3607_v63, %v3667_v9  ;;  %v4555_v54 = vmax.f32 %v4491_v3, %v4523_v55  ;;  %v10068_v23 = vadd.f32 %v5282_v0, %v4958_v12  ;;  %v4301_v43 = vld [vmem:[#allocation7 + $0x1c6] sm:$0xff]  ;;  %v5292_v49 = vpop.f32.mrf.mxu0 }
 0x2da   : > { %v4396_v47 = vld [vmem:[#allocation7 + $0x1b0] sm:$0xff]  ;;  %v7135_v9 = vpop.f32.mrf.mxu1 }
 0x2db   : > { %v3885_v37 = vld [vmem:[#allocation6 + $0x216] sm:$0xf]  ;;  %v4428_v28 = vmax.f32 %v4364_v2, %v4396_v47  ;;  %4269 = vst.msk [vmem:[#allocation7 + $0x1d6] sm:$0xf] %vm3730_vm3, %v4221_v18  ;;  %3788 = vst.msk [vmem:[#allocation6 + $0x276] sm:$0xf] %vm3730_vm3, %v3727_v33  ;;  %7280 = vmatprep.mubr.msk.f32.mxu0 %vm308_vm0, %v4555_v54  ;;  %v10072_v58 = vadd.f32 %v7185_v19, %v7135_v9 }
 0x2dc   : > { %v3982_v20 = vld [vmem:[#allocation6 + $0x236] sm:$0xf]  ;;  %v3933_v21 = vmax.f32 %v3836_v34, %v3885_v37  ;;  %v4174_v2 = vld [vmem:[#allocation6 + $0x266] sm:$0xff]  ;;  %v4968_v63 = vpop.f32.mrf.mxu1 }
 0x2dd   : > { %v4460_v32 = vld [vmem:[#allocation7 + $0x1b1] sm:$0xff]  ;;  %v4333_v10 = vld [vmem:[#allocation7 + $0x1c7] sm:$0xff]  ;;  %v4222_v18 = vmax.f32 %v4125_v53, %v4174_v2  ;;  %v10075_v61 = vadd.f32 %v5292_v49, %v4968_v63 }
 0x2de   : > { %v4659_v56 = vld [vmem:[#allocation6 + $0x230] sm:$0xff]  ;;  %v4492_v1 = vmax.f32 %v4428_v28, %v4460_v32  ;;  %v4030_v29 = vmax.f32 %v3933_v21, %v3982_v20  ;;  %v4365_v5 = vmax.f32 %v4301_v43, %v4333_v10  ;;  %v4397_v0 = vld [vmem:[#allocation7 + $0x1c8] sm:$0xff] }
 0x2df   : > { %7237 = vmatmul.mubr.msk.f32.gmra.mxu1 %vm308_vm0, %v4659_v56  ;;  %v4524_v17 = vld [vmem:[#allocation7 + $0x1b2] sm:$0xff]  ;;  %v4461_v11 = vld [vmem:[#allocation7 + $0x1c9] sm:$0xff]  ;;  %4270 = vst.msk [vmem:[#allocation7 + $0x1e6] sm:$0xff] %vm308_vm0, %v4222_v18 }
 0x2e0   : > { %v4079_v59 = vld [vmem:[#allocation6 + $0x256] sm:$0xf]  ;;  %v4556_v50 = vmax.f32 %v4492_v1, %v4524_v17  ;;  %v4302_v34 = vld [vmem:[#allocation7 + $0x1ce] sm:$0xff]  ;;  %v4429_v45 = vmax.f32 %v4365_v5, %v4397_v0 }
 0x2e1   : > { %v4175_v47 = vld [vmem:[#allocation6 + $0x26e] sm:$0xff]  ;;  %v4127_v37 = vmax.f32 %v4030_v29, %v4079_v59 }
 0x2e2   : > { %7281 = vmatmul.mubr.msk.f32.gmra.mxu0 %vm308_vm0, %v4556_v50  ;;  %v4223_v20 = vmax.f32 %v4126_v15, %v4175_v47  ;;  %v4334_v3 = vld [vmem:[#allocation7 + $0x1cf] sm:$0xff]  ;;  %v4493_v28 = vmax.f32 %v4429_v45, %v4461_v11  ;;  %v10086_v11 = vpop.f32.mrf.mxu1 }
 0x2e3   : > { %v4366_v33 = vmax.f32 %v4302_v34, %v4334_v3  ;;  %v4176_v21 = vld [vmem:[#allocation6 + $0x276] sm:$0xf]  ;;  %v4525_v60 = vld [vmem:[#allocation7 + $0x1ca] sm:$0xff] }
 0x2e4   : > { %4271 = vst.msk [vmem:[#allocation7 + $0x1ee] sm:$0xff] %vm308_vm0, %v4223_v20  ;;  %v4398_v55 = vld [vmem:[#allocation7 + $0x1d0] sm:$0xff]  ;;  %v4224_v32 = vmax.f32 %v4127_v37, %v4176_v21  ;;  %v4557_v56 = vmax.f32 %v4493_v28, %v4525_v60  ;;  %v10084_v20 = vpop.f32.mrf.mxu0  ;;  %v4978_v28 = vpop.f32.mrf.mxu1 }
 0x2e5   : > { %v4430_v19 = vmax.f32 %v4366_v33, %v4398_v55  ;;  %v4462_v53 = vld [vmem:[#allocation7 + $0x1d1] sm:$0xff]  ;;  %v5158_v55 = vadd.f32 %v9688_v4, %v9724_v14  ;;  %v5163_v4 = vadd.f32 %v9710_v24, %v9747_v52 }
 0x2e6   : > { %4272 = vst.msk [vmem:[#allocation7 + $0x1f6] sm:$0xf] %vm3730_vm3, %v4224_v32  ;;  %7283 = vmatprep.mubr.msk.f32.mxu0 %vm308_vm0, %v4557_v56  ;;  %v4526_v54 = vld [vmem:[#allocation7 + $0x1d2] sm:$0xff]  ;;  %v4303_v29 = vld [vmem:[#allocation7 + $0x1e6] sm:$0xff]  ;;  %v5302_v3 = vpop.f32.mrf.mxu0  ;;  %v7193_v21 = vpop.f32.mrf.mxu1  ;;  %v5153_v56 = vadd.f32 %v9694_v38, %v9731_v13  ;;  %v10106_v38 = vld [vmem:[%s10287_s6] ss:$0 sm:$0xff] }
 0x2e7   : > { %v4494_v12 = vmax.f32 %v4430_v19, %v4462_v53  ;;  %v10088_v33 = vadd.f32 %v5302_v3, %v4978_v28  ;;  %v5637_v19 = vadd.f32 %v7193_v21, %v5158_v55  ;;  %v5168_v53 = vadd.f32 %v9703_v30, %v9739_v44 }
 0x2e8   : > { %v5477_v60 = vpop.f32.mrf.mxu1 }
 0x2e9   : > { %v4558_v1 = vmax.f32 %v4494_v12, %v4526_v54  ;;  %v5636_v12 = vadd.f32 %v5477_v60, %v5153_v56  ;;  %v7243_v54 = vpop.f32.mrf.mxu0 }
 0x2ea   : > { %v7196_v32 = vpop.f32.mrf.mxu1  ;;  %v5994_v14 = vadd.f32 %v7243_v54, %v5637_v19 }
 0x2eb   : > { %v4335_v17 = vld [vmem:[#allocation7 + $0x1e7] sm:$0xff]  ;;  %7284 = vmatmul.mubr.msk.f32.gmra.mxu0 %vm308_vm0, %v4558_v1  ;;  %v10099_v1 = vld [vmem:[%s10286_s5] ss:$0 sm:$0xff] }
 0x2ec   : > { %v4367_v43 = vmax.f32 %v4303_v29, %v4335_v17  ;;  %v4304_v15 = vld [vmem:[#allocation7 + $0x1ee] sm:$0xff]  ;;  %v5487_v29 = vpop.f32.mrf.mxu1  ;;  %v5639_v17 = vadd.f32 %v7196_v32, %v5168_v53  ;;  %v6033_v30 = vmul.f32 %v10099_v1, %v5994_v14 }
 0x2ed   : > { %v4399_v59 = vld [vmem:[#allocation7 + $0x1e8] sm:$0xff]  ;;  %v4400_v49 = vld [vmem:[#allocation7 + $0x1f0] sm:$0xff]  ;;  %v5638_v44 = vadd.f32 %v5487_v29, %v5163_v4 }
 0x2ee   : > { %v4431_v9 = vmax.f32 %v4367_v43, %v4399_v59  ;;  %v4336_v50 = vld [vmem:[#allocation7 + $0x1ef] sm:$0xff]  ;;  %v5834_v43 = vpop.f32.mrf.mxu0  ;;  %v6072_v59 = vadd.f32 %v10106_v38, %v6033_v30 }
 0x2ef   : > { %v4463_v10 = vld [vmem:[#allocation7 + $0x1e9] sm:$0xff]  ;;  %v4368_v5 = vmax.f32 %v4304_v15, %v4336_v50  ;;  %v4464_v47 = vld [vmem:[#allocation7 + $0x1f1] sm:$0xff]  ;;  %v5993_v13 = vadd.f32 %v5834_v43, %v5636_v12 }
 0x2f0   : > { %v4495_v2 = vmax.f32 %v4431_v9, %v4463_v10  ;;  %v4527_v63 = vld [vmem:[#allocation7 + $0x1ea] sm:$0xff]  ;;  %v4528_v37 = vld [vmem:[#allocation7 + $0x1f2] sm:$0xff]  ;;  %v7246_v15 = vpop.f32.mrf.mxu0  ;;  %v6104_v52 = vmax.f32 %v6072_v59, 0.0 }
 0x2f1   : > { %v4432_v0 = vmax.f32 %v4368_v5, %v4400_v49  ;;  %v6032_v9 = vmul.f32 %v10099_v1, %v5993_v13  ;;  %v5996_v50 = vadd.f32 %v7246_v15, %v5639_v17  ;;  %v7199_v49 = vpop.f32.mrf.mxu1 }
 0x2f2   : > { %v4559_v34 = vmax.f32 %v4495_v2, %v4527_v63  ;;  %v5844_v24 = vpop.f32.mrf.mxu0  ;;  %6137 = vst.msk [vmem:[%s10116_s13 + $0x8] sm:$0xff] %vm424_vm1, %v6104_v52 }
 0x2f3   : > { %v4496_v18 = vmax.f32 %v4432_v0, %v4464_v47  ;;  %v6071_v10 = vadd.f32 %v10106_v38, %v6032_v9  ;;  %v6035_v5 = vmul.f32 %v10099_v1, %v5996_v50  ;;  %v5995_v2 = vadd.f32 %v5844_v24, %v5638_v44 }
 0x2f4   : > { %7286 = vmatprep.mubr.msk.f32.mxu0 %vm308_vm0, %v4559_v34 }
 0x2f5   : > { %v4560_v45 = vmax.f32 %v4496_v18, %v4528_v37  ;;  %v6103_v63 = vmax.f32 %v6071_v10, 0.0  ;;  %v6074_v0 = vadd.f32 %v10106_v38, %v6035_v5  ;;  %v6034_v34 = vmul.f32 %v10099_v1, %v5995_v2  ;;  %v5497_v37 = vpop.f32.mrf.mxu1 }
 0x2f6   : > { %v5640_v28 = vadd.f32 %v5497_v37, %v9780_v16 }
 0x2f7   : > { %7287 = vmatmul.mubr.msk.f32.gmra.mxu0 %vm308_vm0, %v4560_v45  ;;  %6136 = vst.msk [vmem:[%s10116_s13] sm:$0xff] %vm424_vm1, %v6103_v63  ;;  %v6106_v47 = vmax.f32 %v6074_v0, 0.0  ;;  %v6073_v18 = vadd.f32 %v10106_v38, %v6034_v34  ;;  %v5641_v45 = vadd.f32 %v7199_v49, %v9777_v41  ;;  %v7202_v55 = vpop.f32.mrf.mxu1 }
 0x2f8   : > { %v5643_v54 = vadd.f32 %v7202_v55, %v9827_v26 }
 0x2f9   : > { %6139 = vst.msk [vmem:[%s10116_s13 + $0x18] sm:$0xff] %vm424_vm1, %v6106_v47  ;;  %v6105_v3 = vmax.f32 %v6073_v18, 0.0  ;;  %v5507_v12 = vpop.f32.mrf.mxu1 }
 0x2fa   : > { %v5642_v4 = vadd.f32 %v5507_v12, %v9830_v48 }
 0x2fb   : > { %6138 = vst.msk [vmem:[%s10116_s13 + $0x10] sm:$0xff] %vm424_vm1, %v6105_v3 }
 0x2fc   : > { %v7249_v21 = vpop.f32.mrf.mxu0  ;;  %v7205_v59 = vpop.f32.mrf.mxu1 }
 0x2fd   : > { %v5998_v60 = vadd.f32 %v7249_v21, %v5641_v45  ;;  %v5645_v52 = vadd.f32 %v7205_v59, %v9843_v39 }
 0x2fe   : > { %v5854_v32 = vpop.f32.mrf.mxu0  ;;  %v5517_v24 = vpop.f32.mrf.mxu1 }
 0x2ff   : > { %v6037_v56 = vmul.f32 %v10099_v1, %v5998_v60  ;;  %v5997_v19 = vadd.f32 %v5854_v32, %v5640_v28  ;;  %v5644_v10 = vadd.f32 %v5517_v24, %v9860_v35 }
 0x301   : > { %v6076_v53 = vadd.f32 %v10106_v38, %v6037_v56  ;;  %v6036_v41 = vmul.f32 %v10099_v1, %v5997_v19 }
 0x303   : > { %v6108_v29 = vmax.f32 %v6076_v53, 0.0  ;;  %v6075_v16 = vadd.f32 %v10106_v38, %v6036_v41 }
 0x305   : > { %6141 = vst.msk [vmem:[%s10116_s13 + $0x28] sm:$0xff] %vm424_vm1, %v6108_v29  ;;  %v6107_v17 = vmax.f32 %v6075_v16, 0.0 }
 0x307   : > { %6140 = vst.msk [vmem:[%s10116_s13 + $0x20] sm:$0xff] %vm424_vm1, %v6107_v17 }
 0x30a   : > { %v7252_v14 = vpop.f32.mrf.mxu0  ;;  %v7208_v34 = vpop.f32.mrf.mxu1 }
 0x30b   : > { %v6000_v43 = vadd.f32 %v7252_v14, %v5643_v54  ;;  %v5647_v39 = vadd.f32 %v7208_v34, %v9869_v8 }
 0x30c   : > { %v5864_v30 = vpop.f32.mrf.mxu0  ;;  %v5527_v3 = vpop.f32.mrf.mxu1 }
 0x30d   : > { %v6039_v13 = vmul.f32 %v10099_v1, %v6000_v43  ;;  %v5999_v44 = vadd.f32 %v5864_v30, %v5642_v4  ;;  %v5646_v28 = vadd.f32 %v5527_v3, %v9876_v42 }
 0x30f   : > { %v6078_v26 = vadd.f32 %v10106_v38, %v6039_v13  ;;  %v6038_v15 = vmul.f32 %v10099_v1, %v5999_v44 }
 0x311   : > { %v6110_v9 = vmax.f32 %v6078_v26, 0.0  ;;  %v6077_v48 = vadd.f32 %v10106_v38, %v6038_v15 }
 0x313   : > { %6143 = vst.msk [vmem:[%s10116_s13 + $0x38] sm:$0xff] %vm424_vm1, %v6110_v9  ;;  %v6109_v50 = vmax.f32 %v6077_v48, 0.0 }
 0x315   : > { %6142 = vst.msk [vmem:[%s10116_s13 + $0x30] sm:$0xff] %vm424_vm1, %v6109_v50 }
 0x318   : > { %v7211_v55 = vpop.f32.mrf.mxu1 }
 0x319   : > { %v5649_v12 = vadd.f32 %v7211_v55, %v9879_v22 }
 0x31a   : > { %v5537_v41 = vpop.f32.mrf.mxu1 }
 0x31b   : > { %v7255_v5 = vpop.f32.mrf.mxu0  ;;  %v5648_v29 = vadd.f32 %v5537_v41, %v9885_v31 }
 0x31c   : > { %v6002_v2 = vadd.f32 %v7255_v5, %v5645_v52 }
 0x31d   : > { %v5874_v49 = vpop.f32.mrf.mxu0 }
 0x31e   : > { %v6041_v63 = vmul.f32 %v10099_v1, %v6002_v2  ;;  %v6001_v0 = vadd.f32 %v5874_v49, %v5644_v10 }
 0x320   : > { %v6080_v47 = vadd.f32 %v10106_v38, %v6041_v63  ;;  %v6040_v18 = vmul.f32 %v10099_v1, %v6001_v0 }
 0x322   : > { %v6112_v37 = vmax.f32 %v6080_v47, 0.0  ;;  %v6079_v45 = vadd.f32 %v10106_v38, %v6040_v18 }
 0x324   : > { %6145 = vst.msk [vmem:[%s10116_s13 + $0x48] sm:$0xff] %vm424_vm1, %v6112_v37  ;;  %v6111_v35 = vmax.f32 %v6079_v45, 0.0 }
 0x326   : > { %6144 = vst.msk [vmem:[%s10116_s13 + $0x40] sm:$0xff] %vm424_vm1, %v6111_v35 }
 0x327   : > { %v7214_v44 = vpop.f32.mrf.mxu1 }
 0x328   : > { %v5651_v9 = vadd.f32 %v7214_v44, %v9915_v27 }
 0x329   : > { %v7258_v21 = vpop.f32.mrf.mxu0  ;;  %v5547_v59 = vpop.f32.mrf.mxu1 }
 0x32a   : > { %v6004_v60 = vadd.f32 %v7258_v21, %v5647_v39  ;;  %v5650_v48 = vadd.f32 %v5547_v59, %v9922_v57 }
 0x32b   : > { %v5884_v32 = vpop.f32.mrf.mxu0 }
 0x32c   : > { %v6043_v56 = vmul.f32 %v10099_v1, %v6004_v60  ;;  %v6003_v19 = vadd.f32 %v5884_v32, %v5646_v28 }
 0x32e   : > { %v6082_v53 = vadd.f32 %v10106_v38, %v6043_v56  ;;  %v6042_v8 = vmul.f32 %v10099_v1, %v6003_v19 }
 0x330   : > { %v6114_v54 = vmax.f32 %v6082_v53, 0.0  ;;  %v6081_v42 = vadd.f32 %v10106_v38, %v6042_v8 }
 0x332   : > { %6147 = vst.msk [vmem:[%s10116_s13 + $0x58] sm:$0xff] %vm424_vm1, %v6114_v54  ;;  %v6113_v4 = vmax.f32 %v6081_v42, 0.0 }
 0x334   : > { %6146 = vst.msk [vmem:[%s10116_s13 + $0x50] sm:$0xff] %vm424_vm1, %v6113_v4 }
 0x337   : > { %v7261_v16 = vpop.f32.mrf.mxu0  ;;  %v7217_v2 = vpop.f32.mrf.mxu1 }
 0x338   : > { %v6006_v14 = vadd.f32 %v7261_v16, %v5649_v12  ;;  %v5653_v27 = vadd.f32 %v7217_v2, %v9930_v36 }
 0x339   : > { %v5894_v17 = vpop.f32.mrf.mxu0  ;;  %v5557_v47 = vpop.f32.mrf.mxu1 }
 0x33a   : > { %v6045_v43 = vmul.f32 %v10099_v1, %v6006_v14  ;;  %v6005_v30 = vadd.f32 %v5894_v17, %v5648_v29  ;;  %v5652_v18 = vadd.f32 %v5557_v47, %v9936_v62 }
 0x33c   : > { %v6084_v22 = vadd.f32 %v10106_v38, %v6045_v43  ;;  %v6044_v13 = vmul.f32 %v10099_v1, %v6005_v30  ;;  %v10298_v43 = vld [vmem:[#allocation8_spill] sm:$0xff] }
 0x33e   : > { %v6116_v26 = vmax.f32 %v6084_v22, 0.0  ;;  %v6083_v31 = vadd.f32 %v10106_v38, %v6044_v13 }
 0x340   : > { %6149 = vst.msk [vmem:[%s10116_s13 + $0x68] sm:$0xff] %vm424_vm1, %v6116_v26  ;;  %v6115_v15 = vmax.f32 %v6083_v31, 0.0 }
 0x342   : > { %6148 = vst.msk [vmem:[%s10116_s13 + $0x60] sm:$0xff] %vm424_vm1, %v6115_v15 }
 0x347   : > { %v7220_v3 = vpop.f32.mrf.mxu1 }
 0x348   : > { %v7264_v50 = vpop.f32.mrf.mxu0  ;;  %v5655_v55 = vadd.f32 %v7220_v3, %v9957_v25 }
 0x349   : > { %v6008_v24 = vadd.f32 %v7264_v50, %v5651_v9  ;;  %v5567_v60 = vpop.f32.mrf.mxu1 }
 0x34a   : > { %v5904_v52 = vpop.f32.mrf.mxu0  ;;  %v5654_v56 = vadd.f32 %v5567_v60, %v9961_v40 }
 0x34b   : > { %v6047_v10 = vmul.f32 %v10099_v1, %v6008_v24  ;;  %v6007_v5 = vadd.f32 %v5904_v52, %v5650_v48  ;;  %v10299_v24 = vld [vmem:[#allocation9_spill] sm:$0xff] }
 0x34d   : > { %v6086_v49 = vadd.f32 %v10106_v38, %v6047_v10  ;;  %v6046_v63 = vmul.f32 %v10099_v1, %v6007_v5  ;;  %v10300_v5 = vld [vmem:[#allocation10_spill] sm:$0xff] }
 0x34f   : > { %v6118_v0 = vmax.f32 %v6086_v49, 0.0  ;;  %v6085_v34 = vadd.f32 %v10106_v38, %v6046_v63 }
 0x351   : > { %6151 = vst.msk [vmem:[%s10116_s13 + $0x78] sm:$0xff] %vm424_vm1, %v6118_v0  ;;  %v6117_v57 = vmax.f32 %v6085_v34, 0.0 }
 0x353   : > { %6150 = vst.msk [vmem:[%s10116_s13 + $0x70] sm:$0xff] %vm424_vm1, %v6117_v57 }
 0x357   : > { %v7267_v37 = vpop.f32.mrf.mxu0 }
 0x358   : > { %v6010_v45 = vadd.f32 %v7267_v37, %v5653_v27  ;;  %v7223_v42 = vpop.f32.mrf.mxu1 }
 0x359   : > { %v5914_v39 = vpop.f32.mrf.mxu0  ;;  %v5657_v17 = vadd.f32 %v7223_v42, %v9963_v46 }
 0x35a   : > { %v6049_v35 = vmul.f32 %v10099_v1, %v6010_v45  ;;  %v6009_v28 = vadd.f32 %v5914_v39, %v5652_v18  ;;  %v5577_v4 = vpop.f32.mrf.mxu1 }
 0x35b   : > { %v5656_v30 = vadd.f32 %v5577_v4, %v10298_v43 }
 0x35c   : > { %v6088_v21 = vadd.f32 %v10106_v38, %v6049_v35  ;;  %v6048_v36 = vmul.f32 %v10099_v1, %v6009_v28 }
 0x35e   : > { %v6120_v32 = vmax.f32 %v6088_v21, 0.0  ;;  %v6087_v62 = vadd.f32 %v10106_v38, %v6048_v36 }
 0x360   : > { %6153 = vst.msk [vmem:[%s10116_s13 + $0x88] sm:$0xff] %vm424_vm1, %v6120_v32  ;;  %v6119_v53 = vmax.f32 %v6087_v62, 0.0 }
 0x362   : > { %6152 = vst.msk [vmem:[%s10116_s13 + $0x80] sm:$0xff] %vm424_vm1, %v6119_v53 }
 0x365   : > { %v7270_v19 = vpop.f32.mrf.mxu0  ;;  %v7226_v15 = vpop.f32.mrf.mxu1 }
 0x366   : > { %v6012_v8 = vadd.f32 %v7270_v19, %v5655_v55  ;;  %v5659_v52 = vadd.f32 %v7226_v15, %v10299_v24 }
 0x367   : > { %v5924_v41 = vpop.f32.mrf.mxu0  ;;  %v5587_v46 = vpop.f32.mrf.mxu1 }
 0x368   : > { %v6051_v12 = vmul.f32 %v10099_v1, %v6012_v8  ;;  %v6011_v54 = vadd.f32 %v5924_v41, %v5654_v56  ;;  %v5658_v2 = vadd.f32 %v5587_v46, %v10300_v5 }
 0x36a   : > { %v6090_v25 = vadd.f32 %v10106_v38, %v6051_v12  ;;  %v6050_v29 = vmul.f32 %v10099_v1, %v6011_v54 }
 0x36c   : > { %v6122_v16 = vmax.f32 %v6090_v25, 0.0  ;;  %v6089_v40 = vadd.f32 %v10106_v38, %v6050_v29 }
 0x36e   : > { %6155 = vst.msk [vmem:[%s10116_s13 + $0x98] sm:$0xff] %vm424_vm1, %v6122_v16  ;;  %v6121_v14 = vmax.f32 %v6089_v40, 0.0 }
 0x370   : > { %6154 = vst.msk [vmem:[%s10116_s13 + $0x90] sm:$0xff] %vm424_vm1, %v6121_v14 }
 0x373   : > { %v7273_v22 = vpop.f32.mrf.mxu0 }
 0x374   : > { %v6014_v13 = vadd.f32 %v7273_v22, %v5657_v17  ;;  %v7229_v18 = vpop.f32.mrf.mxu1 }
 0x375   : > { %v5934_v44 = vpop.f32.mrf.mxu0  ;;  %v5661_v35 = vadd.f32 %v7229_v18, %v10050_v7 }
 0x376   : > { %v6053_v26 = vmul.f32 %v10099_v1, %v6014_v13  ;;  %v6013_v31 = vadd.f32 %v5934_v44, %v5656_v30  ;;  %v5597_v39 = vpop.f32.mrf.mxu1 }
 0x377   : > { %v5660_v28 = vadd.f32 %v5597_v39, %v10057_v51 }
 0x378   : > { %v6092_v59 = vadd.f32 %v10106_v38, %v6053_v26  ;;  %v6052_v9 = vmul.f32 %v10099_v1, %v6013_v31 }
 0x37a   : > { %v6124_v48 = vmax.f32 %v6092_v59, 0.0  ;;  %v6091_v50 = vadd.f32 %v10106_v38, %v6052_v9 }
 0x37c   : > { %6157 = vst.msk [vmem:[%s10116_s13 + $0xa8] sm:$0xff] %vm424_vm1, %v6124_v48  ;;  %v6123_v10 = vmax.f32 %v6091_v50, 0.0  ;;  %v5308_v48 = vadd.f32 %v10084_v20, %v10086_v11 }
 0x37e   : > { %6156 = vst.msk [vmem:[%s10116_s13 + $0xa0] sm:$0xff] %vm424_vm1, %v6123_v10 }
 0x383   : > { %v7276_v49 = vpop.f32.mrf.mxu0  ;;  %v7232_v60 = vpop.f32.mrf.mxu1 }
 0x384   : > { %v6016_v63 = vadd.f32 %v7276_v49, %v5659_v52  ;;  %v5663_v8 = vadd.f32 %v7232_v60, %v10064_v6 }
 0x385   : > { %v5944_v0 = vpop.f32.mrf.mxu0  ;;  %v5607_v53 = vpop.f32.mrf.mxu1 }
 0x386   : > { %v6055_v34 = vmul.f32 %v10099_v1, %v6016_v63  ;;  %v6015_v47 = vadd.f32 %v5944_v0, %v5658_v2  ;;  %v5662_v51 = vadd.f32 %v5607_v53, %v10068_v23 }
 0x388   : > { %v6094_v27 = vadd.f32 %v10106_v38, %v6055_v34  ;;  %v6054_v57 = vmul.f32 %v10099_v1, %v6015_v47 }
 0x38a   : > { %v6126_v37 = vmax.f32 %v6094_v27, 0.0  ;;  %v6093_v45 = vadd.f32 %v10106_v38, %v6054_v57 }
 0x38c   : > { %6159 = vst.msk [vmem:[%s10116_s13 + $0xb8] sm:$0xff] %vm424_vm1, %v6126_v37  ;;  %v6125_v3 = vmax.f32 %v6093_v45, 0.0 }
 0x38e   : > { %6158 = vst.msk [vmem:[%s10116_s13 + $0xb0] sm:$0xff] %vm424_vm1, %v6125_v3 }
 0x391   : > { %v7235_v40 = vpop.f32.mrf.mxu1 }
 0x392   : > { %v5665_v43 = vadd.f32 %v7235_v40, %v10072_v58 }
 0x393   : > { %v5617_v17 = vpop.f32.mrf.mxu1 }
 0x394   : > { %v5664_v22 = vadd.f32 %v5617_v17, %v10075_v61 }
 0x397   : > { %v7279_v21 = vpop.f32.mrf.mxu0 }
 0x398   : > { %v6018_v36 = vadd.f32 %v7279_v21, %v5661_v35 }
 0x399   : > { %v5954_v55 = vpop.f32.mrf.mxu0 }
 0x39a   : > { %v6057_v32 = vmul.f32 %v10099_v1, %v6018_v36  ;;  %v6017_v62 = vadd.f32 %v5954_v55, %v5660_v28 }
 0x39c   : > { %v6096_v56 = vadd.f32 %v10106_v38, %v6057_v32  ;;  %v6056_v19 = vmul.f32 %v10099_v1, %v6017_v62 }
 0x39e   : > { %v6128_v41 = vmax.f32 %v6096_v56, 0.0  ;;  %v6095_v7 = vadd.f32 %v10106_v38, %v6056_v19 }
 0x39f   : > { %v7238_v59 = vpop.f32.mrf.mxu1 }
 0x3a0   : > { %6161 = vst.msk [vmem:[%s10116_s13 + $0xc8] sm:$0xff] %vm424_vm1, %v6128_v41  ;;  %v6127_v54 = vmax.f32 %v6095_v7, 0.0  ;;  %v5667_v24 = vadd.f32 %v7238_v59, %v5308_v48 }
 0x3a1   : > { %v5627_v46 = vpop.f32.mrf.mxu1 }
 0x3a2   : > { %v7282_v12 = vpop.f32.mrf.mxu0  ;;  %6160 = vst.msk [vmem:[%s10116_s13 + $0xc0] sm:$0xff] %vm424_vm1, %v6127_v54  ;;  %v5666_v10 = vadd.f32 %v5627_v46, %v10088_v33 }
 0x3a3   : > { %v6020_v42 = vadd.f32 %v7282_v12, %v5663_v8 }
 0x3a4   : > { %v5964_v25 = vpop.f32.mrf.mxu0 }
 0x3a5   : > { %v6059_v29 = vmul.f32 %v10099_v1, %v6020_v42  ;;  %v6019_v16 = vadd.f32 %v5964_v25, %v5662_v51 }
 0x3a7   : > { %v6098_v6 = vadd.f32 %v10106_v38, %v6059_v29  ;;  %v6058_v4 = vmul.f32 %v10099_v1, %v6019_v16 }
 0x3a9   : > { %v6130_v14 = vmax.f32 %v6098_v6, 0.0  ;;  %v6097_v23 = vadd.f32 %v10106_v38, %v6058_v4 }
 0x3ab   : > { %6163 = vst.msk [vmem:[%s10116_s13 + $0xd8] sm:$0xff] %vm424_vm1, %v6130_v14  ;;  %v6129_v30 = vmax.f32 %v6097_v23, 0.0  ;;  %v7285_v13 = vpop.f32.mrf.mxu0 }
 0x3ac   : > { %v6022_v44 = vadd.f32 %v7285_v13, %v5665_v43 }
 0x3ad   : > { %6162 = vst.msk [vmem:[%s10116_s13 + $0xd0] sm:$0xff] %vm424_vm1, %v6129_v30  ;;  %v5974_v26 = vpop.f32.mrf.mxu0 }
 0x3ae   : > { %v6061_v31 = vmul.f32 %v10099_v1, %v6022_v44  ;;  %v6021_v15 = vadd.f32 %v5974_v26, %v5664_v22 }
 0x3b0   : > { %v6100_v9 = vadd.f32 %v10106_v38, %v6061_v31  ;;  %v6060_v58 = vmul.f32 %v10099_v1, %v6021_v15 }
 0x3b2   : > { %v6132_v50 = vmax.f32 %v6100_v9, 0.0  ;;  %v6099_v61 = vadd.f32 %v10106_v38, %v6060_v58 }
 0x3b4   : > { %6165 = vst.msk [vmem:[%s10116_s13 + $0xe8] sm:$0xff] %vm424_vm1, %v6132_v50  ;;  %v6131_v52 = vmax.f32 %v6099_v61, 0.0 }
 0x3b6   : > { %6164 = vst.msk [vmem:[%s10116_s13 + $0xe0] sm:$0xff] %vm424_vm1, %v6131_v52 }
 0x3b7   : > { %v7288_v5 = vpop.f32.mrf.mxu0 }
 0x3b8   : > { %v6024_v2 = vadd.f32 %v7288_v5, %v5667_v24 }
 0x3b9   : > { %v5984_v49 = vpop.f32.mrf.mxu0 }
 0x3ba   : > { %v6063_v63 = vmul.f32 %v10099_v1, %v6024_v2  ;;  %v6023_v20 = vadd.f32 %v5984_v49, %v5666_v10 }
 0x3bc   : > { %v6102_v11 = vadd.f32 %v10106_v38, %v6063_v63  ;;  %v6062_v0 = vmul.f32 %v10099_v1, %v6023_v20 }
 0x3be   : > { %v6134_v34 = vmax.f32 %v6102_v11, 0.0  ;;  %v6101_v47 = vadd.f32 %v10106_v38, %v6062_v0 }
 0x3c0   : > { %6167 = vst.msk [vmem:[%s10116_s13 + $0xf8] sm:$0xff] %vm424_vm1, %v6134_v34  ;;  %v6133_v27 = vmax.f32 %v6101_v47, 0.0 }
 0x3c2   : > { %6166 = vst.msk [vmem:[%s10116_s13 + $0xf0] sm:$0xff] %vm424_vm1, %v6133_v27 }
 0x3c3 PF: > { %s17_s26 = sadd.s32 1, %s7355_s26   ;;  %s10301_s24 = smov %s7351_s25 }
 0x3c4   : > { %p14_p5 = scmp.ge.s32.totalorder %s17_s26, 4   ;;  %s10302_s25 = smov %s10304_s27 }
 0x3c6   :  { %16 = sbr.rel (!%p14_p5) target bundleno = 2 (0x2), region = 98 }

</bundles_post_ra>
